<compile_context>
chip_gen: v7x
topology: tpu7x:2x2x1
jax: 0.10.0
libtpu: 0.0.40
codegen_flags: <defaults>
</compile_context>

<pallas_src>
import numpy as np

import jax
import jax.numpy as jnp
from jax.experimental import pallas as pl
from jax.experimental.pallas import tpu as pltpu

L = 500                # hidden width of feature_extractor_part2
LP = 512               # lane-padded fc output width (zero cols/bias, sliced off)
NEG_SLOPE = 0.01       # nn.LeakyReLU default
MXU_DTYPE = jnp.bfloat16


def _leaky(v):
    return jnp.where(v > 0, v, NEG_SLOPE * v)


def _choose_nblk(n):
    """Instances per grid step: big enough to fill the MXU (conv2 M = 8*nblk),
    capped at 64, kept a multiple of 16 (bf16 sublane tile) and sized so there
    are >=2 grid steps when possible (v7x: 2 TensorCores share the parallel axis)."""
    half = (n + 1) // 2
    half = ((half + 15) // 16) * 16
    return max(16, min(64, half))


def myconv_kernel(p_ref, t1_ref, b1_ref, t2_ref, b2_ref, w3_ref, b3_ref, o_ref):
    nb = p_ref.shape[1]                                    # instances in this block

    # ---- conv1: one MXU matmul, K = 5*28 = 140 (row im2col done in the wrapper,
    # already bf16).  Rows of `p` are (y-parity, y', instance); output lanes are
    # (x-parity, x', channel).
    p = p_ref[...].reshape(24 * nb, 140)
    a1 = jnp.dot(p, t1_ref[...], preferred_element_type=jnp.float32)   # (24*nb, 512)

    # ---- 2x2 max-pool as two aligned-half maxes, then bias, then LeakyReLU.
    a1 = a1.reshape(2, 12 * nb, 512)
    h1 = jnp.maximum(a1[0], a1[1])                         # pool over rows  (y)
    h1 = jnp.maximum(h1[:, :256], h1[:, 256:])             # pool over lanes (x)
    h1 = _leaky(h1 + b1_ref[...])                          # (12*nb, 256); row = y'*nb + n

    # ---- conv2: ONE MXU matmul with K = 5*256 = 1280 (kh folded into lanes).
    # The five kh-shifted row windows of h1 are 8-row-aligned static slices,
    # concatenated along 256-aligned lane blocks; accumulation stays in the MXU.
    h1b = h1.astype(MXU_DTYPE)
    lhs2 = jnp.concatenate([h1b[kh * nb:(kh + 8) * nb, :] for kh in range(5)],
                           axis=-1)                        # (8*nb, 1280)
    a2 = jnp.dot(lhs2, t2_ref[...], preferred_element_type=jnp.float32)  # (8*nb, 512)

    # ---- 2x2 max-pool, bias, LeakyReLU.
    h2 = jnp.maximum(a2[:, :256], a2[:, 256:])             # pool over lanes (w)
    h2 = h2.reshape(4, 2, nb, 256)
    h2 = jnp.maximum(h2[:, 0], h2[:, 1])                   # pool over rows  (h)
    h2 = _leaky(h2 + b2_ref[...])                          # (4, nb, 256)

    # ---- fc: one MXU matmul, K = 4*256 = 1024 (padded lanes hit zero weight rows),
    # output lane-padded to 512 (zero cols / zero bias -> exact zeros, sliced off).
    h2f = jnp.concatenate([h2[0], h2[1], h2[2], h2[3]], axis=-1).astype(MXU_DTYPE)
    fc = jnp.dot(h2f, w3_ref[...], preferred_element_type=jnp.float32)   # (nb, 512)
    # TODO(synk): nn.Dropout() is identity in eval mode; train-mode stochastic
    # masking (p=0.5) is not implemented here.
    o_ref[...] = _leaky(fc + b3_ref[...])


def _im2col_rows(x):
    """(N,28,28) f32 -> (24, N, 140) bf16: rows grouped by conv1-output-row
    parity (12 pooled rows per parity, no padding); last dim = kh*28 + column."""
    n = x.shape[0]
    yy = np.arange(12)
    kh = np.arange(5)
    halves = []
    for parity in (0, 1):
        iy = 2 * yy[:, None] + parity + kh[None, :]             # (12, 5) row gather
        g = x[:, iy, :].reshape(n, 12, 140)                     # [n, y', kh*28+u]
        halves.append(jnp.transpose(g, (1, 0, 2)))              # [12, n, 140]
    return jnp.concatenate(halves, axis=0).astype(MXU_DTYPE)    # (24, N, 140) bf16


def _prep_params(W1, b1, W2, b2, W3, b3):
    """Re-layout PyTorch parameters into matmul-ready (Toeplitz-expanded) forms."""
    f32 = jnp.float32

    # conv1: T1[kh*28+u, q*256 + x'*20 + c] = W1[c,0,kh, u-(2x'+q)], else 0.
    Wt1 = jnp.transpose(W1[:, 0], (1, 2, 0)).astype(f32)            # (5,5,20) [kh,kw,c]
    E1 = np.zeros((5, 28, 24), np.float32)
    for k in range(5):
        E1[k, k:k + 24, :] = np.eye(24, dtype=np.float32)           # u == x + kw
    T1 = jnp.einsum('kuo,hkc->huoc', E1, Wt1)                       # (5,28,24,20)
    T1 = jnp.transpose(T1.reshape(5, 28, 12, 2, 20), (0, 1, 3, 2, 4))
    T1 = jnp.pad(T1.reshape(5, 28, 2, 240), ((0, 0), (0, 0), (0, 0), (0, 16)))
    T1 = T1.reshape(140, 512).astype(MXU_DTYPE)

    # conv2 (kh fused into K): T2[kh*256 + x'*20+ci, q*256 + w'*50+co]
    #   = W2[co,ci,kh, x'-(2w'+q)], else 0.
    Wt2 = jnp.transpose(W2, (2, 3, 1, 0)).astype(f32)               # (5,5,20,50) [kh,kw,ci,co]
    E2 = np.zeros((5, 12, 8), np.float32)
    for k in range(5):
        E2[k, k:k + 8, :] = np.eye(8, dtype=np.float32)             # x' == w + kw
    T2 = jnp.einsum('kxw,hkcd->hxcwd', E2, Wt2)                     # (5,12,20,8,50)
    T2 = jnp.transpose(T2.reshape(5, 12, 20, 4, 2, 50), (0, 1, 2, 4, 3, 5))
    T2 = T2.reshape(5, 240, 2, 200)
    T2 = jnp.pad(T2, ((0, 0), (0, 16), (0, 0), (0, 56)))            # (5,256,2,256)
    T2 = T2.reshape(5 * 256, 512).astype(MXU_DTYPE)                 # (1280, 512)

    # fc: kernel lanes are h'*256 + w'*50 + c; torch flattens as c*16 + h'*4 + w'.
    # Output columns zero-padded 500 -> 512 for lane-dense output stores.
    W3r = jnp.transpose(W3.reshape(L, 50, 4, 4), (2, 3, 1, 0))      # (4,4,50,L) [h',w',c,l]
    W3r = jnp.pad(W3r.reshape(4, 200, L), ((0, 0), (0, 56), (0, 0)))
    W3big = jnp.pad(W3r.reshape(1024, L), ((0, 0), (0, LP - L))).astype(MXU_DTYPE)

    b1t = jnp.pad(jnp.tile(b1.astype(f32), 12), (0, 16)).reshape(1, 256)
    b2t = jnp.pad(jnp.tile(b2.astype(f32), 4), (0, 56)).reshape(1, 256)
    b3t = jnp.pad(b3.astype(f32), (0, LP - L)).reshape(1, LP)
    return T1, b1t, T2, b2t, W3big, b3t


@jax.jit
def myconv_forward(x, W1, b1, W2, b2, W3, b3):
    """x: (N, 28, 28) float32; parameters in PyTorch layouts. Returns (N, 500)."""
    n = x.shape[0]
    nblk = _choose_nblk(n)
    n_pad = ((n + nblk - 1) // nblk) * nblk
    xp = jnp.pad(x.astype(jnp.float32), ((0, n_pad - n), (0, 0), (0, 0)))

    P = _im2col_rows(xp)                                            # (24, n_pad, 140) bf16
    T1, b1t, T2, b2t, W3big, b3t = _prep_params(W1, b1, W2, b2, W3, b3)

    out = pl.pallas_call(
        myconv_kernel,
        out_shape=jax.ShapeDtypeStruct((n_pad, LP), jnp.float32),
        grid=(n_pad // nblk,),
        in_specs=[
            pl.BlockSpec((24, nblk, 140), lambda i: (0, i, 0)),     # per-block im2col (bf16)
            pl.BlockSpec((140, 512), lambda i: (0, 0)),             # conv1 weight  (resident)
            pl.BlockSpec((1, 256), lambda i: (0, 0)),               # conv1 bias
            pl.BlockSpec((1280, 512), lambda i: (0, 0)),            # conv2 weight  (resident)
            pl.BlockSpec((1, 256), lambda i: (0, 0)),               # conv2 bias
            pl.BlockSpec((1024, LP), lambda i: (0, 0)),             # fc weight     (resident)
            pl.BlockSpec((1, LP), lambda i: (0, 0)),                # fc bias
        ],
        out_specs=pl.BlockSpec((nblk, LP), lambda i: (i, 0)),
        compiler_params=pltpu.CompilerParams(
            dimension_semantics=("parallel",),       # v7x: shard instance blocks over 2 TCs
            vmem_limit_bytes=32 * 1024 * 1024,       # footprint ~14-16 MiB at nblk=64
        ),
    )(P, T1, b1t, T2, b2t, W3big, b3t)
    return out[:n, :L]


def reference_forward(x, W1, b1, W2, b2, W3, b3):
    """Pure-JAX (XLA) reference mirroring the PyTorch module in eval mode."""
    def conv(v, W, b):
        y = jax.lax.conv_general_dilated(
            v, W, window_strides=(1, 1), padding='VALID',
            dimension_numbers=('NCHW', 'OIHW', 'NCHW'))
        return y + b[None, :, None, None]

    def pool(v):
        n, c, hh, ww = v.shape
        return v.reshape(n, c, hh // 2, 2, ww // 2, 2).max(axis=(3, 5))

    h = x[:, None, :, :]                                   # unsqueeze(dim=1)
    h = pool(_leaky(conv(h, W1, b1)))
    h = pool(_leaky(conv(h, W2, b2)))
    h = h.reshape(h.shape[0], -1)                          # (N, 800): c*16 + h*4 + w
    h = h @ W3.T + b3
    return _leaky(h)                                       # dropout = identity (eval)


if __name__ == "__main__":
    key = jax.random.PRNGKey(0)
    ks = jax.random.split(key, 7)
    N_INST = 128                                           # 2 grid blocks of 64 instances
    x  = jax.random.normal(ks[0], (N_INST, 28, 28), jnp.float32)
    W1 = 0.10 * jax.random.normal(ks[1], (20, 1, 5, 5), jnp.float32)
    b1 = 0.10 * jax.random.normal(ks[2], (20,), jnp.float32)
    W2 = 0.05 * jax.random.normal(ks[3], (50, 20, 5, 5), jnp.float32)
    b2 = 0.10 * jax.random.normal(ks[4], (50,), jnp.float32)
    W3 = 0.02 * jax.random.normal(ks[5], (500, 800), jnp.float32)
    b3 = 0.10 * jax.random.normal(ks[6], (500,), jnp.float32)

    out = jax.block_until_ready(myconv_forward(x, W1, b1, W2, b2, W3, b3))
    ref = jax.block_until_ready(reference_forward(x, W1, b1, W2, b2, W3, b3))

    assert out.shape == (N_INST, L), out.shape
    assert bool(jnp.all(jnp.isfinite(out)))
    max_diff = float(jnp.max(jnp.abs(out - ref)))
    # bf16 MXU operands (f32 accumulation) vs. the f32 XLA reference.
    assert bool(jnp.allclose(out, ref, rtol=1e-1, atol=5e-2)), max_diff
    print("KERNEL_OK")
</pallas_src>

<mosaic_0001>
module attributes {stable_mosaic.version = 11 : i64} {
  func.func @myconv_kernel(%arg0: i32, %arg1: memref<24x64x140xbf16, #tpu.memory_space<vmem>>, %arg2: memref<140x512xbf16, #tpu.memory_space<vmem>>, %arg3: memref<1x256xf32, #tpu.memory_space<vmem>>, %arg4: memref<1280x512xbf16, #tpu.memory_space<vmem>>, %arg5: memref<1x256xf32, #tpu.memory_space<vmem>>, %arg6: memref<1024x512xbf16, #tpu.memory_space<vmem>>, %arg7: memref<1x512xf32, #tpu.memory_space<vmem>>, %arg8: memref<64x512xf32, #tpu.memory_space<vmem>>) attributes {dimension_semantics = [#tpu.dimension_semantics<parallel>], iteration_bounds = array<i64: 2>, scalar_prefetch = 0 : i64, scratch_operands = 0 : i64, tpu.core_type = #tpu.core_type<tc>, window_params = [{transform_indices = @transform_0, window_bounds = array<i64: 24, 64, 140>}, {pipeline_mode = #tpu.pipeline_mode<synchronous>, transform_indices = @transform_1, window_bounds = array<i64: 140, 512>}, {pipeline_mode = #tpu.pipeline_mode<synchronous>, transform_indices = @transform_2, window_bounds = array<i64: 1, 256>}, {pipeline_mode = #tpu.pipeline_mode<synchronous>, transform_indices = @transform_3, window_bounds = array<i64: 1280, 512>}, {pipeline_mode = #tpu.pipeline_mode<synchronous>, transform_indices = @transform_4, window_bounds = array<i64: 1, 256>}, {pipeline_mode = #tpu.pipeline_mode<synchronous>, transform_indices = @transform_5, window_bounds = array<i64: 1024, 512>}, {pipeline_mode = #tpu.pipeline_mode<synchronous>, transform_indices = @transform_6, window_bounds = array<i64: 1, 512>}, {transform_indices = @transform_7, window_bounds = array<i64: 64, 512>}]} {
    %c0 = arith.constant 0 : index
    %c0_0 = arith.constant 0 : index
    %c0_1 = arith.constant 0 : index
    %0 = vector.load %arg1[%c0, %c0_0, %c0_1] : memref<24x64x140xbf16, #tpu.memory_space<vmem>>, vector<24x64x140xbf16>
    %1 = vector.shape_cast %0 : vector<24x64x140xbf16> to vector<1536x140xbf16>
    %c0_2 = arith.constant 0 : index
    %c0_3 = arith.constant 0 : index
    %2 = vector.load %arg2[%c0_2, %c0_3] : memref<140x512xbf16, #tpu.memory_space<vmem>>, vector<140x512xbf16>
    %cst = arith.constant dense<0.000000e+00> : vector<1536x512xf32>
    %3 = tpu.matmul %1, %2, %cst {dimension_numbers = #tpu.dot_dimension_numbers<[1], [0], [0], [1], [0, 0, 1, 1], [], []>} : vector<1536x140xbf16>, vector<140x512xbf16>, vector<1536x512xf32> -> vector<1536x512xf32>
    %4 = vector.shape_cast %3 : vector<1536x512xf32> to vector<2x768x512xf32>
    %5 = vector.extract_strided_slice %4 {offsets = [0, 0, 0], sizes = [1, 768, 512], strides = [1, 1, 1]} : vector<2x768x512xf32> to vector<1x768x512xf32>
    %6 = vector.shape_cast %5 : vector<1x768x512xf32> to vector<768x512xf32>
    %7 = vector.extract_strided_slice %4 {offsets = [1, 0, 0], sizes = [1, 768, 512], strides = [1, 1, 1]} : vector<2x768x512xf32> to vector<1x768x512xf32>
    %8 = vector.shape_cast %7 : vector<1x768x512xf32> to vector<768x512xf32>
    %9 = arith.maximumf %6, %8 : vector<768x512xf32>
    %10 = vector.extract_strided_slice %9 {offsets = [0, 0], sizes = [768, 256], strides = [1, 1]} : vector<768x512xf32> to vector<768x256xf32>
    %11 = vector.extract_strided_slice %9 {offsets = [0, 256], sizes = [768, 256], strides = [1, 1]} : vector<768x512xf32> to vector<768x256xf32>
    %12 = arith.maximumf %10, %11 : vector<768x256xf32>
    %c0_4 = arith.constant 0 : index
    %c0_5 = arith.constant 0 : index
    %13 = vector.load %arg3[%c0_4, %c0_5] : memref<1x256xf32, #tpu.memory_space<vmem>>, vector<1x256xf32>
    %14 = vector.broadcast %13 : vector<1x256xf32> to vector<768x256xf32>
    %15 = arith.addf %12, %14 : vector<768x256xf32>
    %cst_6 = arith.constant 0.000000e+00 : f32
    %16 = vector.broadcast %cst_6 : f32 to vector<768x256xf32>
    %17 = arith.cmpf ogt, %15, %16 : vector<768x256xf32>
    %cst_7 = arith.constant 0.00999999977 : f32
    %18 = vector.broadcast %cst_7 : f32 to vector<768x256xf32>
    %19 = arith.mulf %18, %15 : vector<768x256xf32>
    %20 = arith.select %17, %15, %19 : vector<768x256xi1>, vector<768x256xf32>
    %21 = arith.truncf %20 : vector<768x256xf32> to vector<768x256xbf16>
    %22 = vector.extract_strided_slice %21 {offsets = [0, 0], sizes = [512, 256], strides = [1, 1]} : vector<768x256xbf16> to vector<512x256xbf16>
    %23 = vector.extract_strided_slice %21 {offsets = [64, 0], sizes = [512, 256], strides = [1, 1]} : vector<768x256xbf16> to vector<512x256xbf16>
    %24 = vector.extract_strided_slice %21 {offsets = [128, 0], sizes = [512, 256], strides = [1, 1]} : vector<768x256xbf16> to vector<512x256xbf16>
    %25 = vector.extract_strided_slice %21 {offsets = [192, 0], sizes = [512, 256], strides = [1, 1]} : vector<768x256xbf16> to vector<512x256xbf16>
    %26 = vector.extract_strided_slice %21 {offsets = [256, 0], sizes = [512, 256], strides = [1, 1]} : vector<768x256xbf16> to vector<512x256xbf16>
    %27 = tpu.concatenate %22, %23, %24, %25, %26 in 1 : vector<512x256xbf16>, vector<512x256xbf16>, vector<512x256xbf16>, vector<512x256xbf16>, vector<512x256xbf16> -> vector<512x1280xbf16>
    %c0_8 = arith.constant 0 : index
    %c0_9 = arith.constant 0 : index
    %28 = vector.load %arg4[%c0_8, %c0_9] : memref<1280x512xbf16, #tpu.memory_space<vmem>>, vector<1280x512xbf16>
    %cst_10 = arith.constant dense<0.000000e+00> : vector<512x512xf32>
    %29 = tpu.matmul %27, %28, %cst_10 {dimension_numbers = #tpu.dot_dimension_numbers<[1], [0], [0], [1], [0, 0, 1, 1], [], []>} : vector<512x1280xbf16>, vector<1280x512xbf16>, vector<512x512xf32> -> vector<512x512xf32>
    %30 = vector.extract_strided_slice %29 {offsets = [0, 0], sizes = [512, 256], strides = [1, 1]} : vector<512x512xf32> to vector<512x256xf32>
    %31 = vector.extract_strided_slice %29 {offsets = [0, 256], sizes = [512, 256], strides = [1, 1]} : vector<512x512xf32> to vector<512x256xf32>
    %32 = arith.maximumf %30, %31 : vector<512x256xf32>
    %33 = vector.shape_cast %32 : vector<512x256xf32> to vector<4x2x64x256xf32>
    %34 = vector.extract_strided_slice %33 {offsets = [0, 0, 0, 0], sizes = [4, 1, 64, 256], strides = [1, 1, 1, 1]} : vector<4x2x64x256xf32> to vector<4x1x64x256xf32>
    %35 = vector.shape_cast %34 : vector<4x1x64x256xf32> to vector<4x64x256xf32>
    %36 = vector.extract_strided_slice %33 {offsets = [0, 1, 0, 0], sizes = [4, 1, 64, 256], strides = [1, 1, 1, 1]} : vector<4x2x64x256xf32> to vector<4x1x64x256xf32>
    %37 = vector.shape_cast %36 : vector<4x1x64x256xf32> to vector<4x64x256xf32>
    %38 = arith.maximumf %35, %37 : vector<4x64x256xf32>
    %c0_11 = arith.constant 0 : index
    %c0_12 = arith.constant 0 : index
    %39 = vector.load %arg5[%c0_11, %c0_12] : memref<1x256xf32, #tpu.memory_space<vmem>>, vector<1x256xf32>
    %40 = vector.shape_cast %39 : vector<1x256xf32> to vector<1x1x256xf32>
    %41 = vector.broadcast %40 : vector<1x1x256xf32> to vector<4x64x256xf32>
    %42 = arith.addf %38, %41 : vector<4x64x256xf32>
    %cst_13 = arith.constant 0.000000e+00 : f32
    %43 = vector.broadcast %cst_13 : f32 to vector<4x64x256xf32>
    %44 = arith.cmpf ogt, %42, %43 : vector<4x64x256xf32>
    %cst_14 = arith.constant 0.00999999977 : f32
    %45 = vector.broadcast %cst_14 : f32 to vector<4x64x256xf32>
    %46 = arith.mulf %45, %42 : vector<4x64x256xf32>
    %47 = arith.select %44, %42, %46 : vector<4x64x256xi1>, vector<4x64x256xf32>
    %48 = vector.extract_strided_slice %47 {offsets = [0, 0, 0], sizes = [1, 64, 256], strides = [1, 1, 1]} : vector<4x64x256xf32> to vector<1x64x256xf32>
    %49 = vector.shape_cast %48 : vector<1x64x256xf32> to vector<64x256xf32>
    %50 = vector.extract_strided_slice %47 {offsets = [1, 0, 0], sizes = [1, 64, 256], strides = [1, 1, 1]} : vector<4x64x256xf32> to vector<1x64x256xf32>
    %51 = vector.shape_cast %50 : vector<1x64x256xf32> to vector<64x256xf32>
    %52 = vector.extract_strided_slice %47 {offsets = [2, 0, 0], sizes = [1, 64, 256], strides = [1, 1, 1]} : vector<4x64x256xf32> to vector<1x64x256xf32>
    %53 = vector.shape_cast %52 : vector<1x64x256xf32> to vector<64x256xf32>
    %54 = vector.extract_strided_slice %47 {offsets = [3, 0, 0], sizes = [1, 64, 256], strides = [1, 1, 1]} : vector<4x64x256xf32> to vector<1x64x256xf32>
    %55 = vector.shape_cast %54 : vector<1x64x256xf32> to vector<64x256xf32>
    %56 = tpu.concatenate %49, %51, %53, %55 in 1 : vector<64x256xf32>, vector<64x256xf32>, vector<64x256xf32>, vector<64x256xf32> -> vector<64x1024xf32>
    %57 = arith.truncf %56 : vector<64x1024xf32> to vector<64x1024xbf16>
    %c0_15 = arith.constant 0 : index
    %c0_16 = arith.constant 0 : index
    %58 = vector.load %arg6[%c0_15, %c0_16] : memref<1024x512xbf16, #tpu.memory_space<vmem>>, vector<1024x512xbf16>
    %cst_17 = arith.constant dense<0.000000e+00> : vector<64x512xf32>
    %59 = tpu.matmul %57, %58, %cst_17 {dimension_numbers = #tpu.dot_dimension_numbers<[1], [0], [0], [1], [0, 0, 1, 1], [], []>} : vector<64x1024xbf16>, vector<1024x512xbf16>, vector<64x512xf32> -> vector<64x512xf32>
    %c0_18 = arith.constant 0 : index
    %c0_19 = arith.constant 0 : index
    %60 = vector.load %arg7[%c0_18, %c0_19] : memref<1x512xf32, #tpu.memory_space<vmem>>, vector<1x512xf32>
    %61 = vector.broadcast %60 : vector<1x512xf32> to vector<64x512xf32>
    %62 = arith.addf %59, %61 : vector<64x512xf32>
    %cst_20 = arith.constant 0.000000e+00 : f32
    %63 = vector.broadcast %cst_20 : f32 to vector<64x512xf32>
    %64 = arith.cmpf ogt, %62, %63 : vector<64x512xf32>
    %cst_21 = arith.constant 0.00999999977 : f32
    %65 = vector.broadcast %cst_21 : f32 to vector<64x512xf32>
    %66 = arith.mulf %65, %62 : vector<64x512xf32>
    %67 = arith.select %64, %62, %66 : vector<64x512xi1>, vector<64x512xf32>
    %c0_22 = arith.constant 0 : index
    %c0_23 = arith.constant 0 : index
    %68 = vector.load %arg8[%c0_22, %c0_23] : memref<64x512xf32, #tpu.memory_space<vmem>>, vector<64x512xf32>
    tpu.vector_store %arg8[%c0_22, %c0_23], %67 {strides = array<i32>} : memref<64x512xf32, #tpu.memory_space<vmem>>, vector<64x512xf32>,
    return
  }
  func.func @transform_0(%arg0: i32) -> (i32, i32, i32) {
    %c0_i32 = arith.constant 0 : i32
    %c0_i32_0 = arith.constant 0 : i32
    %c0_i32_1 = arith.constant 0 : i32
    return %c0_i32, %arg0, %c0_i32_0 : i32, i32, i32
  }
  func.func @transform_1(%arg0: i32) -> (i32, i32) {
    %c0_i32 = arith.constant 0 : i32
    %c0_i32_0 = arith.constant 0 : i32
    %c0_i32_1 = arith.constant 0 : i32
    return %c0_i32, %c0_i32_0 : i32, i32
  }
  func.func @transform_2(%arg0: i32) -> (i32, i32) {
    %c0_i32 = arith.constant 0 : i32
    %c0_i32_0 = arith.constant 0 : i32
    %c0_i32_1 = arith.constant 0 : i32
    return %c0_i32, %c0_i32_0 : i32, i32
  }
  func.func @transform_3(%arg0: i32) -> (i32, i32) {
    %c0_i32 = arith.constant 0 : i32
    %c0_i32_0 = arith.constant 0 : i32
    %c0_i32_1 = arith.constant 0 : i32
    return %c0_i32, %c0_i32_0 : i32, i32
  }
  func.func @transform_4(%arg0: i32) -> (i32, i32) {
    %c0_i32 = arith.constant 0 : i32
    %c0_i32_0 = arith.constant 0 : i32
    %c0_i32_1 = arith.constant 0 : i32
    return %c0_i32, %c0_i32_0 : i32, i32
  }
  func.func @transform_5(%arg0: i32) -> (i32, i32) {
    %c0_i32 = arith.constant 0 : i32
    %c0_i32_0 = arith.constant 0 : i32
    %c0_i32_1 = arith.constant 0 : i32
    return %c0_i32, %c0_i32_0 : i32, i32
  }
  func.func @transform_6(%arg0: i32) -> (i32, i32) {
    %c0_i32 = arith.constant 0 : i32
    %c0_i32_0 = arith.constant 0 : i32
    %c0_i32_1 = arith.constant 0 : i32
    return %c0_i32, %c0_i32_0 : i32, i32
  }
  func.func @transform_7(%arg0: i32) -> (i32, i32) {
    %c0_i32 = arith.constant 0 : i32
    %c0_i32_0 = arith.constant 0 : i32
    return %arg0, %c0_i32 : i32, i32
  }
}

</mosaic_0001>

<bundles_post_ra>
// kernel: tile.13
= control target key start
LH: loop header
LB: loop body
LE: loop exit
PB: predicated region body
PF: predicated region fallthrough
CT: control target
= control target key end

     0   :  { %s28_s0 = inlined_call_operand.vmem [shape: f32[20], index: 0, kind: input, shape index: {}]   ;;  %s29_s1 = inlined_call_operand.vmem [shape: f32[12,20], index: 1, kind: output, shape index: {}]  }
   0x1   :  { %v4_v0 = vld [vmem:[%s28_s0] ss:$0 sm:$0xff] }
   0x2   :  { %5 = vst [vmem:[%s29_s1] sm:$0xff] %v4_v0  ;;  %8 = vst [vmem:[%s29_s1 + $0x8] sm:$0xff] %v4_v0 }

// kernel: tile.14
= control target key start
LH: loop header
LB: loop body
LE: loop exit
PB: predicated region body
PF: predicated region fallthrough
CT: control target
= control target key end

     0   :  { %vm9_vm0 = vcmask 64512   ;;  %s112_s12 = smov 120   ;;  %s113_s13 = smov 92   ;;  %vm3_vm1 = vcmask 162816   ;;  %vm13_vm2 = vcmask 97280   ;;  %vm16_vm3 = vcmask 1048512   ;;  %s175_s0 = inlined_call_operand.vmem [shape: f32[12,20], index: 0, kind: input, shape index: {}]   ;;  %s176_s1 = inlined_call_operand.vmem [shape: f32[240], index: 1, kind: output, shape index: {}]  }
   0x1   :  { %v89_v0 = vld [vmem:[%s175_s0 + $0x6] sm:$0x1]   ;;  %v92_v3 = vld [vmem:[%s175_s0 + $0xb] sm:$0x1]   ;;  %v91_v4 = vld [vmem:[%s175_s0 + $0x5] sm:$0x1]  }
   0x2   :  { %v90_v1 = vld [vmem:[%s175_s0 + $0x6] sm:$0x1]   ;;  %26 = vrot.lane.b32.xlu1 %v92_v3, %s113_s13  ;;  %v93_v5 = vld [vmem:[%s175_s0 + $0x4] sm:$0x1]   ;;  %s114_s18 = smov 100   ;;  %s115_s19 = smov 80  }
   0x3   :  { %v10_v2 = vsel %vm9_vm0, %v90_v1, %v89_v0  ;;  %v2_v6 = vld [vmem:[%s175_s0] sm:$0x1]   ;;  %v94_v7 = vld [vmem:[%s175_s0 + $0xa] sm:$0x1]   ;;  %v95_v8 = vld [vmem:[%s175_s0 + $0x3] sm:$0x1]  }
   0x4   :  { %11 = vrot.lane.b32.xlu0 %v10_v2, %s112_s12  ;;  %4 = vst.msk [vmem:[#allocation0] sm:$0x1] %vm3_vm1, %v2_v6   ;;  %s116_s26 = smov 72   ;;  %s117_s27 = smov 60   ;;  %v96_v9 = vld [vmem:[%s175_s0 + $0x9] sm:$0x1]  }
   0x5   :  { %v97_v10 = vld [vmem:[%s175_s0 + $0x2] sm:$0x1]   ;;  %s118_s3 = smov 52   ;;  %s119_s4 = smov 40   ;;  %v98_v11 = vld [vmem:[%s175_s0 + $0x8] sm:$0x1]  }
   0x6   :  { %33 = vrot.lane.b32.xlu1 %v93_v5, %s115_s19  ;;  %v99_v12 = vld [vmem:[%s175_s0 + $0x1] sm:$0x1]   ;;  %s120_s9 = smov 32   ;;  %s121_s10 = smov 20   ;;  %v100_v13 = vld [vmem:[%s175_s0 + $0x7] sm:$0x1]  }
   0x7   :  { %s122_s0 = smov 12   ;;  %vm28_vm4 = vcmask 917216   ;;  %vm22_vm5 = vcmask 982816   ;;  %vm35_vm6 = vcmask 818816   ;;  %vm41_vm7 = vcmask 753216  }
   0x8   :  { %20 = vrot.lane.b32.xlu0 %v91_v4, %s114_s18  ;;  %vm48_vm8 = vcmask 654816   ;;  %vm54_vm9 = vcmask 589216   ;;  %vm61_vm10 = vcmask 490816   ;;  %vm67_vm11 = vcmask 425216  }
   0x9   :  { %vm74_vm12 = vcmask 326816   ;;  %vm80_vm13 = vcmask 261216  }
   0xa   :  { %46 = vrot.lane.b32.xlu1 %v95_v8, %s117_s27 }
   0xc   :  { %39 = vrot.lane.b32.xlu0 %v94_v7, %s116_s26 }
   0xe   :  { %59 = vrot.lane.b32.xlu1 %v97_v10, %s119_s4 }
  0x10   :  { %52 = vrot.lane.b32.xlu0 %v96_v9, %s118_s3 }
  0x12   :  { %72 = vrot.lane.b32.xlu1 %v99_v12, %s121_s10 }
  0x14   :  { %65 = vrot.lane.b32.xlu0 %v98_v11, %s120_s9 }
  0x18   :  { %78 = vrot.lane.b32.xlu0 %v100_v13, %s122_s0 }
  0x74   :  { %v27_v15 = vpop.permute.xlu1 %26  }
  0x76   :  { %v12_v14 = vpop.permute.xlu0 %11  }
  0x77   :  { %15 = vst.msk [vmem:[#allocation0 + $0x1] sm:$0x1] %vm13_vm2, %v12_v14  }
  0x78   :  { %17 = vst.msk [vmem:[#allocation0] sm:$0x1] %vm16_vm3, %v12_v14   ;;  %v34_v17 = vpop.permute.xlu1 %33  }
  0x79   :  { %30 = vst.msk [vmem:[#allocation0 + $0x1] sm:$0x1] %vm28_vm4, %v27_v15  }
  0x7a   :  { %v21_v16 = vpop.permute.xlu0 %20  }
  0x7b   :  { %23 = vst.msk [vmem:[#allocation0] sm:$0x1] %vm22_vm5, %v21_v16  }
  0x7c   :  { %36 = vst.msk [vmem:[#allocation0] sm:$0x1] %vm35_vm6, %v34_v17   ;;  %v47_v19 = vpop.permute.xlu1 %46  }
  0x7d   :  { %49 = vst.msk [vmem:[#allocation0] sm:$0x1] %vm48_vm8, %v47_v19  }
  0x7e   :  { %v40_v18 = vpop.permute.xlu0 %39  }
  0x7f   :  { %43 = vst.msk [vmem:[#allocation0 + $0x1] sm:$0x1] %vm41_vm7, %v40_v18  }
  0x80   :  { %v60_v21 = vpop.permute.xlu1 %59  }
  0x81   :  { %62 = vst.msk [vmem:[#allocation0] sm:$0x1] %vm61_vm10, %v60_v21  }
  0x82   :  { %v53_v20 = vpop.permute.xlu0 %52  }
  0x83   :  { %56 = vst.msk [vmem:[#allocation0 + $0x1] sm:$0x1] %vm54_vm9, %v53_v20  }
  0x84   :  { %v73_v23 = vpop.permute.xlu1 %72  }
  0x85   :  { %75 = vst.msk [vmem:[#allocation0] sm:$0x1] %vm74_vm12, %v73_v23  }
  0x86   :  { %v66_v22 = vpop.permute.xlu0 %65  }
  0x87   :  { %69 = vst.msk [vmem:[#allocation0 + $0x1] sm:$0x1] %vm67_vm11, %v66_v22  }
  0x8a   :  { %v79_v24 = vpop.permute.xlu0 %78  }
  0x8b   :  { %82 = vst.msk [vmem:[#allocation0 + $0x1] sm:$0x1] %vm80_vm13, %v79_v24  }
  0x92   :  { %v86_v25 = vld [vmem:[#allocation0] sm:$0x3] }
  0x93   :  { %88 = vst [vmem:[%s176_s1] sm:$0x3] %v86_v25 }

// kernel: tile.18
= control target key start
LH: loop header
LB: loop body
LE: loop exit
PB: predicated region body
PF: predicated region fallthrough
CT: control target
= control target key end

     0   :  { %s22_s0 = inlined_call_operand.vmem [shape: f32[50], index: 0, kind: input, shape index: {}]   ;;  %s23_s1 = inlined_call_operand.vmem [shape: f32[4,50], index: 1, kind: output, shape index: {}]  }
   0x1   :  { %v4_v0 = vld [vmem:[%s22_s0] ss:$0 sm:$0xff] }
   0x2   :  { %5 = vst [vmem:[%s23_s1] sm:$0xf] %v4_v0 }

// kernel: tile.19
= control target key start
LH: loop header
LB: loop body
LE: loop exit
PB: predicated region body
PF: predicated region fallthrough
CT: control target
= control target key end

     0   :  { %vm13_vm0 = vcmask 228352   ;;  %vm7_vm1 = vcmask 408576   ;;  %s45_s8 = smov 100   ;;  %s46_s9 = smov 50   ;;  %vm17_vm2 = vcmask 179200   ;;  %vm20_vm3 = vcmask 1048352   ;;  %s63_s0 = inlined_call_operand.vmem [shape: f32[4,50], index: 0, kind: input, shape index: {}]   ;;  %s64_s1 = inlined_call_operand.vmem [shape: f32[200], index: 1, kind: output, shape index: {}]  }
   0x1   :  { %v4_v0 = vld [vmem:[%s63_s0] sm:$0xf]  ;;  %s44_s0 = smov 22   ;;  %vm32_vm4 = vcmask 588976   ;;  %vm26_vm5 = vcmask 818576  }
   0x2   :  { %5 = vst [vmem:[#allocation1] sm:$0xf] %v4_v0 }
   0x9   :  { %v10_v1 = vld [vmem:[#allocation1 + $0x2] sm:$0x1]   ;;  %v29_v3 = vld [vmem:[#allocation1 + $0x3] sm:$0x1]   ;;  %v6_v5 = vld [vmem:[#allocation1] sm:$0x1]  }
   0xa   :  { %v12_v2 = vld [vmem:[#allocation1 + $0x2] sm:$0x1]   ;;  %30 = vrot.lane.b32.xlu1 %v29_v3, %s44_s0  ;;  %8 = vst.msk [vmem:[#allocation0] sm:$0x1] %vm7_vm1, %v6_v5   ;;  %v23_v6 = vld [vmem:[#allocation1 + $0x1] sm:$0x1]  }
   0xb   :  { %v14_v4 = vsel %vm13_vm0, %v12_v2, %v10_v1 }
   0xc   :  { %15 = vrot.lane.b32.xlu0 %v14_v4, %s45_s8 }
  0x10   :  { %24 = vrot.lane.b32.xlu0 %v23_v6, %s46_s9 }
  0x7c   :  { %v31_v7 = vpop.permute.xlu1 %30  }
  0x7e   :  { %v16_v8 = vpop.permute.xlu0 %15  }
  0x7f   :  { %19 = vst.msk [vmem:[#allocation0 + $0x1] sm:$0x1] %vm17_vm2, %v16_v8  }
  0x80   :  { %21 = vst.msk [vmem:[#allocation0] sm:$0x1] %vm20_vm3, %v16_v8  }
  0x81   :  { %34 = vst.msk [vmem:[#allocation0 + $0x1] sm:$0x1] %vm32_vm4, %v31_v7  }
  0x82   :  { %v25_v9 = vpop.permute.xlu0 %24  }
  0x83   :  { %27 = vst.msk [vmem:[#allocation0] sm:$0x1] %vm26_vm5, %v25_v9  }
  0x8a   :  { %v38_v10 = vld [vmem:[#allocation0] sm:$0x3] }
  0x8b   :  { %40 = vst [vmem:[%s64_s1] sm:$0x3] %v38_v10 }

// kernel: myconv_forward.1
= control target key start
LH: loop header
LB: loop body
LE: loop exit
PB: predicated region body
PF: predicated region fallthrough
CT: control target
= control target key end

     0   :  { %s17830_s24 = smov 0   ;;  %s17832_s25 = smov 0   ;;  %s23507_s0 = inlined_call_operand.vmem [shape: bf16[24,128,140], index: 0, kind: input, shape index: {}]   ;;  %s23508_s1 = inlined_call_operand.vmem [shape: bf16[140,512], index: 1, kind: input, shape index: {}]   ;;  %s23509_s2 = inlined_call_operand.vmem [shape: f32[1,256], index: 2, kind: input, shape index: {}]   ;;  %s23510_s3 = inlined_call_operand.vmem [shape: bf16[1280,512], index: 3, kind: input, shape index: {}]   ;;  %s23511_s4 = inlined_call_operand.vmem [shape: f32[1,256], index: 4, kind: input, shape index: {}]   ;;  %s23512_s5 = inlined_call_operand.vmem [shape: bf16[1024,512], index: 5, kind: input, shape index: {}]   ;;  %s23513_s6 = inlined_call_operand.vmem [shape: f32[1,512], index: 6, kind: input, shape index: {}]   ;;  %s23514_s7 = inlined_call_operand.vmem [shape: f32[128,512], index: 7, kind: output, shape index: {}]  }
   0x1   :  { %s17834_s26 = smov 0  }
   0x2 LB: > { %s14368_s27 = sadd.s32 4294967295, %s17788_s26   ;;  %s17847_s28 = sadd.s32 1, %s17788_s26   ;;  %s17788_s26 = sphi %s17834_s26, %s24425_s26   ;;  %s17784_s25 = sphi %s17832_s25, %s24424_s25   ;;  %s17780_s24 = sphi %s17830_s24, %s24423_s24  }
   0x3   : > { %s21_s29 = ssub.s32 %s17788_s26, %s17847_s28  ;;  %s24_s30 = sadd.s32 1, %s17784_s25 }
   0x4   : > { %p22_p0 = scmp.eq.s32.totalorder %s21_s29, 0  ;;  %p31_p1 = scmp.ne.s32.totalorder %s17784_s25, %s17780_s24 }
   0x5   : > { %p32_p2 = scmp.eq.s32.totalorder %s17788_s26, 0  ;;  %p14371_p4 = scmp.ge.s32.totalorder %s17788_s26, 2 }
   0x6   : > { %s17856_s8 = scalar_select %p22_p0, %s17784_s25, %s24_s30  }
   0x7   : > { %p33_p3 = por %p32_p2, %p31_p1  ;;  %227 = sbr.rel (%p14371_p4) target bundleno = 115 (0x73), region = 40 }
   0xe   : > { %230 = sbr.rel (!%p33_p3) target bundleno = 115 (0x73), region = 44  ;;  %s232_s9 = sand.u32 (%p33_p3), 1, %s17784_s25  }
   0xf   : > { %s15380_s10 = sshll.u32 (%p33_p3), %s17788_s26, 6  ;;  %s16534_s11 = smul.u32 (%p33_p3), 1536, %s232_s9 }
  0x10   : > { %s17864_s14 = scalar_lea.vmem (%p33_p3), %s23507_s0, %s15380_s10 }
  0x11   : > { %v648_v0 = vld [vmem:[%s17864_s14] sm:$0xff] (%p33_p3)  ;;  %v650_v1 = vld [vmem:[%s17864_s14 + $0x8] sm:$0xff] (%p33_p3)  ;;  %v652_v2 = vld [vmem:[%s17864_s14 + $0x10] sm:$0xff] (%p33_p3)  ;;  %s17872_s15 = scalar_lea.vmem (%p33_p3), [#allocation2], %s16534_s11 }
  0x12   : > { %v654_v3 = vld [vmem:[%s17864_s14 + $0x18] sm:$0xff] (%p33_p3)  ;;  %v656_v4 = vld [vmem:[%s17864_s14 + $0x20] sm:$0xff] (%p33_p3)  ;;  %v658_v5 = vld [vmem:[%s17864_s14 + $0x28] sm:$0xff] (%p33_p3)  ;;  %649 = vst [vmem:[%s17872_s15] sm:$0xff] (%p33_p3), %v648_v0 }
  0x13   : > { %651 = vst [vmem:[%s17872_s15 + $0x8] sm:$0xff] (%p33_p3), %v650_v1  ;;  %653 = vst [vmem:[%s17872_s15 + $0x10] sm:$0xff] (%p33_p3), %v652_v2  ;;  %v660_v6 = vld [vmem:[%s17864_s14 + $0x30] sm:$0xff] (%p33_p3)  ;;  %v662_v7 = vld [vmem:[%s17864_s14 + $0x38] sm:$0xff] (%p33_p3) }
  0x14   : > { %655 = vst [vmem:[%s17872_s15 + $0x18] sm:$0xff] (%p33_p3), %v654_v3  ;;  %657 = vst [vmem:[%s17872_s15 + $0x20] sm:$0xff] (%p33_p3), %v656_v4  ;;  %v664_v8 = vld [vmem:[%s17864_s14 + $0x80] sm:$0xff] (%p33_p3)  ;;  %v666_v9 = vld [vmem:[%s17864_s14 + $0x88] sm:$0xff] (%p33_p3) }
  0x15   : > { %659 = vst [vmem:[%s17872_s15 + $0x28] sm:$0xff] %v658_v5  ;;  %661 = vst [vmem:[%s17872_s15 + $0x30] sm:$0xff] %v660_v6  ;;  %v668_v10 = vld [vmem:[%s17864_s14 + $0x90] sm:$0xff]  ;;  %v670_v11 = vld [vmem:[%s17864_s14 + $0x98] sm:$0xff] }
  0x16   : > { %663 = vst [vmem:[%s17872_s15 + $0x38] sm:$0xff] %v662_v7  ;;  %665 = vst [vmem:[%s17872_s15 + $0x40] sm:$0xff] %v664_v8  ;;  %v672_v12 = vld [vmem:[%s17864_s14 + $0xa0] sm:$0xff]  ;;  %v674_v13 = vld [vmem:[%s17864_s14 + $0xa8] sm:$0xff] }
  0x17   : > { %667 = vst [vmem:[%s17872_s15 + $0x48] sm:$0xff] %v666_v9  ;;  %669 = vst [vmem:[%s17872_s15 + $0x50] sm:$0xff] %v668_v10  ;;  %v676_v14 = vld [vmem:[%s17864_s14 + $0xb0] sm:$0xff]  ;;  %v678_v15 = vld [vmem:[%s17864_s14 + $0xb8] sm:$0xff] }
  0x18   : > { %671 = vst [vmem:[%s17872_s15 + $0x58] sm:$0xff] %v670_v11  ;;  %673 = vst [vmem:[%s17872_s15 + $0x60] sm:$0xff] %v672_v12  ;;  %v680_v16 = vld [vmem:[%s17864_s14 + $0x100] sm:$0xff]  ;;  %v682_v17 = vld [vmem:[%s17864_s14 + $0x108] sm:$0xff] }
  0x19   : > { %675 = vst [vmem:[%s17872_s15 + $0x68] sm:$0xff] %v674_v13  ;;  %677 = vst [vmem:[%s17872_s15 + $0x70] sm:$0xff] %v676_v14  ;;  %v684_v18 = vld [vmem:[%s17864_s14 + $0x110] sm:$0xff]  ;;  %v686_v19 = vld [vmem:[%s17864_s14 + $0x118] sm:$0xff] }
  0x1a   : > { %679 = vst [vmem:[%s17872_s15 + $0x78] sm:$0xff] %v678_v15  ;;  %681 = vst [vmem:[%s17872_s15 + $0x80] sm:$0xff] %v680_v16  ;;  %v688_v20 = vld [vmem:[%s17864_s14 + $0x120] sm:$0xff]  ;;  %v690_v21 = vld [vmem:[%s17864_s14 + $0x128] sm:$0xff] }
  0x1b   : > { %683 = vst [vmem:[%s17872_s15 + $0x88] sm:$0xff] %v682_v17  ;;  %685 = vst [vmem:[%s17872_s15 + $0x90] sm:$0xff] %v684_v18  ;;  %v692_v22 = vld [vmem:[%s17864_s14 + $0x130] sm:$0xff]  ;;  %v694_v23 = vld [vmem:[%s17864_s14 + $0x138] sm:$0xff] }
  0x1c   : > { %687 = vst [vmem:[%s17872_s15 + $0x98] sm:$0xff] %v686_v19  ;;  %689 = vst [vmem:[%s17872_s15 + $0xa0] sm:$0xff] %v688_v20  ;;  %v696_v24 = vld [vmem:[%s17864_s14 + $0x180] sm:$0xff]  ;;  %v698_v25 = vld [vmem:[%s17864_s14 + $0x188] sm:$0xff] }
  0x1d   : > { %691 = vst [vmem:[%s17872_s15 + $0xa8] sm:$0xff] %v690_v21  ;;  %693 = vst [vmem:[%s17872_s15 + $0xb0] sm:$0xff] %v692_v22  ;;  %v700_v26 = vld [vmem:[%s17864_s14 + $0x190] sm:$0xff]  ;;  %v702_v27 = vld [vmem:[%s17864_s14 + $0x198] sm:$0xff] }
  0x1e   : > { %695 = vst [vmem:[%s17872_s15 + $0xb8] sm:$0xff] %v694_v23  ;;  %697 = vst [vmem:[%s17872_s15 + $0xc0] sm:$0xff] %v696_v24  ;;  %v704_v28 = vld [vmem:[%s17864_s14 + $0x1a0] sm:$0xff]  ;;  %v706_v29 = vld [vmem:[%s17864_s14 + $0x1a8] sm:$0xff] }
  0x1f   : > { %699 = vst [vmem:[%s17872_s15 + $0xc8] sm:$0xff] %v698_v25  ;;  %701 = vst [vmem:[%s17872_s15 + $0xd0] sm:$0xff] %v700_v26  ;;  %v708_v30 = vld [vmem:[%s17864_s14 + $0x1b0] sm:$0xff]  ;;  %v710_v31 = vld [vmem:[%s17864_s14 + $0x1b8] sm:$0xff] }
  0x20   : > { %703 = vst [vmem:[%s17872_s15 + $0xd8] sm:$0xff] %v702_v27  ;;  %705 = vst [vmem:[%s17872_s15 + $0xe0] sm:$0xff] %v704_v28  ;;  %v712_v32 = vld [vmem:[%s17864_s14 + $0x200] sm:$0xff]  ;;  %v714_v33 = vld [vmem:[%s17864_s14 + $0x208] sm:$0xff] }
  0x21   : > { %707 = vst [vmem:[%s17872_s15 + $0xe8] sm:$0xff] %v706_v29  ;;  %709 = vst [vmem:[%s17872_s15 + $0xf0] sm:$0xff] %v708_v30  ;;  %v716_v34 = vld [vmem:[%s17864_s14 + $0x210] sm:$0xff]  ;;  %v718_v35 = vld [vmem:[%s17864_s14 + $0x218] sm:$0xff] }
  0x22   : > { %711 = vst [vmem:[%s17872_s15 + $0xf8] sm:$0xff] %v710_v31  ;;  %713 = vst [vmem:[%s17872_s15 + $0x100] sm:$0xff] %v712_v32  ;;  %v720_v36 = vld [vmem:[%s17864_s14 + $0x220] sm:$0xff]  ;;  %v722_v37 = vld [vmem:[%s17864_s14 + $0x228] sm:$0xff] }
  0x23   : > { %715 = vst [vmem:[%s17872_s15 + $0x108] sm:$0xff] %v714_v33  ;;  %717 = vst [vmem:[%s17872_s15 + $0x110] sm:$0xff] %v716_v34  ;;  %v724_v38 = vld [vmem:[%s17864_s14 + $0x230] sm:$0xff]  ;;  %v726_v39 = vld [vmem:[%s17864_s14 + $0x238] sm:$0xff] }
  0x24   : > { %719 = vst [vmem:[%s17872_s15 + $0x118] sm:$0xff] %v718_v35  ;;  %721 = vst [vmem:[%s17872_s15 + $0x120] sm:$0xff] %v720_v36  ;;  %v728_v40 = vld [vmem:[%s17864_s14 + $0x280] sm:$0xff]  ;;  %v730_v41 = vld [vmem:[%s17864_s14 + $0x288] sm:$0xff] }
  0x25   : > { %723 = vst [vmem:[%s17872_s15 + $0x128] sm:$0xff] %v722_v37  ;;  %725 = vst [vmem:[%s17872_s15 + $0x130] sm:$0xff] %v724_v38  ;;  %v732_v42 = vld [vmem:[%s17864_s14 + $0x290] sm:$0xff]  ;;  %v734_v43 = vld [vmem:[%s17864_s14 + $0x298] sm:$0xff] }
  0x26   : > { %727 = vst [vmem:[%s17872_s15 + $0x138] sm:$0xff] %v726_v39  ;;  %729 = vst [vmem:[%s17872_s15 + $0x140] sm:$0xff] %v728_v40  ;;  %v736_v44 = vld [vmem:[%s17864_s14 + $0x2a0] sm:$0xff]  ;;  %v738_v45 = vld [vmem:[%s17864_s14 + $0x2a8] sm:$0xff] }
  0x27   : > { %731 = vst [vmem:[%s17872_s15 + $0x148] sm:$0xff] %v730_v41  ;;  %733 = vst [vmem:[%s17872_s15 + $0x150] sm:$0xff] %v732_v42  ;;  %v740_v46 = vld [vmem:[%s17864_s14 + $0x2b0] sm:$0xff]  ;;  %v742_v47 = vld [vmem:[%s17864_s14 + $0x2b8] sm:$0xff] }
  0x28   : > { %735 = vst [vmem:[%s17872_s15 + $0x158] sm:$0xff] %v734_v43  ;;  %737 = vst [vmem:[%s17872_s15 + $0x160] sm:$0xff] %v736_v44  ;;  %v744_v48 = vld [vmem:[%s17864_s14 + $0x300] sm:$0xff]  ;;  %v746_v49 = vld [vmem:[%s17864_s14 + $0x308] sm:$0xff] }
  0x29   : > { %739 = vst [vmem:[%s17872_s15 + $0x168] sm:$0xff] %v738_v45  ;;  %741 = vst [vmem:[%s17872_s15 + $0x170] sm:$0xff] %v740_v46  ;;  %v748_v50 = vld [vmem:[%s17864_s14 + $0x310] sm:$0xff]  ;;  %v750_v51 = vld [vmem:[%s17864_s14 + $0x318] sm:$0xff] }
  0x2a   : > { %743 = vst [vmem:[%s17872_s15 + $0x178] sm:$0xff] %v742_v47  ;;  %745 = vst [vmem:[%s17872_s15 + $0x180] sm:$0xff] %v744_v48  ;;  %v752_v52 = vld [vmem:[%s17864_s14 + $0x320] sm:$0xff]  ;;  %v754_v53 = vld [vmem:[%s17864_s14 + $0x328] sm:$0xff] }
  0x2b   : > { %747 = vst [vmem:[%s17872_s15 + $0x188] sm:$0xff] %v746_v49  ;;  %749 = vst [vmem:[%s17872_s15 + $0x190] sm:$0xff] %v748_v50  ;;  %v756_v54 = vld [vmem:[%s17864_s14 + $0x330] sm:$0xff]  ;;  %v758_v55 = vld [vmem:[%s17864_s14 + $0x338] sm:$0xff] }
  0x2c   : > { %751 = vst [vmem:[%s17872_s15 + $0x198] sm:$0xff] %v750_v51  ;;  %753 = vst [vmem:[%s17872_s15 + $0x1a0] sm:$0xff] %v752_v52  ;;  %v760_v56 = vld [vmem:[%s17864_s14 + $0x380] sm:$0xff]  ;;  %v762_v57 = vld [vmem:[%s17864_s14 + $0x388] sm:$0xff] }
  0x2d   : > { %755 = vst [vmem:[%s17872_s15 + $0x1a8] sm:$0xff] %v754_v53  ;;  %757 = vst [vmem:[%s17872_s15 + $0x1b0] sm:$0xff] %v756_v54  ;;  %v764_v58 = vld [vmem:[%s17864_s14 + $0x390] sm:$0xff]  ;;  %v766_v59 = vld [vmem:[%s17864_s14 + $0x398] sm:$0xff] }
  0x2e   : > { %759 = vst [vmem:[%s17872_s15 + $0x1b8] sm:$0xff] %v758_v55  ;;  %761 = vst [vmem:[%s17872_s15 + $0x1c0] sm:$0xff] %v760_v56  ;;  %v768_v60 = vld [vmem:[%s17864_s14 + $0x3a0] sm:$0xff]  ;;  %v770_v61 = vld [vmem:[%s17864_s14 + $0x3a8] sm:$0xff] }
  0x2f   : > { %763 = vst [vmem:[%s17872_s15 + $0x1c8] sm:$0xff] %v762_v57  ;;  %765 = vst [vmem:[%s17872_s15 + $0x1d0] sm:$0xff] %v764_v58  ;;  %v772_v62 = vld [vmem:[%s17864_s14 + $0x3b0] sm:$0xff]  ;;  %v774_v63 = vld [vmem:[%s17864_s14 + $0x3b8] sm:$0xff] }
  0x30   : > { %767 = vst [vmem:[%s17872_s15 + $0x1d8] sm:$0xff] %v766_v59  ;;  %769 = vst [vmem:[%s17872_s15 + $0x1e0] sm:$0xff] %v768_v60  ;;  %v776_v0 = vld [vmem:[%s17864_s14 + $0x400] sm:$0xff]  ;;  %v778_v1 = vld [vmem:[%s17864_s14 + $0x408] sm:$0xff] }
  0x31   : > { %771 = vst [vmem:[%s17872_s15 + $0x1e8] sm:$0xff] %v770_v61  ;;  %773 = vst [vmem:[%s17872_s15 + $0x1f0] sm:$0xff] %v772_v62  ;;  %v780_v2 = vld [vmem:[%s17864_s14 + $0x410] sm:$0xff]  ;;  %v782_v3 = vld [vmem:[%s17864_s14 + $0x418] sm:$0xff] }
  0x32   : > { %775 = vst [vmem:[%s17872_s15 + $0x1f8] sm:$0xff] %v774_v63  ;;  %777 = vst [vmem:[%s17872_s15 + $0x200] sm:$0xff] %v776_v0  ;;  %v784_v4 = vld [vmem:[%s17864_s14 + $0x420] sm:$0xff]  ;;  %v786_v5 = vld [vmem:[%s17864_s14 + $0x428] sm:$0xff] }
  0x33   : > { %779 = vst [vmem:[%s17872_s15 + $0x208] sm:$0xff] %v778_v1  ;;  %781 = vst [vmem:[%s17872_s15 + $0x210] sm:$0xff] %v780_v2  ;;  %v788_v6 = vld [vmem:[%s17864_s14 + $0x430] sm:$0xff]  ;;  %v790_v7 = vld [vmem:[%s17864_s14 + $0x438] sm:$0xff] }
  0x34   : > { %783 = vst [vmem:[%s17872_s15 + $0x218] sm:$0xff] %v782_v3  ;;  %785 = vst [vmem:[%s17872_s15 + $0x220] sm:$0xff] %v784_v4  ;;  %v792_v8 = vld [vmem:[%s17864_s14 + $0x480] sm:$0xff]  ;;  %v794_v9 = vld [vmem:[%s17864_s14 + $0x488] sm:$0xff] }
  0x35   : > { %787 = vst [vmem:[%s17872_s15 + $0x228] sm:$0xff] %v786_v5  ;;  %789 = vst [vmem:[%s17872_s15 + $0x230] sm:$0xff] %v788_v6  ;;  %v796_v10 = vld [vmem:[%s17864_s14 + $0x490] sm:$0xff]  ;;  %v798_v11 = vld [vmem:[%s17864_s14 + $0x498] sm:$0xff] }
  0x36   : > { %791 = vst [vmem:[%s17872_s15 + $0x238] sm:$0xff] %v790_v7  ;;  %793 = vst [vmem:[%s17872_s15 + $0x240] sm:$0xff] %v792_v8  ;;  %v800_v12 = vld [vmem:[%s17864_s14 + $0x4a0] sm:$0xff]  ;;  %v802_v13 = vld [vmem:[%s17864_s14 + $0x4a8] sm:$0xff] }
  0x37   : > { %795 = vst [vmem:[%s17872_s15 + $0x248] sm:$0xff] %v794_v9  ;;  %797 = vst [vmem:[%s17872_s15 + $0x250] sm:$0xff] %v796_v10  ;;  %v804_v14 = vld [vmem:[%s17864_s14 + $0x4b0] sm:$0xff]  ;;  %v806_v15 = vld [vmem:[%s17864_s14 + $0x4b8] sm:$0xff] }
  0x38   : > { %799 = vst [vmem:[%s17872_s15 + $0x258] sm:$0xff] %v798_v11  ;;  %801 = vst [vmem:[%s17872_s15 + $0x260] sm:$0xff] %v800_v12  ;;  %v808_v16 = vld [vmem:[%s17864_s14 + $0x500] sm:$0xff]  ;;  %v810_v17 = vld [vmem:[%s17864_s14 + $0x508] sm:$0xff] }
  0x39   : > { %803 = vst [vmem:[%s17872_s15 + $0x268] sm:$0xff] %v802_v13  ;;  %805 = vst [vmem:[%s17872_s15 + $0x270] sm:$0xff] %v804_v14  ;;  %v812_v18 = vld [vmem:[%s17864_s14 + $0x510] sm:$0xff]  ;;  %v814_v19 = vld [vmem:[%s17864_s14 + $0x518] sm:$0xff] }
  0x3a   : > { %807 = vst [vmem:[%s17872_s15 + $0x278] sm:$0xff] %v806_v15  ;;  %809 = vst [vmem:[%s17872_s15 + $0x280] sm:$0xff] %v808_v16  ;;  %v816_v20 = vld [vmem:[%s17864_s14 + $0x520] sm:$0xff]  ;;  %v818_v21 = vld [vmem:[%s17864_s14 + $0x528] sm:$0xff] }
  0x3b   : > { %811 = vst [vmem:[%s17872_s15 + $0x288] sm:$0xff] %v810_v17  ;;  %813 = vst [vmem:[%s17872_s15 + $0x290] sm:$0xff] %v812_v18  ;;  %v820_v22 = vld [vmem:[%s17864_s14 + $0x530] sm:$0xff]  ;;  %v822_v23 = vld [vmem:[%s17864_s14 + $0x538] sm:$0xff] }
  0x3c   : > { %815 = vst [vmem:[%s17872_s15 + $0x298] sm:$0xff] %v814_v19  ;;  %817 = vst [vmem:[%s17872_s15 + $0x2a0] sm:$0xff] %v816_v20  ;;  %v824_v24 = vld [vmem:[%s17864_s14 + $0x580] sm:$0xff]  ;;  %v826_v25 = vld [vmem:[%s17864_s14 + $0x588] sm:$0xff] }
  0x3d   : > { %819 = vst [vmem:[%s17872_s15 + $0x2a8] sm:$0xff] %v818_v21  ;;  %821 = vst [vmem:[%s17872_s15 + $0x2b0] sm:$0xff] %v820_v22  ;;  %v828_v26 = vld [vmem:[%s17864_s14 + $0x590] sm:$0xff]  ;;  %v830_v27 = vld [vmem:[%s17864_s14 + $0x598] sm:$0xff] }
  0x3e   : > { %823 = vst [vmem:[%s17872_s15 + $0x2b8] sm:$0xff] %v822_v23  ;;  %825 = vst [vmem:[%s17872_s15 + $0x2c0] sm:$0xff] %v824_v24  ;;  %v832_v28 = vld [vmem:[%s17864_s14 + $0x5a0] sm:$0xff]  ;;  %v834_v29 = vld [vmem:[%s17864_s14 + $0x5a8] sm:$0xff] }
  0x3f   : > { %827 = vst [vmem:[%s17872_s15 + $0x2c8] sm:$0xff] %v826_v25  ;;  %829 = vst [vmem:[%s17872_s15 + $0x2d0] sm:$0xff] %v828_v26  ;;  %v836_v30 = vld [vmem:[%s17864_s14 + $0x5b0] sm:$0xff]  ;;  %v838_v31 = vld [vmem:[%s17864_s14 + $0x5b8] sm:$0xff] }
  0x40   : > { %831 = vst [vmem:[%s17872_s15 + $0x2d8] sm:$0xff] %v830_v27  ;;  %833 = vst [vmem:[%s17872_s15 + $0x2e0] sm:$0xff] %v832_v28  ;;  %v840_v32 = vld [vmem:[%s17864_s14 + $0x600] sm:$0xff]  ;;  %v842_v33 = vld [vmem:[%s17864_s14 + $0x608] sm:$0xff] }
  0x41   : > { %835 = vst [vmem:[%s17872_s15 + $0x2e8] sm:$0xff] %v834_v29  ;;  %837 = vst [vmem:[%s17872_s15 + $0x2f0] sm:$0xff] %v836_v30  ;;  %v844_v34 = vld [vmem:[%s17864_s14 + $0x610] sm:$0xff]  ;;  %v846_v35 = vld [vmem:[%s17864_s14 + $0x618] sm:$0xff] }
  0x42   : > { %839 = vst [vmem:[%s17872_s15 + $0x2f8] sm:$0xff] %v838_v31  ;;  %841 = vst [vmem:[%s17872_s15 + $0x300] sm:$0xff] %v840_v32  ;;  %v848_v36 = vld [vmem:[%s17864_s14 + $0x620] sm:$0xff]  ;;  %v850_v37 = vld [vmem:[%s17864_s14 + $0x628] sm:$0xff] }
  0x43   : > { %843 = vst [vmem:[%s17872_s15 + $0x308] sm:$0xff] %v842_v33  ;;  %845 = vst [vmem:[%s17872_s15 + $0x310] sm:$0xff] %v844_v34  ;;  %v852_v38 = vld [vmem:[%s17864_s14 + $0x630] sm:$0xff]  ;;  %v854_v39 = vld [vmem:[%s17864_s14 + $0x638] sm:$0xff] }
  0x44   : > { %847 = vst [vmem:[%s17872_s15 + $0x318] sm:$0xff] %v846_v35  ;;  %849 = vst [vmem:[%s17872_s15 + $0x320] sm:$0xff] %v848_v36  ;;  %v856_v40 = vld [vmem:[%s17864_s14 + $0x680] sm:$0xff]  ;;  %v858_v41 = vld [vmem:[%s17864_s14 + $0x688] sm:$0xff] }
  0x45   : > { %851 = vst [vmem:[%s17872_s15 + $0x328] sm:$0xff] %v850_v37  ;;  %853 = vst [vmem:[%s17872_s15 + $0x330] sm:$0xff] %v852_v38  ;;  %v860_v42 = vld [vmem:[%s17864_s14 + $0x690] sm:$0xff]  ;;  %v862_v43 = vld [vmem:[%s17864_s14 + $0x698] sm:$0xff] }
  0x46   : > { %855 = vst [vmem:[%s17872_s15 + $0x338] sm:$0xff] %v854_v39  ;;  %857 = vst [vmem:[%s17872_s15 + $0x340] sm:$0xff] %v856_v40  ;;  %v864_v44 = vld [vmem:[%s17864_s14 + $0x6a0] sm:$0xff]  ;;  %v866_v45 = vld [vmem:[%s17864_s14 + $0x6a8] sm:$0xff] }
  0x47   : > { %859 = vst [vmem:[%s17872_s15 + $0x348] sm:$0xff] %v858_v41  ;;  %861 = vst [vmem:[%s17872_s15 + $0x350] sm:$0xff] %v860_v42  ;;  %v868_v46 = vld [vmem:[%s17864_s14 + $0x6b0] sm:$0xff]  ;;  %v870_v47 = vld [vmem:[%s17864_s14 + $0x6b8] sm:$0xff] }
  0x48   : > { %863 = vst [vmem:[%s17872_s15 + $0x358] sm:$0xff] %v862_v43  ;;  %865 = vst [vmem:[%s17872_s15 + $0x360] sm:$0xff] %v864_v44  ;;  %v872_v48 = vld [vmem:[%s17864_s14 + $0x700] sm:$0xff]  ;;  %v874_v49 = vld [vmem:[%s17864_s14 + $0x708] sm:$0xff] }
  0x49   : > { %867 = vst [vmem:[%s17872_s15 + $0x368] sm:$0xff] %v866_v45  ;;  %869 = vst [vmem:[%s17872_s15 + $0x370] sm:$0xff] %v868_v46  ;;  %v876_v50 = vld [vmem:[%s17864_s14 + $0x710] sm:$0xff]  ;;  %v878_v51 = vld [vmem:[%s17864_s14 + $0x718] sm:$0xff] }
  0x4a   : > { %871 = vst [vmem:[%s17872_s15 + $0x378] sm:$0xff] %v870_v47  ;;  %873 = vst [vmem:[%s17872_s15 + $0x380] sm:$0xff] %v872_v48  ;;  %v880_v52 = vld [vmem:[%s17864_s14 + $0x720] sm:$0xff]  ;;  %v882_v53 = vld [vmem:[%s17864_s14 + $0x728] sm:$0xff] }
  0x4b   : > { %875 = vst [vmem:[%s17872_s15 + $0x388] sm:$0xff] %v874_v49  ;;  %877 = vst [vmem:[%s17872_s15 + $0x390] sm:$0xff] %v876_v50  ;;  %v884_v54 = vld [vmem:[%s17864_s14 + $0x730] sm:$0xff]  ;;  %v886_v55 = vld [vmem:[%s17864_s14 + $0x738] sm:$0xff] }
  0x4c   : > { %879 = vst [vmem:[%s17872_s15 + $0x398] sm:$0xff] %v878_v51  ;;  %881 = vst [vmem:[%s17872_s15 + $0x3a0] sm:$0xff] %v880_v52  ;;  %v888_v56 = vld [vmem:[%s17864_s14 + $0x780] sm:$0xff]  ;;  %v890_v57 = vld [vmem:[%s17864_s14 + $0x788] sm:$0xff] }
  0x4d   : > { %883 = vst [vmem:[%s17872_s15 + $0x3a8] sm:$0xff] %v882_v53  ;;  %885 = vst [vmem:[%s17872_s15 + $0x3b0] sm:$0xff] %v884_v54  ;;  %v892_v58 = vld [vmem:[%s17864_s14 + $0x790] sm:$0xff]  ;;  %v894_v59 = vld [vmem:[%s17864_s14 + $0x798] sm:$0xff] }
  0x4e   : > { %887 = vst [vmem:[%s17872_s15 + $0x3b8] sm:$0xff] %v886_v55  ;;  %889 = vst [vmem:[%s17872_s15 + $0x3c0] sm:$0xff] %v888_v56  ;;  %v896_v60 = vld [vmem:[%s17864_s14 + $0x7a0] sm:$0xff]  ;;  %v898_v61 = vld [vmem:[%s17864_s14 + $0x7a8] sm:$0xff] }
  0x4f   : > { %891 = vst [vmem:[%s17872_s15 + $0x3c8] sm:$0xff] %v890_v57  ;;  %893 = vst [vmem:[%s17872_s15 + $0x3d0] sm:$0xff] %v892_v58  ;;  %v900_v62 = vld [vmem:[%s17864_s14 + $0x7b0] sm:$0xff]  ;;  %v902_v63 = vld [vmem:[%s17864_s14 + $0x7b8] sm:$0xff] }
  0x50   : > { %895 = vst [vmem:[%s17872_s15 + $0x3d8] sm:$0xff] %v894_v59  ;;  %897 = vst [vmem:[%s17872_s15 + $0x3e0] sm:$0xff] %v896_v60  ;;  %v904_v0 = vld [vmem:[%s17864_s14 + $0x800] sm:$0xff]  ;;  %v906_v1 = vld [vmem:[%s17864_s14 + $0x808] sm:$0xff] }
  0x51   : > { %899 = vst [vmem:[%s17872_s15 + $0x3e8] sm:$0xff] %v898_v61  ;;  %901 = vst [vmem:[%s17872_s15 + $0x3f0] sm:$0xff] %v900_v62  ;;  %v908_v2 = vld [vmem:[%s17864_s14 + $0x810] sm:$0xff]  ;;  %v910_v3 = vld [vmem:[%s17864_s14 + $0x818] sm:$0xff] }
  0x52   : > { %903 = vst [vmem:[%s17872_s15 + $0x3f8] sm:$0xff] %v902_v63  ;;  %905 = vst [vmem:[%s17872_s15 + $0x400] sm:$0xff] %v904_v0  ;;  %v912_v4 = vld [vmem:[%s17864_s14 + $0x820] sm:$0xff]  ;;  %v914_v5 = vld [vmem:[%s17864_s14 + $0x828] sm:$0xff] }
  0x53   : > { %907 = vst [vmem:[%s17872_s15 + $0x408] sm:$0xff] %v906_v1  ;;  %909 = vst [vmem:[%s17872_s15 + $0x410] sm:$0xff] %v908_v2  ;;  %v916_v6 = vld [vmem:[%s17864_s14 + $0x830] sm:$0xff]  ;;  %v918_v7 = vld [vmem:[%s17864_s14 + $0x838] sm:$0xff] }
  0x54   : > { %911 = vst [vmem:[%s17872_s15 + $0x418] sm:$0xff] %v910_v3  ;;  %913 = vst [vmem:[%s17872_s15 + $0x420] sm:$0xff] %v912_v4  ;;  %v920_v8 = vld [vmem:[%s17864_s14 + $0x880] sm:$0xff]  ;;  %v922_v9 = vld [vmem:[%s17864_s14 + $0x888] sm:$0xff] }
  0x55   : > { %915 = vst [vmem:[%s17872_s15 + $0x428] sm:$0xff] %v914_v5  ;;  %917 = vst [vmem:[%s17872_s15 + $0x430] sm:$0xff] %v916_v6  ;;  %v924_v10 = vld [vmem:[%s17864_s14 + $0x890] sm:$0xff]  ;;  %v926_v11 = vld [vmem:[%s17864_s14 + $0x898] sm:$0xff] }
  0x56   : > { %919 = vst [vmem:[%s17872_s15 + $0x438] sm:$0xff] %v918_v7  ;;  %921 = vst [vmem:[%s17872_s15 + $0x440] sm:$0xff] %v920_v8  ;;  %v928_v12 = vld [vmem:[%s17864_s14 + $0x8a0] sm:$0xff]  ;;  %v930_v13 = vld [vmem:[%s17864_s14 + $0x8a8] sm:$0xff] }
  0x57   : > { %923 = vst [vmem:[%s17872_s15 + $0x448] sm:$0xff] %v922_v9  ;;  %925 = vst [vmem:[%s17872_s15 + $0x450] sm:$0xff] %v924_v10  ;;  %v932_v14 = vld [vmem:[%s17864_s14 + $0x8b0] sm:$0xff]  ;;  %v934_v15 = vld [vmem:[%s17864_s14 + $0x8b8] sm:$0xff] }
  0x58   : > { %927 = vst [vmem:[%s17872_s15 + $0x458] sm:$0xff] %v926_v11  ;;  %929 = vst [vmem:[%s17872_s15 + $0x460] sm:$0xff] %v928_v12  ;;  %v936_v16 = vld [vmem:[%s17864_s14 + $0x900] sm:$0xff]  ;;  %v938_v17 = vld [vmem:[%s17864_s14 + $0x908] sm:$0xff] }
  0x59   : > { %931 = vst [vmem:[%s17872_s15 + $0x468] sm:$0xff] %v930_v13  ;;  %933 = vst [vmem:[%s17872_s15 + $0x470] sm:$0xff] %v932_v14  ;;  %v940_v18 = vld [vmem:[%s17864_s14 + $0x910] sm:$0xff]  ;;  %v942_v19 = vld [vmem:[%s17864_s14 + $0x918] sm:$0xff] }
  0x5a   : > { %935 = vst [vmem:[%s17872_s15 + $0x478] sm:$0xff] %v934_v15  ;;  %937 = vst [vmem:[%s17872_s15 + $0x480] sm:$0xff] %v936_v16  ;;  %v944_v20 = vld [vmem:[%s17864_s14 + $0x920] sm:$0xff]  ;;  %v946_v21 = vld [vmem:[%s17864_s14 + $0x928] sm:$0xff] }
  0x5b   : > { %939 = vst [vmem:[%s17872_s15 + $0x488] sm:$0xff] %v938_v17  ;;  %941 = vst [vmem:[%s17872_s15 + $0x490] sm:$0xff] %v940_v18  ;;  %v948_v22 = vld [vmem:[%s17864_s14 + $0x930] sm:$0xff]  ;;  %v950_v23 = vld [vmem:[%s17864_s14 + $0x938] sm:$0xff] }
  0x5c   : > { %943 = vst [vmem:[%s17872_s15 + $0x498] sm:$0xff] %v942_v19  ;;  %945 = vst [vmem:[%s17872_s15 + $0x4a0] sm:$0xff] %v944_v20  ;;  %v952_v24 = vld [vmem:[%s17864_s14 + $0x980] sm:$0xff]  ;;  %v954_v25 = vld [vmem:[%s17864_s14 + $0x988] sm:$0xff] }
  0x5d   : > { %947 = vst [vmem:[%s17872_s15 + $0x4a8] sm:$0xff] %v946_v21  ;;  %949 = vst [vmem:[%s17872_s15 + $0x4b0] sm:$0xff] %v948_v22  ;;  %v956_v26 = vld [vmem:[%s17864_s14 + $0x990] sm:$0xff]  ;;  %v958_v27 = vld [vmem:[%s17864_s14 + $0x998] sm:$0xff] }
  0x5e   : > { %951 = vst [vmem:[%s17872_s15 + $0x4b8] sm:$0xff] %v950_v23  ;;  %953 = vst [vmem:[%s17872_s15 + $0x4c0] sm:$0xff] %v952_v24  ;;  %v960_v28 = vld [vmem:[%s17864_s14 + $0x9a0] sm:$0xff]  ;;  %v962_v29 = vld [vmem:[%s17864_s14 + $0x9a8] sm:$0xff] }
  0x5f   : > { %955 = vst [vmem:[%s17872_s15 + $0x4c8] sm:$0xff] %v954_v25  ;;  %957 = vst [vmem:[%s17872_s15 + $0x4d0] sm:$0xff] %v956_v26  ;;  %v964_v30 = vld [vmem:[%s17864_s14 + $0x9b0] sm:$0xff]  ;;  %v966_v31 = vld [vmem:[%s17864_s14 + $0x9b8] sm:$0xff] }
  0x60   : > { %959 = vst [vmem:[%s17872_s15 + $0x4d8] sm:$0xff] %v958_v27  ;;  %961 = vst [vmem:[%s17872_s15 + $0x4e0] sm:$0xff] %v960_v28  ;;  %v968_v32 = vld [vmem:[%s17864_s14 + $0xa00] sm:$0xff]  ;;  %v970_v33 = vld [vmem:[%s17864_s14 + $0xa08] sm:$0xff] }
  0x61   : > { %963 = vst [vmem:[%s17872_s15 + $0x4e8] sm:$0xff] %v962_v29  ;;  %965 = vst [vmem:[%s17872_s15 + $0x4f0] sm:$0xff] %v964_v30  ;;  %v972_v34 = vld [vmem:[%s17864_s14 + $0xa10] sm:$0xff]  ;;  %v974_v35 = vld [vmem:[%s17864_s14 + $0xa18] sm:$0xff] }
  0x62   : > { %967 = vst [vmem:[%s17872_s15 + $0x4f8] sm:$0xff] %v966_v31  ;;  %969 = vst [vmem:[%s17872_s15 + $0x500] sm:$0xff] %v968_v32  ;;  %v976_v36 = vld [vmem:[%s17864_s14 + $0xa20] sm:$0xff]  ;;  %v978_v37 = vld [vmem:[%s17864_s14 + $0xa28] sm:$0xff] }
  0x63   : > { %971 = vst [vmem:[%s17872_s15 + $0x508] sm:$0xff] %v970_v33  ;;  %973 = vst [vmem:[%s17872_s15 + $0x510] sm:$0xff] %v972_v34  ;;  %v980_v38 = vld [vmem:[%s17864_s14 + $0xa30] sm:$0xff]  ;;  %v982_v39 = vld [vmem:[%s17864_s14 + $0xa38] sm:$0xff] }
  0x64   : > { %975 = vst [vmem:[%s17872_s15 + $0x518] sm:$0xff] %v974_v35  ;;  %977 = vst [vmem:[%s17872_s15 + $0x520] sm:$0xff] %v976_v36  ;;  %v984_v40 = vld [vmem:[%s17864_s14 + $0xa80] sm:$0xff]  ;;  %v986_v41 = vld [vmem:[%s17864_s14 + $0xa88] sm:$0xff] }
  0x65   : > { %979 = vst [vmem:[%s17872_s15 + $0x528] sm:$0xff] %v978_v37  ;;  %981 = vst [vmem:[%s17872_s15 + $0x530] sm:$0xff] %v980_v38  ;;  %v988_v42 = vld [vmem:[%s17864_s14 + $0xa90] sm:$0xff]  ;;  %v990_v43 = vld [vmem:[%s17864_s14 + $0xa98] sm:$0xff] }
  0x66   : > { %983 = vst [vmem:[%s17872_s15 + $0x538] sm:$0xff] %v982_v39  ;;  %985 = vst [vmem:[%s17872_s15 + $0x540] sm:$0xff] %v984_v40  ;;  %v992_v44 = vld [vmem:[%s17864_s14 + $0xaa0] sm:$0xff]  ;;  %v994_v45 = vld [vmem:[%s17864_s14 + $0xaa8] sm:$0xff] }
  0x67   : > { %987 = vst [vmem:[%s17872_s15 + $0x548] sm:$0xff] %v986_v41  ;;  %989 = vst [vmem:[%s17872_s15 + $0x550] sm:$0xff] %v988_v42  ;;  %v996_v46 = vld [vmem:[%s17864_s14 + $0xab0] sm:$0xff]  ;;  %v998_v47 = vld [vmem:[%s17864_s14 + $0xab8] sm:$0xff] }
  0x68   : > { %991 = vst [vmem:[%s17872_s15 + $0x558] sm:$0xff] %v990_v43  ;;  %993 = vst [vmem:[%s17872_s15 + $0x560] sm:$0xff] %v992_v44  ;;  %v1000_v48 = vld [vmem:[%s17864_s14 + $0xb00] sm:$0xff]  ;;  %v1002_v49 = vld [vmem:[%s17864_s14 + $0xb08] sm:$0xff] }
  0x69   : > { %995 = vst [vmem:[%s17872_s15 + $0x568] sm:$0xff] %v994_v45  ;;  %997 = vst [vmem:[%s17872_s15 + $0x570] sm:$0xff] %v996_v46  ;;  %v1004_v50 = vld [vmem:[%s17864_s14 + $0xb10] sm:$0xff]  ;;  %v1006_v51 = vld [vmem:[%s17864_s14 + $0xb18] sm:$0xff] }
  0x6a   : > { %999 = vst [vmem:[%s17872_s15 + $0x578] sm:$0xff] %v998_v47  ;;  %1001 = vst [vmem:[%s17872_s15 + $0x580] sm:$0xff] %v1000_v48  ;;  %v1008_v52 = vld [vmem:[%s17864_s14 + $0xb20] sm:$0xff]  ;;  %v1010_v53 = vld [vmem:[%s17864_s14 + $0xb28] sm:$0xff] }
  0x6b   : > { %1003 = vst [vmem:[%s17872_s15 + $0x588] sm:$0xff] %v1002_v49  ;;  %1005 = vst [vmem:[%s17872_s15 + $0x590] sm:$0xff] %v1004_v50  ;;  %v1012_v54 = vld [vmem:[%s17864_s14 + $0xb30] sm:$0xff]  ;;  %v1014_v55 = vld [vmem:[%s17864_s14 + $0xb38] sm:$0xff] }
  0x6c   : > { %1007 = vst [vmem:[%s17872_s15 + $0x598] sm:$0xff] %v1006_v51  ;;  %1009 = vst [vmem:[%s17872_s15 + $0x5a0] sm:$0xff] %v1008_v52  ;;  %v1016_v56 = vld [vmem:[%s17864_s14 + $0xb80] sm:$0xff]  ;;  %v1018_v57 = vld [vmem:[%s17864_s14 + $0xb88] sm:$0xff] }
  0x6d   : > { %1011 = vst [vmem:[%s17872_s15 + $0x5a8] sm:$0xff] %v1010_v53  ;;  %1013 = vst [vmem:[%s17872_s15 + $0x5b0] sm:$0xff] %v1012_v54  ;;  %v1020_v58 = vld [vmem:[%s17864_s14 + $0xb90] sm:$0xff]  ;;  %v1022_v59 = vld [vmem:[%s17864_s14 + $0xb98] sm:$0xff] }
  0x6e   : > { %1015 = vst [vmem:[%s17872_s15 + $0x5b8] sm:$0xff] %v1014_v55  ;;  %1017 = vst [vmem:[%s17872_s15 + $0x5c0] sm:$0xff] %v1016_v56  ;;  %v1024_v60 = vld [vmem:[%s17864_s14 + $0xba0] sm:$0xff]  ;;  %v1026_v61 = vld [vmem:[%s17864_s14 + $0xba8] sm:$0xff] }
  0x6f   : > { %1019 = vst [vmem:[%s17872_s15 + $0x5c8] sm:$0xff] %v1018_v57  ;;  %1021 = vst [vmem:[%s17872_s15 + $0x5d0] sm:$0xff] %v1020_v58  ;;  %v1028_v62 = vld [vmem:[%s17864_s14 + $0xbb0] sm:$0xff]  ;;  %v1030_v63 = vld [vmem:[%s17864_s14 + $0xbb8] sm:$0xff] }
  0x70   : > { %1023 = vst [vmem:[%s17872_s15 + $0x5d8] sm:$0xff] %v1022_v59  ;;  %1025 = vst [vmem:[%s17872_s15 + $0x5e0] sm:$0xff] %v1024_v60 }
  0x71   : > { %1027 = vst [vmem:[%s17872_s15 + $0x5e8] sm:$0xff] %v1026_v61  ;;  %1029 = vst [vmem:[%s17872_s15 + $0x5f0] sm:$0xff] %v1028_v62 }
  0x72   : > { %1031 = vst [vmem:[%s17872_s15 + $0x5f8] sm:$0xff] %v1030_v63 }
  0x73 PF: > { %p14375_p5 = scmp.ge.s32.totalorder %s17788_s26, 1  ;;  %p1036_p6 = scmp.lt.s32.totalorder %s17788_s26, 3 }
  0x75   : > { %p1037_p7 = pnand %p14375_p5, %p1036_p6 }
  0x77   : > { %1040 = sbr.rel (%p1037_p7) target bundleno = 2656 (0xa60), region = 82 }
  0x7e   : > { %v16560_v0 = vld [vmem:[%s23508_s1 + $0x4] ss:$16 sps:$4 sm:$0xff]   ;;  %v16562_v1 = vld [vmem:[%s23508_s1 + $0xc] ss:$16 sps:$4 sm:$0xff]   ;;  %v16564_v2 = vld [vmem:[%s23508_s1] ss:$16 sps:$4 sm:$0xff]  }
  0x7f   : > { %2654 = vmatprep.subr.bf16.mxu0 %v16560_v0  ;;  %v16565_v3 = vld [vmem:[%s23508_s1 + $0x8] ss:$16 sps:$4 sm:$0xff]   ;;  %3647 = vmatprep.subr.bf16.mxu1 %v16562_v1  ;;  %v16566_v4 = vld [vmem:[%s23508_s1 + $0x24] ss:$16 sps:$4 sm:$0xff]   ;;  %v16568_v5 = vld [vmem:[%s23508_s1 + $0x2c] ss:$16 sps:$4 sm:$0xff]  }
  0x80   : > { %2655 = vmatpush1.bf16.msra.mxu0 %v16564_v2  ;;  %3648 = vmatpush1.bf16.msra.mxu1 %v16565_v3  ;;  %v16570_v6 = vld [vmem:[%s23508_s1 + $0x20] ss:$16 sps:$4 sm:$0xff]   ;;  %v16571_v7 = vld [vmem:[%s23508_s1 + $0x28] ss:$16 sps:$4 sm:$0xff]   ;;  %v16572_v8 = vld [vmem:[%s23508_s1 + $0x44] ss:$16 sps:$4 sm:$0xff]  }
  0x81   : > { %2656 = vmatprep.subr.bf16.mxu0 %v16566_v4  ;;  %3649 = vmatprep.subr.bf16.mxu1 %v16568_v5  ;;  %v16574_v9 = vld [vmem:[%s23508_s1 + $0x4c] ss:$16 sps:$4 sm:$0xff]   ;;  %v16576_v10 = vld [vmem:[%s23508_s1 + $0x40] ss:$16 sps:$4 sm:$0xff]   ;;  %v16577_v11 = vld [vmem:[%s23508_s1 + $0x48] ss:$16 sps:$4 sm:$0xff]  }
  0x82   : > { %v16578_v12 = vld [vmem:[%s23508_s1 + $0x64] ss:$16 sps:$4 sm:$0xff]   ;;  %v16580_v13 = vld [vmem:[%s23508_s1 + $0x6c] ss:$16 sps:$4 sm:$0xff]   ;;  %v16582_v14 = vld [vmem:[%s23508_s1 + $0x60] ss:$16 sps:$4 sm:$0xff]  }
  0x83   : > { %v16583_v15 = vld [vmem:[%s23508_s1 + $0x68] ss:$16 sps:$4 sm:$0xff]   ;;  %v16584_v16 = vld [vmem:[%s23508_s1 + $0x84] ss:$16 sps:$4 sm:$0xff]   ;;  %v16586_v17 = vld [vmem:[%s23508_s1 + $0x8c] ss:$16 sps:$4 sm:$0xff]  }
  0x84   : > { %2657 = vmatpush1.bf16.msra.mxu0 %v16570_v6  ;;  %3650 = vmatpush1.bf16.msra.mxu1 %v16571_v7  ;;  %v16588_v18 = vld [vmem:[%s23508_s1 + $0x80] ss:$16 sps:$4 sm:$0xff]   ;;  %v16589_v19 = vld [vmem:[%s23508_s1 + $0x88] ss:$16 sps:$4 sm:$0xff]   ;;  %s1043_s22 = sand.u32 1, %s17780_s24   ;;  %vm2352_vm0 = vcmask 97280  }
  0x85   : > { %2658 = vmatprep.subr.bf16.mxu0 %v16572_v8  ;;  %3651 = vmatprep.subr.bf16.mxu1 %v16574_v9  ;;  %v16590_v20 = vld [vmem:[%s23508_s1 + $0xa4] ss:$16 sps:$4 sm:$0xff]   ;;  %v16592_v21 = vld [vmem:[%s23508_s1 + $0xac] ss:$16 sps:$4 sm:$0xff]   ;;  %s16535_s10 = smul.u32 1536, %s1043_s22  ;;  %vm2641_vm1 = vcmask 1045504  }
  0x86   : > { %v16594_v22 = vld [vmem:[%s23508_s1 + $0xa0] ss:$16 sps:$4 sm:$0xff]   ;;  %v16595_v23 = vld [vmem:[%s23508_s1 + $0xa8] ss:$16 sps:$4 sm:$0xff]   ;;  %v16596_v24 = vld [vmem:[%s23508_s1 + $0xc4] ss:$16 sps:$4 sm:$0xff]  }
  0x87   : > { %v16598_v25 = vld [vmem:[%s23508_s1 + $0xcc] ss:$16 sps:$4 sm:$0xff]   ;;  %v16600_v26 = vld [vmem:[%s23508_s1 + $0xc0] ss:$16 sps:$4 sm:$0xff]   ;;  %v16601_v27 = vld [vmem:[%s23508_s1 + $0xc8] ss:$16 sps:$4 sm:$0xff]  }
  0x88   : > { %2659 = vmatpush1.bf16.msra.mxu0 %v16576_v10  ;;  %3652 = vmatpush1.bf16.msra.mxu1 %v16577_v11  ;;  %v16602_v28 = vld [vmem:[%s23508_s1 + $0xe4] ss:$16 sps:$4 sm:$0xff]   ;;  %s18342_s29 = scalar_lea.vmem [#allocation2], %s16535_s10  ;;  %v16604_v29 = vld [vmem:[%s23508_s1 + $0xec] ss:$16 sps:$4 sm:$0xff]   ;;  %s14376_s15 = sshll.u32 %s14368_s27, 3 }
  0x89   : > { %2660 = vmatprep.subr.bf16.mxu0 %v16578_v12  ;;  %3653 = vmatprep.subr.bf16.mxu1 %v16580_v13  ;;  %v16616_v30 = vld [vmem:[%s18342_s29 + $0x4] ss:$8 sps:$4 sm:$0xff]   ;;  %v16606_v31 = vld [vmem:[%s23508_s1 + $0xe0] ss:$16 sps:$4 sm:$0xff]   ;;  %v16607_v32 = vld [vmem:[%s23508_s1 + $0xe8] ss:$16 sps:$4 sm:$0xff]  }
  0x8a   : > { %v16608_v33 = vld [vmem:[%s23508_s1 + $0x104] ss:$16 sps:$4 sm:$0x3f]   ;;  %v16610_v34 = vld [vmem:[%s23508_s1 + $0x10c] ss:$16 sps:$4 sm:$0x3f]   ;;  %14608 = vmatprep.mubr.msk.bf16.mxu0 %vm2352_vm0, %v16616_v30  ;;  %14705 = vmatprep.mubr.msk.bf16.mxu1 %vm2352_vm0, %v16616_v30 }
  0x8b   : > { %v16612_v35 = vld [vmem:[%s23508_s1 + $0x100] ss:$16 sps:$4 sm:$0x3f]   ;;  %v16613_v36 = vld [vmem:[%s23508_s1 + $0x108] ss:$16 sps:$4 sm:$0x3f]  }
  0x8c   : > { %2661 = vmatpush1.bf16.msra.mxu0 %v16582_v14  ;;  %3654 = vmatpush1.bf16.msra.mxu1 %v16583_v15  ;;  %v2643_v37 = vsel %vm2641_vm1, %v16612_v35, 0  ;;  %v2649_v38 = vsel %vm2641_vm1, %v16613_v36, 0  ;;  %v16619_v39 = vld [vmem:[%s23510_s3 + $0x4] ss:$16 sps:$4 sm:$0xff]   ;;  %v16622_v40 = vld [vmem:[%s23510_s3 + $0xc] ss:$16 sps:$4 sm:$0xff]  }
  0x8d   : > { %2662 = vmatprep.subr.bf16.mxu0 %v16584_v16  ;;  %3655 = vmatprep.subr.bf16.mxu1 %v16586_v17  ;;  %v16614_v41 = vld [vmem:[%s18342_s29] ss:$8 sps:$4 sm:$0xff]   ;;  %v16623_v44 = vld [vmem:[%s18342_s29 + $0x14] ss:$8 sps:$4 sm:$0xff]   ;;  %v16625_v49 = vld [vmem:[%s18342_s29 + $0x10] ss:$8 sps:$4 sm:$0xff]  }
  0x8e   : > { %v16617_v42 = vld [vmem:[%s23510_s3] ss:$16 sps:$4 sm:$0xff]   ;;  %v16620_v43 = vld [vmem:[%s23510_s3 + $0x8] ss:$16 sps:$4 sm:$0xff]   ;;  %v16643_v45 = vld [vmem:[%s23510_s3 + $0x24] ss:$16 sps:$4 sm:$0xff]  }
  0x8f   : > { %v16646_v46 = vld [vmem:[%s23510_s3 + $0x2c] ss:$16 sps:$4 sm:$0xff]   ;;  %v16641_v47 = vld [vmem:[%s23510_s3 + $0x20] ss:$16 sps:$4 sm:$0xff]   ;;  %v16644_v48 = vld [vmem:[%s23510_s3 + $0x28] ss:$16 sps:$4 sm:$0xff]  }
  0x90   : > { %2663 = vmatpush1.bf16.msra.mxu0 %v16588_v18  ;;  %3656 = vmatpush1.bf16.msra.mxu1 %v16589_v19  ;;  %v16626_v50 = vld [vmem:[%s18342_s29 + $0x24] ss:$8 sps:$4 sm:$0xff]   ;;  %v16665_v51 = vld [vmem:[%s23510_s3 + $0x40] ss:$16 sps:$4 sm:$0xff]   ;;  %v16668_v53 = vld [vmem:[%s23510_s3 + $0x48] ss:$16 sps:$4 sm:$0xff]  }
  0x91   : > { %2664 = vmatprep.subr.bf16.mxu0 %v16590_v20  ;;  %3657 = vmatprep.subr.bf16.mxu1 %v16592_v21  ;;  %v16667_v52 = vld [vmem:[%s23510_s3 + $0x44] ss:$16 sps:$4 sm:$0xff]   ;;  %v16670_v54 = vld [vmem:[%s23510_s3 + $0x4c] ss:$16 sps:$4 sm:$0xff]   ;;  %v16628_v55 = vld [vmem:[%s18342_s29 + $0x20] ss:$8 sps:$4 sm:$0xff]  }
  0x92   : > { %v16629_v56 = vld [vmem:[%s18342_s29 + $0x34] ss:$8 sps:$4 sm:$0xff]   ;;  %v16631_v57 = vld [vmem:[%s18342_s29 + $0x30] ss:$8 sps:$4 sm:$0xff]   ;;  %v16632_v60 = vld [vmem:[%s18342_s29 + $0x44] ss:$8 sps:$4 sm:$0xff]  }
  0x93   : > { %v16689_v58 = vld [vmem:[%s23510_s3 + $0x60] ss:$16 sps:$4 sm:$0xff]   ;;  %v16691_v59 = vld [vmem:[%s23510_s3 + $0x64] ss:$16 sps:$4 sm:$0xff]   ;;  %v16694_v61 = vld [vmem:[%s23510_s3 + $0x6c] ss:$16 sps:$4 sm:$0xff]  }
  0x94   : > { %2665 = vmatpush1.bf16.msra.mxu0 %v16594_v22  ;;  %3658 = vmatpush1.bf16.msra.mxu1 %v16595_v23  ;;  %v16692_v62 = vld [vmem:[%s23510_s3 + $0x68] ss:$16 sps:$4 sm:$0xff]   ;;  %v16635_v0 = vld [vmem:[%s18342_s29 + $0x54] ss:$8 sps:$4 sm:$0xff]   ;;  %v16638_v2 = vld [vmem:[%s18342_s29 + $0x64] ss:$8 sps:$4 sm:$0xff]  }
  0x95   : > { %2666 = vmatprep.subr.bf16.mxu0 %v16596_v24  ;;  %3659 = vmatprep.subr.bf16.mxu1 %v16598_v25  ;;  %v16634_v63 = vld [vmem:[%s18342_s29 + $0x40] ss:$8 sps:$4 sm:$0xff]   ;;  %v16637_v1 = vld [vmem:[%s18342_s29 + $0x50] ss:$8 sps:$4 sm:$0xff]   ;;  %v16647_v4 = vld [vmem:[%s18342_s29 + $0x74] ss:$8 sps:$4 sm:$0xff]  }
  0x96   : > { %v16640_v3 = vld [vmem:[%s18342_s29 + $0x60] ss:$8 sps:$4 sm:$0xff]   ;;  %v16649_v5 = vld [vmem:[%s18342_s29 + $0x70] ss:$8 sps:$4 sm:$0xff]   ;;  %v16650_v6 = vld [vmem:[%s18342_s29 + $0x84] ss:$8 sps:$4 sm:$0xff]  }
  0x97   : > { %v16652_v7 = vld [vmem:[%s18342_s29 + $0x80] ss:$8 sps:$4 sm:$0xff]   ;;  %v16653_v8 = vld [vmem:[%s18342_s29 + $0x94] ss:$8 sps:$4 sm:$0xff]   ;;  %v16655_v13 = vld [vmem:[%s18342_s29 + $0x90] ss:$8 sps:$4 sm:$0xff]  }
  0x98   : > { %2667 = vmatpush1.bf16.msra.mxu0 %v16600_v26  ;;  %3660 = vmatpush1.bf16.msra.mxu1 %v16601_v27  ;;  %v16713_v9 = vld [vmem:[%s23510_s3 + $0x80] ss:$16 sps:$4 sm:$0xff]   ;;  %v16715_v10 = vld [vmem:[%s23510_s3 + $0x84] ss:$16 sps:$4 sm:$0xff]   ;;  %v16716_v11 = vld [vmem:[%s23510_s3 + $0x88] ss:$16 sps:$4 sm:$0xff]  }
  0x99   : > { %2668 = vmatprep.subr.bf16.mxu0 %v16602_v28  ;;  %3661 = vmatprep.subr.bf16.mxu1 %v16604_v29  ;;  %v16718_v12 = vld [vmem:[%s23510_s3 + $0x8c] ss:$16 sps:$4 sm:$0xff]   ;;  %v16658_v15 = vld [vmem:[%s18342_s29 + $0xa0] ss:$8 sps:$4 sm:$0xff]   ;;  %v16661_v17 = vld [vmem:[%s18342_s29 + $0xb0] ss:$8 sps:$4 sm:$0xff]  }
  0x9a   : > { %v16656_v14 = vld [vmem:[%s18342_s29 + $0xa4] ss:$8 sps:$4 sm:$0xff]   ;;  %v16659_v16 = vld [vmem:[%s18342_s29 + $0xb4] ss:$8 sps:$4 sm:$0xff]   ;;  %v16664_v19 = vld [vmem:[%s18342_s29 + $0xc0] ss:$8 sps:$4 sm:$0xff]  }
  0x9b   : > { %v16662_v18 = vld [vmem:[%s18342_s29 + $0xc4] ss:$8 sps:$4 sm:$0xff]   ;;  %v16671_v20 = vld [vmem:[%s18342_s29 + $0xd4] ss:$8 sps:$4 sm:$0xff]   ;;  %v16673_v21 = vld [vmem:[%s18342_s29 + $0xd0] ss:$8 sps:$4 sm:$0xff]  }
  0x9c   : > { %2669 = vmatpush1.bf16.msra.mxu0 %v16606_v31  ;;  %3662 = vmatpush1.bf16.msra.mxu1 %v16607_v32  ;;  %v16674_v22 = vld [vmem:[%s18342_s29 + $0xe4] ss:$8 sps:$4 sm:$0xff]   ;;  %v16676_v23 = vld [vmem:[%s18342_s29 + $0xe0] ss:$8 sps:$4 sm:$0xff]   ;;  %v16677_v24 = vld [vmem:[%s18342_s29 + $0xf4] ss:$8 sps:$4 sm:$0xff]  }
  0x9d   : > { %14607 = vmatprep.subr.msk.bf16.mxu0 %vm2641_vm1, %v16608_v33  ;;  %14704 = vmatprep.subr.msk.bf16.mxu1 %vm2641_vm1, %v16610_v34  ;;  %v16737_v25 = vld [vmem:[%s23510_s3 + $0xa0] ss:$16 sps:$4 sm:$0xff]   ;;  %v16739_v26 = vld [vmem:[%s23510_s3 + $0xa4] ss:$16 sps:$4 sm:$0xff]   ;;  %v16740_v27 = vld [vmem:[%s23510_s3 + $0xa8] ss:$16 sps:$4 sm:$0xff]  }
  0x9e   : > { %v16742_v28 = vld [vmem:[%s23510_s3 + $0xac] ss:$16 sps:$4 sm:$0xff]   ;;  %v16679_v29 = vld [vmem:[%s18342_s29 + $0xf0] ss:$8 sps:$4 sm:$0xff]   ;;  %v16682_v31 = vld [vmem:[%s18342_s29 + $0x100] ss:$8 sps:$4 sm:$0xff]  }
  0x9f   : > { %v16680_v30 = vld [vmem:[%s18342_s29 + $0x104] ss:$8 sps:$4 sm:$0xff]   ;;  %v16683_v32 = vld [vmem:[%s18342_s29 + $0x114] ss:$8 sps:$4 sm:$0xff]   ;;  %v16685_v33 = vld [vmem:[%s18342_s29 + $0x110] ss:$8 sps:$4 sm:$0xff]  }
  0xa0   : > { %2671 = vmatpush1.bf16.msra.mxu0 %v2643_v37  ;;  %3664 = vmatpush1.bf16.msra.mxu1 %v2649_v38  ;;  %v16686_v34 = vld [vmem:[%s18342_s29 + $0x124] ss:$8 sps:$4 sm:$0xff]   ;;  %v16688_v35 = vld [vmem:[%s18342_s29 + $0x120] ss:$8 sps:$4 sm:$0xff]   ;;  %v16695_v36 = vld [vmem:[%s18342_s29 + $0x134] ss:$8 sps:$4 sm:$0xff]  }
  0xa1   : > { %8012 = vmatprep.subr.bf16.mxu0 %v16619_v39  ;;  %9777 = vmatprep.subr.bf16.mxu1 %v16622_v40  ;;  %v16697_v37 = vld [vmem:[%s18342_s29 + $0x130] ss:$8 sps:$4 sm:$0xff]   ;;  %v16698_v38 = vld [vmem:[%s18342_s29 + $0x144] ss:$8 sps:$4 sm:$0xff]   ;;  %v16700_v39 = vld [vmem:[%s18342_s29 + $0x140] ss:$8 sps:$4 sm:$0xff]  }
  0xa2   : > { %v16701_v40 = vld [vmem:[%s18342_s29 + $0x154] ss:$8 sps:$4 sm:$0xff]   ;;  %p1077_p8 = scmp.lt.s32.totalorder %s14376_s15, 15 }
  0xa3   : > { %2687 = vmatmul.mubr.bf16.vlgmr.msra.gmra.mrb[0].mxu0 %v16614_v41  ;;  %3680 = vmatmul.mubr.bf16.vlgmr.msra.gmra.mrb[0].mxu1 %v16614_v41  ;;  %v16761_v41 = vld [vmem:[%s23510_s3 + $0xc0] ss:$16 sps:$4 sm:$0xff]  }
  0xa4   : > { %8013 = vmatpush1.bf16.msra.mxu0 %v16617_v42  ;;  %9778 = vmatpush1.bf16.msra.mxu1 %v16620_v43  ;;  %v16763_v42 = vld [vmem:[%s23510_s3 + $0xc4] ss:$16 sps:$4 sm:$0xff]   ;;  %v16764_v43 = vld [vmem:[%s23510_s3 + $0xc8] ss:$16 sps:$4 sm:$0xff]   ;;  %s24427_s15 = smov (!%p1077_p8, %s14376_s15), 15 }
  0xa5   : > { %14609 = vmatprep.mubr.msk.bf16.mxu0 %vm2352_vm0, %v16623_v44  ;;  %14706 = vmatprep.mubr.msk.bf16.mxu1 %vm2352_vm0, %v16623_v44  ;;  %v16766_v44 = vld [vmem:[%s23510_s3 + $0xcc] ss:$16 sps:$4 sm:$0xff]   ;;  %s15381_s26 = sshll.u32 %s24427_s15, 5 }
  0xa6   : > { %8014 = vmatprep.subr.bf16.mxu0 %v16643_v45  ;;  %9779 = vmatprep.subr.bf16.mxu1 %v16646_v46  ;;  %v16703_v45 = vld [vmem:[%s18342_s29 + $0x150] ss:$8 sps:$4 sm:$0xff]   ;;  %v16704_v46 = vld [vmem:[%s18342_s29 + $0x164] ss:$8 sps:$4 sm:$0xff]  }
  0xa8   : > { %8015 = vmatpush1.bf16.msra.mxu0 %v16641_v47  ;;  %9780 = vmatpush1.bf16.msra.mxu1 %v16644_v48  ;;  %v16706_v47 = vld [vmem:[%s18342_s29 + $0x160] ss:$8 sps:$4 sm:$0xff]   ;;  %v16707_v48 = vld [vmem:[%s18342_s29 + $0x174] ss:$8 sps:$4 sm:$0xff]  }
  0xa9   : > { %8016 = vmatprep.subr.bf16.mxu0 %v16667_v52  ;;  %9781 = vmatprep.subr.bf16.mxu1 %v16670_v54  ;;  %v16719_v52 = vld [vmem:[%s18342_s29 + $0x194] ss:$8 sps:$4 sm:$0xff]   ;;  %v16722_v54 = vld [vmem:[%s18342_s29 + $0x1a4] ss:$8 sps:$4 sm:$0xff]  }
  0xab   : > { %2697 = vmatmul.mubr.bf16.gmra.mrb[4].mxu0 %v16625_v49  ;;  %3690 = vmatmul.mubr.bf16.gmra.mrb[4].mxu1 %v16625_v49  ;;  %v16709_v49 = vld [vmem:[%s18342_s29 + $0x170] ss:$8 sps:$4 sm:$0xff]  }
  0xac   : > { %14610 = vmatprep.mubr.msk.bf16.mxu0 %vm2352_vm0, %v16626_v50  ;;  %14707 = vmatprep.mubr.msk.bf16.mxu1 %vm2352_vm0, %v16626_v50  ;;  %v16710_v50 = vld [vmem:[%s18342_s29 + $0x184] ss:$8 sps:$4 sm:$0xff]  }
  0xad   : > { %8017 = vmatpush1.bf16.msra.mxu0 %v16665_v51  ;;  %9782 = vmatpush1.bf16.msra.mxu1 %v16668_v53  ;;  %v16712_v51 = vld [vmem:[%s18342_s29 + $0x180] ss:$8 sps:$4 sm:$0xff]   ;;  %v16721_v53 = vld [vmem:[%s18342_s29 + $0x190] ss:$8 sps:$4 sm:$0xff]  }
  0xae   : > { %8018 = vmatprep.subr.bf16.mxu0 %v16691_v59  ;;  %9783 = vmatprep.subr.bf16.mxu1 %v16694_v61  ;;  %v16788_v59 = vld [vmem:[%s23510_s3 + $0xe8] ss:$16 sps:$4 sm:$0xff]  }
  0xaf   : > { %v16727_v61 = vld [vmem:[%s18342_s29 + $0x1b0] ss:$8 sps:$4 sm:$0xff]  }
  0xb1   : > { %8019 = vmatpush1.bf16.msra.mxu0 %v16689_v58  ;;  %9784 = vmatpush1.bf16.msra.mxu1 %v16692_v62  ;;  %v16787_v58 = vld [vmem:[%s23510_s3 + $0xe4] ss:$16 sps:$4 sm:$0xff]  }
  0xb2   : > { %8020 = vmatprep.subr.bf16.mxu0 %v16715_v10  ;;  %9785 = vmatprep.subr.bf16.mxu1 %v16718_v12 }
  0xb3   : > { %2707 = vmatmul.mubr.bf16.gmra.mrb[8].mxu0 %v16628_v55  ;;  %3700 = vmatmul.mubr.bf16.gmra.mrb[8].mxu1 %v16628_v55  ;;  %v16724_v55 = vld [vmem:[%s18342_s29 + $0x1a0] ss:$8 sps:$4 sm:$0xff]  }
  0xb4   : > { %14611 = vmatprep.mubr.msk.bf16.mxu0 %vm2352_vm0, %v16629_v56  ;;  %14708 = vmatprep.mubr.msk.bf16.mxu1 %vm2352_vm0, %v16629_v56  ;;  %v16725_v56 = vld [vmem:[%s18342_s29 + $0x1b4] ss:$8 sps:$4 sm:$0xff]  }
  0xb5   : > { %8021 = vmatpush1.bf16.msra.mxu0 %v16713_v9  ;;  %9786 = vmatpush1.bf16.msra.mxu1 %v16716_v11 }
  0xb6   : > { %8022 = vmatprep.subr.bf16.mxu0 %v16739_v26  ;;  %9787 = vmatprep.subr.bf16.mxu1 %v16742_v28 }
  0xb9   : > { %8023 = vmatpush1.bf16.msra.mxu0 %v16737_v25  ;;  %9788 = vmatpush1.bf16.msra.mxu1 %v16740_v27  ;;  %v16736_v27 = vld [vmem:[%s18342_s29 + $0x1e0] ss:$8 sps:$4 sm:$0xff]  }
  0xba   : > { %8024 = vmatprep.subr.bf16.mxu0 %v16763_v42  ;;  %9789 = vmatprep.subr.bf16.mxu1 %v16766_v44  ;;  %v16746_v44 = vld [vmem:[%s18342_s29 + $0x204] ss:$8 sps:$4 sm:$0xff]  }
  0xbb   : > { %2717 = vmatmul.mubr.bf16.gmra.mrb[12].mxu0 %v16631_v57  ;;  %3710 = vmatmul.mubr.bf16.gmra.mrb[12].mxu1 %v16631_v57  ;;  %v16785_v57 = vld [vmem:[%s23510_s3 + $0xe0] ss:$16 sps:$4 sm:$0xff]  }
  0xbc   : > { %14612 = vmatprep.mubr.msk.bf16.mxu0 %vm2352_vm0, %v16632_v60  ;;  %14709 = vmatprep.mubr.msk.bf16.mxu1 %vm2352_vm0, %v16632_v60  ;;  %v16790_v60 = vld [vmem:[%s23510_s3 + $0xec] ss:$16 sps:$4 sm:$0xff]  }
  0xbd   : > { %8025 = vmatpush1.bf16.msra.mxu0 %v16761_v41  ;;  %9790 = vmatpush1.bf16.msra.mxu1 %v16764_v43 }
  0xbe   : > { %8026 = vmatprep.subr.bf16.mxu0 %v16787_v58  ;;  %9791 = vmatprep.subr.bf16.mxu1 %v16790_v60  ;;  %v16811_v58 = vld [vmem:[%s23510_s3 + $0x104] ss:$16 sps:$4 sm:$0xff]   ;;  %v16814_v60 = vld [vmem:[%s23510_s3 + $0x10c] ss:$16 sps:$4 sm:$0xff]  }
  0xc1   : > { %8027 = vmatpush1.bf16.msra.mxu0 %v16785_v57  ;;  %9792 = vmatpush1.bf16.msra.mxu1 %v16788_v59  ;;  %v16809_v57 = vld [vmem:[%s23510_s3 + $0x100] ss:$16 sps:$4 sm:$0xff]   ;;  %v16812_v59 = vld [vmem:[%s23510_s3 + $0x108] ss:$16 sps:$4 sm:$0xff]  }
  0xc2   : > { %8028 = vmatprep.subr.bf16.mxu0 %v16811_v58  ;;  %9793 = vmatprep.subr.bf16.mxu1 %v16814_v60 }
  0xc3   : > { %2727 = vmatmul.mubr.bf16.gmra.mrb[16].mxu0 %v16634_v63  ;;  %3720 = vmatmul.mubr.bf16.gmra.mrb[16].mxu1 %v16634_v63 }
  0xc4   : > { %14613 = vmatprep.mubr.msk.bf16.mxu0 %vm2352_vm0, %v16635_v0  ;;  %14710 = vmatprep.mubr.msk.bf16.mxu1 %vm2352_vm0, %v16635_v0 }
  0xc5   : > { %8029 = vmatpush1.bf16.msra.mxu0 %v16809_v57  ;;  %9794 = vmatpush1.bf16.msra.mxu1 %v16812_v59 }
  0xcb   : > { %2737 = vmatmul.mubr.bf16.gmra.mrb[20].mxu0 %v16637_v1  ;;  %3730 = vmatmul.mubr.bf16.gmra.mrb[20].mxu1 %v16637_v1 }
  0xcc   : > { %14614 = vmatprep.mubr.msk.bf16.mxu0 %vm2352_vm0, %v16638_v2  ;;  %14711 = vmatprep.mubr.msk.bf16.mxu1 %vm2352_vm0, %v16638_v2 }
  0xd3   : > { %2747 = vmatmul.mubr.bf16.gmra.mrb[24].mxu0 %v16640_v3  ;;  %3740 = vmatmul.mubr.bf16.gmra.mrb[24].mxu1 %v16640_v3 }
  0xd4   : > { %14615 = vmatprep.mubr.msk.bf16.mxu0 %vm2352_vm0, %v16647_v4  ;;  %14712 = vmatprep.mubr.msk.bf16.mxu1 %vm2352_vm0, %v16647_v4  ;;  %v16728_v4 = vld [vmem:[%s18342_s29 + $0x1c4] ss:$8 sps:$4 sm:$0xff]  }
  0xdb   : > { %2757 = vmatmul.mubr.bf16.gmra.mrb[28].mxu0 %v16649_v5  ;;  %3750 = vmatmul.mubr.bf16.gmra.mrb[28].mxu1 %v16649_v5 }
  0xdc   : > { %14616 = vmatprep.mubr.msk.bf16.mxu0 %vm2352_vm0, %v16650_v6  ;;  %14713 = vmatprep.mubr.msk.bf16.mxu1 %vm2352_vm0, %v16650_v6 }
  0xe3   : > { %2767 = vmatmul.mubr.bf16.gmra.mrb[32].mxu0 %v16652_v7  ;;  %3760 = vmatmul.mubr.bf16.gmra.mrb[32].mxu1 %v16652_v7  ;;  %v16730_v7 = vld [vmem:[%s18342_s29 + $0x1c0] ss:$8 sps:$4 sm:$0xff]  }
  0xe4   : > { %14617 = vmatprep.mubr.msk.bf16.mxu0 %vm2352_vm0, %v16653_v8  ;;  %14714 = vmatprep.mubr.msk.bf16.mxu1 %vm2352_vm0, %v16653_v8 }
  0xeb   : > { %2777 = vmatmul.mubr.bf16.gmra.mrb[36].mxu0 %v16655_v13  ;;  %3770 = vmatmul.mubr.bf16.gmra.mrb[36].mxu1 %v16655_v13 }
  0xec   : > { %14618 = vmatprep.mubr.msk.bf16.mxu0 %vm2352_vm0, %v16656_v14  ;;  %14715 = vmatprep.mubr.msk.bf16.mxu1 %vm2352_vm0, %v16656_v14  ;;  %v16731_v14 = vld [vmem:[%s18342_s29 + $0x1d4] ss:$8 sps:$4 sm:$0xff]  }
  0xf3   : > { %2787 = vmatmul.mubr.bf16.gmra.mrb[40].mxu0 %v16658_v15  ;;  %3780 = vmatmul.mubr.bf16.gmra.mrb[40].mxu1 %v16658_v15 }
  0xf4   : > { %14619 = vmatprep.mubr.msk.bf16.mxu0 %vm2352_vm0, %v16659_v16  ;;  %14716 = vmatprep.mubr.msk.bf16.mxu1 %vm2352_vm0, %v16659_v16 }
  0xfb   : > { %2797 = vmatmul.mubr.bf16.gmra.mrb[44].mxu0 %v16661_v17  ;;  %3790 = vmatmul.mubr.bf16.gmra.mrb[44].mxu1 %v16661_v17  ;;  %v16733_v17 = vld [vmem:[%s18342_s29 + $0x1d0] ss:$8 sps:$4 sm:$0xff]  }
  0xfc   : > { %14620 = vmatprep.mubr.msk.bf16.mxu0 %vm2352_vm0, %v16662_v18  ;;  %14717 = vmatprep.mubr.msk.bf16.mxu1 %vm2352_vm0, %v16662_v18 }
 0x103   : > { %2807 = vmatmul.mubr.bf16.gmra.mrb[48].mxu0 %v16664_v19  ;;  %3800 = vmatmul.mubr.bf16.gmra.mrb[48].mxu1 %v16664_v19 }
 0x104   : > { %14621 = vmatprep.mubr.msk.bf16.mxu0 %vm2352_vm0, %v16671_v20  ;;  %14718 = vmatprep.mubr.msk.bf16.mxu1 %vm2352_vm0, %v16671_v20 }
 0x10b   : > { %2817 = vmatmul.mubr.bf16.gmra.mrb[52].mxu0 %v16673_v21  ;;  %3810 = vmatmul.mubr.bf16.gmra.mrb[52].mxu1 %v16673_v21 }
 0x10c   : > { %14622 = vmatprep.mubr.msk.bf16.mxu0 %vm2352_vm0, %v16674_v22  ;;  %14719 = vmatprep.mubr.msk.bf16.mxu1 %vm2352_vm0, %v16674_v22 }
 0x113   : > { %2827 = vmatmul.mubr.bf16.gmra.mrb[56].mxu0 %v16676_v23  ;;  %3820 = vmatmul.mubr.bf16.gmra.mrb[56].mxu1 %v16676_v23 }
 0x114   : > { %14623 = vmatprep.mubr.msk.bf16.mxu0 %vm2352_vm0, %v16677_v24  ;;  %14720 = vmatprep.mubr.msk.bf16.mxu1 %vm2352_vm0, %v16677_v24  ;;  %v16734_v24 = vld [vmem:[%s18342_s29 + $0x1e4] ss:$8 sps:$4 sm:$0xff]  }
 0x11b   : > { %2837 = vmatmul.mubr.bf16.gmra.mrb[60].mxu0 %v16679_v29  ;;  %3830 = vmatmul.mubr.bf16.gmra.mrb[60].mxu1 %v16679_v29 }
 0x11c   : > { %14624 = vmatprep.mubr.msk.bf16.mxu0 %vm2352_vm0, %v16680_v30  ;;  %14721 = vmatprep.mubr.msk.bf16.mxu1 %vm2352_vm0, %v16680_v30 }
 0x123   : > { %2847 = vmatmul.mubr.bf16.gmra.mrb[64].mxu0 %v16682_v31  ;;  %3840 = vmatmul.mubr.bf16.gmra.mrb[64].mxu1 %v16682_v31 }
 0x124   : > { %14625 = vmatprep.mubr.msk.bf16.mxu0 %vm2352_vm0, %v16683_v32  ;;  %14722 = vmatprep.mubr.msk.bf16.mxu1 %vm2352_vm0, %v16683_v32 }
 0x12b   : > { %2857 = vmatmul.mubr.bf16.gmra.mrb[68].mxu0 %v16685_v33  ;;  %3850 = vmatmul.mubr.bf16.gmra.mrb[68].mxu1 %v16685_v33 }
 0x12c   : > { %14626 = vmatprep.mubr.msk.bf16.mxu0 %vm2352_vm0, %v16686_v34  ;;  %14723 = vmatprep.mubr.msk.bf16.mxu1 %vm2352_vm0, %v16686_v34  ;;  %v16743_v34 = vld [vmem:[%s18342_s29 + $0x1f4] ss:$8 sps:$4 sm:$0xff]  }
 0x133   : > { %2867 = vmatmul.mubr.bf16.gmra.mrb[72].mxu0 %v16688_v35  ;;  %3860 = vmatmul.mubr.bf16.gmra.mrb[72].mxu1 %v16688_v35 }
 0x134   : > { %14627 = vmatprep.mubr.msk.bf16.mxu0 %vm2352_vm0, %v16695_v36  ;;  %14724 = vmatprep.mubr.msk.bf16.mxu1 %vm2352_vm0, %v16695_v36 }
 0x13b   : > { %2877 = vmatmul.mubr.bf16.gmra.mrb[76].mxu0 %v16697_v37  ;;  %3870 = vmatmul.mubr.bf16.gmra.mrb[76].mxu1 %v16697_v37  ;;  %v16745_v37 = vld [vmem:[%s18342_s29 + $0x1f0] ss:$8 sps:$4 sm:$0xff]  }
 0x13c   : > { %14628 = vmatprep.mubr.msk.bf16.mxu0 %vm2352_vm0, %v16698_v38  ;;  %14725 = vmatprep.mubr.msk.bf16.mxu1 %vm2352_vm0, %v16698_v38 }
 0x143   : > { %2887 = vmatmul.mubr.bf16.gmra.mrb[80].mxu0 %v16700_v39  ;;  %3880 = vmatmul.mubr.bf16.gmra.mrb[80].mxu1 %v16700_v39 }
 0x144   : > { %14629 = vmatprep.mubr.msk.bf16.mxu0 %vm2352_vm0, %v16701_v40  ;;  %14726 = vmatprep.mubr.msk.bf16.mxu1 %vm2352_vm0, %v16701_v40 }
 0x14b   : > { %2897 = vmatmul.mubr.bf16.gmra.mrb[84].mxu0 %v16703_v45  ;;  %3890 = vmatmul.mubr.bf16.gmra.mrb[84].mxu1 %v16703_v45 }
 0x14c   : > { %14630 = vmatprep.mubr.msk.bf16.mxu0 %vm2352_vm0, %v16704_v46  ;;  %14727 = vmatprep.mubr.msk.bf16.mxu1 %vm2352_vm0, %v16704_v46 }
 0x153   : > { %2907 = vmatmul.mubr.bf16.gmra.mrb[88].mxu0 %v16706_v47  ;;  %3900 = vmatmul.mubr.bf16.gmra.mrb[88].mxu1 %v16706_v47  ;;  %v16748_v47 = vld [vmem:[%s18342_s29 + $0x200] ss:$8 sps:$4 sm:$0xff]  }
 0x154   : > { %14631 = vmatprep.mubr.msk.bf16.mxu0 %vm2352_vm0, %v16707_v48  ;;  %14728 = vmatprep.mubr.msk.bf16.mxu1 %vm2352_vm0, %v16707_v48 }
 0x15b   : > { %2917 = vmatmul.mubr.bf16.gmra.mrb[92].mxu0 %v16709_v49  ;;  %3910 = vmatmul.mubr.bf16.gmra.mrb[92].mxu1 %v16709_v49 }
 0x15c   : > { %14632 = vmatprep.mubr.msk.bf16.mxu0 %vm2352_vm0, %v16710_v50  ;;  %14729 = vmatprep.mubr.msk.bf16.mxu1 %vm2352_vm0, %v16710_v50 }
 0x163   : > { %2927 = vmatmul.mubr.bf16.gmra.mrb[96].mxu0 %v16712_v51  ;;  %3920 = vmatmul.mubr.bf16.gmra.mrb[96].mxu1 %v16712_v51 }
 0x164   : > { %14633 = vmatprep.mubr.msk.bf16.mxu0 %vm2352_vm0, %v16719_v52  ;;  %14730 = vmatprep.mubr.msk.bf16.mxu1 %vm2352_vm0, %v16719_v52 }
 0x16b   : > { %2937 = vmatmul.mubr.bf16.gmra.mrb[100].mxu0 %v16721_v53  ;;  %3930 = vmatmul.mubr.bf16.gmra.mrb[100].mxu1 %v16721_v53 }
 0x16c   : > { %14634 = vmatprep.mubr.msk.bf16.mxu0 %vm2352_vm0, %v16722_v54  ;;  %14731 = vmatprep.mubr.msk.bf16.mxu1 %vm2352_vm0, %v16722_v54  ;;  %v16749_v54 = vld [vmem:[%s18342_s29 + $0x214] ss:$8 sps:$4 sm:$0xff]  }
 0x173   : > { %2947 = vmatmul.mubr.bf16.gmra.mrb[104].mxu0 %v16724_v55  ;;  %3940 = vmatmul.mubr.bf16.gmra.mrb[104].mxu1 %v16724_v55 }
 0x174   : > { %14635 = vmatprep.mubr.msk.bf16.mxu0 %vm2352_vm0, %v16725_v56  ;;  %14732 = vmatprep.mubr.msk.bf16.mxu1 %vm2352_vm0, %v16725_v56 }
 0x176   : > { %v18573_v62 = vpop.f32.mrb[0].mxu0  ;;  %v18575_v63 = vpop.f32.mrb[0].mxu1 }
 0x177   : > { %v18577_v0 = vpop.f32.mrb[1].mxu0  ;;  %v18579_v1 = vpop.f32.mrb[1].mxu1 }
 0x178   : > { %v18581_v2 = vpop.f32.mrb[2].mxu0  ;;  %v18583_v3 = vpop.f32.mrb[2].mxu1 }
 0x179   : > { %v18586_v5 = vpop.f32.mrb[3].mxu0  ;;  %v18588_v6 = vpop.f32.mrb[3].mxu1 }
 0x17b   : > { %2957 = vmatmul.mubr.bf16.gmra.mrb[108].mxu0 %v16727_v61  ;;  %3950 = vmatmul.mubr.bf16.gmra.mrb[108].mxu1 %v16727_v61  ;;  %v16751_v61 = vld [vmem:[%s18342_s29 + $0x210] ss:$8 sps:$4 sm:$0xff]  }
 0x17c   : > { %14636 = vmatprep.mubr.msk.bf16.mxu0 %vm2352_vm0, %v16728_v4  ;;  %14733 = vmatprep.mubr.msk.bf16.mxu1 %vm2352_vm0, %v16728_v4 }
 0x17e   : > { %v18593_v8 = vpop.f32.mrb[4].mxu0  ;;  %v18595_v9 = vpop.f32.mrb[4].mxu1 }
 0x17f   : > { %v18597_v10 = vpop.f32.mrb[5].mxu0  ;;  %v18599_v11 = vpop.f32.mrb[5].mxu1 }
 0x180   : > { %v18601_v12 = vpop.f32.mrb[6].mxu0  ;;  %v18603_v13 = vpop.f32.mrb[6].mxu1 }
 0x181   : > { %v18606_v15 = vpop.f32.mrb[7].mxu0  ;;  %v18608_v16 = vpop.f32.mrb[7].mxu1 }
 0x183   : > { %2967 = vmatmul.mubr.bf16.gmra.mrb[112].mxu0 %v16730_v7  ;;  %3960 = vmatmul.mubr.bf16.gmra.mrb[112].mxu1 %v16730_v7 }
 0x184   : > { %14637 = vmatprep.mubr.msk.bf16.mxu0 %vm2352_vm0, %v16731_v14  ;;  %14734 = vmatprep.mubr.msk.bf16.mxu1 %vm2352_vm0, %v16731_v14 }
 0x186   : > { %v18613_v18 = vpop.f32.mrb[8].mxu0  ;;  %v18615_v19 = vpop.f32.mrb[8].mxu1 }
 0x187   : > { %v18617_v20 = vpop.f32.mrb[9].mxu0  ;;  %v18619_v21 = vpop.f32.mrb[9].mxu1 }
 0x188   : > { %v18621_v22 = vpop.f32.mrb[10].mxu0  ;;  %v18623_v23 = vpop.f32.mrb[10].mxu1 }
 0x189   : > { %v18626_v25 = vpop.f32.mrb[11].mxu0  ;;  %v18628_v26 = vpop.f32.mrb[11].mxu1 }
 0x18b   : > { %2977 = vmatmul.mubr.bf16.gmra.mrb[116].mxu0 %v16733_v17  ;;  %3970 = vmatmul.mubr.bf16.gmra.mrb[116].mxu1 %v16733_v17 }
 0x18c   : > { %14638 = vmatprep.mubr.msk.bf16.mxu0 %vm2352_vm0, %v16734_v24  ;;  %14735 = vmatprep.mubr.msk.bf16.mxu1 %vm2352_vm0, %v16734_v24 }
 0x18e   : > { %v18633_v28 = vpop.f32.mrb[12].mxu0  ;;  %v18635_v29 = vpop.f32.mrb[12].mxu1 }
 0x18f   : > { %v18637_v30 = vpop.f32.mrb[13].mxu0  ;;  %v18639_v31 = vpop.f32.mrb[13].mxu1 }
 0x190   : > { %v18641_v32 = vpop.f32.mrb[14].mxu0  ;;  %v18643_v33 = vpop.f32.mrb[14].mxu1 }
 0x191   : > { %v18646_v35 = vpop.f32.mrb[15].mxu0  ;;  %v18648_v36 = vpop.f32.mrb[15].mxu1 }
 0x193   : > { %2987 = vmatmul.mubr.bf16.gmra.mrb[120].mxu0 %v16736_v27  ;;  %3980 = vmatmul.mubr.bf16.gmra.mrb[120].mxu1 %v16736_v27 }
 0x194   : > { %14639 = vmatprep.mubr.msk.bf16.mxu0 %vm2352_vm0, %v16743_v34  ;;  %14736 = vmatprep.mubr.msk.bf16.mxu1 %vm2352_vm0, %v16743_v34  ;;  %v16752_v34 = vld [vmem:[%s18342_s29 + $0x224] ss:$8 sps:$4 sm:$0xff]  }
 0x196   : > { %v18653_v38 = vpop.f32.mrb[16].mxu0  ;;  %v18655_v39 = vpop.f32.mrb[16].mxu1 }
 0x197   : > { %v18657_v40 = vpop.f32.mrb[17].mxu0  ;;  %v18659_v41 = vpop.f32.mrb[17].mxu1 }
 0x198   : > { %v18661_v42 = vpop.f32.mrb[18].mxu0  ;;  %v18663_v43 = vpop.f32.mrb[18].mxu1 }
 0x199   : > { %v18666_v45 = vpop.f32.mrb[19].mxu0  ;;  %v18668_v46 = vpop.f32.mrb[19].mxu1 }
 0x19b   : > { %2997 = vmatmul.mubr.bf16.gmra.mrb[124].mxu0 %v16745_v37  ;;  %3990 = vmatmul.mubr.bf16.gmra.mrb[124].mxu1 %v16745_v37 }
 0x19c   : > { %14640 = vmatprep.mubr.msk.bf16.mxu0 %vm2352_vm0, %v16746_v44  ;;  %14737 = vmatprep.mubr.msk.bf16.mxu1 %vm2352_vm0, %v16746_v44 }
 0x19e   : > { %v18673_v48 = vpop.f32.mrb[20].mxu0  ;;  %v18675_v49 = vpop.f32.mrb[20].mxu1 }
 0x19f   : > { %v18677_v50 = vpop.f32.mrb[21].mxu0  ;;  %v18679_v51 = vpop.f32.mrb[21].mxu1 }
 0x1a0   : > { %v18681_v52 = vpop.f32.mrb[22].mxu0  ;;  %v18683_v53 = vpop.f32.mrb[22].mxu1 }
 0x1a1   : > { %23603 = vst [vmem:[#allocation3_spill] sm:$0xff] %v18681_v52  ;;  %23604 = vst [vmem:[#allocation4_spill] sm:$0xff] %v18683_v53  ;;  %v18686_v55 = vpop.f32.mrb[23].mxu0  ;;  %v18688_v56 = vpop.f32.mrb[23].mxu1 }
 0x1a2   : > { %23605 = vst [vmem:[#allocation5_spill] sm:$0xff] %v18686_v55  ;;  %23606 = vst [vmem:[#allocation6_spill] sm:$0xff] %v18688_v56 }
 0x1a3   : > { %3007 = vmatmul.mubr.bf16.gmra.mrb[128].mxu0 %v16748_v47  ;;  %4000 = vmatmul.mubr.bf16.gmra.mrb[128].mxu1 %v16748_v47  ;;  %v16754_v47 = vld [vmem:[%s18342_s29 + $0x220] ss:$8 sps:$4 sm:$0xff]  }
 0x1a4   : > { %14641 = vmatprep.mubr.msk.bf16.mxu0 %vm2352_vm0, %v16749_v54  ;;  %14738 = vmatprep.mubr.msk.bf16.mxu1 %vm2352_vm0, %v16749_v54 }
 0x1a6   : > { %v18705_v4 = vpop.f32.mrb[24].mxu0  ;;  %v18707_v7 = vpop.f32.mrb[24].mxu1 }
 0x1a7   : > { %23607 = vst [vmem:[#allocation7_spill] sm:$0xff] %v18705_v4  ;;  %23608 = vst [vmem:[#allocation8_spill] sm:$0xff] %v18707_v7  ;;  %v18709_v14 = vpop.f32.mrb[25].mxu0  ;;  %v18711_v17 = vpop.f32.mrb[25].mxu1  ;;  %v16922_v4 = vld [vmem:[%s18342_s29 + $0x4c4] ss:$8 sps:$4 sm:$0xff]  }
 0x1a8   : > { %23609 = vst [vmem:[#allocation9_spill] sm:$0xff] %v18709_v14  ;;  %23610 = vst [vmem:[#allocation10_spill] sm:$0xff] %v18711_v17  ;;  %v18713_v24 = vpop.f32.mrb[26].mxu0  ;;  %v18715_v27 = vpop.f32.mrb[26].mxu1  ;;  %v16917_v17 = vld [vmem:[%s18342_s29 + $0x4b0] ss:$8 sps:$4 sm:$0xff]  }
 0x1a9   : > { %23611 = vst [vmem:[#allocation11_spill] sm:$0xff] %v18713_v24  ;;  %23612 = vst [vmem:[#allocation12_spill] sm:$0xff] %v18715_v27  ;;  %v18718_v37 = vpop.f32.mrb[27].mxu0  ;;  %v18720_v44 = vpop.f32.mrb[27].mxu1  ;;  %v16776_v24 = vld [vmem:[%s18342_s29 + $0x284] ss:$8 sps:$4 sm:$0xff]  }
 0x1aa   : > { %23613 = vst [vmem:[#allocation13_spill] sm:$0xff] %v18718_v37  ;;  %23614 = vst [vmem:[#allocation14_spill] sm:$0xff] %v18720_v44 }
 0x1ab   : > { %3017 = vmatmul.mubr.bf16.gmra.mrb[132].mxu0 %v16751_v61  ;;  %4010 = vmatmul.mubr.bf16.gmra.mrb[132].mxu1 %v16751_v61  ;;  %v16755_v61 = vld [vmem:[%s18342_s29 + $0x234] ss:$8 sps:$4 sm:$0xff]  }
 0x1ac   : > { %14642 = vmatprep.mubr.msk.bf16.mxu0 %vm2352_vm0, %v16752_v34  ;;  %14739 = vmatprep.mubr.msk.bf16.mxu1 %vm2352_vm0, %v16752_v34  ;;  %v16757_v34 = vld [vmem:[%s18342_s29 + $0x230] ss:$8 sps:$4 sm:$0xff]  }
 0x1ae   : > { %v18725_v54 = vpop.f32.mrb[28].mxu0  ;;  %v18727_v57 = vpop.f32.mrb[28].mxu1 }
 0x1af   : > { %23615 = vst [vmem:[#allocation15_spill] sm:$0xff] %v18725_v54  ;;  %23616 = vst [vmem:[#allocation16_spill] sm:$0xff] %v18727_v57  ;;  %v18729_v58 = vpop.f32.mrb[29].mxu0  ;;  %v18731_v59 = vpop.f32.mrb[29].mxu1 }
 0x1b0   : > { %23617 = vst [vmem:[#allocation17_spill] sm:$0xff] %v18729_v58  ;;  %23618 = vst [vmem:[#allocation18_spill] sm:$0xff] %v18731_v59  ;;  %v18733_v60 = vpop.f32.mrb[30].mxu0  ;;  %v18735_v44 = vpop.f32.mrb[30].mxu1 }
 0x1b1   : > { %23619 = vst [vmem:[#allocation19_spill] sm:$0xff] %v18733_v60  ;;  %23620 = vst [vmem:[#allocation20_spill] sm:$0xff] %v18735_v44  ;;  %v18738_v37 = vpop.f32.mrb[31].mxu0  ;;  %v18740_v27 = vpop.f32.mrb[31].mxu1 }
 0x1b2   : > { %23621 = vst [vmem:[#allocation21_spill] sm:$0xff] %v18738_v37  ;;  %23622 = vst [vmem:[#allocation22_spill] sm:$0xff] %v18740_v27 }
 0x1b3   : > { %3027 = vmatmul.mubr.bf16.gmra.mrb[136].mxu0 %v16754_v47  ;;  %4020 = vmatmul.mubr.bf16.gmra.mrb[136].mxu1 %v16754_v47  ;;  %v16758_v47 = vld [vmem:[%s18342_s29 + $0x244] ss:$8 sps:$4 sm:$0xff]  }
 0x1b4   : > { %14643 = vmatprep.mubr.msk.bf16.mxu0 %vm2352_vm0, %v16755_v61  ;;  %14740 = vmatprep.mubr.msk.bf16.mxu1 %vm2352_vm0, %v16755_v61  ;;  %v16760_v61 = vld [vmem:[%s18342_s29 + $0x240] ss:$8 sps:$4 sm:$0xff]  }
 0x1b6   : > { %v18745_v58 = vpop.f32.mrb[32].mxu0  ;;  %v18747_v59 = vpop.f32.mrb[32].mxu1 }
 0x1b7   : > { %23623 = vst [vmem:[#allocation23_spill] sm:$0xff] %v18745_v58  ;;  %23624 = vst [vmem:[#allocation24_spill] sm:$0xff] %v18747_v59  ;;  %v18749_v60 = vpop.f32.mrb[33].mxu0  ;;  %v18751_v44 = vpop.f32.mrb[33].mxu1 }
 0x1b8   : > { %23625 = vst [vmem:[#allocation25_spill] sm:$0xff] %v18749_v60  ;;  %23626 = vst [vmem:[#allocation26_spill] sm:$0xff] %v18751_v44  ;;  %v18753_v57 = vpop.f32.mrb[34].mxu0  ;;  %v18755_v27 = vpop.f32.mrb[34].mxu1 }
 0x1b9   : > { %23627 = vst [vmem:[#allocation27_spill] sm:$0xff] %v18753_v57  ;;  %23628 = vst [vmem:[#allocation28_spill] sm:$0xff] %v18755_v27  ;;  %v18758_v37 = vpop.f32.mrb[35].mxu0  ;;  %v18760_v54 = vpop.f32.mrb[35].mxu1 }
 0x1ba   : > { %23629 = vst [vmem:[#allocation29_spill] sm:$0xff] %v18758_v37  ;;  %23630 = vst [vmem:[#allocation30_spill] sm:$0xff] %v18760_v54 }
 0x1bb   : > { %3037 = vmatmul.mubr.bf16.gmra.mrb[140].mxu0 %v16757_v34  ;;  %4030 = vmatmul.mubr.bf16.gmra.mrb[140].mxu1 %v16757_v34  ;;  %v16767_v34 = vld [vmem:[%s18342_s29 + $0x254] ss:$8 sps:$4 sm:$0xff]  }
 0x1bc   : > { %14644 = vmatprep.mubr.msk.bf16.mxu0 %vm2352_vm0, %v16758_v47  ;;  %14741 = vmatprep.mubr.msk.bf16.mxu1 %vm2352_vm0, %v16758_v47 }
 0x1be   : > { %v18765_v60 = vpop.f32.mrb[36].mxu0  ;;  %v18767_v44 = vpop.f32.mrb[36].mxu1 }
 0x1bf   : > { %23631 = vst [vmem:[#allocation31_spill] sm:$0xff] %v18765_v60  ;;  %23632 = vst [vmem:[#allocation32_spill] sm:$0xff] %v18767_v44  ;;  %v18769_v57 = vpop.f32.mrb[37].mxu0  ;;  %v18771_v27 = vpop.f32.mrb[37].mxu1 }
 0x1c0   : > { %23633 = vst [vmem:[#allocation33_spill] sm:$0xff] %v18769_v57  ;;  %23634 = vst [vmem:[#allocation34_spill] sm:$0xff] %v18771_v27  ;;  %v18773_v59 = vpop.f32.mrb[38].mxu0  ;;  %v18775_v54 = vpop.f32.mrb[38].mxu1 }
 0x1c1   : > { %23635 = vst [vmem:[#allocation35_spill] sm:$0xff] %v18773_v59  ;;  %23636 = vst [vmem:[#allocation36_spill] sm:$0xff] %v18775_v54  ;;  %v18778_v37 = vpop.f32.mrb[39].mxu0  ;;  %v18780_v58 = vpop.f32.mrb[39].mxu1  ;;  %v16769_v54 = vld [vmem:[%s18342_s29 + $0x250] ss:$8 sps:$4 sm:$0xff]  }
 0x1c2   : > { %23637 = vst [vmem:[#allocation37_spill] sm:$0xff] %v18778_v37  ;;  %23638 = vst [vmem:[#allocation38_spill] sm:$0xff] %v18780_v58 }
 0x1c3   : > { %3047 = vmatmul.mubr.bf16.gmra.mrb[144].mxu0 %v16760_v61  ;;  %4040 = vmatmul.mubr.bf16.gmra.mrb[144].mxu1 %v16760_v61  ;;  %v16770_v61 = vld [vmem:[%s18342_s29 + $0x264] ss:$8 sps:$4 sm:$0xff]  }
 0x1c4   : > { %14645 = vmatprep.mubr.msk.bf16.mxu0 %vm2352_vm0, %v16767_v34  ;;  %14742 = vmatprep.mubr.msk.bf16.mxu1 %vm2352_vm0, %v16767_v34 }
 0x1c6   : > { %v18784_v47 = vpop.f32.mrb[40].mxu0  ;;  %v18786_v57 = vpop.f32.mrb[40].mxu1 }
 0x1c7   : > { %23639 = vst [vmem:[#allocation39_spill] sm:$0xff] %v18784_v47  ;;  %23640 = vst [vmem:[#allocation40_spill] sm:$0xff] %v18786_v57  ;;  %v18788_v27 = vpop.f32.mrb[41].mxu0  ;;  %v18790_v59 = vpop.f32.mrb[41].mxu1 }
 0x1c8   : > { %23641 = vst [vmem:[#allocation41_spill] sm:$0xff] %v18788_v27  ;;  %23642 = vst [vmem:[#allocation42_spill] sm:$0xff] %v18790_v59  ;;  %v18793_v44 = vpop.f32.mrb[42].mxu0  ;;  %v18795_v58 = vpop.f32.mrb[42].mxu1 }
 0x1c9   : > { %23643 = vst [vmem:[#allocation43_spill] sm:$0xff] %v18793_v44  ;;  %23644 = vst [vmem:[#allocation44_spill] sm:$0xff] %v18795_v58  ;;  %v18798_v37 = vpop.f32.mrb[43].mxu0  ;;  %v18800_v60 = vpop.f32.mrb[43].mxu1  ;;  %v16772_v58 = vld [vmem:[%s18342_s29 + $0x260] ss:$8 sps:$4 sm:$0xff]  }
 0x1ca   : > { %23645 = vst [vmem:[#allocation45_spill] sm:$0xff] %v18798_v37  ;;  %23646 = vst [vmem:[#allocation46_spill] sm:$0xff] %v18800_v60  ;;  %v16773_v60 = vld [vmem:[%s18342_s29 + $0x274] ss:$8 sps:$4 sm:$0xff]  }
 0x1cb   : > { %3057 = vmatmul.mubr.bf16.gmra.mrb[148].mxu0 %v16769_v54  ;;  %4050 = vmatmul.mubr.bf16.gmra.mrb[148].mxu1 %v16769_v54 }
 0x1cc   : > { %14646 = vmatprep.mubr.msk.bf16.mxu0 %vm2352_vm0, %v16770_v61  ;;  %14743 = vmatprep.mubr.msk.bf16.mxu1 %vm2352_vm0, %v16770_v61  ;;  %v16833_v61 = vld [vmem:[%s23510_s3 + $0x120] ss:$16 sps:$4 sm:$0xff]  }
 0x1ce   : > { %v18804_v34 = vpop.f32.mrb[44].mxu0  ;;  %v18806_v59 = vpop.f32.mrb[44].mxu1 }
 0x1cf   : > { %23647 = vst [vmem:[#allocation47_spill] sm:$0xff] %v18804_v34  ;;  %23648 = vst [vmem:[#allocation48_spill] sm:$0xff] %v18806_v59  ;;  %v18808_v27 = vpop.f32.mrb[45].mxu0  ;;  %v18810_v44 = vpop.f32.mrb[45].mxu1  ;;  %v16775_v59 = vld [vmem:[%s18342_s29 + $0x270] ss:$8 sps:$4 sm:$0xff]  }
 0x1d0   : > { %23649 = vst [vmem:[#allocation49_spill] sm:$0xff] %v18808_v27  ;;  %23650 = vst [vmem:[#allocation50_spill] sm:$0xff] %v18810_v44  ;;  %v18813_v57 = vpop.f32.mrb[46].mxu0  ;;  %v18815_v37 = vpop.f32.mrb[46].mxu1  ;;  %v16835_v44 = vld [vmem:[%s23510_s3 + $0x124] ss:$16 sps:$4 sm:$0xff]  }
 0x1d1   : > { %23651 = vst [vmem:[#allocation51_spill] sm:$0xff] %v18813_v57  ;;  %23652 = vst [vmem:[#allocation52_spill] sm:$0xff] %v18815_v37  ;;  %v18818_v47 = vpop.f32.mrb[47].mxu0  ;;  %v18820_v54 = vpop.f32.mrb[47].mxu1  ;;  %v16836_v37 = vld [vmem:[%s23510_s3 + $0x128] ss:$16 sps:$4 sm:$0xff]   ;;  %8030 = vmatprep.subr.bf16.mxu0 %v16835_v44 }
 0x1d2   : > { %23653 = vst [vmem:[#allocation53_spill] sm:$0xff] %v18818_v47  ;;  %23654 = vst [vmem:[#allocation54_spill] sm:$0xff] %v18820_v54  ;;  %8031 = vmatpush1.bf16.msra.mxu0 %v16833_v61 }
 0x1d3   : > { %3067 = vmatmul.mubr.bf16.gmra.mrb[152].mxu0 %v16772_v58  ;;  %4060 = vmatmul.mubr.bf16.gmra.mrb[152].mxu1 %v16772_v58  ;;  %v16838_v58 = vld [vmem:[%s23510_s3 + $0x12c] ss:$16 sps:$4 sm:$0xff]  }
 0x1d4   : > { %14647 = vmatprep.mubr.msk.bf16.mxu0 %vm2352_vm0, %v16773_v60  ;;  %14744 = vmatprep.mubr.msk.bf16.mxu1 %vm2352_vm0, %v16773_v60 }
 0x1d5   : > { %9795 = vmatprep.subr.bf16.mxu1 %v16838_v58 }
 0x1d6   : > { %v18836_v54 = vpop.f32.mrb[48].mxu0  ;;  %v18838_v47 = vpop.f32.mrb[48].mxu1  ;;  %9796 = vmatpush1.bf16.msra.mxu1 %v16836_v37 }
 0x1d7   : > { %23655 = vst [vmem:[#allocation55_spill] sm:$0xff] %v18836_v54  ;;  %23656 = vst [vmem:[#allocation56_spill] sm:$0xff] %v18838_v47  ;;  %v18840_v57 = vpop.f32.mrb[49].mxu0  ;;  %v18842_v27 = vpop.f32.mrb[49].mxu1  ;;  %v16800_v47 = vld [vmem:[%s18342_s29 + $0x2e4] ss:$8 sps:$4 sm:$0xff]  }
 0x1d8   : > { %23657 = vst [vmem:[#allocation57_spill] sm:$0xff] %v18840_v57  ;;  %23658 = vst [vmem:[#allocation58_spill] sm:$0xff] %v18842_v27  ;;  %v18845_v34 = vpop.f32.mrb[50].mxu0  ;;  %v18847_v60 = vpop.f32.mrb[50].mxu1 }
 0x1d9   : > { %23659 = vst [vmem:[#allocation59_spill] sm:$0xff] %v18845_v34  ;;  %23660 = vst [vmem:[#allocation60_spill] sm:$0xff] %v18847_v60  ;;  %v18850_v44 = vpop.f32.mrb[51].mxu0  ;;  %v18852_v54 = vpop.f32.mrb[51].mxu1  ;;  %v16778_v60 = vld [vmem:[%s18342_s29 + $0x280] ss:$8 sps:$4 sm:$0xff]  }
 0x1da   : > { %23661 = vst [vmem:[#allocation61_spill] sm:$0xff] %v18850_v44  ;;  %23662 = vst [vmem:[#allocation62_spill] sm:$0xff] %v18852_v54 }
 0x1db   : > { %3077 = vmatmul.mubr.bf16.gmra.mrb[156].mxu0 %v16775_v59  ;;  %4070 = vmatmul.mubr.bf16.gmra.mrb[156].mxu1 %v16775_v59  ;;  %v16779_v59 = vld [vmem:[%s18342_s29 + $0x294] ss:$8 sps:$4 sm:$0xff]  }
 0x1dc   : > { %14648 = vmatprep.mubr.msk.bf16.mxu0 %vm2352_vm0, %v16776_v24  ;;  %14745 = vmatprep.mubr.msk.bf16.mxu1 %vm2352_vm0, %v16776_v24 }
 0x1de   : > { %v18856_v61 = vpop.f32.mrb[52].mxu0  ;;  %v18858_v58 = vpop.f32.mrb[52].mxu1 }
 0x1df   : > { %23663 = vst [vmem:[#allocation63_spill] sm:$0xff] %v18856_v61  ;;  %23664 = vst [vmem:[#allocation64_spill] sm:$0xff] %v18858_v58  ;;  %v18860_v37 = vpop.f32.mrb[53].mxu0  ;;  %v18862_v34 = vpop.f32.mrb[53].mxu1 }
 0x1e0   : > { %23665 = vst [vmem:[#allocation65_spill] sm:$0xff] %v18860_v37  ;;  %23666 = vst [vmem:[#allocation66_spill] sm:$0xff] %v18862_v34  ;;  %v18865_v27 = vpop.f32.mrb[54].mxu0  ;;  %v18867_v54 = vpop.f32.mrb[54].mxu1 }
 0x1e1   : > { %23667 = vst [vmem:[#allocation67_spill] sm:$0xff] %v18865_v27  ;;  %23668 = vst [vmem:[#allocation68_spill] sm:$0xff] %v18867_v54  ;;  %v18870_v44 = vpop.f32.mrb[55].mxu0  ;;  %v18872_v57 = vpop.f32.mrb[55].mxu1  ;;  %v16781_v54 = vld [vmem:[%s18342_s29 + $0x290] ss:$8 sps:$4 sm:$0xff]  }
 0x1e2   : > { %23669 = vst [vmem:[#allocation69_spill] sm:$0xff] %v18870_v44  ;;  %23670 = vst [vmem:[#allocation70_spill] sm:$0xff] %v18872_v57 }
 0x1e3   : > { %3087 = vmatmul.mubr.bf16.gmra.mrb[160].mxu0 %v16778_v60  ;;  %4080 = vmatmul.mubr.bf16.gmra.mrb[160].mxu1 %v16778_v60  ;;  %v16782_v60 = vld [vmem:[%s18342_s29 + $0x2a4] ss:$8 sps:$4 sm:$0xff]  }
 0x1e4   : > { %14649 = vmatprep.mubr.msk.bf16.mxu0 %vm2352_vm0, %v16779_v59  ;;  %14746 = vmatprep.mubr.msk.bf16.mxu1 %vm2352_vm0, %v16779_v59 }
 0x1e6   : > { %v18876_v24 = vpop.f32.mrb[56].mxu0  ;;  %v18878_v34 = vpop.f32.mrb[56].mxu1 }
 0x1e7   : > { %23671 = vst [vmem:[#allocation71_spill] sm:$0xff] %v18876_v24  ;;  %23672 = vst [vmem:[#allocation72_spill] sm:$0xff] %v18878_v34  ;;  %v18880_v37 = vpop.f32.mrb[57].mxu0  ;;  %v18882_v27 = vpop.f32.mrb[57].mxu1 }
 0x1e8   : > { %23673 = vst [vmem:[#allocation73_spill] sm:$0xff] %v18880_v37  ;;  %23674 = vst [vmem:[#allocation74_spill] sm:$0xff] %v18882_v27  ;;  %v18885_v58 = vpop.f32.mrb[58].mxu0  ;;  %v18887_v57 = vpop.f32.mrb[58].mxu1 }
 0x1e9   : > { %23675 = vst [vmem:[#allocation75_spill] sm:$0xff] %v18885_v58  ;;  %23676 = vst [vmem:[#allocation76_spill] sm:$0xff] %v18887_v57  ;;  %v18890_v44 = vpop.f32.mrb[59].mxu0  ;;  %v18892_v61 = vpop.f32.mrb[59].mxu1  ;;  %v16784_v57 = vld [vmem:[%s18342_s29 + $0x2a0] ss:$8 sps:$4 sm:$0xff]  }
 0x1ea   : > { %23677 = vst [vmem:[#allocation77_spill] sm:$0xff] %v18890_v44  ;;  %23678 = vst [vmem:[#allocation78_spill] sm:$0xff] %v18892_v61 }
 0x1eb   : > { %3097 = vmatmul.mubr.bf16.gmra.mrb[164].mxu0 %v16781_v54  ;;  %4090 = vmatmul.mubr.bf16.gmra.mrb[164].mxu1 %v16781_v54  ;;  %v16791_v54 = vld [vmem:[%s18342_s29 + $0x2b4] ss:$8 sps:$4 sm:$0xff]  }
 0x1ec   : > { %14650 = vmatprep.mubr.msk.bf16.mxu0 %vm2352_vm0, %v16782_v60  ;;  %14747 = vmatprep.mubr.msk.bf16.mxu1 %vm2352_vm0, %v16782_v60 }
 0x1ee   : > { %v18896_v59 = vpop.f32.mrb[60].mxu0  ;;  %v18898_v27 = vpop.f32.mrb[60].mxu1 }
 0x1ef   : > { %23679 = vst [vmem:[#allocation79_spill] sm:$0xff] %v18896_v59  ;;  %23680 = vst [vmem:[#allocation80_spill] sm:$0xff] %v18898_v27  ;;  %v18900_v37 = vpop.f32.mrb[61].mxu0  ;;  %v18902_v58 = vpop.f32.mrb[61].mxu1 }
 0x1f0   : > { %23681 = vst [vmem:[#allocation81_spill] sm:$0xff] %v18900_v37  ;;  %23682 = vst [vmem:[#allocation82_spill] sm:$0xff] %v18902_v58  ;;  %v18905_v34 = vpop.f32.mrb[62].mxu0  ;;  %v18907_v61 = vpop.f32.mrb[62].mxu1 }
 0x1f1   : > { %23683 = vst [vmem:[#allocation83_spill] sm:$0xff] %v18905_v34  ;;  %23684 = vst [vmem:[#allocation84_spill] sm:$0xff] %v18907_v61  ;;  %v18910_v44 = vpop.f32.mrb[63].mxu0  ;;  %v18912_v24 = vpop.f32.mrb[63].mxu1  ;;  %v16793_v61 = vld [vmem:[%s18342_s29 + $0x2b0] ss:$8 sps:$4 sm:$0xff]  }
 0x1f2   : > { %23685 = vst [vmem:[#allocation85_spill] sm:$0xff] %v18910_v44  ;;  %23686 = vst [vmem:[#allocation86_spill] sm:$0xff] %v18912_v24 }
 0x1f3   : > { %3107 = vmatmul.mubr.bf16.gmra.mrb[168].mxu0 %v16784_v57  ;;  %4100 = vmatmul.mubr.bf16.gmra.mrb[168].mxu1 %v16784_v57  ;;  %v16794_v57 = vld [vmem:[%s18342_s29 + $0x2c4] ss:$8 sps:$4 sm:$0xff]  }
 0x1f4   : > { %14651 = vmatprep.mubr.msk.bf16.mxu0 %vm2352_vm0, %v16791_v54  ;;  %14748 = vmatprep.mubr.msk.bf16.mxu1 %vm2352_vm0, %v16791_v54 }
 0x1f6   : > { %v18916_v60 = vpop.f32.mrb[64].mxu0  ;;  %v18918_v58 = vpop.f32.mrb[64].mxu1 }
 0x1f7   : > { %23687 = vst [vmem:[#allocation87_spill] sm:$0xff] %v18916_v60  ;;  %23688 = vst [vmem:[#allocation88_spill] sm:$0xff] %v18918_v58  ;;  %v18920_v37 = vpop.f32.mrb[65].mxu0  ;;  %v18922_v34 = vpop.f32.mrb[65].mxu1 }
 0x1f8   : > { %23689 = vst [vmem:[#allocation89_spill] sm:$0xff] %v18920_v37  ;;  %23690 = vst [vmem:[#allocation90_spill] sm:$0xff] %v18922_v34  ;;  %v18925_v27 = vpop.f32.mrb[66].mxu0  ;;  %v18927_v24 = vpop.f32.mrb[66].mxu1 }
 0x1f9   : > { %23691 = vst [vmem:[#allocation91_spill] sm:$0xff] %v18925_v27  ;;  %23692 = vst [vmem:[#allocation92_spill] sm:$0xff] %v18927_v24  ;;  %v18930_v44 = vpop.f32.mrb[67].mxu0  ;;  %v18932_v59 = vpop.f32.mrb[67].mxu1  ;;  %v16796_v24 = vld [vmem:[%s18342_s29 + $0x2c0] ss:$8 sps:$4 sm:$0xff]  }
 0x1fa   : > { %23693 = vst [vmem:[#allocation93_spill] sm:$0xff] %v18930_v44  ;;  %23694 = vst [vmem:[#allocation94_spill] sm:$0xff] %v18932_v59  ;;  %v16797_v59 = vld [vmem:[%s18342_s29 + $0x2d4] ss:$8 sps:$4 sm:$0xff]  }
 0x1fb   : > { %3117 = vmatmul.mubr.bf16.gmra.mrb[172].mxu0 %v16793_v61  ;;  %4110 = vmatmul.mubr.bf16.gmra.mrb[172].mxu1 %v16793_v61 }
 0x1fc   : > { %14652 = vmatprep.mubr.msk.bf16.mxu0 %vm2352_vm0, %v16794_v57  ;;  %14749 = vmatprep.mubr.msk.bf16.mxu1 %vm2352_vm0, %v16794_v57  ;;  %v16857_v57 = vld [vmem:[%s23510_s3 + $0x140] ss:$16 sps:$4 sm:$0xff]  }
 0x1fe   : > { %v18936_v54 = vpop.f32.mrb[68].mxu0  ;;  %v18938_v34 = vpop.f32.mrb[68].mxu1 }
 0x1ff   : > { %23695 = vst [vmem:[#allocation95_spill] sm:$0xff] %v18936_v54  ;;  %23696 = vst [vmem:[#allocation96_spill] sm:$0xff] %v18938_v34  ;;  %v18940_v37 = vpop.f32.mrb[69].mxu0  ;;  %v18942_v27 = vpop.f32.mrb[69].mxu1  ;;  %v16799_v34 = vld [vmem:[%s18342_s29 + $0x2d0] ss:$8 sps:$4 sm:$0xff]  }
 0x200   : > { %23697 = vst [vmem:[#allocation97_spill] sm:$0xff] %v18940_v37  ;;  %23698 = vst [vmem:[#allocation98_spill] sm:$0xff] %v18942_v27  ;;  %v18945_v58 = vpop.f32.mrb[70].mxu0  ;;  %v18947_v44 = vpop.f32.mrb[70].mxu1  ;;  %v16859_v27 = vld [vmem:[%s23510_s3 + $0x144] ss:$16 sps:$4 sm:$0xff]  }
 0x201   : > { %23699 = vst [vmem:[#allocation99_spill] sm:$0xff] %v18945_v58  ;;  %23700 = vst [vmem:[#allocation100_spill] sm:$0xff] %v18947_v44  ;;  %v18950_v60 = vpop.f32.mrb[71].mxu0  ;;  %v18952_v61 = vpop.f32.mrb[71].mxu1  ;;  %v16860_v44 = vld [vmem:[%s23510_s3 + $0x148] ss:$16 sps:$4 sm:$0xff]   ;;  %8032 = vmatprep.subr.bf16.mxu0 %v16859_v27 }
 0x202   : > { %23701 = vst [vmem:[#allocation101_spill] sm:$0xff] %v18950_v60  ;;  %23702 = vst [vmem:[#allocation102_spill] sm:$0xff] %v18952_v61  ;;  %8033 = vmatpush1.bf16.msra.mxu0 %v16857_v57 }
 0x203   : > { %3127 = vmatmul.mubr.bf16.gmra.mrb[176].mxu0 %v16796_v24  ;;  %4120 = vmatmul.mubr.bf16.gmra.mrb[176].mxu1 %v16796_v24  ;;  %v16862_v24 = vld [vmem:[%s23510_s3 + $0x14c] ss:$16 sps:$4 sm:$0xff]  }
 0x204   : > { %14653 = vmatprep.mubr.msk.bf16.mxu0 %vm2352_vm0, %v16797_v59  ;;  %14750 = vmatprep.mubr.msk.bf16.mxu1 %vm2352_vm0, %v16797_v59 }
 0x205   : > { %9797 = vmatprep.subr.bf16.mxu1 %v16862_v24 }
 0x206   : > { %v18968_v61 = vpop.f32.mrb[72].mxu0  ;;  %v18970_v60 = vpop.f32.mrb[72].mxu1  ;;  %9798 = vmatpush1.bf16.msra.mxu1 %v16860_v44 }
 0x207   : > { %23703 = vst [vmem:[#allocation103_spill] sm:$0xff] %v18968_v61  ;;  %23704 = vst [vmem:[#allocation104_spill] sm:$0xff] %v18970_v60  ;;  %v18972_v58 = vpop.f32.mrb[73].mxu0  ;;  %v18974_v37 = vpop.f32.mrb[73].mxu1  ;;  %v16824_v60 = vld [vmem:[%s18342_s29 + $0x344] ss:$8 sps:$4 sm:$0xff]  }
 0x208   : > { %23705 = vst [vmem:[#allocation105_spill] sm:$0xff] %v18972_v58  ;;  %23706 = vst [vmem:[#allocation106_spill] sm:$0xff] %v18974_v37  ;;  %v18977_v54 = vpop.f32.mrb[74].mxu0  ;;  %v18979_v59 = vpop.f32.mrb[74].mxu1 }
 0x209   : > { %23707 = vst [vmem:[#allocation107_spill] sm:$0xff] %v18977_v54  ;;  %23708 = vst [vmem:[#allocation108_spill] sm:$0xff] %v18979_v59  ;;  %v18982_v27 = vpop.f32.mrb[75].mxu0  ;;  %v18984_v61 = vpop.f32.mrb[75].mxu1  ;;  %v16802_v59 = vld [vmem:[%s18342_s29 + $0x2e0] ss:$8 sps:$4 sm:$0xff]  }
 0x20a   : > { %23709 = vst [vmem:[#allocation109_spill] sm:$0xff] %v18982_v27  ;;  %23710 = vst [vmem:[#allocation110_spill] sm:$0xff] %v18984_v61 }
 0x20b   : > { %3137 = vmatmul.mubr.bf16.gmra.mrb[180].mxu0 %v16799_v34  ;;  %4130 = vmatmul.mubr.bf16.gmra.mrb[180].mxu1 %v16799_v34  ;;  %v16803_v34 = vld [vmem:[%s18342_s29 + $0x2f4] ss:$8 sps:$4 sm:$0xff]  }
 0x20c   : > { %14654 = vmatprep.mubr.msk.bf16.mxu0 %vm2352_vm0, %v16800_v47  ;;  %14751 = vmatprep.mubr.msk.bf16.mxu1 %vm2352_vm0, %v16800_v47 }
 0x20e   : > { %v18988_v57 = vpop.f32.mrb[76].mxu0  ;;  %v18990_v24 = vpop.f32.mrb[76].mxu1 }
 0x20f   : > { %23711 = vst [vmem:[#allocation111_spill] sm:$0xff] %v18988_v57  ;;  %23712 = vst [vmem:[#allocation112_spill] sm:$0xff] %v18990_v24  ;;  %v18992_v44 = vpop.f32.mrb[77].mxu0  ;;  %v18994_v54 = vpop.f32.mrb[77].mxu1 }
 0x210   : > { %23713 = vst [vmem:[#allocation113_spill] sm:$0xff] %v18992_v44  ;;  %23714 = vst [vmem:[#allocation114_spill] sm:$0xff] %v18994_v54  ;;  %v18997_v37 = vpop.f32.mrb[78].mxu0  ;;  %v18999_v61 = vpop.f32.mrb[78].mxu1 }
 0x211   : > { %23715 = vst [vmem:[#allocation115_spill] sm:$0xff] %v18997_v37  ;;  %23716 = vst [vmem:[#allocation116_spill] sm:$0xff] %v18999_v61  ;;  %v19002_v27 = vpop.f32.mrb[79].mxu0  ;;  %v19004_v58 = vpop.f32.mrb[79].mxu1  ;;  %v16805_v61 = vld [vmem:[%s18342_s29 + $0x2f0] ss:$8 sps:$4 sm:$0xff]  }
 0x212   : > { %23717 = vst [vmem:[#allocation117_spill] sm:$0xff] %v19002_v27  ;;  %23718 = vst [vmem:[#allocation118_spill] sm:$0xff] %v19004_v58 }
 0x213   : > { %3147 = vmatmul.mubr.bf16.gmra.mrb[184].mxu0 %v16802_v59  ;;  %4140 = vmatmul.mubr.bf16.gmra.mrb[184].mxu1 %v16802_v59  ;;  %v16806_v59 = vld [vmem:[%s18342_s29 + $0x304] ss:$8 sps:$4 sm:$0xff]  }
 0x214   : > { %14655 = vmatprep.mubr.msk.bf16.mxu0 %vm2352_vm0, %v16803_v34  ;;  %14752 = vmatprep.mubr.msk.bf16.mxu1 %vm2352_vm0, %v16803_v34 }
 0x216   : > { %v19008_v47 = vpop.f32.mrb[80].mxu0  ;;  %v19010_v54 = vpop.f32.mrb[80].mxu1 }
 0x217   : > { %23719 = vst [vmem:[#allocation119_spill] sm:$0xff] %v19008_v47  ;;  %23720 = vst [vmem:[#allocation120_spill] sm:$0xff] %v19010_v54  ;;  %v19012_v44 = vpop.f32.mrb[81].mxu0  ;;  %v19014_v37 = vpop.f32.mrb[81].mxu1 }
 0x218   : > { %23721 = vst [vmem:[#allocation121_spill] sm:$0xff] %v19012_v44  ;;  %23722 = vst [vmem:[#allocation122_spill] sm:$0xff] %v19014_v37  ;;  %v19017_v24 = vpop.f32.mrb[82].mxu0  ;;  %v19019_v58 = vpop.f32.mrb[82].mxu1 }
 0x219   : > { %23723 = vst [vmem:[#allocation123_spill] sm:$0xff] %v19017_v24  ;;  %23724 = vst [vmem:[#allocation124_spill] sm:$0xff] %v19019_v58  ;;  %v19022_v27 = vpop.f32.mrb[83].mxu0  ;;  %v19024_v57 = vpop.f32.mrb[83].mxu1  ;;  %v16808_v58 = vld [vmem:[%s18342_s29 + $0x300] ss:$8 sps:$4 sm:$0xff]  }
 0x21a   : > { %23725 = vst [vmem:[#allocation125_spill] sm:$0xff] %v19022_v27  ;;  %23726 = vst [vmem:[#allocation126_spill] sm:$0xff] %v19024_v57 }
 0x21b   : > { %3157 = vmatmul.mubr.bf16.gmra.mrb[188].mxu0 %v16805_v61  ;;  %4150 = vmatmul.mubr.bf16.gmra.mrb[188].mxu1 %v16805_v61  ;;  %v16815_v61 = vld [vmem:[%s18342_s29 + $0x314] ss:$8 sps:$4 sm:$0xff]  }
 0x21c   : > { %14656 = vmatprep.mubr.msk.bf16.mxu0 %vm2352_vm0, %v16806_v59  ;;  %14753 = vmatprep.mubr.msk.bf16.mxu1 %vm2352_vm0, %v16806_v59 }
 0x21e   : > { %v19028_v34 = vpop.f32.mrb[84].mxu0  ;;  %v19030_v37 = vpop.f32.mrb[84].mxu1 }
 0x21f   : > { %23727 = vst [vmem:[#allocation127_spill] sm:$0xff] %v19028_v34  ;;  %23728 = vst [vmem:[#allocation128_spill] sm:$0xff] %v19030_v37  ;;  %v19032_v44 = vpop.f32.mrb[85].mxu0  ;;  %v19034_v24 = vpop.f32.mrb[85].mxu1 }
 0x220   : > { %23729 = vst [vmem:[#allocation129_spill] sm:$0xff] %v19032_v44  ;;  %23730 = vst [vmem:[#allocation130_spill] sm:$0xff] %v19034_v24  ;;  %v19037_v54 = vpop.f32.mrb[86].mxu0  ;;  %v19039_v57 = vpop.f32.mrb[86].mxu1 }
 0x221   : > { %23731 = vst [vmem:[#allocation131_spill] sm:$0xff] %v19037_v54  ;;  %23732 = vst [vmem:[#allocation132_spill] sm:$0xff] %v19039_v57  ;;  %v19042_v27 = vpop.f32.mrb[87].mxu0  ;;  %v19044_v47 = vpop.f32.mrb[87].mxu1  ;;  %v16817_v57 = vld [vmem:[%s18342_s29 + $0x310] ss:$8 sps:$4 sm:$0xff]  }
 0x222   : > { %23733 = vst [vmem:[#allocation133_spill] sm:$0xff] %v19042_v27  ;;  %23734 = vst [vmem:[#allocation134_spill] sm:$0xff] %v19044_v47 }
 0x223   : > { %3167 = vmatmul.mubr.bf16.gmra.mrb[192].mxu0 %v16808_v58  ;;  %4160 = vmatmul.mubr.bf16.gmra.mrb[192].mxu1 %v16808_v58  ;;  %v16818_v58 = vld [vmem:[%s18342_s29 + $0x324] ss:$8 sps:$4 sm:$0xff]  }
 0x224   : > { %14657 = vmatprep.mubr.msk.bf16.mxu0 %vm2352_vm0, %v16815_v61  ;;  %14754 = vmatprep.mubr.msk.bf16.mxu1 %vm2352_vm0, %v16815_v61 }
 0x226   : > { %v19048_v59 = vpop.f32.mrb[88].mxu0  ;;  %v19050_v24 = vpop.f32.mrb[88].mxu1 }
 0x227   : > { %23735 = vst [vmem:[#allocation135_spill] sm:$0xff] %v19048_v59  ;;  %23736 = vst [vmem:[#allocation136_spill] sm:$0xff] %v19050_v24  ;;  %v19052_v44 = vpop.f32.mrb[89].mxu0  ;;  %v19054_v54 = vpop.f32.mrb[89].mxu1 }
 0x228   : > { %23737 = vst [vmem:[#allocation137_spill] sm:$0xff] %v19052_v44  ;;  %23738 = vst [vmem:[#allocation138_spill] sm:$0xff] %v19054_v54  ;;  %v19057_v37 = vpop.f32.mrb[90].mxu0  ;;  %v19059_v47 = vpop.f32.mrb[90].mxu1 }
 0x229   : > { %23739 = vst [vmem:[#allocation139_spill] sm:$0xff] %v19057_v37  ;;  %23740 = vst [vmem:[#allocation140_spill] sm:$0xff] %v19059_v47  ;;  %v19062_v27 = vpop.f32.mrb[91].mxu0  ;;  %v19064_v34 = vpop.f32.mrb[91].mxu1  ;;  %v16820_v47 = vld [vmem:[%s18342_s29 + $0x320] ss:$8 sps:$4 sm:$0xff]  }
 0x22a   : > { %23741 = vst [vmem:[#allocation141_spill] sm:$0xff] %v19062_v27  ;;  %23742 = vst [vmem:[#allocation142_spill] sm:$0xff] %v19064_v34  ;;  %v16821_v34 = vld [vmem:[%s18342_s29 + $0x334] ss:$8 sps:$4 sm:$0xff]  }
 0x22b   : > { %3177 = vmatmul.mubr.bf16.gmra.mrb[196].mxu0 %v16817_v57  ;;  %4170 = vmatmul.mubr.bf16.gmra.mrb[196].mxu1 %v16817_v57 }
 0x22c   : > { %14658 = vmatprep.mubr.msk.bf16.mxu0 %vm2352_vm0, %v16818_v58  ;;  %14755 = vmatprep.mubr.msk.bf16.mxu1 %vm2352_vm0, %v16818_v58  ;;  %v16881_v58 = vld [vmem:[%s23510_s3 + $0x160] ss:$16 sps:$4 sm:$0xff]  }
 0x22e   : > { %v19068_v61 = vpop.f32.mrb[92].mxu0  ;;  %v19070_v54 = vpop.f32.mrb[92].mxu1 }
 0x22f   : > { %23743 = vst [vmem:[#allocation143_spill] sm:$0xff] %v19068_v61  ;;  %23744 = vst [vmem:[#allocation144_spill] sm:$0xff] %v19070_v54  ;;  %v19072_v44 = vpop.f32.mrb[93].mxu0  ;;  %v19074_v37 = vpop.f32.mrb[93].mxu1  ;;  %v16823_v54 = vld [vmem:[%s18342_s29 + $0x330] ss:$8 sps:$4 sm:$0xff]  }
 0x230   : > { %23745 = vst [vmem:[#allocation145_spill] sm:$0xff] %v19072_v44  ;;  %23746 = vst [vmem:[#allocation146_spill] sm:$0xff] %v19074_v37  ;;  %v19077_v24 = vpop.f32.mrb[94].mxu0  ;;  %v19079_v27 = vpop.f32.mrb[94].mxu1  ;;  %v16883_v37 = vld [vmem:[%s23510_s3 + $0x164] ss:$16 sps:$4 sm:$0xff]  }
 0x231   : > { %23747 = vst [vmem:[#allocation147_spill] sm:$0xff] %v19077_v24  ;;  %23748 = vst [vmem:[#allocation148_spill] sm:$0xff] %v19079_v27  ;;  %v19082_v59 = vpop.f32.mrb[95].mxu0  ;;  %v19084_v57 = vpop.f32.mrb[95].mxu1  ;;  %v16884_v27 = vld [vmem:[%s23510_s3 + $0x168] ss:$16 sps:$4 sm:$0xff]   ;;  %8034 = vmatprep.subr.bf16.mxu0 %v16883_v37 }
 0x232   : > { %23749 = vst [vmem:[#allocation149_spill] sm:$0xff] %v19082_v59  ;;  %23750 = vst [vmem:[#allocation150_spill] sm:$0xff] %v19084_v57  ;;  %8035 = vmatpush1.bf16.msra.mxu0 %v16881_v58 }
 0x233   : > { %3187 = vmatmul.mubr.bf16.gmra.mrb[200].mxu0 %v16820_v47  ;;  %4180 = vmatmul.mubr.bf16.gmra.mrb[200].mxu1 %v16820_v47  ;;  %v16886_v47 = vld [vmem:[%s23510_s3 + $0x16c] ss:$16 sps:$4 sm:$0xff]  }
 0x234   : > { %14659 = vmatprep.mubr.msk.bf16.mxu0 %vm2352_vm0, %v16821_v34  ;;  %14756 = vmatprep.mubr.msk.bf16.mxu1 %vm2352_vm0, %v16821_v34 }
 0x235   : > { %9799 = vmatprep.subr.bf16.mxu1 %v16886_v47 }
 0x236   : > { %v19100_v57 = vpop.f32.mrb[96].mxu0  ;;  %v19102_v59 = vpop.f32.mrb[96].mxu1  ;;  %9800 = vmatpush1.bf16.msra.mxu1 %v16884_v27 }
 0x237   : > { %23751 = vst [vmem:[#allocation151_spill] sm:$0xff] %v19100_v57  ;;  %23752 = vst [vmem:[#allocation152_spill] sm:$0xff] %v19102_v59  ;;  %v19104_v24 = vpop.f32.mrb[97].mxu0  ;;  %v19106_v44 = vpop.f32.mrb[97].mxu1  ;;  %v16848_v59 = vld [vmem:[%s18342_s29 + $0x3a4] ss:$8 sps:$4 sm:$0xff]  }
 0x238   : > { %23753 = vst [vmem:[#allocation153_spill] sm:$0xff] %v19104_v24  ;;  %23754 = vst [vmem:[#allocation154_spill] sm:$0xff] %v19106_v44  ;;  %v19109_v61 = vpop.f32.mrb[98].mxu0  ;;  %v19111_v34 = vpop.f32.mrb[98].mxu1 }
 0x239   : > { %23755 = vst [vmem:[#allocation155_spill] sm:$0xff] %v19109_v61  ;;  %23756 = vst [vmem:[#allocation156_spill] sm:$0xff] %v19111_v34  ;;  %v19114_v37 = vpop.f32.mrb[99].mxu0  ;;  %v19116_v57 = vpop.f32.mrb[99].mxu1  ;;  %v16826_v34 = vld [vmem:[%s18342_s29 + $0x340] ss:$8 sps:$4 sm:$0xff]  }
 0x23a   : > { %23757 = vst [vmem:[#allocation157_spill] sm:$0xff] %v19114_v37  ;;  %23758 = vst [vmem:[#allocation158_spill] sm:$0xff] %v19116_v57 }
 0x23b   : > { %3197 = vmatmul.mubr.bf16.gmra.mrb[204].mxu0 %v16823_v54  ;;  %4190 = vmatmul.mubr.bf16.gmra.mrb[204].mxu1 %v16823_v54  ;;  %v16827_v54 = vld [vmem:[%s18342_s29 + $0x354] ss:$8 sps:$4 sm:$0xff]  }
 0x23c   : > { %14660 = vmatprep.mubr.msk.bf16.mxu0 %vm2352_vm0, %v16824_v60  ;;  %14757 = vmatprep.mubr.msk.bf16.mxu1 %vm2352_vm0, %v16824_v60 }
 0x23e   : > { %v19120_v58 = vpop.f32.mrb[100].mxu0  ;;  %v19122_v47 = vpop.f32.mrb[100].mxu1 }
 0x23f   : > { %23759 = vst [vmem:[#allocation159_spill] sm:$0xff] %v19120_v58  ;;  %23760 = vst [vmem:[#allocation160_spill] sm:$0xff] %v19122_v47  ;;  %v19124_v27 = vpop.f32.mrb[101].mxu0  ;;  %v19126_v61 = vpop.f32.mrb[101].mxu1 }
 0x240   : > { %23761 = vst [vmem:[#allocation161_spill] sm:$0xff] %v19124_v27  ;;  %23762 = vst [vmem:[#allocation162_spill] sm:$0xff] %v19126_v61  ;;  %v19129_v44 = vpop.f32.mrb[102].mxu0  ;;  %v19131_v57 = vpop.f32.mrb[102].mxu1 }
 0x241   : > { %23763 = vst [vmem:[#allocation163_spill] sm:$0xff] %v19129_v44  ;;  %23764 = vst [vmem:[#allocation164_spill] sm:$0xff] %v19131_v57  ;;  %v19134_v37 = vpop.f32.mrb[103].mxu0  ;;  %v19136_v24 = vpop.f32.mrb[103].mxu1  ;;  %v16829_v57 = vld [vmem:[%s18342_s29 + $0x350] ss:$8 sps:$4 sm:$0xff]  }
 0x242   : > { %23765 = vst [vmem:[#allocation165_spill] sm:$0xff] %v19134_v37  ;;  %23766 = vst [vmem:[#allocation166_spill] sm:$0xff] %v19136_v24 }
 0x243   : > { %3207 = vmatmul.mubr.bf16.gmra.mrb[208].mxu0 %v16826_v34  ;;  %4200 = vmatmul.mubr.bf16.gmra.mrb[208].mxu1 %v16826_v34  ;;  %v16830_v34 = vld [vmem:[%s18342_s29 + $0x364] ss:$8 sps:$4 sm:$0xff]  }
 0x244   : > { %14661 = vmatprep.mubr.msk.bf16.mxu0 %vm2352_vm0, %v16827_v54  ;;  %14758 = vmatprep.mubr.msk.bf16.mxu1 %vm2352_vm0, %v16827_v54 }
 0x246   : > { %v19140_v60 = vpop.f32.mrb[104].mxu0  ;;  %v19142_v61 = vpop.f32.mrb[104].mxu1 }
 0x247   : > { %23767 = vst [vmem:[#allocation167_spill] sm:$0xff] %v19140_v60  ;;  %23768 = vst [vmem:[#allocation168_spill] sm:$0xff] %v19142_v61  ;;  %v19144_v27 = vpop.f32.mrb[105].mxu0  ;;  %v19146_v44 = vpop.f32.mrb[105].mxu1 }
 0x248   : > { %23769 = vst [vmem:[#allocation169_spill] sm:$0xff] %v19144_v27  ;;  %23770 = vst [vmem:[#allocation170_spill] sm:$0xff] %v19146_v44  ;;  %v19149_v47 = vpop.f32.mrb[106].mxu0  ;;  %v19151_v24 = vpop.f32.mrb[106].mxu1 }
 0x249   : > { %23771 = vst [vmem:[#allocation171_spill] sm:$0xff] %v19149_v47  ;;  %23772 = vst [vmem:[#allocation172_spill] sm:$0xff] %v19151_v24  ;;  %v19154_v37 = vpop.f32.mrb[107].mxu0  ;;  %v19156_v58 = vpop.f32.mrb[107].mxu1  ;;  %v16832_v24 = vld [vmem:[%s18342_s29 + $0x360] ss:$8 sps:$4 sm:$0xff]  }
 0x24a   : > { %23773 = vst [vmem:[#allocation173_spill] sm:$0xff] %v19154_v37  ;;  %23774 = vst [vmem:[#allocation174_spill] sm:$0xff] %v19156_v58 }
 0x24b   : > { %3217 = vmatmul.mubr.bf16.gmra.mrb[212].mxu0 %v16829_v57  ;;  %4210 = vmatmul.mubr.bf16.gmra.mrb[212].mxu1 %v16829_v57  ;;  %v16839_v57 = vld [vmem:[%s18342_s29 + $0x374] ss:$8 sps:$4 sm:$0xff]  }
 0x24c   : > { %14662 = vmatprep.mubr.msk.bf16.mxu0 %vm2352_vm0, %v16830_v34  ;;  %14759 = vmatprep.mubr.msk.bf16.mxu1 %vm2352_vm0, %v16830_v34 }
 0x24e   : > { %v19160_v54 = vpop.f32.mrb[108].mxu0  ;;  %v19162_v44 = vpop.f32.mrb[108].mxu1 }
 0x24f   : > { %23775 = vst [vmem:[#allocation175_spill] sm:$0xff] %v19160_v54  ;;  %23776 = vst [vmem:[#allocation176_spill] sm:$0xff] %v19162_v44  ;;  %v19164_v27 = vpop.f32.mrb[109].mxu0  ;;  %v19166_v47 = vpop.f32.mrb[109].mxu1 }
 0x250   : > { %23777 = vst [vmem:[#allocation177_spill] sm:$0xff] %v19164_v27  ;;  %23778 = vst [vmem:[#allocation178_spill] sm:$0xff] %v19166_v47  ;;  %v19169_v61 = vpop.f32.mrb[110].mxu0  ;;  %v19171_v58 = vpop.f32.mrb[110].mxu1 }
 0x251   : > { %23779 = vst [vmem:[#allocation179_spill] sm:$0xff] %v19169_v61  ;;  %23780 = vst [vmem:[#allocation180_spill] sm:$0xff] %v19171_v58  ;;  %v19174_v37 = vpop.f32.mrb[111].mxu0  ;;  %v19176_v60 = vpop.f32.mrb[111].mxu1  ;;  %v16841_v58 = vld [vmem:[%s18342_s29 + $0x370] ss:$8 sps:$4 sm:$0xff]  }
 0x252   : > { %23781 = vst [vmem:[#allocation181_spill] sm:$0xff] %v19174_v37  ;;  %23782 = vst [vmem:[#allocation182_spill] sm:$0xff] %v19176_v60 }
 0x253   : > { %3227 = vmatmul.mubr.bf16.gmra.mrb[216].mxu0 %v16832_v24  ;;  %4220 = vmatmul.mubr.bf16.gmra.mrb[216].mxu1 %v16832_v24  ;;  %v16842_v24 = vld [vmem:[%s18342_s29 + $0x384] ss:$8 sps:$4 sm:$0xff]  }
 0x254   : > { %14663 = vmatprep.mubr.msk.bf16.mxu0 %vm2352_vm0, %v16839_v57  ;;  %14760 = vmatprep.mubr.msk.bf16.mxu1 %vm2352_vm0, %v16839_v57 }
 0x256   : > { %v19180_v34 = vpop.f32.mrb[112].mxu0  ;;  %v19182_v47 = vpop.f32.mrb[112].mxu1 }
 0x257   : > { %23783 = vst [vmem:[#allocation183_spill] sm:$0xff] %v19180_v34  ;;  %23784 = vst [vmem:[#allocation184_spill] sm:$0xff] %v19182_v47  ;;  %v19184_v27 = vpop.f32.mrb[113].mxu0  ;;  %v19186_v61 = vpop.f32.mrb[113].mxu1 }
 0x258   : > { %23785 = vst [vmem:[#allocation185_spill] sm:$0xff] %v19184_v27  ;;  %23786 = vst [vmem:[#allocation186_spill] sm:$0xff] %v19186_v61  ;;  %v19189_v44 = vpop.f32.mrb[114].mxu0  ;;  %v19191_v60 = vpop.f32.mrb[114].mxu1 }
 0x259   : > { %23787 = vst [vmem:[#allocation187_spill] sm:$0xff] %v19189_v44  ;;  %23788 = vst [vmem:[#allocation188_spill] sm:$0xff] %v19191_v60  ;;  %v19194_v37 = vpop.f32.mrb[115].mxu0  ;;  %v19196_v54 = vpop.f32.mrb[115].mxu1  ;;  %v16844_v60 = vld [vmem:[%s18342_s29 + $0x380] ss:$8 sps:$4 sm:$0xff]  }
 0x25a   : > { %23789 = vst [vmem:[#allocation189_spill] sm:$0xff] %v19194_v37  ;;  %23790 = vst [vmem:[#allocation190_spill] sm:$0xff] %v19196_v54  ;;  %v16845_v54 = vld [vmem:[%s18342_s29 + $0x394] ss:$8 sps:$4 sm:$0xff]  }
 0x25b   : > { %3237 = vmatmul.mubr.bf16.gmra.mrb[220].mxu0 %v16841_v58  ;;  %4230 = vmatmul.mubr.bf16.gmra.mrb[220].mxu1 %v16841_v58 }
 0x25c   : > { %14664 = vmatprep.mubr.msk.bf16.mxu0 %vm2352_vm0, %v16842_v24  ;;  %14761 = vmatprep.mubr.msk.bf16.mxu1 %vm2352_vm0, %v16842_v24  ;;  %v16905_v24 = vld [vmem:[%s23510_s3 + $0x180] ss:$16 sps:$4 sm:$0xff]  }
 0x25e   : > { %v19200_v57 = vpop.f32.mrb[116].mxu0  ;;  %v19202_v61 = vpop.f32.mrb[116].mxu1 }
 0x25f   : > { %23791 = vst [vmem:[#allocation191_spill] sm:$0xff] %v19200_v57  ;;  %23792 = vst [vmem:[#allocation192_spill] sm:$0xff] %v19202_v61  ;;  %v19204_v27 = vpop.f32.mrb[117].mxu0  ;;  %v19206_v44 = vpop.f32.mrb[117].mxu1  ;;  %v16847_v61 = vld [vmem:[%s18342_s29 + $0x390] ss:$8 sps:$4 sm:$0xff]  }
 0x260   : > { %23793 = vst [vmem:[#allocation193_spill] sm:$0xff] %v19204_v27  ;;  %23794 = vst [vmem:[#allocation194_spill] sm:$0xff] %v19206_v44  ;;  %v19209_v47 = vpop.f32.mrb[118].mxu0  ;;  %v19211_v37 = vpop.f32.mrb[118].mxu1  ;;  %v16907_v44 = vld [vmem:[%s23510_s3 + $0x184] ss:$16 sps:$4 sm:$0xff]  }
 0x261   : > { %23795 = vst [vmem:[#allocation195_spill] sm:$0xff] %v19209_v47  ;;  %23796 = vst [vmem:[#allocation196_spill] sm:$0xff] %v19211_v37  ;;  %v19214_v34 = vpop.f32.mrb[119].mxu0  ;;  %v19216_v58 = vpop.f32.mrb[119].mxu1  ;;  %v16908_v37 = vld [vmem:[%s23510_s3 + $0x188] ss:$16 sps:$4 sm:$0xff]   ;;  %8036 = vmatprep.subr.bf16.mxu0 %v16907_v44 }
 0x262   : > { %23797 = vst [vmem:[#allocation197_spill] sm:$0xff] %v19214_v34  ;;  %23798 = vst [vmem:[#allocation198_spill] sm:$0xff] %v19216_v58  ;;  %8037 = vmatpush1.bf16.msra.mxu0 %v16905_v24 }
 0x263   : > { %3247 = vmatmul.mubr.bf16.gmra.mrb[224].mxu0 %v16844_v60  ;;  %4240 = vmatmul.mubr.bf16.gmra.mrb[224].mxu1 %v16844_v60  ;;  %v16910_v60 = vld [vmem:[%s23510_s3 + $0x18c] ss:$16 sps:$4 sm:$0xff]  }
 0x264   : > { %14665 = vmatprep.mubr.msk.bf16.mxu0 %vm2352_vm0, %v16845_v54  ;;  %14762 = vmatprep.mubr.msk.bf16.mxu1 %vm2352_vm0, %v16845_v54 }
 0x265   : > { %9801 = vmatprep.subr.bf16.mxu1 %v16910_v60 }
 0x266   : > { %v19232_v58 = vpop.f32.mrb[120].mxu0  ;;  %v19234_v34 = vpop.f32.mrb[120].mxu1  ;;  %9802 = vmatpush1.bf16.msra.mxu1 %v16908_v37 }
 0x267   : > { %23799 = vst [vmem:[#allocation199_spill] sm:$0xff] %v19232_v58  ;;  %23800 = vst [vmem:[#allocation200_spill] sm:$0xff] %v19234_v34  ;;  %v19236_v47 = vpop.f32.mrb[121].mxu0  ;;  %v19238_v27 = vpop.f32.mrb[121].mxu1 }
 0x268   : > { %23801 = vst [vmem:[#allocation201_spill] sm:$0xff] %v19236_v47  ;;  %23802 = vst [vmem:[#allocation202_spill] sm:$0xff] %v19238_v27  ;;  %v19241_v57 = vpop.f32.mrb[122].mxu0  ;;  %v19243_v54 = vpop.f32.mrb[122].mxu1 }
 0x269   : > { %23803 = vst [vmem:[#allocation203_spill] sm:$0xff] %v19241_v57  ;;  %23804 = vst [vmem:[#allocation204_spill] sm:$0xff] %v19243_v54  ;;  %v19246_v44 = vpop.f32.mrb[123].mxu0  ;;  %v19248_v58 = vpop.f32.mrb[123].mxu1  ;;  %v16850_v54 = vld [vmem:[%s18342_s29 + $0x3a0] ss:$8 sps:$4 sm:$0xff]  }
 0x26a   : > { %23805 = vst [vmem:[#allocation205_spill] sm:$0xff] %v19246_v44  ;;  %23806 = vst [vmem:[#allocation206_spill] sm:$0xff] %v19248_v58 }
 0x26b   : > { %3257 = vmatmul.mubr.bf16.gmra.mrb[228].mxu0 %v16847_v61  ;;  %4250 = vmatmul.mubr.bf16.gmra.mrb[228].mxu1 %v16847_v61  ;;  %v16851_v61 = vld [vmem:[%s18342_s29 + $0x3b4] ss:$8 sps:$4 sm:$0xff]  }
 0x26c   : > { %14666 = vmatprep.mubr.msk.bf16.mxu0 %vm2352_vm0, %v16848_v59  ;;  %14763 = vmatprep.mubr.msk.bf16.mxu1 %vm2352_vm0, %v16848_v59 }
 0x26e   : > { %v19252_v24 = vpop.f32.mrb[124].mxu0  ;;  %v19254_v60 = vpop.f32.mrb[124].mxu1 }
 0x26f   : > { %23807 = vst [vmem:[#allocation207_spill] sm:$0xff] %v19252_v24  ;;  %23808 = vst [vmem:[#allocation208_spill] sm:$0xff] %v19254_v60  ;;  %v19256_v37 = vpop.f32.mrb[125].mxu0  ;;  %v19258_v57 = vpop.f32.mrb[125].mxu1 }
 0x270   : > { %23809 = vst [vmem:[#allocation209_spill] sm:$0xff] %v19256_v37  ;;  %23810 = vst [vmem:[#allocation210_spill] sm:$0xff] %v19258_v57  ;;  %v19261_v27 = vpop.f32.mrb[126].mxu0  ;;  %v19263_v58 = vpop.f32.mrb[126].mxu1 }
 0x271   : > { %23811 = vst [vmem:[#allocation211_spill] sm:$0xff] %v19261_v27  ;;  %23812 = vst [vmem:[#allocation212_spill] sm:$0xff] %v19263_v58  ;;  %v19266_v44 = vpop.f32.mrb[127].mxu0  ;;  %v19268_v47 = vpop.f32.mrb[127].mxu1  ;;  %v16853_v58 = vld [vmem:[%s18342_s29 + $0x3b0] ss:$8 sps:$4 sm:$0xff]  }
 0x272   : > { %23813 = vst [vmem:[#allocation213_spill] sm:$0xff] %v19266_v44  ;;  %23814 = vst [vmem:[#allocation214_spill] sm:$0xff] %v19268_v47 }
 0x273   : > { %3267 = vmatmul.mubr.bf16.gmra.mrb[232].mxu0 %v16850_v54  ;;  %4260 = vmatmul.mubr.bf16.gmra.mrb[232].mxu1 %v16850_v54  ;;  %v16854_v54 = vld [vmem:[%s18342_s29 + $0x3c4] ss:$8 sps:$4 sm:$0xff]  }
 0x274   : > { %14667 = vmatprep.mubr.msk.bf16.mxu0 %vm2352_vm0, %v16851_v61  ;;  %14764 = vmatprep.mubr.msk.bf16.mxu1 %vm2352_vm0, %v16851_v61 }
 0x276   : > { %v19272_v59 = vpop.f32.mrb[128].mxu0  ;;  %v19274_v57 = vpop.f32.mrb[128].mxu1 }
 0x277   : > { %23815 = vst [vmem:[#allocation215_spill] sm:$0xff] %v19272_v59  ;;  %23816 = vst [vmem:[#allocation216_spill] sm:$0xff] %v19274_v57  ;;  %v19276_v37 = vpop.f32.mrb[129].mxu0  ;;  %v19278_v27 = vpop.f32.mrb[129].mxu1 }
 0x278   : > { %23817 = vst [vmem:[#allocation217_spill] sm:$0xff] %v19276_v37  ;;  %23818 = vst [vmem:[#allocation218_spill] sm:$0xff] %v19278_v27  ;;  %v19281_v60 = vpop.f32.mrb[130].mxu0  ;;  %v19283_v47 = vpop.f32.mrb[130].mxu1 }
 0x279   : > { %23819 = vst [vmem:[#allocation219_spill] sm:$0xff] %v19281_v60  ;;  %23820 = vst [vmem:[#allocation220_spill] sm:$0xff] %v19283_v47  ;;  %v19286_v44 = vpop.f32.mrb[131].mxu0  ;;  %v19288_v24 = vpop.f32.mrb[131].mxu1  ;;  %v16856_v47 = vld [vmem:[%s18342_s29 + $0x3c0] ss:$8 sps:$4 sm:$0xff]  }
 0x27a   : > { %23821 = vst [vmem:[#allocation221_spill] sm:$0xff] %v19286_v44  ;;  %23822 = vst [vmem:[#allocation222_spill] sm:$0xff] %v19288_v24 }
 0x27b   : > { %3277 = vmatmul.mubr.bf16.gmra.mrb[236].mxu0 %v16853_v58  ;;  %4270 = vmatmul.mubr.bf16.gmra.mrb[236].mxu1 %v16853_v58  ;;  %v16863_v58 = vld [vmem:[%s18342_s29 + $0x3d4] ss:$8 sps:$4 sm:$0xff]  }
 0x27c   : > { %14668 = vmatprep.mubr.msk.bf16.mxu0 %vm2352_vm0, %v16854_v54  ;;  %14765 = vmatprep.mubr.msk.bf16.mxu1 %vm2352_vm0, %v16854_v54 }
 0x27e   : > { %v19292_v61 = vpop.f32.mrb[132].mxu0  ;;  %v19294_v27 = vpop.f32.mrb[132].mxu1 }
 0x27f   : > { %23823 = vst [vmem:[#allocation223_spill] sm:$0xff] %v19292_v61  ;;  %23824 = vst [vmem:[#allocation224_spill] sm:$0xff] %v19294_v27  ;;  %v19296_v37 = vpop.f32.mrb[133].mxu0  ;;  %v19298_v60 = vpop.f32.mrb[133].mxu1 }
 0x280   : > { %23825 = vst [vmem:[#allocation225_spill] sm:$0xff] %v19296_v37  ;;  %23826 = vst [vmem:[#allocation226_spill] sm:$0xff] %v19298_v60  ;;  %v19301_v57 = vpop.f32.mrb[134].mxu0  ;;  %v19303_v24 = vpop.f32.mrb[134].mxu1 }
 0x281   : > { %23827 = vst [vmem:[#allocation227_spill] sm:$0xff] %v19301_v57  ;;  %23828 = vst [vmem:[#allocation228_spill] sm:$0xff] %v19303_v24  ;;  %v19306_v44 = vpop.f32.mrb[135].mxu0  ;;  %v19308_v59 = vpop.f32.mrb[135].mxu1  ;;  %v16865_v24 = vld [vmem:[%s18342_s29 + $0x3d0] ss:$8 sps:$4 sm:$0xff]  }
 0x282   : > { %23829 = vst [vmem:[#allocation229_spill] sm:$0xff] %v19306_v44  ;;  %23830 = vst [vmem:[#allocation230_spill] sm:$0xff] %v19308_v59 }
 0x283   : > { %3287 = vmatmul.mubr.bf16.gmra.mrb[240].mxu0 %v16856_v47  ;;  %4280 = vmatmul.mubr.bf16.gmra.mrb[240].mxu1 %v16856_v47  ;;  %v16866_v47 = vld [vmem:[%s18342_s29 + $0x3e4] ss:$8 sps:$4 sm:$0xff]  }
 0x284   : > { %14669 = vmatprep.mubr.msk.bf16.mxu0 %vm2352_vm0, %v16863_v58  ;;  %14766 = vmatprep.mubr.msk.bf16.mxu1 %vm2352_vm0, %v16863_v58 }
 0x286   : > { %v19312_v54 = vpop.f32.mrb[136].mxu0  ;;  %v19314_v60 = vpop.f32.mrb[136].mxu1 }
 0x287   : > { %23831 = vst [vmem:[#allocation231_spill] sm:$0xff] %v19312_v54  ;;  %23832 = vst [vmem:[#allocation232_spill] sm:$0xff] %v19314_v60  ;;  %v19316_v37 = vpop.f32.mrb[137].mxu0  ;;  %v19318_v57 = vpop.f32.mrb[137].mxu1 }
 0x288   : > { %23833 = vst [vmem:[#allocation233_spill] sm:$0xff] %v19316_v37  ;;  %23834 = vst [vmem:[#allocation234_spill] sm:$0xff] %v19318_v57  ;;  %v19321_v27 = vpop.f32.mrb[138].mxu0  ;;  %v19323_v59 = vpop.f32.mrb[138].mxu1 }
 0x289   : > { %23835 = vst [vmem:[#allocation235_spill] sm:$0xff] %v19321_v27  ;;  %23836 = vst [vmem:[#allocation236_spill] sm:$0xff] %v19323_v59  ;;  %v19326_v44 = vpop.f32.mrb[139].mxu0  ;;  %v19328_v61 = vpop.f32.mrb[139].mxu1  ;;  %v16868_v59 = vld [vmem:[%s18342_s29 + $0x3e0] ss:$8 sps:$4 sm:$0xff]  }
 0x28a   : > { %23837 = vst [vmem:[#allocation237_spill] sm:$0xff] %v19326_v44  ;;  %23838 = vst [vmem:[#allocation238_spill] sm:$0xff] %v19328_v61 }
 0x28b   : > { %3297 = vmatmul.mubr.bf16.gmra.mrb[244].mxu0 %v16865_v24  ;;  %4290 = vmatmul.mubr.bf16.gmra.mrb[244].mxu1 %v16865_v24  ;;  %v16869_v24 = vld [vmem:[%s18342_s29 + $0x3f4] ss:$8 sps:$4 sm:$0xff]  }
 0x28c   : > { %14670 = vmatprep.mubr.msk.bf16.mxu0 %vm2352_vm0, %v16866_v47  ;;  %14767 = vmatprep.mubr.msk.bf16.mxu1 %vm2352_vm0, %v16866_v47 }
 0x28e   : > { %v19332_v58 = vpop.f32.mrb[140].mxu0  ;;  %v19334_v57 = vpop.f32.mrb[140].mxu1 }
 0x28f   : > { %23839 = vst [vmem:[#allocation239_spill] sm:$0xff] %v19332_v58  ;;  %23840 = vst [vmem:[#allocation240_spill] sm:$0xff] %v19334_v57  ;;  %v19336_v37 = vpop.f32.mrb[141].mxu0  ;;  %v19338_v27 = vpop.f32.mrb[141].mxu1 }
 0x290   : > { %23841 = vst [vmem:[#allocation241_spill] sm:$0xff] %v19336_v37  ;;  %23842 = vst [vmem:[#allocation242_spill] sm:$0xff] %v19338_v27  ;;  %v19341_v60 = vpop.f32.mrb[142].mxu0  ;;  %v19343_v61 = vpop.f32.mrb[142].mxu1 }
 0x291   : > { %23843 = vst [vmem:[#allocation243_spill] sm:$0xff] %v19341_v60  ;;  %23844 = vst [vmem:[#allocation244_spill] sm:$0xff] %v19343_v61  ;;  %v19346_v44 = vpop.f32.mrb[143].mxu0  ;;  %v19348_v54 = vpop.f32.mrb[143].mxu1  ;;  %v16871_v61 = vld [vmem:[%s18342_s29 + $0x3f0] ss:$8 sps:$4 sm:$0xff]  }
 0x292   : > { %23845 = vst [vmem:[#allocation245_spill] sm:$0xff] %v19346_v44  ;;  %23846 = vst [vmem:[#allocation246_spill] sm:$0xff] %v19348_v54  ;;  %v16874_v54 = vld [vmem:[%s18342_s29 + $0x404] ss:$8 sps:$4 sm:$0xff]  }
 0x293   : > { %3307 = vmatmul.mubr.bf16.gmra.mrb[248].mxu0 %v16868_v59  ;;  %4300 = vmatmul.mubr.bf16.gmra.mrb[248].mxu1 %v16868_v59 }
 0x294   : > { %14671 = vmatprep.mubr.msk.bf16.mxu0 %vm2352_vm0, %v16869_v24  ;;  %14768 = vmatprep.mubr.msk.bf16.mxu1 %vm2352_vm0, %v16869_v24  ;;  %v16931_v24 = vld [vmem:[%s23510_s3 + $0x1a4] ss:$16 sps:$4 sm:$0xff]  }
 0x295   : > { %8038 = vmatprep.subr.bf16.mxu0 %v16931_v24 }
 0x296   : > { %v19352_v47 = vpop.f32.mrb[144].mxu0  ;;  %v19354_v27 = vpop.f32.mrb[144].mxu1 }
 0x297   : > { %23847 = vst [vmem:[#allocation247_spill] sm:$0xff] %v19352_v47  ;;  %23848 = vst [vmem:[#allocation248_spill] sm:$0xff] %v19354_v27  ;;  %v19356_v37 = vpop.f32.mrb[145].mxu0  ;;  %v19358_v60 = vpop.f32.mrb[145].mxu1  ;;  %v16872_v47 = vld [vmem:[%s18342_s29 + $0x400] ss:$8 sps:$4 sm:$0xff]  }
 0x298   : > { %23849 = vst [vmem:[#allocation249_spill] sm:$0xff] %v19356_v37  ;;  %23850 = vst [vmem:[#allocation250_spill] sm:$0xff] %v19358_v60  ;;  %v19361_v57 = vpop.f32.mrb[146].mxu0  ;;  %v19363_v44 = vpop.f32.mrb[146].mxu1  ;;  %v16929_v37 = vld [vmem:[%s23510_s3 + $0x1a0] ss:$16 sps:$4 sm:$0xff]  }
 0x299   : > { %23851 = vst [vmem:[#allocation251_spill] sm:$0xff] %v19361_v57  ;;  %23852 = vst [vmem:[#allocation252_spill] sm:$0xff] %v19363_v44  ;;  %v19366_v58 = vpop.f32.mrb[147].mxu0  ;;  %v19368_v59 = vpop.f32.mrb[147].mxu1  ;;  %v16932_v57 = vld [vmem:[%s23510_s3 + $0x1a8] ss:$16 sps:$4 sm:$0xff]   ;;  %8039 = vmatpush1.bf16.msra.mxu0 %v16929_v37 }
 0x29a   : > { %23853 = vst [vmem:[#allocation253_spill] sm:$0xff] %v19366_v58  ;;  %23854 = vst [vmem:[#allocation254_spill] sm:$0xff] %v19368_v59  ;;  %v16934_v44 = vld [vmem:[%s23510_s3 + $0x1ac] ss:$16 sps:$4 sm:$0xff]  }
 0x29b   : > { %3317 = vmatmul.mubr.bf16.gmra.mrb[252].mxu0 %v16871_v61  ;;  %4310 = vmatmul.mubr.bf16.gmra.mrb[252].mxu1 %v16871_v61 }
 0x29c   : > { %14672 = vmatprep.mubr.msk.bf16.mxu0 %vm2352_vm0, %v16874_v54  ;;  %14769 = vmatprep.mubr.msk.bf16.mxu1 %vm2352_vm0, %v16874_v54  ;;  %v16877_v54 = vld [vmem:[%s18342_s29 + $0x414] ss:$8 sps:$4 sm:$0xff]  }
 0x29d   : > { %9803 = vmatprep.subr.bf16.mxu1 %v16934_v44 }
 0x29e   : > { %v19384_v59 = vpop.f32.mrb[148].mxu0  ;;  %v19386_v58 = vpop.f32.mrb[148].mxu1  ;;  %9804 = vmatpush1.bf16.msra.mxu1 %v16932_v57 }
 0x29f   : > { %23855 = vst [vmem:[#allocation255_spill] sm:$0xff] %v19384_v59  ;;  %23856 = vst [vmem:[#allocation256_spill] sm:$0xff] %v19386_v58  ;;  %v19388_v60 = vpop.f32.mrb[149].mxu0  ;;  %v19390_v27 = vpop.f32.mrb[149].mxu1 }
 0x2a0   : > { %23857 = vst [vmem:[#allocation257_spill] sm:$0xff] %v19388_v60  ;;  %23858 = vst [vmem:[#allocation258_spill] sm:$0xff] %v19390_v27  ;;  %v19393_v34 = vpop.f32.mrb[150].mxu0  ;;  %v19395_v61 = vpop.f32.mrb[150].mxu1 }
 0x2a1   : > { %23859 = vst [vmem:[#allocation259_spill] sm:$0xff] %v19393_v34  ;;  %23860 = vst [vmem:[#allocation260_spill] sm:$0xff] %v19395_v61  ;;  %v19398_v24 = vpop.f32.mrb[151].mxu0  ;;  %v19400_v44 = vpop.f32.mrb[151].mxu1  ;;  %v16875_v61 = vld [vmem:[%s18342_s29 + $0x410] ss:$8 sps:$4 sm:$0xff]  }
 0x2a2   : > { %23861 = vst [vmem:[#allocation261_spill] sm:$0xff] %v19398_v24  ;;  %23862 = vst [vmem:[#allocation262_spill] sm:$0xff] %v19400_v44 }
 0x2a3   : > { %3327 = vmatmul.mubr.bf16.gmra.mrb[0].mxu0 %v16872_v47  ;;  %4320 = vmatmul.mubr.bf16.gmra.mrb[0].mxu1 %v16872_v47  ;;  %v16880_v47 = vld [vmem:[%s18342_s29 + $0x424] ss:$8 sps:$4 sm:$0xff]  }
 0x2a4   : > { %14673 = vmatprep.mubr.msk.bf16.mxu0 %vm2352_vm0, %v16877_v54  ;;  %14770 = vmatprep.mubr.msk.bf16.mxu1 %vm2352_vm0, %v16877_v54 }
 0x2a6   : > { %v19404_v57 = vpop.f32.mrb[152].mxu0  ;;  %v19406_v37 = vpop.f32.mrb[152].mxu1 }
 0x2a7   : > { %23863 = vst [vmem:[#allocation263_spill] sm:$0xff] %v19404_v57  ;;  %23864 = vst [vmem:[#allocation264_spill] sm:$0xff] %v19406_v37  ;;  %v19408_v27 = vpop.f32.mrb[153].mxu0  ;;  %v19410_v34 = vpop.f32.mrb[153].mxu1 }
 0x2a8   : > { %23865 = vst [vmem:[#allocation265_spill] sm:$0xff] %v19408_v27  ;;  %23866 = vst [vmem:[#allocation266_spill] sm:$0xff] %v19410_v34  ;;  %v19413_v60 = vpop.f32.mrb[154].mxu0  ;;  %v19415_v44 = vpop.f32.mrb[154].mxu1 }
 0x2a9   : > { %23867 = vst [vmem:[#allocation267_spill] sm:$0xff] %v19413_v60  ;;  %23868 = vst [vmem:[#allocation268_spill] sm:$0xff] %v19415_v44  ;;  %v19418_v24 = vpop.f32.mrb[155].mxu0  ;;  %v19420_v58 = vpop.f32.mrb[155].mxu1  ;;  %v16878_v44 = vld [vmem:[%s18342_s29 + $0x420] ss:$8 sps:$4 sm:$0xff]  }
 0x2aa   : > { %23869 = vst [vmem:[#allocation269_spill] sm:$0xff] %v19418_v24  ;;  %23870 = vst [vmem:[#allocation270_spill] sm:$0xff] %v19420_v58 }
 0x2ab   : > { %3337 = vmatmul.mubr.bf16.gmra.mrb[4].mxu0 %v16875_v61  ;;  %4330 = vmatmul.mubr.bf16.gmra.mrb[4].mxu1 %v16875_v61  ;;  %v16889_v61 = vld [vmem:[%s18342_s29 + $0x434] ss:$8 sps:$4 sm:$0xff]  }
 0x2ac   : > { %14674 = vmatprep.mubr.msk.bf16.mxu0 %vm2352_vm0, %v16880_v47  ;;  %14771 = vmatprep.mubr.msk.bf16.mxu1 %vm2352_vm0, %v16880_v47 }
 0x2ae   : > { %v19424_v54 = vpop.f32.mrb[156].mxu0  ;;  %v19426_v34 = vpop.f32.mrb[156].mxu1 }
 0x2af   : > { %23871 = vst [vmem:[#allocation271_spill] sm:$0xff] %v19424_v54  ;;  %23872 = vst [vmem:[#allocation272_spill] sm:$0xff] %v19426_v34  ;;  %v19428_v27 = vpop.f32.mrb[157].mxu0  ;;  %v19430_v60 = vpop.f32.mrb[157].mxu1 }
 0x2b0   : > { %23873 = vst [vmem:[#allocation273_spill] sm:$0xff] %v19428_v27  ;;  %23874 = vst [vmem:[#allocation274_spill] sm:$0xff] %v19430_v60  ;;  %v19433_v37 = vpop.f32.mrb[158].mxu0  ;;  %v19435_v58 = vpop.f32.mrb[158].mxu1 }
 0x2b1   : > { %23875 = vst [vmem:[#allocation275_spill] sm:$0xff] %v19433_v37  ;;  %23876 = vst [vmem:[#allocation276_spill] sm:$0xff] %v19435_v58  ;;  %v19438_v24 = vpop.f32.mrb[159].mxu0  ;;  %v19440_v57 = vpop.f32.mrb[159].mxu1  ;;  %v16887_v58 = vld [vmem:[%s18342_s29 + $0x430] ss:$8 sps:$4 sm:$0xff]  }
 0x2b2   : > { %23877 = vst [vmem:[#allocation277_spill] sm:$0xff] %v19438_v24  ;;  %23878 = vst [vmem:[#allocation278_spill] sm:$0xff] %v19440_v57 }
 0x2b3   : > { %3347 = vmatmul.mubr.bf16.gmra.mrb[8].mxu0 %v16878_v44  ;;  %4340 = vmatmul.mubr.bf16.gmra.mrb[8].mxu1 %v16878_v44  ;;  %v16892_v44 = vld [vmem:[%s18342_s29 + $0x444] ss:$8 sps:$4 sm:$0xff]  }
 0x2b4   : > { %14675 = vmatprep.mubr.msk.bf16.mxu0 %vm2352_vm0, %v16889_v61  ;;  %14772 = vmatprep.mubr.msk.bf16.mxu1 %vm2352_vm0, %v16889_v61 }
 0x2b6   : > { %v19444_v47 = vpop.f32.mrb[160].mxu0  ;;  %v19446_v60 = vpop.f32.mrb[160].mxu1 }
 0x2b7   : > { %23879 = vst [vmem:[#allocation279_spill] sm:$0xff] %v19444_v47  ;;  %23880 = vst [vmem:[#allocation280_spill] sm:$0xff] %v19446_v60  ;;  %v19448_v27 = vpop.f32.mrb[161].mxu0  ;;  %v19450_v37 = vpop.f32.mrb[161].mxu1 }
 0x2b8   : > { %23881 = vst [vmem:[#allocation281_spill] sm:$0xff] %v19448_v27  ;;  %23882 = vst [vmem:[#allocation282_spill] sm:$0xff] %v19450_v37  ;;  %v19453_v34 = vpop.f32.mrb[162].mxu0  ;;  %v19455_v57 = vpop.f32.mrb[162].mxu1 }
 0x2b9   : > { %23883 = vst [vmem:[#allocation283_spill] sm:$0xff] %v19453_v34  ;;  %23884 = vst [vmem:[#allocation284_spill] sm:$0xff] %v19455_v57  ;;  %v19458_v24 = vpop.f32.mrb[163].mxu0  ;;  %v19460_v54 = vpop.f32.mrb[163].mxu1  ;;  %v16890_v57 = vld [vmem:[%s18342_s29 + $0x440] ss:$8 sps:$4 sm:$0xff]  }
 0x2ba   : > { %23885 = vst [vmem:[#allocation285_spill] sm:$0xff] %v19458_v24  ;;  %23886 = vst [vmem:[#allocation286_spill] sm:$0xff] %v19460_v54 }
 0x2bb   : > { %3357 = vmatmul.mubr.bf16.gmra.mrb[12].mxu0 %v16887_v58  ;;  %4350 = vmatmul.mubr.bf16.gmra.mrb[12].mxu1 %v16887_v58  ;;  %v16895_v58 = vld [vmem:[%s18342_s29 + $0x454] ss:$8 sps:$4 sm:$0xff]  }
 0x2bc   : > { %14676 = vmatprep.mubr.msk.bf16.mxu0 %vm2352_vm0, %v16892_v44  ;;  %14773 = vmatprep.mubr.msk.bf16.mxu1 %vm2352_vm0, %v16892_v44 }
 0x2be   : > { %v19464_v61 = vpop.f32.mrb[164].mxu0  ;;  %v19466_v37 = vpop.f32.mrb[164].mxu1 }
 0x2bf   : > { %23887 = vst [vmem:[#allocation287_spill] sm:$0xff] %v19464_v61  ;;  %23888 = vst [vmem:[#allocation288_spill] sm:$0xff] %v19466_v37  ;;  %v19468_v27 = vpop.f32.mrb[165].mxu0  ;;  %v19470_v34 = vpop.f32.mrb[165].mxu1 }
 0x2c0   : > { %23889 = vst [vmem:[#allocation289_spill] sm:$0xff] %v19468_v27  ;;  %23890 = vst [vmem:[#allocation290_spill] sm:$0xff] %v19470_v34  ;;  %v19473_v60 = vpop.f32.mrb[166].mxu0  ;;  %v19475_v54 = vpop.f32.mrb[166].mxu1 }
 0x2c1   : > { %23891 = vst [vmem:[#allocation291_spill] sm:$0xff] %v19473_v60  ;;  %23892 = vst [vmem:[#allocation292_spill] sm:$0xff] %v19475_v54  ;;  %v19478_v24 = vpop.f32.mrb[167].mxu0  ;;  %v19480_v47 = vpop.f32.mrb[167].mxu1  ;;  %v16893_v54 = vld [vmem:[%s18342_s29 + $0x450] ss:$8 sps:$4 sm:$0xff]  }
 0x2c2   : > { %23893 = vst [vmem:[#allocation293_spill] sm:$0xff] %v19478_v24  ;;  %23894 = vst [vmem:[#allocation294_spill] sm:$0xff] %v19480_v47  ;;  %v16898_v47 = vld [vmem:[%s18342_s29 + $0x464] ss:$8 sps:$4 sm:$0xff]  }
 0x2c3   : > { %3367 = vmatmul.mubr.bf16.gmra.mrb[16].mxu0 %v16890_v57  ;;  %4360 = vmatmul.mubr.bf16.gmra.mrb[16].mxu1 %v16890_v57 }
 0x2c4   : > { %14677 = vmatprep.mubr.msk.bf16.mxu0 %vm2352_vm0, %v16895_v58  ;;  %14774 = vmatprep.mubr.msk.bf16.mxu1 %vm2352_vm0, %v16895_v58  ;;  %v16955_v58 = vld [vmem:[%s23510_s3 + $0x1c4] ss:$16 sps:$4 sm:$0xff]  }
 0x2c5   : > { %8040 = vmatprep.subr.bf16.mxu0 %v16955_v58 }
 0x2c6   : > { %v19484_v44 = vpop.f32.mrb[168].mxu0  ;;  %v19486_v34 = vpop.f32.mrb[168].mxu1 }
 0x2c7   : > { %23895 = vst [vmem:[#allocation295_spill] sm:$0xff] %v19484_v44  ;;  %23896 = vst [vmem:[#allocation296_spill] sm:$0xff] %v19486_v34  ;;  %v19488_v27 = vpop.f32.mrb[169].mxu0  ;;  %v19490_v60 = vpop.f32.mrb[169].mxu1  ;;  %v16896_v44 = vld [vmem:[%s18342_s29 + $0x460] ss:$8 sps:$4 sm:$0xff]  }
 0x2c8   : > { %23897 = vst [vmem:[#allocation297_spill] sm:$0xff] %v19488_v27  ;;  %23898 = vst [vmem:[#allocation298_spill] sm:$0xff] %v19490_v60  ;;  %v19493_v37 = vpop.f32.mrb[170].mxu0  ;;  %v19495_v24 = vpop.f32.mrb[170].mxu1  ;;  %v16953_v27 = vld [vmem:[%s23510_s3 + $0x1c0] ss:$16 sps:$4 sm:$0xff]  }
 0x2c9   : > { %23899 = vst [vmem:[#allocation299_spill] sm:$0xff] %v19493_v37  ;;  %23900 = vst [vmem:[#allocation300_spill] sm:$0xff] %v19495_v24  ;;  %v19498_v61 = vpop.f32.mrb[171].mxu0  ;;  %v19500_v57 = vpop.f32.mrb[171].mxu1  ;;  %v16956_v37 = vld [vmem:[%s23510_s3 + $0x1c8] ss:$16 sps:$4 sm:$0xff]   ;;  %8041 = vmatpush1.bf16.msra.mxu0 %v16953_v27 }
 0x2ca   : > { %23901 = vst [vmem:[#allocation301_spill] sm:$0xff] %v19498_v61  ;;  %23902 = vst [vmem:[#allocation302_spill] sm:$0xff] %v19500_v57  ;;  %v16958_v24 = vld [vmem:[%s23510_s3 + $0x1cc] ss:$16 sps:$4 sm:$0xff]  }
 0x2cb   : > { %3377 = vmatmul.mubr.bf16.gmra.mrb[20].mxu0 %v16893_v54  ;;  %4370 = vmatmul.mubr.bf16.gmra.mrb[20].mxu1 %v16893_v54 }
 0x2cc   : > { %14678 = vmatprep.mubr.msk.bf16.mxu0 %vm2352_vm0, %v16898_v47  ;;  %14775 = vmatprep.mubr.msk.bf16.mxu1 %vm2352_vm0, %v16898_v47  ;;  %v16901_v47 = vld [vmem:[%s18342_s29 + $0x474] ss:$8 sps:$4 sm:$0xff]  }
 0x2cd   : > { %9805 = vmatprep.subr.bf16.mxu1 %v16958_v24 }
 0x2ce   : > { %v19516_v57 = vpop.f32.mrb[172].mxu0  ;;  %v19518_v61 = vpop.f32.mrb[172].mxu1  ;;  %9806 = vmatpush1.bf16.msra.mxu1 %v16956_v37 }
 0x2cf   : > { %23903 = vst [vmem:[#allocation303_spill] sm:$0xff] %v19516_v57  ;;  %23904 = vst [vmem:[#allocation304_spill] sm:$0xff] %v19518_v61  ;;  %v19520_v60 = vpop.f32.mrb[173].mxu0  ;;  %v19522_v34 = vpop.f32.mrb[173].mxu1 }
 0x2d0   : > { %23905 = vst [vmem:[#allocation305_spill] sm:$0xff] %v19520_v60  ;;  %23906 = vst [vmem:[#allocation306_spill] sm:$0xff] %v19522_v34  ;;  %v19525_v59 = vpop.f32.mrb[174].mxu0  ;;  %v19527_v54 = vpop.f32.mrb[174].mxu1 }
 0x2d1   : > { %23907 = vst [vmem:[#allocation307_spill] sm:$0xff] %v19525_v59  ;;  %23908 = vst [vmem:[#allocation308_spill] sm:$0xff] %v19527_v54  ;;  %v19530_v58 = vpop.f32.mrb[175].mxu0  ;;  %v19532_v24 = vpop.f32.mrb[175].mxu1  ;;  %v16899_v54 = vld [vmem:[%s18342_s29 + $0x470] ss:$8 sps:$4 sm:$0xff]  }
 0x2d2   : > { %23909 = vst [vmem:[#allocation309_spill] sm:$0xff] %v19530_v58  ;;  %23910 = vst [vmem:[#allocation310_spill] sm:$0xff] %v19532_v24 }
 0x2d3   : > { %3387 = vmatmul.mubr.bf16.gmra.mrb[24].mxu0 %v16896_v44  ;;  %4380 = vmatmul.mubr.bf16.gmra.mrb[24].mxu1 %v16896_v44  ;;  %v16904_v44 = vld [vmem:[%s18342_s29 + $0x484] ss:$8 sps:$4 sm:$0xff]  }
 0x2d4   : > { %14679 = vmatprep.mubr.msk.bf16.mxu0 %vm2352_vm0, %v16901_v47  ;;  %14776 = vmatprep.mubr.msk.bf16.mxu1 %vm2352_vm0, %v16901_v47 }
 0x2d6   : > { %v19536_v27 = vpop.f32.mrb[176].mxu0  ;;  %v19538_v37 = vpop.f32.mrb[176].mxu1 }
 0x2d7   : > { %23911 = vst [vmem:[#allocation311_spill] sm:$0xff] %v19536_v27  ;;  %23912 = vst [vmem:[#allocation312_spill] sm:$0xff] %v19538_v37  ;;  %v19540_v34 = vpop.f32.mrb[177].mxu0  ;;  %v19542_v59 = vpop.f32.mrb[177].mxu1 }
 0x2d8   : > { %23913 = vst [vmem:[#allocation313_spill] sm:$0xff] %v19540_v34  ;;  %23914 = vst [vmem:[#allocation314_spill] sm:$0xff] %v19542_v59  ;;  %v19545_v60 = vpop.f32.mrb[178].mxu0  ;;  %v19547_v24 = vpop.f32.mrb[178].mxu1 }
 0x2d9   : > { %23915 = vst [vmem:[#allocation315_spill] sm:$0xff] %v19545_v60  ;;  %23916 = vst [vmem:[#allocation316_spill] sm:$0xff] %v19547_v24  ;;  %v19550_v58 = vpop.f32.mrb[179].mxu0  ;;  %v19552_v61 = vpop.f32.mrb[179].mxu1  ;;  %v16902_v24 = vld [vmem:[%s18342_s29 + $0x480] ss:$8 sps:$4 sm:$0xff]  }
 0x2da   : > { %23917 = vst [vmem:[#allocation317_spill] sm:$0xff] %v19550_v58  ;;  %23918 = vst [vmem:[#allocation318_spill] sm:$0xff] %v19552_v61 }
 0x2db   : > { %3397 = vmatmul.mubr.bf16.gmra.mrb[28].mxu0 %v16899_v54  ;;  %4390 = vmatmul.mubr.bf16.gmra.mrb[28].mxu1 %v16899_v54  ;;  %v16913_v54 = vld [vmem:[%s18342_s29 + $0x494] ss:$8 sps:$4 sm:$0xff]  }
 0x2dc   : > { %14680 = vmatprep.mubr.msk.bf16.mxu0 %vm2352_vm0, %v16904_v44  ;;  %14777 = vmatprep.mubr.msk.bf16.mxu1 %vm2352_vm0, %v16904_v44 }
 0x2de   : > { %v19556_v47 = vpop.f32.mrb[180].mxu0  ;;  %v19558_v59 = vpop.f32.mrb[180].mxu1 }
 0x2df   : > { %23919 = vst [vmem:[#allocation319_spill] sm:$0xff] %v19556_v47  ;;  %23920 = vst [vmem:[#allocation320_spill] sm:$0xff] %v19558_v59  ;;  %v19560_v34 = vpop.f32.mrb[181].mxu0  ;;  %v19562_v60 = vpop.f32.mrb[181].mxu1 }
 0x2e0   : > { %23921 = vst [vmem:[#allocation321_spill] sm:$0xff] %v19560_v34  ;;  %23922 = vst [vmem:[#allocation322_spill] sm:$0xff] %v19562_v60  ;;  %v19565_v37 = vpop.f32.mrb[182].mxu0  ;;  %v19567_v61 = vpop.f32.mrb[182].mxu1 }
 0x2e1   : > { %23923 = vst [vmem:[#allocation323_spill] sm:$0xff] %v19565_v37  ;;  %23924 = vst [vmem:[#allocation324_spill] sm:$0xff] %v19567_v61  ;;  %v19570_v58 = vpop.f32.mrb[183].mxu0  ;;  %v19572_v27 = vpop.f32.mrb[183].mxu1  ;;  %v16911_v61 = vld [vmem:[%s18342_s29 + $0x490] ss:$8 sps:$4 sm:$0xff]  }
 0x2e2   : > { %23925 = vst [vmem:[#allocation325_spill] sm:$0xff] %v19570_v58  ;;  %23926 = vst [vmem:[#allocation326_spill] sm:$0xff] %v19572_v27  ;;  %v16916_v27 = vld [vmem:[%s18342_s29 + $0x4a4] ss:$8 sps:$4 sm:$0xff]  }
 0x2e3   : > { %3407 = vmatmul.mubr.bf16.gmra.mrb[32].mxu0 %v16902_v24  ;;  %4400 = vmatmul.mubr.bf16.gmra.mrb[32].mxu1 %v16902_v24 }
 0x2e4   : > { %14681 = vmatprep.mubr.msk.bf16.mxu0 %vm2352_vm0, %v16913_v54  ;;  %14778 = vmatprep.mubr.msk.bf16.mxu1 %vm2352_vm0, %v16913_v54  ;;  %v5218_v54 = vlaneseq }
 0x2e6   : > { %v19576_v44 = vpop.f32.mrb[184].mxu0  ;;  %v19578_v60 = vpop.f32.mrb[184].mxu1 }
 0x2e7   : > { %23927 = vst [vmem:[#allocation327_spill] sm:$0xff] %v19576_v44  ;;  %23928 = vst [vmem:[#allocation328_spill] sm:$0xff] %v19578_v60  ;;  %v19580_v34 = vpop.f32.mrb[185].mxu0  ;;  %v19582_v37 = vpop.f32.mrb[185].mxu1  ;;  %v16914_v60 = vld [vmem:[%s18342_s29 + $0x4a0] ss:$8 sps:$4 sm:$0xff]  }
 0x2e8   : > { %23929 = vst [vmem:[#allocation329_spill] sm:$0xff] %v19580_v34  ;;  %23930 = vst [vmem:[#allocation330_spill] sm:$0xff] %v19582_v37  ;;  %v19585_v59 = vpop.f32.mrb[186].mxu0  ;;  %v19587_v58 = vpop.f32.mrb[186].mxu1  ;;  %v19605_v44 = vshrl.u32 %v5218_v54, 7 }
 0x2e9   : > { %23931 = vst [vmem:[#allocation331_spill] sm:$0xff] %v19585_v59  ;;  %23932 = vst [vmem:[#allocation332_spill] sm:$0xff] %v19587_v58  ;;  %v19590_v24 = vpop.f32.mrb[187].mxu0  ;;  %v19592_v47 = vpop.f32.mrb[187].mxu1  ;;  %v5216_v54 = vld [vmem:[%s23509_s2] sm:$0x3] }
 0x2ea   : > { %23933 = vst [vmem:[#allocation333_spill] sm:$0xff] %v19590_v24  ;;  %23934 = vst [vmem:[#allocation334_spill] sm:$0xff] %v19592_v47 }
 0x2eb   : > { %3417 = vmatmul.mubr.bf16.gmra.mrb[36].mxu0 %v16911_v61  ;;  %4410 = vmatmul.mubr.bf16.gmra.mrb[36].mxu1 %v16911_v61  ;;  %23939 = vst [vmem:[#allocation339_spill] sm:$0xff] %v19605_v44  ;;  %v16919_v61 = vld [vmem:[%s18342_s29 + $0x4b4] ss:$8 sps:$4 sm:$0xff]  }
 0x2ec   : > { %14682 = vmatprep.mubr.msk.bf16.mxu0 %vm2352_vm0, %v16916_v27  ;;  %14779 = vmatprep.mubr.msk.bf16.mxu1 %vm2352_vm0, %v16916_v27 }
 0x2ee   : > { %v19596_v37 = vpop.f32.mrb[188].mxu0  ;;  %v19598_v34 = vpop.f32.mrb[188].mxu1 }
 0x2ef   : > { %23935 = vst [vmem:[#allocation335_spill] sm:$0xff] %v19596_v37  ;;  %23936 = vst [vmem:[#allocation336_spill] sm:$0xff] %v19598_v34  ;;  %v19600_v59 = vpop.f32.mrb[189].mxu0  ;;  %v19602_v58 = vpop.f32.mrb[189].mxu1 }
 0x2f0   : > { %23937 = vst [vmem:[#allocation337_spill] sm:$0xff] %v19600_v59  ;;  %23938 = vst [vmem:[#allocation338_spill] sm:$0xff] %v19602_v58  ;;  %v19607_v24 = vpop.f32.mrb[190].mxu0  ;;  %v19609_v47 = vpop.f32.mrb[190].mxu1  ;;  %v19617_v59 = vsub.s32 0, %v19605_v44 }
 0x2f1   : > { %23940 = vst [vmem:[#allocation340_spill] sm:$0xff] %v19607_v24  ;;  %23941 = vst [vmem:[#allocation341_spill] sm:$0xff] %v19609_v47  ;;  %v19612_v57 = vpop.f32.mrb[191].mxu0  ;;  %v19614_v27 = vpop.f32.mrb[191].mxu1  ;;  %v19625_v47 = vsub.s32 1, %v19605_v44 }
 0x2f2   : > { %23942 = vst [vmem:[#allocation342_spill] sm:$0xff] %v19612_v57  ;;  %23943 = vst [vmem:[#allocation343_spill] sm:$0xff] %v19614_v27  ;;  %v19630_v58 = vrot.slane %v5216_v54, %v19617_v59 }
 0x2f3   : > { %3427 = vmatmul.mubr.bf16.gmra.mrb[40].mxu0 %v16914_v60  ;;  %4420 = vmatmul.mubr.bf16.gmra.mrb[40].mxu1 %v16914_v60  ;;  %23944 = vst [vmem:[#allocation344_spill] sm:$0xff] %v19617_v59  ;;  %23945 = vst [vmem:[#allocation345_spill] sm:$0xff] %v19625_v47 }
 0x2f4   : > { %14683 = vmatprep.mubr.msk.bf16.mxu0 %vm2352_vm0, %v16919_v61  ;;  %14780 = vmatprep.mubr.msk.bf16.mxu1 %vm2352_vm0, %v16919_v61  ;;  %v19635_v61 = vrot.slane %v5216_v54, %v19625_v47 }
 0x2f6   : > { %v3168_v57 = vpop.f32.mrb[192].mxu0  ;;  %v4161_v24 = vpop.f32.mrb[192].mxu1 }
 0x2f7   : > { %v4640_v27 = vmax.f32 %v18573_v62, %v3168_v57  ;;  %v4642_v60 = vmax.f32 %v18575_v63, %v4161_v24  ;;  %v3170_v34 = vpop.f32.mrb[193].mxu0  ;;  %v4163_v37 = vpop.f32.mrb[193].mxu1 }
 0x2f8   : > { %v3172_v14 = vpop.f32.mrb[194].mxu0  ;;  %v4165_v7 = vpop.f32.mrb[194].mxu1  ;;  %v4641_v44 = vmax.f32 %v18577_v0, %v3170_v34  ;;  %v4643_v56 = vmax.f32 %v18579_v1, %v4163_v37 }
 0x2f9   : > { %v5024_v55 = vmax.f32 %v4640_v27, %v4642_v60  ;;  %v4644_v62 = vmax.f32 %v18581_v2, %v3172_v14  ;;  %v4646_v63 = vmax.f32 %v18583_v3, %v4165_v7  ;;  %v3174_v57 = vpop.f32.mrb[195].mxu0  ;;  %v4167_v24 = vpop.f32.mrb[195].mxu1 }
 0x2fa   : > { %v4645_v59 = vmax.f32 %v18586_v5, %v3174_v57  ;;  %v4647_v53 = vmax.f32 %v18588_v6, %v4167_v24  ;;  %v5025_v52 = vmax.f32 %v4641_v44, %v4643_v56  ;;  %v16920_v5 = vld [vmem:[%s18342_s29 + $0x4c0] ss:$8 sps:$4 sm:$0xff]   ;;  %v16979_v44 = vld [vmem:[%s23510_s3 + $0x1e4] ss:$16 sps:$4 sm:$0xff]  }
 0x2fb   : > { %v5228_v54 = vadd.f32 %v19630_v58, %v5024_v55  ;;  %v5026_v47 = vmax.f32 %v4644_v62, %v4646_v63  ;;  %3437 = vmatmul.mubr.bf16.gmra.mrb[44].mxu0 %v16917_v17  ;;  %4430 = vmatmul.mubr.bf16.gmra.mrb[44].mxu1 %v16917_v17 }
 0x2fc   : > { %14684 = vmatprep.mubr.msk.bf16.mxu0 %vm2352_vm0, %v16922_v4  ;;  %14781 = vmatprep.mubr.msk.bf16.mxu1 %vm2352_vm0, %v16922_v4  ;;  %v5027_v0 = vmax.f32 %v4645_v59, %v4647_v53  ;;  %v5229_v1 = vadd.f32 %v19635_v61, %v5025_v52 }
 0x2fd   : > { %vm5420_vm2 = vcmp.gt.f32.partialorder %v5228_v54, 0.0  ;;  %v5612_v2 = vmul.f32 0.01, %v5228_v54  ;;  %v5230_v3 = vadd.f32 %v19630_v58, %v5026_v47  ;;  %v16925_v47 = vld [vmem:[%s18342_s29 + $0x4d4] ss:$8 sps:$4 sm:$0xff]   ;;  %8042 = vmatprep.subr.bf16.mxu0 %v16979_v44 }
 0x2fe   : > { %v3178_v6 = vpop.f32.mrb[196].mxu0  ;;  %v4171_v56 = vpop.f32.mrb[196].mxu1  ;;  %v5231_v55 = vadd.f32 %v19635_v61, %v5027_v0  ;;  %vm5421_vm3 = vcmp.gt.f32.partialorder %v5229_v1, 0.0  ;;  %v5613_v7 = vmul.f32 0.01, %v5229_v1 }
 0x2ff   : > { %vm5422_vm4 = vcmp.gt.f32.partialorder %v5230_v3, 0.0  ;;  %v5614_v14 = vmul.f32 0.01, %v5230_v3  ;;  %v4648_v17 = vmax.f32 %v18593_v8, %v3178_v6  ;;  %v3180_v4 = vpop.f32.mrb[197].mxu0  ;;  %v4173_v53 = vpop.f32.mrb[197].mxu1  ;;  %v5804_v34 = vsel %vm5420_vm2, %v5228_v54, %v5612_v2 }
 0x300   : > { %v4650_v52 = vmax.f32 %v18595_v9, %v4171_v56  ;;  %v3182_v59 = vpop.f32.mrb[198].mxu0  ;;  %v4175_v37 = vpop.f32.mrb[198].mxu1  ;;  %v4649_v27 = vmax.f32 %v18597_v10, %v3180_v4  ;;  %v4651_v60 = vmax.f32 %v18599_v11, %v4173_v53  ;;  %v16977_v9 = vld [vmem:[%s23510_s3 + $0x1e0] ss:$16 sps:$4 sm:$0xff]   ;;  %v16982_v54 = vld [vmem:[%s23510_s3 + $0x1ec] ss:$16 sps:$4 sm:$0xff]   ;;  %v5805_v0 = vsel %vm5421_vm3, %v5229_v1, %v5613_v7 }
 0x301   : > { %v5806_v62 = vsel %vm5422_vm4, %v5230_v3, %v5614_v14  ;;  %v4652_v63 = vmax.f32 %v18601_v12, %v3182_v59  ;;  %v4654_v8 = vmax.f32 %v18603_v13, %v4175_v37  ;;  %v3184_v57 = vpop.f32.mrb[199].mxu0  ;;  %v4177_v24 = vpop.f32.mrb[199].mxu1  ;;  %v16980_v12 = vld [vmem:[%s23510_s3 + $0x1e8] ss:$16 sps:$4 sm:$0xff]   ;;  %vm5423_vm5 = vcmp.gt.f32.partialorder %v5231_v55, 0.0  ;;  %9807 = vmatprep.subr.bf16.mxu1 %v16982_v54  ;;  %8043 = vmatpush1.bf16.msra.mxu0 %v16977_v9 }
 0x302   : > { %v19667_v10 = vpack.c.bf16 %v5806_v62, %v5804_v34  ;;  %v5028_v11 = vmax.f32 %v4648_v17, %v4650_v52  ;;  %v5615_v13 = vmul.f32 0.01, %v5231_v55  ;;  %v4653_v3 = vmax.f32 %v18606_v15, %v3184_v57  ;;  %v16923_v17 = vld [vmem:[%s18342_s29 + $0x4d0] ss:$8 sps:$4 sm:$0xff]   ;;  %v16928_v34 = vld [vmem:[%s18342_s29 + $0x4e4] ss:$8 sps:$4 sm:$0xff]   ;;  %9808 = vmatpush1.bf16.msra.mxu1 %v16980_v12 }
 0x303   : > { %v5030_v2 = vmax.f32 %v4652_v63, %v4654_v8  ;;  %3447 = vmatmul.mubr.bf16.gmra.mrb[48].mxu0 %v16920_v5  ;;  %4440 = vmatmul.mubr.bf16.gmra.mrb[48].mxu1 %v16920_v5  ;;  %v4655_v6 = vmax.f32 %v18608_v16, %v4177_v24  ;;  %v5029_v7 = vmax.f32 %v4649_v27, %v4651_v60 }
 0x304   : > { %v5232_v1 = vadd.f32 %v19630_v58, %v5028_v11  ;;  %14685 = vmatprep.mubr.msk.bf16.mxu0 %vm2352_vm0, %v16925_v47  ;;  %14782 = vmatprep.mubr.msk.bf16.mxu1 %vm2352_vm0, %v16925_v47  ;;  %v5807_v56 = vsel %vm5423_vm5, %v5231_v55, %v5615_v13 }
 0x305   : > { %v5234_v14 = vadd.f32 %v19630_v58, %v5030_v2  ;;  %v19679_v4 = vpack.c.bf16 %v5807_v56, %v5805_v0  ;;  %v5031_v5 = vmax.f32 %v4653_v3, %v4655_v6  ;;  %v5233_v52 = vadd.f32 %v19635_v61, %v5029_v7 }
 0x306   : > { %vm5424_vm6 = vcmp.gt.f32.partialorder %v5232_v1, 0.0  ;;  %v5616_v15 = vmul.f32 0.01, %v5232_v1  ;;  %v3188_v16 = vpop.f32.mrb[200].mxu0  ;;  %v4181_v53 = vpop.f32.mrb[200].mxu1 }
 0x307   : > { %vm5426_vm7 = vcmp.gt.f32.partialorder %v5234_v14, 0.0  ;;  %v5618_v59 = vmul.f32 0.01, %v5234_v14  ;;  %v4656_v55 = vmax.f32 %v18613_v18, %v3188_v16  ;;  %v4658_v37 = vmax.f32 %v18615_v19, %v4181_v53  ;;  %v3190_v47 = vpop.f32.mrb[201].mxu0  ;;  %v4183_v44 = vpop.f32.mrb[201].mxu1 }
 0x308   : > { %v5808_v27 = vsel %vm5424_vm6, %v5232_v1, %v5616_v15  ;;  %v3192_v60 = vpop.f32.mrb[202].mxu0  ;;  %v4185_v62 = vpop.f32.mrb[202].mxu1  ;;  %v5235_v63 = vadd.f32 %v19635_v61, %v5031_v5  ;;  %vm5425_vm8 = vcmp.gt.f32.partialorder %v5233_v52, 0.0  ;;  %v5617_v8 = vmul.f32 0.01, %v5233_v52 }
 0x309   : > { %v5810_v57 = vsel %vm5426_vm7, %v5234_v14, %v5618_v59  ;;  %v5032_v24 = vmax.f32 %v4656_v55, %v4658_v37  ;;  %v4660_v9 = vmax.f32 %v18621_v22, %v3192_v60  ;;  %v4662_v54 = vmax.f32 %v18623_v23, %v4185_v62  ;;  %v3194_v0 = vpop.f32.mrb[203].mxu0  ;;  %v4187_v11 = vpop.f32.mrb[203].mxu1  ;;  %v16937_v55 = vld [vmem:[%s18342_s29 + $0x4f4] ss:$8 sps:$4 sm:$0xff]  }
 0x30a   : > { %vm5427_vm9 = vcmp.gt.f32.partialorder %v5235_v63, 0.0  ;;  %v5619_v18 = vmul.f32 0.01, %v5235_v63  ;;  %v5809_v19 = vsel %vm5425_vm8, %v5233_v52, %v5617_v8  ;;  %v19688_v12 = vpack.c.bf16 %v5810_v57, %v5808_v27 }
 0x30b   : > { %v5236_v13 = vadd.f32 %v19630_v58, %v5032_v24  ;;  %v5034_v2 = vmax.f32 %v4660_v9, %v4662_v54  ;;  %3457 = vmatmul.mubr.bf16.gmra.mrb[52].mxu0 %v16923_v17  ;;  %4450 = vmatmul.mubr.bf16.gmra.mrb[52].mxu1 %v16923_v17  ;;  %v4657_v3 = vmax.f32 %v18617_v20, %v3190_v47  ;;  %v16926_v17 = vld [vmem:[%s18342_s29 + $0x4e0] ss:$8 sps:$4 sm:$0xff]  }
 0x30c   : > { %14686 = vmatprep.mubr.msk.bf16.mxu0 %vm2352_vm0, %v16928_v34  ;;  %14783 = vmatprep.mubr.msk.bf16.mxu1 %vm2352_vm0, %v16928_v34  ;;  %v5811_v22 = vsel %vm5427_vm9, %v5235_v63, %v5619_v18  ;;  %v4659_v23 = vmax.f32 %v18619_v21, %v4183_v44  ;;  %v4661_v6 = vmax.f32 %v18626_v25, %v3194_v0  ;;  %v16935_v0 = vld [vmem:[%s18342_s29 + $0x4f0] ss:$8 sps:$4 sm:$0xff]  }
 0x30d   : > { %v5238_v1 = vadd.f32 %v19630_v58, %v5034_v2  ;;  %v19697_v56 = vpack.c.bf16 %v5811_v22, %v5809_v19  ;;  %v5620_v7 = vmul.f32 0.01, %v5236_v13  ;;  %v4663_v20 = vmax.f32 %v18628_v26, %v4187_v11 }
 0x30e   : > { %v3198_v14 = vpop.f32.mrb[204].mxu0  ;;  %v4191_v5 = vpop.f32.mrb[204].mxu1  ;;  %v5033_v15 = vmax.f32 %v4657_v3, %v4659_v23  ;;  %vm5428_vm10 = vcmp.gt.f32.partialorder %v5236_v13, 0.0 }
 0x30f   : > { %vm5430_vm11 = vcmp.gt.f32.partialorder %v5238_v1, 0.0  ;;  %v5622_v16 = vmul.f32 0.01, %v5238_v1  ;;  %v4664_v53 = vmax.f32 %v18633_v28, %v3198_v14  ;;  %v3200_v21 = vpop.f32.mrb[205].mxu0  ;;  %v4193_v34 = vpop.f32.mrb[205].mxu1  ;;  %v4666_v25 = vmax.f32 %v18635_v29, %v4191_v5 }
 0x310   : > { %v3202_v52 = vpop.f32.mrb[206].mxu0  ;;  %v4195_v59 = vpop.f32.mrb[206].mxu1  ;;  %v5035_v37 = vmax.f32 %v4661_v6, %v4663_v20  ;;  %v5237_v47 = vadd.f32 %v19635_v61, %v5033_v15  ;;  %v4665_v44 = vmax.f32 %v18637_v30, %v3200_v21  ;;  %v4667_v28 = vmax.f32 %v18639_v31, %v4193_v34  ;;  %v16940_v15 = vld [vmem:[%s18342_s29 + $0x504] ss:$8 sps:$4 sm:$0xff]  }
 0x311   : > { %v5814_v27 = vsel %vm5430_vm11, %v5238_v1, %v5622_v16  ;;  %v4668_v26 = vmax.f32 %v18641_v32, %v3202_v52  ;;  %v4670_v60 = vmax.f32 %v18643_v33, %v4195_v59  ;;  %v3204_v62 = vpop.f32.mrb[207].mxu0  ;;  %v4197_v63 = vpop.f32.mrb[207].mxu1  ;;  %v5812_v8 = vsel %vm5428_vm10, %v5236_v13, %v5620_v7 }
 0x312   : > { %v5036_v29 = vmax.f32 %v4664_v53, %v4666_v25  ;;  %v5239_v57 = vadd.f32 %v19635_v61, %v5035_v37  ;;  %v5621_v24 = vmul.f32 0.01, %v5237_v47  ;;  %vm5429_vm12 = vcmp.gt.f32.partialorder %v5237_v47, 0.0 }
 0x313   : > { %v5038_v9 = vmax.f32 %v4668_v26, %v4670_v60  ;;  %3467 = vmatmul.mubr.bf16.gmra.mrb[56].mxu0 %v16926_v17  ;;  %4460 = vmatmul.mubr.bf16.gmra.mrb[56].mxu1 %v16926_v17  ;;  %v19711_v30 = vpack.c.bf16 %v5814_v27, %v5812_v8  ;;  %v4669_v32 = vmax.f32 %v18646_v35, %v3204_v62  ;;  %v16938_v27 = vld [vmem:[%s18342_s29 + $0x500] ss:$8 sps:$4 sm:$0xff]  }
 0x314   : > { %v5240_v33 = vadd.f32 %v19630_v58, %v5036_v29  ;;  %14687 = vmatprep.mubr.msk.bf16.mxu0 %vm2352_vm0, %v16937_v55  ;;  %14784 = vmatprep.mubr.msk.bf16.mxu1 %vm2352_vm0, %v16937_v55  ;;  %vm5431_vm13 = vcmp.gt.f32.partialorder %v5239_v57, 0.0  ;;  %v5623_v31 = vmul.f32 0.01, %v5239_v57  ;;  %v4671_v11 = vmax.f32 %v18648_v36, %v4197_v63 }
 0x315   : > { %v5242_v54 = vadd.f32 %v19630_v58, %v5038_v9  ;;  %v5037_v18 = vmax.f32 %v4665_v44, %v4667_v28  ;;  %v5813_v35 = vsel %vm5429_vm12, %v5237_v47, %v5621_v24 }
 0x316   : > { %vm5432_vm14 = vcmp.gt.f32.partialorder %v5240_v33, 0.0  ;;  %v5624_v19 = vmul.f32 0.01, %v5240_v33  ;;  %v3208_v13 = vpop.f32.mrb[208].mxu0  ;;  %v4201_v2 = vpop.f32.mrb[208].mxu1  ;;  %v5815_v3 = vsel %vm5431_vm13, %v5239_v57, %v5623_v31 }
 0x317   : > { %vm5434_vm15 = vcmp.gt.f32.partialorder %v5242_v54, 0.0  ;;  %v5626_v22 = vmul.f32 0.01, %v5242_v54  ;;  %v4672_v23 = vmax.f32 %v18653_v38, %v3208_v13  ;;  %v4674_v6 = vmax.f32 %v18655_v39, %v4201_v2  ;;  %v3210_v1 = vpop.f32.mrb[209].mxu0  ;;  %v4203_v7 = vpop.f32.mrb[209].mxu1  ;;  %v23946_v2 = vld [vmem:[#allocation3_spill] sm:$0xff] }
 0x318   : > { %v5816_v14 = vsel %vm5432_vm14, %v5240_v33, %v5624_v19  ;;  %v4673_v36 = vmax.f32 %v18657_v40, %v3210_v1  ;;  %v4675_v5 = vmax.f32 %v18659_v41, %v4203_v7  ;;  %v3212_v17 = vpop.f32.mrb[210].mxu0  ;;  %v4205_v20 = vpop.f32.mrb[210].mxu1  ;;  %v19726_v16 = vpack.c.bf16 %v5815_v3, %v5813_v35  ;;  %v23947_v3 = vld [vmem:[#allocation4_spill] sm:$0xff] }
 0x319   : > { %v5818_v53 = vsel %vm5434_vm15, %v5242_v54, %v5626_v22  ;;  %v5040_v21 = vmax.f32 %v4672_v23, %v4674_v6  ;;  %v4676_v34 = vmax.f32 %v18661_v42, %v3212_v17  ;;  %v4678_v38 = vmax.f32 %v18663_v43, %v4205_v20  ;;  %v3214_v25 = vpop.f32.mrb[211].mxu0  ;;  %v4207_v39 = vpop.f32.mrb[211].mxu1 }
 0x31a   : > { %v4677_v52 = vmax.f32 %v18666_v45, %v3214_v25  ;;  %v4679_v59 = vmax.f32 %v18668_v46, %v4207_v39  ;;  %v5039_v40 = vmax.f32 %v4669_v32, %v4671_v11  ;;  %v5241_v41 = vadd.f32 %v19635_v61, %v5037_v18  ;;  %v16943_v18 = vld [vmem:[%s18342_s29 + $0x514] ss:$8 sps:$4 sm:$0xff]  }
 0x31b   : > { %v5244_v55 = vadd.f32 %v19630_v58, %v5040_v21  ;;  %v5042_v37 = vmax.f32 %v4676_v34, %v4678_v38  ;;  %3477 = vmatmul.mubr.bf16.gmra.mrb[60].mxu0 %v16935_v0  ;;  %4470 = vmatmul.mubr.bf16.gmra.mrb[60].mxu1 %v16935_v0  ;;  %v19734_v47 = vpack.c.bf16 %v5818_v53, %v5816_v14  ;;  %v16941_v34 = vld [vmem:[%s18342_s29 + $0x510] ss:$8 sps:$4 sm:$0xff]  }
 0x31c   : > { %14688 = vmatprep.mubr.msk.bf16.mxu0 %vm2352_vm0, %v16940_v15  ;;  %14785 = vmatprep.mubr.msk.bf16.mxu1 %vm2352_vm0, %v16940_v15  ;;  %v5243_v42 = vadd.f32 %v19635_v61, %v5039_v40  ;;  %vm5433_vm1 = vcmp.gt.f32.partialorder %v5241_v41, 0.0  ;;  %v5625_v43 = vmul.f32 0.01, %v5241_v41  ;;  %v5041_v45 = vmax.f32 %v4673_v36, %v4675_v5 }
 0x31d   : > { %vm5436_vm2 = vcmp.gt.f32.partialorder %v5244_v55, 0.0  ;;  %v5628_v46 = vmul.f32 0.01, %v5244_v55  ;;  %v5246_v44 = vadd.f32 %v19630_v58, %v5042_v37  ;;  %v5043_v26 = vmax.f32 %v4677_v52, %v4679_v59  ;;  %v23951_v37 = vld [vmem:[#allocation7_spill] sm:$0xff] }
 0x31e   : > { %v3218_v60 = vpop.f32.mrb[212].mxu0  ;;  %v4211_v62 = vpop.f32.mrb[212].mxu1  ;;  %vm5435_vm3 = vcmp.gt.f32.partialorder %v5243_v42, 0.0  ;;  %v5627_v63 = vmul.f32 0.01, %v5243_v42  ;;  %v5817_v28 = vsel %vm5433_vm1, %v5241_v41, %v5625_v43  ;;  %v5245_v8 = vadd.f32 %v19635_v61, %v5041_v45  ;;  %v23952_v43 = vld [vmem:[#allocation8_spill] sm:$0xff] }
 0x31f   : > { %v5820_v29 = vsel %vm5436_vm2, %v5244_v55, %v5628_v46  ;;  %vm5438_vm4 = vcmp.gt.f32.partialorder %v5246_v44, 0.0  ;;  %v5630_v57 = vmul.f32 0.01, %v5246_v44  ;;  %v4680_v24 = vmax.f32 %v18673_v48, %v3218_v60  ;;  %v3220_v9 = vpop.f32.mrb[213].mxu0  ;;  %v4213_v32 = vpop.f32.mrb[213].mxu1 }
 0x320   : > { %v4682_v33 = vmax.f32 %v18675_v49, %v4211_v62  ;;  %v4681_v31 = vmax.f32 %v18677_v50, %v3220_v9  ;;  %v4683_v54 = vmax.f32 %v18679_v51, %v4213_v32  ;;  %v3222_v0 = vpop.f32.mrb[214].mxu0  ;;  %v4215_v11 = vpop.f32.mrb[214].mxu1  ;;  %v5819_v19 = vsel %vm5435_vm3, %v5243_v42, %v5627_v63  ;;  %v23948_v49 = vld [vmem:[#allocation5_spill] sm:$0xff]  ;;  %v23949_v50 = vld [vmem:[#allocation6_spill] sm:$0xff]  ;;  %v23956_v32 = vld [vmem:[#allocation11_spill] sm:$0xff] }
 0x321   : > { %v5822_v13 = vsel %vm5438_vm4, %v5246_v44, %v5630_v57  ;;  %v4684_v35 = vmax.f32 %v23946_v2, %v3222_v0  ;;  %v4686_v22 = vmax.f32 %v23947_v3, %v4215_v11  ;;  %v3224_v23 = vpop.f32.mrb[215].mxu0  ;;  %v4217_v48 = vpop.f32.mrb[215].mxu1  ;;  %v19750_v6 = vpack.c.bf16 %v5819_v19, %v5817_v28  ;;  %v23954_v62 = vld [vmem:[#allocation10_spill] sm:$0xff] }
 0x322   : > { %v5044_v1 = vmax.f32 %v4680_v24, %v4682_v33  ;;  %v4685_v7 = vmax.f32 %v23948_v49, %v3224_v23  ;;  %v4687_v51 = vmax.f32 %v23949_v50, %v4217_v48  ;;  %v5247_v14 = vadd.f32 %v19635_v61, %v5043_v26  ;;  %v23953_v26 = vld [vmem:[#allocation9_spill] sm:$0xff] }
 0x323   : > { %v5046_v36 = vmax.f32 %v4684_v35, %v4686_v22  ;;  %3487 = vmatmul.mubr.bf16.gmra.mrb[64].mxu0 %v16938_v27  ;;  %4480 = vmatmul.mubr.bf16.gmra.mrb[64].mxu1 %v16938_v27  ;;  %vm5437_vm5 = vcmp.gt.f32.partialorder %v5245_v8, 0.0  ;;  %v5629_v5 = vmul.f32 0.01, %v5245_v8  ;;  %v19755_v17 = vpack.c.bf16 %v5822_v13, %v5820_v29  ;;  %v16946_v29 = vld [vmem:[%s18342_s29 + $0x524] ss:$8 sps:$4 sm:$0xff]   ;;  %v23959_v13 = vld [vmem:[#allocation14_spill] sm:$0xff] }
 0x324   : > { %v5248_v20 = vadd.f32 %v19630_v58, %v5044_v1  ;;  %14689 = vmatprep.mubr.msk.bf16.mxu0 %vm2352_vm0, %v16943_v18  ;;  %14786 = vmatprep.mubr.msk.bf16.mxu1 %vm2352_vm0, %v16943_v18  ;;  %vm5439_vm6 = vcmp.gt.f32.partialorder %v5247_v14, 0.0  ;;  %v5631_v15 = vmul.f32 0.01, %v5247_v14  ;;  %v5045_v53 = vmax.f32 %v4681_v31, %v4683_v54  ;;  %v23957_v31 = vld [vmem:[#allocation12_spill] sm:$0xff]  ;;  %v23958_v18 = vld [vmem:[#allocation13_spill] sm:$0xff] }
 0x325   : > { %23950 = vst [vmem:[#allocation3_spill] sm:$0xff] %v19755_v17  ;;  %v5250_v21 = vadd.f32 %v19630_v58, %v5046_v36  ;;  %v5821_v38 = vsel %vm5437_vm5, %v5245_v8, %v5629_v5  ;;  %v5047_v25 = vmax.f32 %v4685_v7, %v4687_v51  ;;  %v16944_v5 = vld [vmem:[%s18342_s29 + $0x520] ss:$8 sps:$4 sm:$0xff]  }
 0x326   : > { %vm5440_vm7 = vcmp.gt.f32.partialorder %v5248_v20, 0.0  ;;  %v5632_v39 = vmul.f32 0.01, %v5248_v20  ;;  %v3228_v52 = vpop.f32.mrb[216].mxu0  ;;  %v4221_v59 = vpop.f32.mrb[216].mxu1  ;;  %v5823_v40 = vsel %vm5439_vm6, %v5247_v14, %v5631_v15  ;;  %v5249_v41 = vadd.f32 %v19635_v61, %v5045_v53 }
 0x327   : > { %vm5442_vm8 = vcmp.gt.f32.partialorder %v5250_v21, 0.0  ;;  %v5634_v55 = vmul.f32 0.01, %v5250_v21  ;;  %v4688_v42 = vmax.f32 %v23951_v37, %v3228_v52  ;;  %v4690_v45 = vmax.f32 %v23952_v43, %v4221_v59  ;;  %v3230_v46 = vpop.f32.mrb[217].mxu0  ;;  %v4223_v44 = vpop.f32.mrb[217].mxu1 }
 0x328   : > { %v5824_v27 = vsel %vm5440_vm7, %v5248_v20, %v5632_v39  ;;  %v4689_v60 = vmax.f32 %v23953_v26, %v3230_v46  ;;  %v4691_v63 = vmax.f32 %v23954_v62, %v4223_v44  ;;  %v3232_v28 = vpop.f32.mrb[218].mxu0  ;;  %v4225_v8 = vpop.f32.mrb[218].mxu1  ;;  %v19768_v57 = vpack.c.bf16 %v5823_v40, %v5821_v38  ;;  %v17000_v20 = vld [vmem:[%s23510_s3 + $0x204] ss:$16 sps:$4 sm:$0xff]   ;;  %v17003_v26 = vld [vmem:[%s23510_s3 + $0x20c] ss:$16 sps:$4 sm:$0xff]  }
 0x329   : > { %v5826_v24 = vsel %vm5442_vm8, %v5250_v21, %v5634_v55  ;;  %v5048_v9 = vmax.f32 %v4688_v42, %v4690_v45  ;;  %v4692_v33 = vmax.f32 %v23956_v32, %v3232_v28  ;;  %v4694_v54 = vmax.f32 %v23957_v31, %v4225_v8  ;;  %v3234_v0 = vpop.f32.mrb[219].mxu0  ;;  %v4227_v11 = vpop.f32.mrb[219].mxu1  ;;  %v23961_v39 = vld [vmem:[#allocation15_spill] sm:$0xff]  ;;  %v23962_v55 = vld [vmem:[#allocation16_spill] sm:$0xff]  ;;  %v23963_v42 = vld [vmem:[#allocation17_spill] sm:$0xff]  ;;  %8365 = vmatprep.subr.bf16.mxu0 %v17000_v20 }
 0x32a   : > { %23955 = vst [vmem:[#allocation4_spill] sm:$0xff] %v19768_v57  ;;  %v4693_v19 = vmax.f32 %v23958_v18, %v3234_v0  ;;  %v4695_v2 = vmax.f32 %v23959_v13, %v4227_v11  ;;  %v5251_v35 = vadd.f32 %v19635_v61, %v5047_v25  ;;  %vm5441_vm9 = vcmp.gt.f32.partialorder %v5249_v41, 0.0  ;;  %v23964_v45 = vld [vmem:[#allocation18_spill] sm:$0xff]  ;;  %v23967_v8 = vld [vmem:[#allocation20_spill] sm:$0xff]  ;;  %10130 = vmatprep.subr.bf16.mxu1 %v17003_v26  ;;  %v23972_v20 = vld [vmem:[#allocation23_spill] sm:$0xff] }
 0x32b   : > { %v5252_v3 = vadd.f32 %v19630_v58, %v5048_v9  ;;  %v5050_v22 = vmax.f32 %v4692_v33, %v4694_v54  ;;  %3497 = vmatmul.mubr.bf16.gmra.mrb[68].mxu0 %v16941_v34  ;;  %4490 = vmatmul.mubr.bf16.gmra.mrb[68].mxu1 %v16941_v34  ;;  %v5633_v23 = vmul.f32 0.01, %v5249_v41  ;;  %v19776_v48 = vpack.c.bf16 %v5826_v24, %v5824_v27  ;;  %v16949_v27 = vld [vmem:[%s18342_s29 + $0x534] ss:$8 sps:$4 sm:$0xff]  }
 0x32c   : > { %14690 = vmatprep.mubr.msk.bf16.mxu0 %vm2352_vm0, %v16946_v29  ;;  %14787 = vmatprep.mubr.msk.bf16.mxu1 %vm2352_vm0, %v16946_v29  ;;  %vm5443_vm10 = vcmp.gt.f32.partialorder %v5251_v35, 0.0  ;;  %v5635_v1 = vmul.f32 0.01, %v5251_v35  ;;  %v5049_v49 = vmax.f32 %v4689_v60, %v4691_v63  ;;  %v5051_v7 = vmax.f32 %v4693_v19, %v4695_v2  ;;  %v23966_v63 = vld [vmem:[#allocation19_spill] sm:$0xff]  ;;  %v23968_v33 = vld [vmem:[#allocation21_spill] sm:$0xff]  ;;  %v23969_v54 = vld [vmem:[#allocation22_spill] sm:$0xff] }
 0x32d   : > { %23960 = vst [vmem:[#allocation5_spill] sm:$0xff] %v19776_v48  ;;  %vm5444_vm11 = vcmp.gt.f32.partialorder %v5252_v3, 0.0  ;;  %v5636_v50 = vmul.f32 0.01, %v5252_v3  ;;  %v5254_v51 = vadd.f32 %v19630_v58, %v5050_v22  ;;  %v5825_v15 = vsel %vm5441_vm9, %v5249_v41, %v5633_v23  ;;  %v16947_v23 = vld [vmem:[%s18342_s29 + $0x530] ss:$8 sps:$4 sm:$0xff]  }
 0x32e   : > { %v3238_v14 = vpop.f32.mrb[220].mxu0  ;;  %v4231_v36 = vpop.f32.mrb[220].mxu1  ;;  %v5827_v53 = vsel %vm5443_vm10, %v5251_v35, %v5635_v1  ;;  %v5253_v21 = vadd.f32 %v19635_v61, %v5049_v49  ;;  %v5255_v34 = vadd.f32 %v19635_v61, %v5051_v7 }
 0x32f   : > { %v5828_v38 = vsel %vm5444_vm11, %v5252_v3, %v5636_v50  ;;  %vm5446_vm12 = vcmp.gt.f32.partialorder %v5254_v51, 0.0  ;;  %v5638_v25 = vmul.f32 0.01, %v5254_v51  ;;  %v4696_v52 = vmax.f32 %v23961_v39, %v3238_v14  ;;  %v3240_v59 = vpop.f32.mrb[221].mxu0  ;;  %v4233_v40 = vpop.f32.mrb[221].mxu1 }
 0x330   : > { %v4698_v37 = vmax.f32 %v23962_v55, %v4231_v36  ;;  %v4697_v43 = vmax.f32 %v23963_v42, %v3240_v59  ;;  %v4699_v46 = vmax.f32 %v23964_v45, %v4233_v40  ;;  %v3242_v44 = vpop.f32.mrb[222].mxu0  ;;  %v4235_v41 = vpop.f32.mrb[222].mxu1  ;;  %v19796_v60 = vpack.c.bf16 %v5827_v53, %v5825_v15  ;;  %v23973_v53 = vld [vmem:[#allocation24_spill] sm:$0xff]  ;;  %v23975_v59 = vld [vmem:[#allocation26_spill] sm:$0xff] }
 0x331   : > { %v5830_v62 = vsel %vm5446_vm12, %v5254_v51, %v5638_v25  ;;  %v4700_v28 = vmax.f32 %v23966_v63, %v3242_v44  ;;  %v4702_v29 = vmax.f32 %v23967_v8, %v4235_v41  ;;  %v3244_v24 = vpop.f32.mrb[223].mxu0  ;;  %v4237_v9 = vpop.f32.mrb[223].mxu1  ;;  %vm5445_vm13 = vcmp.gt.f32.partialorder %v5253_v21, 0.0  ;;  %v16952_v42 = vld [vmem:[%s18342_s29 + $0x544] ss:$8 sps:$4 sm:$0xff]   ;;  %v23978_v8 = vld [vmem:[#allocation29_spill] sm:$0xff] }
 0x332   : > { %23965 = vst [vmem:[#allocation6_spill] sm:$0xff] %v19796_v60  ;;  %v5052_v32 = vmax.f32 %v4696_v52, %v4698_v37  ;;  %v4701_v31 = vmax.f32 %v23968_v33, %v3244_v24  ;;  %v4703_v0 = vmax.f32 %v23969_v54, %v4237_v9  ;;  %vm5447_vm14 = vcmp.gt.f32.partialorder %v5255_v34, 0.0  ;;  %v23976_v44 = vld [vmem:[#allocation27_spill] sm:$0xff]  ;;  %v23979_v24 = vld [vmem:[#allocation30_spill] sm:$0xff] }
 0x333   : > { %v5054_v11 = vmax.f32 %v4700_v28, %v4702_v29  ;;  %3507 = vmatmul.mubr.bf16.gmra.mrb[72].mxu0 %v16944_v5  ;;  %4500 = vmatmul.mubr.bf16.gmra.mrb[72].mxu1 %v16944_v5  ;;  %v5637_v18 = vmul.f32 0.01, %v5253_v21  ;;  %v5639_v19 = vmul.f32 0.01, %v5255_v34  ;;  %v19802_v13 = vpack.c.bf16 %v5830_v62, %v5828_v38 }
 0x334   : > { %v5256_v2 = vadd.f32 %v19630_v58, %v5052_v32  ;;  %14691 = vmatprep.mubr.msk.bf16.mxu0 %vm2352_vm0, %v16949_v27  ;;  %14788 = vmatprep.mubr.msk.bf16.mxu1 %vm2352_vm0, %v16949_v27  ;;  %v5053_v35 = vmax.f32 %v4697_v43, %v4699_v46  ;;  %v5055_v3 = vmax.f32 %v4701_v31, %v4703_v0  ;;  %v23977_v27 = vld [vmem:[#allocation28_spill] sm:$0xff] }
 0x335   : > { %23970 = vst [vmem:[#allocation7_spill] sm:$0xff] %v19802_v13  ;;  %v5258_v22 = vadd.f32 %v19630_v58, %v5054_v11  ;;  %v5829_v1 = vsel %vm5445_vm13, %v5253_v21, %v5637_v18  ;;  %v5831_v49 = vsel %vm5447_vm14, %v5255_v34, %v5639_v19  ;;  %v23974_v21 = vld [vmem:[#allocation25_spill] sm:$0xff] }
 0x336   : > { %vm5448_vm15 = vcmp.gt.f32.partialorder %v5256_v2, 0.0  ;;  %v5640_v7 = vmul.f32 0.01, %v5256_v2  ;;  %v3248_v50 = vpop.f32.mrb[224].mxu0  ;;  %v4241_v51 = vpop.f32.mrb[224].mxu1  ;;  %v19810_v14 = vpack.c.bf16 %v5831_v49, %v5829_v1  ;;  %v5257_v36 = vadd.f32 %v19635_v61, %v5053_v35 }
 0x337   : > { %vm5450_vm1 = vcmp.gt.f32.partialorder %v5258_v22, 0.0  ;;  %v5642_v5 = vmul.f32 0.01, %v5258_v22  ;;  %v4704_v15 = vmax.f32 %v23972_v20, %v3248_v50  ;;  %v4706_v38 = vmax.f32 %v23973_v53, %v4241_v51  ;;  %v3250_v25 = vpop.f32.mrb[225].mxu0  ;;  %v4243_v39 = vpop.f32.mrb[225].mxu1  ;;  %v23980_v51 = vld [vmem:[#allocation31_spill] sm:$0xff] }
 0x338   : > { %23971 = vst [vmem:[#allocation8_spill] sm:$0xff] %v19810_v14  ;;  %v5832_v52 = vsel %vm5448_vm15, %v5256_v2, %v5640_v7  ;;  %v4705_v34 = vmax.f32 %v23974_v21, %v3250_v25  ;;  %v4707_v40 = vmax.f32 %v23975_v59, %v4243_v39  ;;  %v3252_v55 = vpop.f32.mrb[226].mxu0  ;;  %v4245_v37 = vpop.f32.mrb[226].mxu1  ;;  %v5259_v43 = vadd.f32 %v19635_v61, %v5055_v3  ;;  %v23981_v53 = vld [vmem:[#allocation32_spill] sm:$0xff]  ;;  %v23982_v25 = vld [vmem:[#allocation33_spill] sm:$0xff] }
 0x339   : > { %v5834_v45 = vsel %vm5450_vm1, %v5258_v22, %v5642_v5  ;;  %v5056_v46 = vmax.f32 %v4704_v15, %v4706_v38  ;;  %v4708_v41 = vmax.f32 %v23976_v44, %v3252_v55  ;;  %v4710_v26 = vmax.f32 %v23977_v27, %v4245_v37  ;;  %v3254_v62 = vpop.f32.mrb[227].mxu0  ;;  %v4247_v63 = vpop.f32.mrb[227].mxu1  ;;  %v23985_v37 = vld [vmem:[#allocation35_spill] sm:$0xff] }
 0x33a   : > { %v5057_v28 = vmax.f32 %v4705_v34, %v4707_v40  ;;  %v4709_v29 = vmax.f32 %v23978_v8, %v3254_v62  ;;  %v4711_v9 = vmax.f32 %v23979_v24, %v4247_v63  ;;  %vm5449_vm2 = vcmp.gt.f32.partialorder %v5257_v36, 0.0  ;;  %v16961_v40 = vld [vmem:[%s18342_s29 + $0x554] ss:$8 sps:$4 sm:$0xff]  }
 0x33b   : > { %v5260_v32 = vadd.f32 %v19630_v58, %v5056_v46  ;;  %v5058_v33 = vmax.f32 %v4708_v41, %v4710_v26  ;;  %3517 = vmatmul.mubr.bf16.gmra.mrb[76].mxu0 %v16947_v23  ;;  %4510 = vmatmul.mubr.bf16.gmra.mrb[76].mxu1 %v16947_v23  ;;  %vm5451_vm3 = vcmp.gt.f32.partialorder %v5259_v43, 0.0  ;;  %v5641_v31 = vmul.f32 0.01, %v5257_v36  ;;  %v16950_v23 = vld [vmem:[%s18342_s29 + $0x540] ss:$8 sps:$4 sm:$0xff]   ;;  %v23987_v26 = vld [vmem:[#allocation37_spill] sm:$0xff] }
 0x33c   : > { %v5059_v54 = vmax.f32 %v4709_v29, %v4711_v9  ;;  %14692 = vmatprep.mubr.msk.bf16.mxu0 %vm2352_vm0, %v16952_v42  ;;  %14789 = vmatprep.mubr.msk.bf16.mxu1 %vm2352_vm0, %v16952_v42  ;;  %v5643_v0 = vmul.f32 0.01, %v5259_v43  ;;  %v19826_v11 = vpack.c.bf16 %v5834_v45, %v5832_v52  ;;  %v5261_v19 = vadd.f32 %v19635_v61, %v5057_v28  ;;  %v23983_v52 = vld [vmem:[#allocation34_spill] sm:$0xff] }
 0x33d   : > { %vm5452_vm4 = vcmp.gt.f32.partialorder %v5260_v32, 0.0  ;;  %v5644_v18 = vmul.f32 0.01, %v5260_v32  ;;  %v5262_v2 = vadd.f32 %v19630_v58, %v5058_v33  ;;  %v5833_v1 = vsel %vm5449_vm2, %v5257_v36, %v5641_v31  ;;  %v23988_v63 = vld [vmem:[#allocation38_spill] sm:$0xff] }
 0x33e   : > { %v5263_v35 = vadd.f32 %v19635_v61, %v5059_v54  ;;  %v3258_v3 = vpop.f32.mrb[228].mxu0  ;;  %v4251_v22 = vpop.f32.mrb[228].mxu1  ;;  %v5835_v49 = vsel %vm5451_vm3, %v5259_v43, %v5643_v0  ;;  %v23986_v43 = vld [vmem:[#allocation36_spill] sm:$0xff]  ;;  %vm5453_vm6 = vcmp.gt.f32.partialorder %v5261_v19, 0.0  ;;  %v5645_v29 = vmul.f32 0.01, %v5261_v19 }
 0x33f   : > { %v5836_v7 = vsel %vm5452_vm4, %v5260_v32, %v5644_v18  ;;  %vm5454_vm5 = vcmp.gt.f32.partialorder %v5262_v2, 0.0  ;;  %v5646_v50 = vmul.f32 0.01, %v5262_v2  ;;  %v4712_v5 = vmax.f32 %v23980_v51, %v3258_v3  ;;  %v3260_v20 = vpop.f32.mrb[229].mxu0  ;;  %v4253_v15 = vpop.f32.mrb[229].mxu1  ;;  %v23990_v51 = vld [vmem:[#allocation39_spill] sm:$0xff] }
 0x340   : > { %v4714_v38 = vmax.f32 %v23981_v53, %v4251_v22  ;;  %v4713_v39 = vmax.f32 %v23982_v25, %v3260_v20  ;;  %v4715_v21 = vmax.f32 %v23983_v52, %v4253_v15  ;;  %v3262_v34 = vpop.f32.mrb[230].mxu0  ;;  %v4255_v59 = vpop.f32.mrb[230].mxu1  ;;  %v19839_v55 = vpack.c.bf16 %v5835_v49, %v5833_v1  ;;  %v16959_v54 = vld [vmem:[%s18342_s29 + $0x550] ss:$8 sps:$4 sm:$0xff]   ;;  %v23991_v20 = vld [vmem:[#allocation40_spill] sm:$0xff] }
 0x341   : > { %v5838_v36 = vsel %vm5454_vm5, %v5262_v2, %v5646_v50  ;;  %v4716_v42 = vmax.f32 %v23985_v37, %v3262_v34  ;;  %v4718_v45 = vmax.f32 %v23986_v43, %v4255_v59  ;;  %v3264_v46 = vpop.f32.mrb[231].mxu0  ;;  %v4257_v44 = vpop.f32.mrb[231].mxu1  ;;  %vm5455_vm7 = vcmp.gt.f32.partialorder %v5263_v35, 0.0  ;;  %v23993_v25 = vld [vmem:[#allocation42_spill] sm:$0xff]  ;;  %v16964_v34 = vld [vmem:[%s18342_s29 + $0x564] ss:$8 sps:$4 sm:$0xff]  }
 0x342   : > { %23984 = vst [vmem:[#allocation9_spill] sm:$0xff] %v19839_v55  ;;  %v5060_v41 = vmax.f32 %v4712_v5, %v4714_v38  ;;  %v5061_v27 = vmax.f32 %v4713_v39, %v4715_v21  ;;  %v4717_v62 = vmax.f32 %v23987_v26, %v3264_v46  ;;  %v4719_v28 = vmax.f32 %v23988_v63, %v4257_v44  ;;  %v23997_v26 = vld [vmem:[#allocation46_spill] sm:$0xff] }
 0x343   : > { %v5062_v8 = vmax.f32 %v4716_v42, %v4718_v45  ;;  %3527 = vmatmul.mubr.bf16.gmra.mrb[80].mxu0 %v16950_v23  ;;  %4520 = vmatmul.mubr.bf16.gmra.mrb[80].mxu1 %v16950_v23  ;;  %v5647_v24 = vmul.f32 0.01, %v5263_v35  ;;  %v5837_v0 = vsel %vm5453_vm6, %v5261_v19, %v5645_v29  ;;  %v19852_v2 = vpack.c.bf16 %v5838_v36, %v5836_v7  ;;  %v23992_v7 = vld [vmem:[#allocation41_spill] sm:$0xff]  ;;  %v23994_v36 = vld [vmem:[#allocation43_spill] sm:$0xff]  ;;  %v23995_v42 = vld [vmem:[#allocation44_spill] sm:$0xff] }
 0x344   : > { %v5264_v9 = vadd.f32 %v19630_v58, %v5060_v41  ;;  %v5265_v32 = vadd.f32 %v19635_v61, %v5061_v27  ;;  %v5063_v33 = vmax.f32 %v4717_v62, %v4719_v28  ;;  %14693 = vmatprep.mubr.msk.bf16.mxu0 %vm2352_vm0, %v16961_v40  ;;  %14790 = vmatprep.mubr.msk.bf16.mxu1 %vm2352_vm0, %v16961_v40  ;;  %v23996_v41 = vld [vmem:[#allocation45_spill] sm:$0xff] }
 0x345   : > { %v5266_v31 = vadd.f32 %v19630_v58, %v5062_v8  ;;  %v5839_v18 = vsel %vm5455_vm7, %v5263_v35, %v5647_v24  ;;  %23989 = vst [vmem:[#allocation10_spill] sm:$0xff] %v19852_v2 }
 0x346   : > { %vm5456_vm8 = vcmp.gt.f32.partialorder %v5264_v9, 0.0  ;;  %v5648_v3 = vmul.f32 0.01, %v5264_v9  ;;  %v5267_v22 = vadd.f32 %v19635_v61, %v5063_v33  ;;  %v3268_v23 = vpop.f32.mrb[232].mxu0  ;;  %v4261_v1 = vpop.f32.mrb[232].mxu1  ;;  %v19855_v49 = vpack.c.bf16 %v5839_v18, %v5837_v0 }
 0x347   : > { %vm5458_vm9 = vcmp.gt.f32.partialorder %v5266_v31, 0.0  ;;  %v5650_v50 = vmul.f32 0.01, %v5266_v31  ;;  %v4720_v5 = vmax.f32 %v23990_v51, %v3268_v23  ;;  %v4722_v15 = vmax.f32 %v23991_v20, %v4261_v1  ;;  %v3270_v53 = vpop.f32.mrb[233].mxu0  ;;  %v4263_v19 = vpop.f32.mrb[233].mxu1  ;;  %v23999_v20 = vld [vmem:[#allocation47_spill] sm:$0xff] }
 0x348   : > { %v5840_v35 = vsel %vm5456_vm8, %v5264_v9, %v5648_v3  ;;  %v4721_v38 = vmax.f32 %v23992_v7, %v3270_v53  ;;  %v4723_v39 = vmax.f32 %v23993_v25, %v4263_v19  ;;  %v3272_v52 = vpop.f32.mrb[234].mxu0  ;;  %v4265_v21 = vpop.f32.mrb[234].mxu1  ;;  %vm5457_vm10 = vcmp.gt.f32.partialorder %v5265_v32, 0.0  ;;  %v16962_v23 = vld [vmem:[%s18342_s29 + $0x560] ss:$8 sps:$4 sm:$0xff]  }
 0x349   : > { %v5842_v59 = vsel %vm5458_vm9, %v5266_v31, %v5650_v50  ;;  %v5064_v40 = vmax.f32 %v4720_v5, %v4722_v15  ;;  %v4724_v37 = vmax.f32 %v23994_v36, %v3272_v52  ;;  %v4726_v43 = vmax.f32 %v23995_v42, %v4265_v21  ;;  %v3274_v45 = vpop.f32.mrb[235].mxu0  ;;  %v4267_v46 = vpop.f32.mrb[235].mxu1 }
 0x34a   : > { %v5065_v44 = vmax.f32 %v4721_v38, %v4723_v39  ;;  %v4725_v27 = vmax.f32 %v23996_v41, %v3274_v45  ;;  %v4727_v62 = vmax.f32 %v23997_v26, %v4267_v46  ;;  %vm5459_vm11 = vcmp.gt.f32.partialorder %v5267_v22, 0.0  ;;  %v24001_v38 = vld [vmem:[#allocation49_spill] sm:$0xff]  ;;  %v24002_v39 = vld [vmem:[#allocation50_spill] sm:$0xff] }
 0x34b   : > { %v5268_v63 = vadd.f32 %v19630_v58, %v5064_v40  ;;  %v5066_v28 = vmax.f32 %v4724_v37, %v4726_v43  ;;  %3537 = vmatmul.mubr.bf16.gmra.mrb[84].mxu0 %v16959_v54  ;;  %4530 = vmatmul.mubr.bf16.gmra.mrb[84].mxu1 %v16959_v54  ;;  %v5649_v8 = vmul.f32 0.01, %v5265_v32  ;;  %v5651_v29 = vmul.f32 0.01, %v5267_v22  ;;  %v24005_v37 = vld [vmem:[#allocation52_spill] sm:$0xff]  ;;  %v24006_v41 = vld [vmem:[#allocation53_spill] sm:$0xff] }
 0x34c   : > { %v5067_v24 = vmax.f32 %v4725_v27, %v4727_v62  ;;  %14694 = vmatprep.mubr.msk.bf16.mxu0 %vm2352_vm0, %v16964_v34  ;;  %14791 = vmatprep.mubr.msk.bf16.mxu1 %vm2352_vm0, %v16964_v34  ;;  %v19869_v9 = vpack.c.bf16 %v5842_v59, %v5840_v35  ;;  %v5269_v31 = vadd.f32 %v19635_v61, %v5065_v44  ;;  %v24000_v35 = vld [vmem:[#allocation48_spill] sm:$0xff]  ;;  %v16967_v59 = vld [vmem:[%s18342_s29 + $0x574] ss:$8 sps:$4 sm:$0xff]  }
 0x34d   : > { %vm5460_vm12 = vcmp.gt.f32.partialorder %v5268_v63, 0.0  ;;  %v5652_v33 = vmul.f32 0.01, %v5268_v63  ;;  %v5270_v0 = vadd.f32 %v19630_v58, %v5066_v28  ;;  %v5841_v1 = vsel %vm5457_vm10, %v5265_v32, %v5649_v8  ;;  %v24007_v26 = vld [vmem:[#allocation54_spill] sm:$0xff] }
 0x34e   : > { %23998 = vst [vmem:[#allocation11_spill] sm:$0xff] %v19869_v9  ;;  %v5271_v18 = vadd.f32 %v19635_v61, %v5067_v24  ;;  %v3278_v3 = vpop.f32.mrb[236].mxu0  ;;  %v4271_v54 = vpop.f32.mrb[236].mxu1  ;;  %v5843_v50 = vsel %vm5459_vm11, %v5267_v22, %v5651_v29  ;;  %v24004_v22 = vld [vmem:[#allocation51_spill] sm:$0xff]  ;;  %vm5461_vm14 = vcmp.gt.f32.partialorder %v5269_v31, 0.0 }
 0x34f   : > { %v5844_v51 = vsel %vm5460_vm12, %v5268_v63, %v5652_v33  ;;  %vm5462_vm13 = vcmp.gt.f32.partialorder %v5270_v0, 0.0  ;;  %v5654_v5 = vmul.f32 0.01, %v5270_v0  ;;  %v4728_v15 = vmax.f32 %v23999_v20, %v3278_v3  ;;  %v3280_v53 = vpop.f32.mrb[237].mxu0  ;;  %v4273_v19 = vpop.f32.mrb[237].mxu1 }
 0x350   : > { %v4730_v7 = vmax.f32 %v24000_v35, %v4271_v54  ;;  %v4729_v25 = vmax.f32 %v24001_v38, %v3280_v53  ;;  %v4731_v52 = vmax.f32 %v24002_v39, %v4273_v19  ;;  %v3282_v21 = vpop.f32.mrb[238].mxu0  ;;  %v4275_v34 = vpop.f32.mrb[238].mxu1  ;;  %v19882_v40 = vpack.c.bf16 %v5843_v50, %v5841_v1  ;;  %v16965_v3 = vld [vmem:[%s18342_s29 + $0x570] ss:$8 sps:$4 sm:$0xff]   ;;  %v24010_v35 = vld [vmem:[#allocation55_spill] sm:$0xff]  ;;  %v24011_v38 = vld [vmem:[#allocation56_spill] sm:$0xff] }
 0x351   : > { %v5846_v32 = vsel %vm5462_vm13, %v5270_v0, %v5654_v5  ;;  %v4732_v36 = vmax.f32 %v24004_v22, %v3282_v21  ;;  %v4734_v42 = vmax.f32 %v24005_v37, %v4275_v34  ;;  %v3284_v43 = vpop.f32.mrb[239].mxu0  ;;  %v4277_v45 = vpop.f32.mrb[239].mxu1  ;;  %vm5463_vm15 = vcmp.gt.f32.partialorder %v5271_v18, 0.0  ;;  %v24013_v21 = vld [vmem:[#allocation58_spill] sm:$0xff]  ;;  %v16970_v22 = vld [vmem:[%s18342_s29 + $0x584] ss:$8 sps:$4 sm:$0xff]  }
 0x352   : > { %24003 = vst [vmem:[#allocation12_spill] sm:$0xff] %v19882_v40  ;;  %v5068_v46 = vmax.f32 %v4728_v15, %v4730_v7  ;;  %v5069_v44 = vmax.f32 %v4729_v25, %v4731_v52  ;;  %v4733_v27 = vmax.f32 %v24006_v41, %v3284_v43  ;;  %v4735_v62 = vmax.f32 %v24007_v26, %v4277_v45  ;;  %v24015_v45 = vld [vmem:[#allocation60_spill] sm:$0xff]  ;;  %v24016_v26 = vld [vmem:[#allocation61_spill] sm:$0xff] }
 0x353   : > { %v5070_v63 = vmax.f32 %v4732_v36, %v4734_v42  ;;  %3547 = vmatmul.mubr.bf16.gmra.mrb[88].mxu0 %v16962_v23  ;;  %4540 = vmatmul.mubr.bf16.gmra.mrb[88].mxu1 %v16962_v23  ;;  %v5653_v28 = vmul.f32 0.01, %v5269_v31  ;;  %v5655_v8 = vmul.f32 0.01, %v5271_v18  ;;  %v19895_v50 = vpack.c.bf16 %v5846_v32, %v5844_v51  ;;  %v24012_v51 = vld [vmem:[#allocation57_spill] sm:$0xff]  ;;  %v24014_v42 = vld [vmem:[#allocation59_spill] sm:$0xff] }
 0x354   : > { %v5272_v29 = vadd.f32 %v19630_v58, %v5068_v46  ;;  %v5273_v24 = vadd.f32 %v19635_v61, %v5069_v44  ;;  %v5071_v33 = vmax.f32 %v4733_v27, %v4735_v62  ;;  %14695 = vmatprep.mubr.msk.bf16.mxu0 %vm2352_vm0, %v16967_v59  ;;  %14792 = vmatprep.mubr.msk.bf16.mxu1 %vm2352_vm0, %v16967_v59 }
 0x355   : > { %v5274_v0 = vadd.f32 %v19630_v58, %v5070_v63  ;;  %v5845_v54 = vsel %vm5461_vm14, %v5269_v31, %v5653_v28  ;;  %v5847_v1 = vsel %vm5463_vm15, %v5271_v18, %v5655_v8  ;;  %24008 = vst [vmem:[#allocation13_spill] sm:$0xff] %v19895_v50  ;;  %v24017_v63 = vld [vmem:[#allocation62_spill] sm:$0xff] }
 0x356   : > { %vm5464_vm1 = vcmp.gt.f32.partialorder %v5272_v29, 0.0  ;;  %v5656_v23 = vmul.f32 0.01, %v5272_v29  ;;  %v5275_v5 = vadd.f32 %v19635_v61, %v5071_v33  ;;  %v3288_v20 = vpop.f32.mrb[240].mxu0  ;;  %v4281_v15 = vpop.f32.mrb[240].mxu1  ;;  %v19898_v53 = vpack.c.bf16 %v5847_v1, %v5845_v54 }
 0x357   : > { %vm5466_vm2 = vcmp.gt.f32.partialorder %v5274_v0, 0.0  ;;  %v5658_v19 = vmul.f32 0.01, %v5274_v0  ;;  %v4736_v7 = vmax.f32 %v24010_v35, %v3288_v20  ;;  %v4738_v25 = vmax.f32 %v24011_v38, %v4281_v15  ;;  %v3290_v39 = vpop.f32.mrb[241].mxu0  ;;  %v4283_v31 = vpop.f32.mrb[241].mxu1 }
 0x358   : > { %24009 = vst [vmem:[#allocation14_spill] sm:$0xff] %v19898_v53  ;;  %v5848_v18 = vsel %vm5464_vm1, %v5272_v29, %v5656_v23  ;;  %v4737_v52 = vmax.f32 %v24012_v51, %v3290_v39  ;;  %v4739_v34 = vmax.f32 %v24013_v21, %v4283_v31  ;;  %v3292_v59 = vpop.f32.mrb[242].mxu0  ;;  %v4285_v32 = vpop.f32.mrb[242].mxu1  ;;  %vm5465_vm3 = vcmp.gt.f32.partialorder %v5273_v24, 0.0  ;;  %v16973_v39 = vld [vmem:[%s18342_s29 + $0x594] ss:$8 sps:$4 sm:$0xff]  }
 0x359   : > { %v5850_v36 = vsel %vm5466_vm2, %v5274_v0, %v5658_v19  ;;  %v5072_v37 = vmax.f32 %v4736_v7, %v4738_v25  ;;  %v4740_v43 = vmax.f32 %v24014_v42, %v3292_v59  ;;  %v4742_v46 = vmax.f32 %v24015_v45, %v4285_v32  ;;  %v3294_v44 = vpop.f32.mrb[243].mxu0  ;;  %v4287_v41 = vpop.f32.mrb[243].mxu1  ;;  %v16968_v19 = vld [vmem:[%s18342_s29 + $0x580] ss:$8 sps:$4 sm:$0xff]   ;;  %v24021_v45 = vld [vmem:[#allocation65_spill] sm:$0xff] }
 0x35a   : > { %v5073_v27 = vmax.f32 %v4737_v52, %v4739_v34  ;;  %v4741_v62 = vmax.f32 %v24016_v26, %v3294_v44  ;;  %v4743_v28 = vmax.f32 %v24017_v63, %v4287_v41  ;;  %vm5467_vm4 = vcmp.gt.f32.partialorder %v5275_v5, 0.0  ;;  %v24019_v52 = vld [vmem:[#allocation63_spill] sm:$0xff]  ;;  %v24022_v44 = vld [vmem:[#allocation66_spill] sm:$0xff] }
 0x35b   : > { %v5276_v8 = vadd.f32 %v19630_v58, %v5072_v37  ;;  %v5074_v29 = vmax.f32 %v4740_v43, %v4742_v46  ;;  %3557 = vmatmul.mubr.bf16.gmra.mrb[92].mxu0 %v16965_v3  ;;  %4550 = vmatmul.mubr.bf16.gmra.mrb[92].mxu1 %v16965_v3  ;;  %v5657_v33 = vmul.f32 0.01, %v5273_v24  ;;  %v5659_v0 = vmul.f32 0.01, %v5275_v5 }
 0x35c   : > { %v5277_v54 = vadd.f32 %v19635_v61, %v5073_v27  ;;  %v5075_v1 = vmax.f32 %v4741_v62, %v4743_v28  ;;  %14696 = vmatprep.mubr.msk.bf16.mxu0 %vm2352_vm0, %v16970_v22  ;;  %14793 = vmatprep.mubr.msk.bf16.mxu1 %vm2352_vm0, %v16970_v22  ;;  %v19913_v23 = vpack.c.bf16 %v5850_v36, %v5848_v18 }
 0x35d   : > { %vm5468_vm5 = vcmp.gt.f32.partialorder %v5276_v8, 0.0  ;;  %v5660_v20 = vmul.f32 0.01, %v5276_v8  ;;  %v5278_v15 = vadd.f32 %v19630_v58, %v5074_v29  ;;  %v5849_v35 = vsel %vm5465_vm3, %v5273_v24, %v5657_v33  ;;  %v24020_v24 = vld [vmem:[#allocation64_spill] sm:$0xff] }
 0x35e   : > { %24018 = vst [vmem:[#allocation15_spill] sm:$0xff] %v19913_v23  ;;  %vm5469_vm6 = vcmp.gt.f32.partialorder %v5277_v54, 0.0  ;;  %v5661_v3 = vmul.f32 0.01, %v5277_v54  ;;  %v5279_v7 = vadd.f32 %v19635_v61, %v5075_v1  ;;  %v3298_v38 = vpop.f32.mrb[244].mxu0  ;;  %v4291_v25 = vpop.f32.mrb[244].mxu1  ;;  %v5851_v31 = vsel %vm5467_vm4, %v5275_v5, %v5659_v0 }
 0x35f   : > { %v5852_v51 = vsel %vm5468_vm5, %v5276_v8, %v5660_v20  ;;  %vm5470_vm7 = vcmp.gt.f32.partialorder %v5278_v15, 0.0  ;;  %v5662_v18 = vmul.f32 0.01, %v5278_v15  ;;  %v4744_v21 = vmax.f32 %v24019_v52, %v3298_v38  ;;  %v3300_v34 = vpop.f32.mrb[245].mxu0  ;;  %v4293_v59 = vpop.f32.mrb[245].mxu1  ;;  %v24023_v5 = vld [vmem:[#allocation67_spill] sm:$0xff] }
 0x360   : > { %v5853_v32 = vsel %vm5469_vm6, %v5277_v54, %v5661_v3  ;;  %vm5471_vm8 = vcmp.gt.f32.partialorder %v5279_v7, 0.0  ;;  %v5663_v22 = vmul.f32 0.01, %v5279_v7  ;;  %v4746_v36 = vmax.f32 %v24020_v24, %v4291_v25  ;;  %v3302_v37 = vpop.f32.mrb[246].mxu0  ;;  %v4295_v42 = vpop.f32.mrb[246].mxu1  ;;  %v24024_v29 = vld [vmem:[#allocation68_spill] sm:$0xff] }
 0x361   : > { %v5854_v43 = vsel %vm5470_vm7, %v5278_v15, %v5662_v18  ;;  %v4745_v46 = vmax.f32 %v24021_v45, %v3300_v34  ;;  %v4747_v41 = vmax.f32 %v24022_v44, %v4293_v59  ;;  %v4748_v27 = vmax.f32 %v24023_v5, %v3302_v37  ;;  %v3304_v26 = vpop.f32.mrb[247].mxu0  ;;  %v4297_v62 = vpop.f32.mrb[247].mxu1  ;;  %v24026_v1 = vld [vmem:[#allocation69_spill] sm:$0xff]  ;;  %v24027_v15 = vld [vmem:[#allocation70_spill] sm:$0xff]  ;;  %v24029_v24 = vld [vmem:[#allocation71_spill] sm:$0xff] }
 0x362   : > { %v19926_v63 = vpack.c.bf16 %v5854_v43, %v5852_v51  ;;  %v5855_v28 = vsel %vm5471_vm8, %v5279_v7, %v5663_v22  ;;  %v5076_v8 = vmax.f32 %v4744_v21, %v4746_v36  ;;  %v4750_v33 = vmax.f32 %v24024_v29, %v4295_v42  ;;  %v16971_v52 = vld [vmem:[%s18342_s29 + $0x590] ss:$8 sps:$4 sm:$0xff]   ;;  %v16976_v37 = vld [vmem:[%s18342_s29 + $0x5a4] ss:$8 sps:$4 sm:$0xff]  }
 0x363   : > { %v19929_v0 = vpack.c.bf16 %v5855_v28, %v5853_v32  ;;  %v5077_v54 = vmax.f32 %v4745_v46, %v4747_v41  ;;  %v4749_v20 = vmax.f32 %v24026_v1, %v3304_v26  ;;  %v4751_v3 = vmax.f32 %v24027_v15, %v4297_v62  ;;  %3567 = vmatmul.mubr.bf16.gmra.mrb[96].mxu0 %v16968_v19  ;;  %v24030_v45 = vld [vmem:[#allocation72_spill] sm:$0xff]  ;;  %v24033_v1 = vld [vmem:[#allocation75_spill] sm:$0xff] }
 0x364   : > { %v5280_v38 = vadd.f32 %v19630_v58, %v5076_v8  ;;  %v5078_v25 = vmax.f32 %v4748_v27, %v4750_v33  ;;  %4560 = vmatmul.mubr.bf16.gmra.mrb[96].mxu1 %v16968_v19  ;;  %14697 = vmatprep.mubr.msk.bf16.mxu0 %vm2352_vm0, %v16973_v39  ;;  %v19935_v51 = vpack.c.bf16 %v5851_v31, %v5849_v35  ;;  %v24031_v27 = vld [vmem:[#allocation73_spill] sm:$0xff]  ;;  %v24032_v33 = vld [vmem:[#allocation74_spill] sm:$0xff] }
 0x365   : > { %24025 = vst [vmem:[#allocation16_spill] sm:$0xff] %v19929_v0  ;;  %v5281_v7 = vadd.f32 %v19635_v61, %v5077_v54  ;;  %v5079_v18 = vmax.f32 %v4749_v20, %v4751_v3  ;;  %14794 = vmatprep.mubr.msk.bf16.mxu1 %vm2352_vm0, %v16973_v39 }
 0x366   : > { %24028 = vst [vmem:[#allocation17_spill] sm:$0xff] %v19935_v51  ;;  %vm5472_vm9 = vcmp.gt.f32.partialorder %v5280_v38, 0.0  ;;  %v5664_v21 = vmul.f32 0.01, %v5280_v38  ;;  %v5282_v34 = vadd.f32 %v19630_v58, %v5078_v25  ;;  %v3308_v59 = vpop.f32.mrb[248].mxu0  ;;  %v4301_v32 = vpop.f32.mrb[248].mxu1 }
 0x367   : > { %vm5473_vm10 = vcmp.gt.f32.partialorder %v5281_v7, 0.0  ;;  %v5665_v22 = vmul.f32 0.01, %v5281_v7  ;;  %v5283_v19 = vadd.f32 %v19635_v61, %v5079_v18  ;;  %v4752_v35 = vmax.f32 %v24029_v24, %v3308_v59  ;;  %v3310_v31 = vpop.f32.mrb[249].mxu0  ;;  %v4303_v36 = vpop.f32.mrb[249].mxu1  ;;  %v24035_v18 = vld [vmem:[#allocation77_spill] sm:$0xff] }
 0x368   : > { %v5856_v42 = vsel %vm5472_vm9, %v5280_v38, %v5664_v21  ;;  %vm5474_vm11 = vcmp.gt.f32.partialorder %v5282_v34, 0.0  ;;  %v5666_v43 = vmul.f32 0.01, %v5282_v34  ;;  %v4754_v39 = vmax.f32 %v24030_v45, %v4301_v32  ;;  %v3312_v46 = vpop.f32.mrb[250].mxu0  ;;  %v4305_v44 = vpop.f32.mrb[250].mxu1  ;;  %v24034_v38 = vld [vmem:[#allocation76_spill] sm:$0xff] }
 0x369   : > { %v5857_v41 = vsel %vm5473_vm10, %v5281_v7, %v5665_v22  ;;  %vm5475_vm12 = vcmp.gt.f32.partialorder %v5283_v19, 0.0  ;;  %v5667_v5 = vmul.f32 0.01, %v5283_v19  ;;  %v4753_v26 = vmax.f32 %v24031_v27, %v3310_v31  ;;  %v3314_v62 = vpop.f32.mrb[251].mxu0  ;;  %v4307_v28 = vpop.f32.mrb[251].mxu1  ;;  %v24036_v22 = vld [vmem:[#allocation78_spill] sm:$0xff] }
 0x36a   : > { %v5858_v8 = vsel %vm5474_vm11, %v5282_v34, %v5666_v43  ;;  %v5080_v29 = vmax.f32 %v4752_v35, %v4754_v39  ;;  %v4755_v54 = vmax.f32 %v24032_v33, %v4303_v36  ;;  %v4756_v20 = vmax.f32 %v24033_v1, %v3312_v46  ;;  %v24037_v45 = vld [vmem:[#allocation79_spill] sm:$0xff]  ;;  %v24038_v46 = vld [vmem:[#allocation80_spill] sm:$0xff]  ;;  %v16985_v27 = vld [vmem:[%s18342_s29 + $0x5b4] ss:$8 sps:$4 sm:$0xff]  }
 0x36b   : > { %v19948_v15 = vpack.c.bf16 %v5858_v8, %v5856_v42  ;;  %v5859_v3 = vsel %vm5475_vm12, %v5283_v19, %v5667_v5  ;;  %v4758_v25 = vmax.f32 %v24034_v38, %v4305_v44  ;;  %v4757_v21 = vmax.f32 %v24035_v18, %v3314_v62  ;;  %3577 = vmatmul.mubr.bf16.gmra.mrb[100].mxu0 %v16971_v52  ;;  %v16974_v5 = vld [vmem:[%s18342_s29 + $0x5a0] ss:$8 sps:$4 sm:$0xff]   ;;  %v24040_v18 = vld [vmem:[#allocation82_spill] sm:$0xff] }
 0x36c   : > { %v19952_v7 = vpack.c.bf16 %v5859_v3, %v5857_v41  ;;  %v5284_v59 = vadd.f32 %v19630_v58, %v5080_v29  ;;  %v5081_v32 = vmax.f32 %v4753_v26, %v4755_v54  ;;  %v4759_v34 = vmax.f32 %v24036_v22, %v4307_v28  ;;  %4570 = vmatmul.mubr.bf16.gmra.mrb[100].mxu1 %v16971_v52  ;;  %v24039_v54 = vld [vmem:[#allocation81_spill] sm:$0xff]  ;;  %v24041_v22 = vld [vmem:[#allocation83_spill] sm:$0xff] }
 0x36d   : > { %v5082_v24 = vmax.f32 %v4756_v20, %v4758_v25  ;;  %14698 = vmatprep.mubr.msk.bf16.mxu0 %vm2352_vm0, %v16976_v37  ;;  %14795 = vmatprep.mubr.msk.bf16.mxu1 %vm2352_vm0, %v16976_v37 }
 0x36e   : > { %vm5476_vm13 = vcmp.gt.f32.partialorder %v5284_v59, 0.0  ;;  %v5668_v19 = vmul.f32 0.01, %v5284_v59  ;;  %v5285_v35 = vadd.f32 %v19635_v61, %v5081_v32  ;;  %v5083_v31 = vmax.f32 %v4757_v21, %v4759_v34  ;;  %v3318_v36 = vpop.f32.mrb[252].mxu0  ;;  %v4311_v42 = vpop.f32.mrb[252].mxu1 }
 0x36f   : > { %v5286_v43 = vadd.f32 %v19630_v58, %v5082_v24  ;;  %v4760_v39 = vmax.f32 %v24037_v45, %v3318_v36  ;;  %v4762_v44 = vmax.f32 %v24038_v46, %v4311_v42  ;;  %v3320_v52 = vpop.f32.mrb[253].mxu0  ;;  %v4313_v41 = vpop.f32.mrb[253].mxu1  ;;  %v24042_v24 = vld [vmem:[#allocation84_spill] sm:$0xff]  ;;  %v24044_v45 = vld [vmem:[#allocation85_spill] sm:$0xff] }
 0x370   : > { %v5860_v26 = vsel %vm5476_vm13, %v5284_v59, %v5668_v19  ;;  %vm5477_vm14 = vcmp.gt.f32.partialorder %v5285_v35, 0.0  ;;  %v5669_v37 = vmul.f32 0.01, %v5285_v35  ;;  %v5287_v62 = vadd.f32 %v19635_v61, %v5083_v31  ;;  %v3322_v28 = vpop.f32.mrb[254].mxu0  ;;  %v4315_v8 = vpop.f32.mrb[254].mxu1 }
 0x371   : > { %vm5478_vm15 = vcmp.gt.f32.partialorder %v5286_v43, 0.0  ;;  %v5670_v29 = vmul.f32 0.01, %v5286_v43  ;;  %v5084_v33 = vmax.f32 %v4760_v39, %v4762_v44  ;;  %v4761_v1 = vmax.f32 %v24039_v54, %v3320_v52  ;;  %v3324_v20 = vpop.f32.mrb[255].mxu0  ;;  %v4317_v3 = vpop.f32.mrb[255].mxu1  ;;  %v24045_v52 = vld [vmem:[#allocation86_spill] sm:$0xff] }
 0x372   : > { %v5861_v38 = vsel %vm5477_vm14, %v5285_v35, %v5669_v37  ;;  %vm5479_vm1 = vcmp.gt.f32.partialorder %v5287_v62, 0.0  ;;  %v5671_v25 = vmul.f32 0.01, %v5287_v62  ;;  %v4763_v21 = vmax.f32 %v24040_v18, %v4313_v41 }
 0x373   : > { %v5862_v32 = vsel %vm5478_vm15, %v5286_v43, %v5670_v29  ;;  %v5288_v59 = vadd.f32 %v19630_v58, %v5084_v33  ;;  %v4764_v34 = vmax.f32 %v24041_v22, %v3322_v28  ;;  %v4766_v19 = vmax.f32 %v24042_v24, %v4315_v8  ;;  %3587 = vmatmul.mubr.bf16.gmra.mrb[104].mxu0 %v16974_v5  ;;  %v24047_v8 = vld [vmem:[#allocation88_spill] sm:$0xff] }
 0x374   : > { %v19970_v31 = vpack.c.bf16 %v5862_v32, %v5860_v26  ;;  %v5863_v36 = vsel %vm5479_vm1, %v5287_v62, %v5671_v25  ;;  %v5085_v42 = vmax.f32 %v4761_v1, %v4763_v21  ;;  %v4765_v39 = vmax.f32 %v24044_v45, %v3324_v20  ;;  %4580 = vmatmul.mubr.bf16.gmra.mrb[104].mxu1 %v16974_v5  ;;  %v24046_v5 = vld [vmem:[#allocation87_spill] sm:$0xff]  ;;  %v16983_v1 = vld [vmem:[%s18342_s29 + $0x5b0] ss:$8 sps:$4 sm:$0xff]  }
 0x375   : > { %v19973_v35 = vpack.c.bf16 %v5863_v36, %v5861_v38  ;;  %vm5480_vm2 = vcmp.gt.f32.partialorder %v5288_v59, 0.0  ;;  %v5672_v46 = vmul.f32 0.01, %v5288_v59  ;;  %v5086_v43 = vmax.f32 %v4764_v34, %v4766_v19  ;;  %14699 = vmatprep.mubr.msk.bf16.mxu0 %vm2352_vm0, %v16985_v27  ;;  %14796 = vmatprep.mubr.msk.bf16.mxu1 %vm2352_vm0, %v16985_v27  ;;  %v24048_v27 = vld [vmem:[#allocation89_spill] sm:$0xff]  ;;  %v16988_v32 = vld [vmem:[%s18342_s29 + $0x5c4] ss:$8 sps:$4 sm:$0xff]  }
 0x376   : > { %24043 = vst [vmem:[#allocation18_spill] sm:$0xff] %v19970_v31  ;;  %v5289_v44 = vadd.f32 %v19635_v61, %v5085_v42  ;;  %v4767_v41 = vmax.f32 %v24045_v52, %v4317_v3  ;;  %v3328_v26 = vpop.f32.mrb[0].mxu0  ;;  %v4321_v37 = vpop.f32.mrb[0].mxu1  ;;  %v24049_v34 = vld [vmem:[#allocation90_spill] sm:$0xff] }
 0x377   : > { %v5290_v62 = vadd.f32 %v19630_v58, %v5086_v43  ;;  %v4768_v28 = vmax.f32 %v24046_v5, %v3328_v26  ;;  %v4770_v29 = vmax.f32 %v24047_v8, %v4321_v37  ;;  %v3330_v33 = vpop.f32.mrb[1].mxu0  ;;  %v4323_v54 = vpop.f32.mrb[1].mxu1  ;;  %v5864_v20 = vsel %vm5480_vm2, %v5288_v59, %v5672_v46  ;;  %v24050_v43 = vld [vmem:[#allocation91_spill] sm:$0xff]  ;;  %v24051_v59 = vld [vmem:[#allocation92_spill] sm:$0xff]  ;;  %v24052_v37 = vld [vmem:[#allocation93_spill] sm:$0xff] }
 0x378   : > { %vm5481_vm3 = vcmp.gt.f32.partialorder %v5289_v44, 0.0  ;;  %v5087_v38 = vmax.f32 %v4765_v39, %v4767_v41  ;;  %v4769_v25 = vmax.f32 %v24048_v27, %v3330_v33  ;;  %v3332_v18 = vpop.f32.mrb[2].mxu0  ;;  %v4325_v21 = vpop.f32.mrb[2].mxu1  ;;  %v4771_v24 = vmax.f32 %v24049_v34, %v4323_v54  ;;  %v24054_v54 = vld [vmem:[#allocation94_spill] sm:$0xff] }
 0x379   : > { %vm5482_vm4 = vcmp.gt.f32.partialorder %v5290_v62, 0.0  ;;  %v5674_v3 = vmul.f32 0.01, %v5290_v62  ;;  %v5088_v22 = vmax.f32 %v4768_v28, %v4770_v29  ;;  %v3334_v19 = vpop.f32.mrb[3].mxu0  ;;  %v4327_v36 = vpop.f32.mrb[3].mxu1  ;;  %v4772_v52 = vmax.f32 %v24050_v43, %v3332_v18 }
 0x37a   : > { %v5673_v42 = vmul.f32 0.01, %v5289_v44  ;;  %v5291_v45 = vadd.f32 %v19635_v61, %v5087_v38  ;;  %v4774_v46 = vmax.f32 %v24051_v59, %v4325_v21  ;;  %v5089_v26 = vmax.f32 %v4769_v25, %v4771_v24 }
 0x37b   : > { %v5866_v39 = vsel %vm5482_vm4, %v5290_v62, %v5674_v3  ;;  %v5292_v41 = vadd.f32 %v19630_v58, %v5088_v22  ;;  %v4773_v5 = vmax.f32 %v24052_v37, %v3334_v19  ;;  %3597 = vmatmul.mubr.bf16.gmra.mrb[108].mxu0 %v16983_v1  ;;  %v4775_v38 = vmax.f32 %v24054_v54, %v4327_v36  ;;  %v16986_v3 = vld [vmem:[%s18342_s29 + $0x5c0] ss:$8 sps:$4 sm:$0xff]   ;;  %v16991_v19 = vld [vmem:[%s18342_s29 + $0x5d4] ss:$8 sps:$4 sm:$0xff]  }
 0x37c   : > { %v19991_v8 = vpack.c.bf16 %v5866_v39, %v5864_v20  ;;  %vm5483_vm5 = vcmp.gt.f32.partialorder %v5291_v45, 0.0  ;;  %v5675_v28 = vmul.f32 0.01, %v5291_v45  ;;  %v5090_v29 = vmax.f32 %v4772_v52, %v4774_v46  ;;  %4590 = vmatmul.mubr.bf16.gmra.mrb[108].mxu1 %v16983_v1  ;;  %14700 = vmatprep.mubr.msk.bf16.mxu0 %vm2352_vm0, %v16988_v32  ;;  %v24056_v52 = vld [vmem:[#allocation95_spill] sm:$0xff]  ;;  %v24058_v39 = vld [vmem:[#allocation97_spill] sm:$0xff]  ;;  %v24059_v37 = vld [vmem:[#allocation98_spill] sm:$0xff] }
 0x37d   : > { %vm5484_vm6 = vcmp.gt.f32.partialorder %v5292_v41, 0.0  ;;  %v5676_v33 = vmul.f32 0.01, %v5292_v41  ;;  %v5293_v62 = vadd.f32 %v19635_v61, %v5089_v26  ;;  %14797 = vmatprep.mubr.msk.bf16.mxu1 %vm2352_vm0, %v16988_v32  ;;  %v5865_v27 = vsel %vm5481_vm3, %v5289_v44, %v5673_v42 }
 0x37e   : > { %24053 = vst [vmem:[#allocation19_spill] sm:$0xff] %v19991_v8  ;;  %v5867_v20 = vsel %vm5483_vm5, %v5291_v45, %v5675_v28  ;;  %v5294_v25 = vadd.f32 %v19630_v58, %v5090_v29  ;;  %v3338_v18 = vpop.f32.mrb[4].mxu0  ;;  %v4331_v21 = vpop.f32.mrb[4].mxu1  ;;  %v5091_v36 = vmax.f32 %v4773_v5, %v4775_v38  ;;  %v24057_v45 = vld [vmem:[#allocation96_spill] sm:$0xff] }
 0x37f   : > { %v20000_v1 = vpack.c.bf16 %v5867_v20, %v5865_v27  ;;  %v5868_v22 = vsel %vm5484_vm6, %v5292_v41, %v5676_v33  ;;  %vm5485_vm7 = vcmp.gt.f32.partialorder %v5293_v62, 0.0  ;;  %v3340_v34 = vpop.f32.mrb[5].mxu0  ;;  %v4333_v24 = vpop.f32.mrb[5].mxu1  ;;  %v4776_v32 = vmax.f32 %v24056_v52, %v3338_v18  ;;  %v24060_v27 = vld [vmem:[#allocation99_spill] sm:$0xff]  ;;  %v24061_v8 = vld [vmem:[#allocation100_spill] sm:$0xff] }
 0x380   : > { %vm5486_vm8 = vcmp.gt.f32.partialorder %v5294_v25, 0.0  ;;  %v5678_v43 = vmul.f32 0.01, %v5294_v25  ;;  %v3342_v59 = vpop.f32.mrb[6].mxu0  ;;  %v4335_v44 = vpop.f32.mrb[6].mxu1  ;;  %v4778_v46 = vmax.f32 %v24057_v45, %v4331_v21  ;;  %v4777_v26 = vmax.f32 %v24058_v39, %v3340_v34 }
 0x381   : > { %24055 = vst [vmem:[#allocation20_spill] sm:$0xff] %v20000_v1  ;;  %v5677_v42 = vmul.f32 0.01, %v5293_v62  ;;  %v4779_v28 = vmax.f32 %v24059_v37, %v4333_v24  ;;  %v3344_v29 = vpop.f32.mrb[7].mxu0  ;;  %v4337_v41 = vpop.f32.mrb[7].mxu1  ;;  %v5295_v54 = vadd.f32 %v19635_v61, %v5091_v36  ;;  %v4780_v20 = vmax.f32 %v24060_v27, %v3342_v59  ;;  %v24062_v1 = vld [vmem:[#allocation101_spill] sm:$0xff] }
 0x382   : > { %v5870_v33 = vsel %vm5486_vm8, %v5294_v25, %v5678_v43  ;;  %v4782_v5 = vmax.f32 %v24061_v8, %v4335_v44  ;;  %v5092_v18 = vmax.f32 %v4776_v32, %v4778_v46  ;;  %v4781_v31 = vmax.f32 %v24062_v1, %v3344_v29  ;;  %v24063_v24 = vld [vmem:[#allocation102_spill] sm:$0xff]  ;;  %v24065_v29 = vld [vmem:[#allocation103_spill] sm:$0xff] }
 0x383   : > { %v20010_v38 = vpack.c.bf16 %v5870_v33, %v5868_v22  ;;  %v5093_v52 = vmax.f32 %v4777_v26, %v4779_v28  ;;  %3607 = vmatmul.mubr.bf16.gmra.mrb[112].mxu0 %v16986_v3  ;;  %vm5487_vm9 = vcmp.gt.f32.partialorder %v5295_v54, 0.0  ;;  %v5679_v21 = vmul.f32 0.01, %v5295_v54  ;;  %v16989_v44 = vld [vmem:[%s18342_s29 + $0x5d0] ss:$8 sps:$4 sm:$0xff]  }
 0x384   : > { %v5094_v34 = vmax.f32 %v4780_v20, %v4782_v5  ;;  %v4783_v45 = vmax.f32 %v24063_v24, %v4337_v41  ;;  %4600 = vmatmul.mubr.bf16.gmra.mrb[112].mxu1 %v16986_v3  ;;  %14701 = vmatprep.mubr.msk.bf16.mxu0 %vm2352_vm0, %v16991_v19  ;;  %v5296_v25 = vadd.f32 %v19630_v58, %v5092_v18  ;;  %v24066_v41 = vld [vmem:[#allocation104_spill] sm:$0xff] }
 0x385   : > { %v5297_v8 = vadd.f32 %v19635_v61, %v5093_v52  ;;  %14798 = vmatprep.mubr.msk.bf16.mxu1 %vm2352_vm0, %v16991_v19  ;;  %v5869_v22 = vsel %vm5485_vm7, %v5293_v62, %v5677_v42  ;;  %v5871_v43 = vsel %vm5487_vm9, %v5295_v54, %v5679_v21  ;;  %v24067_v54 = vld [vmem:[#allocation105_spill] sm:$0xff]  ;;  %v16994_v18 = vld [vmem:[%s18342_s29 + $0x5e4] ss:$8 sps:$4 sm:$0xff]  }
 0x386   : > { %v5298_v1 = vadd.f32 %v19630_v58, %v5094_v34  ;;  %v5095_v36 = vmax.f32 %v4781_v31, %v4783_v45  ;;  %v3348_v32 = vpop.f32.mrb[8].mxu0  ;;  %v4341_v59 = vpop.f32.mrb[8].mxu1  ;;  %v20021_v46 = vpack.c.bf16 %v5871_v43, %v5869_v22  ;;  %vm5488_vm10 = vcmp.gt.f32.partialorder %v5296_v25, 0.0  ;;  %v24069_v43 = vld [vmem:[#allocation106_spill] sm:$0xff] }
 0x387   : > { %v5680_v3 = vmul.f32 0.01, %v5296_v25  ;;  %vm5489_vm11 = vcmp.gt.f32.partialorder %v5297_v8, 0.0  ;;  %v3350_v39 = vpop.f32.mrb[9].mxu0  ;;  %v4343_v26 = vpop.f32.mrb[9].mxu1  ;;  %v4784_v31 = vmax.f32 %v24065_v29, %v3348_v32  ;;  %v4786_v33 = vmax.f32 %v24066_v41, %v4341_v59  ;;  %v24071_v59 = vld [vmem:[#allocation108_spill] sm:$0xff] }
 0x388   : > { %24064 = vst [vmem:[#allocation21_spill] sm:$0xff] %v20021_v46  ;;  %v5681_v37 = vmul.f32 0.01, %v5297_v8  ;;  %vm5490_vm12 = vcmp.gt.f32.partialorder %v5298_v1, 0.0  ;;  %v5682_v19 = vmul.f32 0.01, %v5298_v1  ;;  %v5299_v62 = vadd.f32 %v19635_v61, %v5095_v36 }
 0x389   : > { %v3352_v42 = vpop.f32.mrb[10].mxu0  ;;  %v5872_v28 = vsel %vm5488_vm10, %v5296_v25, %v5680_v3  ;;  %v4785_v27 = vmax.f32 %v24067_v54, %v3350_v39  ;;  %v4345_v20 = vpop.f32.mrb[10].mxu1  ;;  %v5096_v22 = vmax.f32 %v4784_v31, %v4786_v33  ;;  %v4787_v36 = vmax.f32 %v24069_v43, %v4343_v26  ;;  %v24070_v25 = vld [vmem:[#allocation107_spill] sm:$0xff]  ;;  %v24072_v29 = vld [vmem:[#allocation109_spill] sm:$0xff]  ;;  %v24073_v54 = vld [vmem:[#allocation110_spill] sm:$0xff] }
 0x38a   : > { %v3354_v5 = vpop.f32.mrb[11].mxu0  ;;  %v5873_v52 = vsel %vm5489_vm11, %v5297_v8, %v5681_v37  ;;  %v5874_v21 = vsel %vm5490_vm12, %v5298_v1, %v5682_v19  ;;  %vm5491_vm13 = vcmp.gt.f32.partialorder %v5299_v62, 0.0  ;;  %v5683_v34 = vmul.f32 0.01, %v5299_v62  ;;  %v4347_v24 = vpop.f32.mrb[11].mxu1 }
 0x38b   : > { %v20028_v45 = vpack.c.bf16 %v5874_v21, %v5872_v28  ;;  %v4788_v3 = vmax.f32 %v24070_v25, %v3352_v42  ;;  %3617 = vmatmul.mubr.bf16.gmra.mrb[116].mxu0 %v16989_v44  ;;  %v4790_v39 = vmax.f32 %v24071_v59, %v4345_v20  ;;  %v4789_v41 = vmax.f32 %v24072_v29, %v3354_v5  ;;  %v16992_v31 = vld [vmem:[%s18342_s29 + $0x5e0] ss:$8 sps:$4 sm:$0xff]  }
 0x38c   : > { %v5875_v32 = vsel %vm5491_vm13, %v5299_v62, %v5683_v34  ;;  %v4791_v8 = vmax.f32 %v24073_v54, %v4347_v24  ;;  %4610 = vmatmul.mubr.bf16.gmra.mrb[116].mxu1 %v16989_v44  ;;  %v5300_v37 = vadd.f32 %v19630_v58, %v5096_v22  ;;  %v5097_v19 = vmax.f32 %v4785_v27, %v4787_v36  ;;  %v24075_v44 = vld [vmem:[#allocation111_spill] sm:$0xff]  ;;  %v24076_v24 = vld [vmem:[#allocation112_spill] sm:$0xff]  ;;  %v24077_v22 = vld [vmem:[#allocation113_spill] sm:$0xff] }
 0x38d   : > { %24068 = vst [vmem:[#allocation22_spill] sm:$0xff] %v20028_v45  ;;  %v20035_v1 = vpack.c.bf16 %v5875_v32, %v5873_v52  ;;  %14702 = vmatprep.mubr.msk.bf16.mxu0 %vm2352_vm0, %v16994_v18  ;;  %14799 = vmatprep.mubr.msk.bf16.mxu1 %vm2352_vm0, %v16994_v18  ;;  %v5098_v26 = vmax.f32 %v4788_v3, %v4790_v39  ;;  %v16997_v3 = vld [vmem:[%s18342_s29 + $0x5f4] ss:$8 sps:$4 sm:$0xff]  }
 0x38e   : > { %v5099_v42 = vmax.f32 %v4789_v41, %v4791_v8  ;;  %v3358_v62 = vpop.f32.mrb[12].mxu0  ;;  %v4351_v28 = vpop.f32.mrb[12].mxu1  ;;  %vm5492_vm14 = vcmp.gt.f32.partialorder %v5300_v37, 0.0  ;;  %v5684_v33 = vmul.f32 0.01, %v5300_v37  ;;  %v5301_v20 = vadd.f32 %v19635_v61, %v5097_v19  ;;  %v24078_v39 = vld [vmem:[#allocation114_spill] sm:$0xff] }
 0x38f   : > { %24074 = vst [vmem:[#allocation23_spill] sm:$0xff] %v20035_v1  ;;  %v4792_v5 = vmax.f32 %v24075_v44, %v3358_v62  ;;  %v3360_v52 = vpop.f32.mrb[13].mxu0  ;;  %v4353_v21 = vpop.f32.mrb[13].mxu1  ;;  %v5302_v27 = vadd.f32 %v19630_v58, %v5098_v26  ;;  %v4794_v18 = vmax.f32 %v24076_v24, %v4351_v28  ;;  %v24079_v28 = vld [vmem:[#allocation115_spill] sm:$0xff] }
 0x390   : > { %v5303_v34 = vadd.f32 %v19635_v61, %v5099_v42  ;;  %v4793_v43 = vmax.f32 %v24077_v22, %v3360_v52  ;;  %v3362_v36 = vpop.f32.mrb[14].mxu0  ;;  %v4355_v25 = vpop.f32.mrb[14].mxu1  ;;  %v5876_v32 = vsel %vm5492_vm14, %v5300_v37, %v5684_v33  ;;  %vm5493_vm15 = vcmp.gt.f32.partialorder %v5301_v20, 0.0  ;;  %v24080_v22 = vld [vmem:[#allocation116_spill] sm:$0xff]  ;;  %v24081_v33 = vld [vmem:[#allocation117_spill] sm:$0xff] }
 0x391   : > { %v5685_v59 = vmul.f32 0.01, %v5301_v20  ;;  %v4795_v29 = vmax.f32 %v24078_v39, %v4353_v21  ;;  %v3364_v41 = vpop.f32.mrb[15].mxu0  ;;  %v4357_v54 = vpop.f32.mrb[15].mxu1  ;;  %vm5494_vm1 = vcmp.gt.f32.partialorder %v5302_v27, 0.0  ;;  %v5100_v42 = vmax.f32 %v4792_v5, %v4794_v18  ;;  %v24083_v18 = vld [vmem:[#allocation118_spill] sm:$0xff] }
 0x392   : > { %v5686_v8 = vmul.f32 0.01, %v5302_v27  ;;  %vm5495_vm2 = vcmp.gt.f32.partialorder %v5303_v34, 0.0  ;;  %v5687_v19 = vmul.f32 0.01, %v5303_v34  ;;  %v4796_v44 = vmax.f32 %v24079_v28, %v3362_v36 }
 0x393   : > { %v5877_v26 = vsel %vm5493_vm15, %v5301_v20, %v5685_v59  ;;  %v5101_v62 = vmax.f32 %v4793_v43, %v4795_v29  ;;  %3627 = vmatmul.mubr.bf16.gmra.mrb[120].mxu0 %v16992_v31  ;;  %v4798_v37 = vmax.f32 %v24080_v22, %v4355_v25  ;;  %v4797_v45 = vmax.f32 %v24081_v33, %v3364_v41  ;;  %v24084_v59 = vld [vmem:[#allocation119_spill] sm:$0xff]  ;;  %v24085_v41 = vld [vmem:[#allocation120_spill] sm:$0xff] }
 0x394   : > { %v5878_v52 = vsel %vm5494_vm1, %v5302_v27, %v5686_v8  ;;  %v5879_v24 = vsel %vm5495_vm2, %v5303_v34, %v5687_v19  ;;  %4620 = vmatmul.mubr.bf16.gmra.mrb[120].mxu1 %v16992_v31  ;;  %v5304_v1 = vadd.f32 %v19630_v58, %v5100_v42  ;;  %14703 = vmatprep.mubr.msk.bf16.mxu0 %vm2352_vm0, %v16997_v3  ;;  %v16995_v31 = vld [vmem:[%s18342_s29 + $0x5f0] ss:$8 sps:$4 sm:$0xff]   ;;  %s23435_s29 = scalar_lea.vmem %s23514_s7, %s15381_s26 }
 0x395   : > { %v20052_v21 = vpack.c.bf16 %v5878_v52, %v5876_v32  ;;  %v20054_v39 = vpack.c.bf16 %v5879_v24, %v5877_v26  ;;  %v5305_v20 = vadd.f32 %v19635_v61, %v5101_v62  ;;  %v5102_v5 = vmax.f32 %v4796_v44, %v4798_v37  ;;  %14800 = vmatprep.mubr.msk.bf16.mxu1 %vm2352_vm0, %v16997_v3  ;;  %v24087_v44 = vld [vmem:[#allocation122_spill] sm:$0xff] }
 0x396   : > { %v4799_v27 = vmax.f32 %v24083_v18, %v4357_v54  ;;  %v3368_v34 = vpop.f32.mrb[16].mxu0  ;;  %v4361_v43 = vpop.f32.mrb[16].mxu1  ;;  %vm5496_vm3 = vcmp.gt.f32.partialorder %v5304_v1, 0.0  ;;  %v5688_v36 = vmul.f32 0.01, %v5304_v1  ;;  %v24086_v54 = vld [vmem:[#allocation121_spill] sm:$0xff] }
 0x397   : > { %24082 = vst [vmem:[#allocation24_spill] sm:$0xff] %v20054_v39  ;;  %vm5497_vm4 = vcmp.gt.f32.partialorder %v5305_v20, 0.0  ;;  %v5306_v25 = vadd.f32 %v19630_v58, %v5102_v5  ;;  %v4800_v29 = vmax.f32 %v24084_v59, %v3368_v34  ;;  %v4802_v8 = vmax.f32 %v24085_v41, %v4361_v43  ;;  %v3370_v19 = vpop.f32.mrb[17].mxu0  ;;  %v4363_v26 = vpop.f32.mrb[17].mxu1  ;;  %v24089_v43 = vld [vmem:[#allocation124_spill] sm:$0xff] }
 0x398   : > { %v5103_v32 = vmax.f32 %v4797_v45, %v4799_v27  ;;  %v5880_v42 = vsel %vm5496_vm3, %v5304_v1, %v5688_v36  ;;  %v5689_v62 = vmul.f32 0.01, %v5305_v20  ;;  %v4801_v28 = vmax.f32 %v24086_v54, %v3370_v19  ;;  %v3372_v3 = vpop.f32.mrb[18].mxu0  ;;  %v4365_v24 = vpop.f32.mrb[18].mxu1  ;;  %v24088_v27 = vld [vmem:[#allocation123_spill] sm:$0xff]  ;;  %v24090_v1 = vld [vmem:[#allocation125_spill] sm:$0xff] }
 0x399   : > { %v4803_v52 = vmax.f32 %v24087_v44, %v4363_v26  ;;  %vm5498_vm0 = vcmp.gt.f32.partialorder %v5306_v25, 0.0  ;;  %v5690_v22 = vmul.f32 0.01, %v5306_v25  ;;  %v5104_v33 = vmax.f32 %v4800_v29, %v4802_v8  ;;  %v3374_v45 = vpop.f32.mrb[19].mxu0  ;;  %v4367_v5 = vpop.f32.mrb[19].mxu1  ;;  %v24092_v54 = vld [vmem:[#allocation126_spill] sm:$0xff] }
 0x39a   : > { %v5307_v37 = vadd.f32 %v19635_v61, %v5103_v32  ;;  %v4804_v34 = vmax.f32 %v24088_v27, %v3372_v3  ;;  %v4806_v59 = vmax.f32 %v24089_v43, %v4365_v24  ;;  %v4805_v36 = vmax.f32 %v24090_v1, %v3374_v45  ;;  %v24094_v27 = vld [vmem:[#allocation127_spill] sm:$0xff]  ;;  %v24096_v1 = vld [vmem:[#allocation129_spill] sm:$0xff] }
 0x39b   : > { %v5105_v18 = vmax.f32 %v4801_v28, %v4803_v52  ;;  %3637 = vmatmul.mubr.bf16.gmra.mrb[124].mxu0 %v16995_v31  ;;  %v5882_v41 = vsel %vm5498_vm0, %v5306_v25, %v5690_v22  ;;  %v5308_v26 = vadd.f32 %v19630_v58, %v5104_v33  ;;  %v4807_v28 = vmax.f32 %v24092_v54, %v4367_v5 }
 0x39c   : > { %vm5499_vm5 = vcmp.gt.f32.partialorder %v5307_v37, 0.0  ;;  %v5691_v19 = vmul.f32 0.01, %v5307_v37  ;;  %4630 = vmatmul.mubr.bf16.gmra.mrb[124].mxu1 %v16995_v31  ;;  %8044 = vmatprep.mubr.bf16.mxu0 %v19679_v4  ;;  %v20073_v32 = vpack.c.bf16 %v5882_v41, %v5880_v42  ;;  %v5106_v8 = vmax.f32 %v4804_v34, %v4806_v59  ;;  %v24095_v34 = vld [vmem:[#allocation128_spill] sm:$0xff] }
 0x39d   : > { %v5309_v29 = vadd.f32 %v19635_v61, %v5105_v18  ;;  %9809 = vmatprep.mubr.bf16.mxu1 %v19679_v4  ;;  %v5881_v44 = vsel %vm5497_vm4, %v5305_v20, %v5689_v62  ;;  %vm5500_vm6 = vcmp.gt.f32.partialorder %v5308_v26, 0.0  ;;  %v5692_v25 = vmul.f32 0.01, %v5308_v26  ;;  %v16998_v62 = vld [vmem:[%s23510_s3 + $0x200] ss:$16 sps:$4 sm:$0xff]  }
 0x39e   : > { %24091 = vst [vmem:[#allocation25_spill] sm:$0xff] %v20073_v32  ;;  %v5883_v52 = vsel %vm5499_vm5, %v5307_v37, %v5691_v19  ;;  %v3378_v3 = vpop.f32.mrb[20].mxu0  ;;  %v4371_v24 = vpop.f32.mrb[20].mxu1  ;;  %v5310_v31 = vadd.f32 %v19630_v58, %v5106_v8  ;;  %v5107_v18 = vmax.f32 %v4805_v36, %v4807_v28  ;;  %v24097_v28 = vld [vmem:[#allocation130_spill] sm:$0xff] }
 0x39f   : > { %v20079_v22 = vpack.c.bf16 %v5883_v52, %v5881_v44  ;;  %vm5501_vm7 = vcmp.gt.f32.partialorder %v5309_v29, 0.0  ;;  %v3380_v42 = vpop.f32.mrb[21].mxu0  ;;  %v4373_v33 = vpop.f32.mrb[21].mxu1  ;;  %v5693_v45 = vmul.f32 0.01, %v5309_v29  ;;  %v4808_v5 = vmax.f32 %v24094_v27, %v3378_v3  ;;  %v24098_v52 = vld [vmem:[#allocation131_spill] sm:$0xff] }
 0x3a0   : > { %v4810_v4 = vmax.f32 %v24095_v34, %v4371_v24  ;;  %v3382_v43 = vpop.f32.mrb[22].mxu0  ;;  %v4375_v20 = vpop.f32.mrb[22].mxu1  ;;  %v5884_v37 = vsel %vm5500_vm6, %v5308_v26, %v5692_v25  ;;  %vm5502_vm8 = vcmp.gt.f32.partialorder %v5310_v31, 0.0  ;;  %v5694_v59 = vmul.f32 0.01, %v5310_v31  ;;  %v24099_v27 = vld [vmem:[#allocation132_spill] sm:$0xff] }
 0x3a1   : > { %24093 = vst [vmem:[#allocation26_spill] sm:$0xff] %v20079_v22  ;;  %v4809_v41 = vmax.f32 %v24096_v1, %v3380_v42  ;;  %v3384_v19 = vpop.f32.mrb[23].mxu0  ;;  %v4377_v8 = vpop.f32.mrb[23].mxu1  ;;  %v5311_v36 = vadd.f32 %v19635_v61, %v5107_v18  ;;  %v4811_v44 = vmax.f32 %v24097_v28, %v4373_v33  ;;  %v4812_v3 = vmax.f32 %v24098_v52, %v3382_v43  ;;  %v17001_v24 = vld [vmem:[%s23510_s3 + $0x208] ss:$16 sps:$4 sm:$0xff]   ;;  %v24100_v34 = vld [vmem:[#allocation133_spill] sm:$0xff] }
 0x3a2   : > { %v5108_v54 = vmax.f32 %v4808_v5, %v4810_v4  ;;  %v17006_v26 = vld [vmem:[%s23510_s3 + $0x224] ss:$16 sps:$4 sm:$0xff]   ;;  %v5886_v25 = vsel %vm5502_vm8, %v5310_v31, %v5694_v59  ;;  %v4814_v42 = vmax.f32 %v24099_v27, %v4375_v20  ;;  %v4813_v1 = vmax.f32 %v24100_v34, %v3384_v19  ;;  %v24101_v32 = vld [vmem:[#allocation134_spill] sm:$0xff] }
 0x3a3   : > { %v4815_v18 = vmax.f32 %v24101_v32, %v4377_v8  ;;  %8045 = vmatmul.mubr.bf16.vlgmr.msra.gmra.mrb[128].mxu0 %v19667_v10  ;;  %v17009_v33 = vld [vmem:[%s23510_s3 + $0x22c] ss:$16 sps:$4 sm:$0xff]   ;;  %v20105_v5 = vpack.c.bf16 %v5886_v25, %v5884_v37  ;;  %vm5503_vm9 = vcmp.gt.f32.partialorder %v5311_v36, 0.0  ;;  %v5695_v4 = vmul.f32 0.01, %v5311_v36 }
 0x3a4   : > { %v5312_v43 = vadd.f32 %v19630_v58, %v5108_v54  ;;  %9810 = vmatmul.mubr.bf16.vlgmr.msra.gmra.mrb[128].mxu1 %v19667_v10  ;;  %8054 = vmatprep.mubr.bf16.mxu0 %v19697_v56  ;;  %v5109_v31 = vmax.f32 %v4809_v41, %v4811_v44  ;;  %v5110_v20 = vmax.f32 %v4812_v3, %v4814_v42  ;;  %v17004_v32 = vld [vmem:[%s23510_s3 + $0x220] ss:$16 sps:$4 sm:$0xff]   ;;  %v17007_v37 = vld [vmem:[%s23510_s3 + $0x228] ss:$16 sps:$4 sm:$0xff]   ;;  %v17012_v10 = vld [vmem:[%s23510_s3 + $0x244] ss:$16 sps:$4 sm:$0xff]  }
 0x3a5   : > { %v5111_v59 = vmax.f32 %v4813_v1, %v4815_v18  ;;  %8366 = vmatpush1.bf16.msra.mxu0 %v16998_v62  ;;  %9819 = vmatprep.mubr.bf16.mxu1 %v19697_v56  ;;  %v5885_v19 = vsel %vm5501_vm7, %v5309_v29, %v5693_v45  ;;  %v5887_v41 = vsel %vm5503_vm9, %v5311_v36, %v5695_v4  ;;  %v24103_v29 = vld [vmem:[#allocation135_spill] sm:$0xff]  ;;  %v24104_v36 = vld [vmem:[#allocation136_spill] sm:$0xff] }
 0x3a6   : > { %vm5504_vm10 = vcmp.gt.f32.partialorder %v5312_v43, 0.0  ;;  %v5696_v8 = vmul.f32 0.01, %v5312_v43  ;;  %10131 = vmatpush1.bf16.msra.mxu1 %v17001_v24  ;;  %v3388_v62 = vpop.f32.mrb[24].mxu0  ;;  %v4381_v56 = vpop.f32.mrb[24].mxu1  ;;  %8367 = vmatprep.subr.bf16.mxu0 %v17006_v26  ;;  %v20121_v54 = vpack.c.bf16 %v5887_v41, %v5885_v19  ;;  %v5313_v28 = vadd.f32 %v19635_v61, %v5109_v31  ;;  %v24105_v24 = vld [vmem:[#allocation137_spill] sm:$0xff] }
 0x3a7   : > { %v5314_v44 = vadd.f32 %v19630_v58, %v5110_v20  ;;  %v5315_v52 = vadd.f32 %v19635_v61, %v5111_v59  ;;  %v3390_v3 = vpop.f32.mrb[25].mxu0  ;;  %v4383_v25 = vpop.f32.mrb[25].mxu1  ;;  %10132 = vmatprep.subr.bf16.mxu1 %v17009_v33  ;;  %v4816_v45 = vmax.f32 %v24103_v29, %v3388_v62  ;;  %v4818_v42 = vmax.f32 %v24104_v36, %v4381_v56  ;;  %v17015_v18 = vld [vmem:[%s23510_s3 + $0x24c] ss:$16 sps:$4 sm:$0xff]   ;;  %v24107_v56 = vld [vmem:[#allocation139_spill] sm:$0xff] }
 0x3a8   : > { %24102 = vst [vmem:[#allocation27_spill] sm:$0xff] %v20121_v54  ;;  %v5888_v27 = vsel %vm5504_vm10, %v5312_v43, %v5696_v8  ;;  %v4817_v34 = vmax.f32 %v24105_v24, %v3390_v3  ;;  %v3392_v1 = vpop.f32.mrb[26].mxu0  ;;  %v4385_v26 = vpop.f32.mrb[26].mxu1  ;;  %vm5505_vm11 = vcmp.gt.f32.partialorder %v5313_v28, 0.0  ;;  %v5697_v4 = vmul.f32 0.01, %v5313_v28 }
 0x3a9   : > { %vm5506_vm12 = vcmp.gt.f32.partialorder %v5314_v44, 0.0  ;;  %v5698_v31 = vmul.f32 0.01, %v5314_v44  ;;  %8368 = vmatpush1.bf16.msra.mxu0 %v17004_v32  ;;  %vm5507_vm13 = vcmp.gt.f32.partialorder %v5315_v52, 0.0  ;;  %v5699_v33 = vmul.f32 0.01, %v5315_v52 }
 0x3aa   : > { %v5112_v43 = vmax.f32 %v4816_v45, %v4818_v42  ;;  %v24106_v20 = vld [vmem:[#allocation138_spill] sm:$0xff]  ;;  %v3394_v19 = vpop.f32.mrb[27].mxu0  ;;  %v4387_v41 = vpop.f32.mrb[27].mxu1  ;;  %10133 = vmatpush1.bf16.msra.mxu1 %v17007_v37  ;;  %8369 = vmatprep.subr.bf16.mxu0 %v17012_v10  ;;  %v5889_v8 = vsel %vm5505_vm11, %v5313_v28, %v5697_v4  ;;  %v4820_v3 = vmax.f32 %v24107_v56, %v3392_v1  ;;  %v24108_v29 = vld [vmem:[#allocation140_spill] sm:$0xff]  ;;  %v17010_v32 = vld [vmem:[%s23510_s3 + $0x240] ss:$16 sps:$4 sm:$0xff]  }
 0x3ab   : > { %v4819_v59 = vmax.f32 %v24106_v20, %v4383_v25  ;;  %v5890_v62 = vsel %vm5506_vm12, %v5314_v44, %v5698_v31  ;;  %v4822_v36 = vmax.f32 %v24108_v29, %v4385_v26  ;;  %8055 = vmatmul.mubr.bf16.gmra.mrb[132].mxu0 %v19688_v12  ;;  %v5891_v45 = vsel %vm5507_vm13, %v5315_v52, %v5699_v33  ;;  %v17013_v37 = vld [vmem:[%s23510_s3 + $0x248] ss:$16 sps:$4 sm:$0xff]   ;;  %v17018_v10 = vld [vmem:[%s23510_s3 + $0x264] ss:$16 sps:$4 sm:$0xff]  }
 0x3ac   : > { %v20139_v24 = vpack.c.bf16 %v5890_v62, %v5888_v27  ;;  %v5316_v25 = vadd.f32 %v19630_v58, %v5112_v43  ;;  %9820 = vmatmul.mubr.bf16.gmra.mrb[132].mxu1 %v19688_v12  ;;  %v20149_v28 = vpack.c.bf16 %v5891_v45, %v5889_v8  ;;  %v24109_v1 = vld [vmem:[#allocation141_spill] sm:$0xff]  ;;  %v24110_v26 = vld [vmem:[#allocation142_spill] sm:$0xff]  ;;  %8064 = vmatprep.mubr.bf16.mxu0 %v19726_v16 }
 0x3ad   : > { %v5113_v42 = vmax.f32 %v4817_v34, %v4819_v59  ;;  %v5114_v44 = vmax.f32 %v4820_v3, %v4822_v36  ;;  %v4821_v27 = vmax.f32 %v24109_v1, %v3394_v19  ;;  %v4823_v52 = vmax.f32 %v24110_v26, %v4387_v41  ;;  %v17021_v12 = vld [vmem:[%s23510_s3 + $0x26c] ss:$16 sps:$4 sm:$0xff]   ;;  %9829 = vmatprep.mubr.bf16.mxu1 %v19726_v16  ;;  %v24111_v59 = vld [vmem:[#allocation143_spill] sm:$0xff]  ;;  %v24113_v36 = vld [vmem:[#allocation145_spill] sm:$0xff] }
 0x3ae   : > { %vm5508_vm14 = vcmp.gt.f32.partialorder %v5316_v25, 0.0  ;;  %v5700_v34 = vmul.f32 0.01, %v5316_v25  ;;  %v3398_v31 = vpop.f32.mrb[28].mxu0  ;;  %v4391_v33 = vpop.f32.mrb[28].mxu1  ;;  %10134 = vmatprep.subr.bf16.mxu1 %v17015_v18  ;;  %v24112_v41 = vld [vmem:[#allocation144_spill] sm:$0xff]  ;;  %8370 = vmatpush1.bf16.msra.mxu0 %v17010_v32 }
 0x3af   : > { %v5317_v4 = vadd.f32 %v19635_v61, %v5113_v42  ;;  %v5318_v43 = vadd.f32 %v19630_v58, %v5114_v44  ;;  %v5115_v20 = vmax.f32 %v4821_v27, %v4823_v52  ;;  %v4824_v19 = vmax.f32 %v24111_v59, %v3398_v31  ;;  %v3400_v62 = vpop.f32.mrb[29].mxu0  ;;  %v4393_v56 = vpop.f32.mrb[29].mxu1  ;;  %10135 = vmatpush1.bf16.msra.mxu1 %v17013_v37  ;;  %v24114_v31 = vld [vmem:[#allocation146_spill] sm:$0xff]  ;;  %v17016_v37 = vld [vmem:[%s23510_s3 + $0x260] ss:$16 sps:$4 sm:$0xff]  }
 0x3b0   : > { %v4826_v8 = vmax.f32 %v24112_v41, %v4391_v33  ;;  %v5892_v3 = vsel %vm5508_vm14, %v5316_v25, %v5700_v34  ;;  %v4825_v45 = vmax.f32 %v24113_v36, %v3400_v62  ;;  %v3402_v42 = vpop.f32.mrb[30].mxu0  ;;  %v4395_v16 = vpop.f32.mrb[30].mxu1  ;;  %8371 = vmatprep.subr.bf16.mxu0 %v17018_v10  ;;  %10136 = vmatprep.subr.bf16.mxu1 %v17021_v12  ;;  %v24115_v25 = vld [vmem:[#allocation147_spill] sm:$0xff]  ;;  %v24116_v33 = vld [vmem:[#allocation148_spill] sm:$0xff] }
 0x3b1   : > { %vm5509_vm15 = vcmp.gt.f32.partialorder %v5317_v4, 0.0  ;;  %v5701_v29 = vmul.f32 0.01, %v5317_v4  ;;  %vm5510_vm1 = vcmp.gt.f32.partialorder %v5318_v43, 0.0  ;;  %v5702_v18 = vmul.f32 0.01, %v5318_v43 }
 0x3b2   : > { %v5319_v44 = vadd.f32 %v19635_v61, %v5115_v20  ;;  %v5116_v1 = vmax.f32 %v4824_v19, %v4826_v8  ;;  %v3404_v27 = vpop.f32.mrb[31].mxu0  ;;  %v4397_v26 = vpop.f32.mrb[31].mxu1  ;;  %v4827_v32 = vmax.f32 %v24114_v31, %v4393_v56  ;;  %v4828_v34 = vmax.f32 %v24115_v25, %v3402_v42  ;;  %v17019_v10 = vld [vmem:[%s23510_s3 + $0x268] ss:$16 sps:$4 sm:$0xff]   ;;  %v24118_v56 = vld [vmem:[#allocation149_spill] sm:$0xff]  ;;  %8372 = vmatpush1.bf16.msra.mxu0 %v17016_v37 }
 0x3b3   : > { %v5893_v52 = vsel %vm5509_vm15, %v5317_v4, %v5701_v29  ;;  %v4830_v59 = vmax.f32 %v24116_v33, %v4395_v16  ;;  %v5894_v20 = vsel %vm5510_vm1, %v5318_v43, %v5702_v18  ;;  %8065 = vmatmul.mubr.bf16.gmra.mrb[136].mxu0 %v19711_v30  ;;  %v17024_v4 = vld [vmem:[%s23510_s3 + $0x284] ss:$16 sps:$4 sm:$0xff]   ;;  %v4829_v29 = vmax.f32 %v24118_v56, %v3404_v27  ;;  %v17027_v43 = vld [vmem:[%s23510_s3 + $0x28c] ss:$16 sps:$4 sm:$0xff]   ;;  %v17025_v33 = vld [vmem:[%s23510_s3 + $0x288] ss:$16 sps:$4 sm:$0xff]  }
 0x3b4   : > { %vm5511_vm2 = vcmp.gt.f32.partialorder %v5319_v44, 0.0  ;;  %v5703_v19 = vmul.f32 0.01, %v5319_v44  ;;  %v5320_v12 = vadd.f32 %v19630_v58, %v5116_v1  ;;  %v20178_v41 = vpack.c.bf16 %v5894_v20, %v5892_v3  ;;  %9830 = vmatmul.mubr.bf16.gmra.mrb[136].mxu1 %v19711_v30  ;;  %v24119_v16 = vld [vmem:[#allocation150_spill] sm:$0xff]  ;;  %8074 = vmatprep.mubr.bf16.mxu0 %v19750_v6  ;;  %v24121_v25 = vld [vmem:[#allocation152_spill] sm:$0xff] }
 0x3b5   : > { %v5117_v8 = vmax.f32 %v4825_v45, %v4827_v32  ;;  %v5118_v62 = vmax.f32 %v4828_v34, %v4830_v59  ;;  %v4831_v18 = vmax.f32 %v24119_v16, %v4397_v26  ;;  %9839 = vmatprep.mubr.bf16.mxu1 %v19750_v6  ;;  %10137 = vmatpush1.bf16.msra.mxu1 %v17019_v10  ;;  %v24120_v26 = vld [vmem:[#allocation151_spill] sm:$0xff]  ;;  %v24123_v56 = vld [vmem:[#allocation154_spill] sm:$0xff] }
 0x3b6   : > { %24117 = vst [vmem:[#allocation28_spill] sm:$0xff] %v20178_v41  ;;  %v5895_v36 = vsel %vm5511_vm2, %v5319_v44, %v5703_v19  ;;  %vm5512_vm3 = vcmp.gt.f32.partialorder %v5320_v12, 0.0  ;;  %v5704_v42 = vmul.f32 0.01, %v5320_v12  ;;  %v3408_v30 = vpop.f32.mrb[32].mxu0  ;;  %v4401_v27 = vpop.f32.mrb[32].mxu1  ;;  %8373 = vmatprep.subr.bf16.mxu0 %v17024_v4  ;;  %10138 = vmatprep.subr.bf16.mxu1 %v17027_v43 }
 0x3b7   : > { %v20188_v3 = vpack.c.bf16 %v5895_v36, %v5893_v52  ;;  %v5321_v45 = vadd.f32 %v19635_v61, %v5117_v8  ;;  %v5322_v1 = vadd.f32 %v19630_v58, %v5118_v62  ;;  %v17022_v44 = vld [vmem:[%s23510_s3 + $0x280] ss:$16 sps:$4 sm:$0xff]   ;;  %v5119_v31 = vmax.f32 %v4829_v29, %v4831_v18  ;;  %v3410_v6 = vpop.f32.mrb[33].mxu0  ;;  %v4403_v52 = vpop.f32.mrb[33].mxu1 }
 0x3b8   : > { %v4832_v32 = vmax.f32 %v24120_v26, %v3408_v30  ;;  %v4834_v34 = vmax.f32 %v24121_v25, %v4401_v27  ;;  %v5896_v59 = vsel %vm5512_vm3, %v5320_v12, %v5704_v42  ;;  %v24122_v8 = vld [vmem:[#allocation153_spill] sm:$0xff]  ;;  %v4835_v29 = vmax.f32 %v24123_v56, %v4403_v52  ;;  %v3412_v36 = vpop.f32.mrb[34].mxu0  ;;  %v4405_v16 = vpop.f32.mrb[34].mxu1  ;;  %v24124_v12 = vld [vmem:[#allocation155_spill] sm:$0xff]  ;;  %v24125_v30 = vld [vmem:[#allocation156_spill] sm:$0xff]  ;;  %8374 = vmatpush1.bf16.msra.mxu0 %v17022_v44 }
 0x3b9   : > { %v5705_v37 = vmul.f32 0.01, %v5321_v45  ;;  %vm5514_vm4 = vcmp.gt.f32.partialorder %v5322_v1, 0.0  ;;  %v5706_v10 = vmul.f32 0.01, %v5322_v1  ;;  %v5323_v20 = vadd.f32 %v19635_v61, %v5119_v31  ;;  %v3414_v43 = vpop.f32.mrb[35].mxu0  ;;  %10139 = vmatpush1.bf16.msra.mxu1 %v17025_v33 }
 0x3ba   : > { %v5120_v19 = vmax.f32 %v4832_v32, %v4834_v34  ;;  %v4833_v62 = vmax.f32 %v24122_v8, %v3410_v6  ;;  %v17028_v4 = vld [vmem:[%s23510_s3 + $0x2a0] ss:$16 sps:$4 sm:$0xff]   ;;  %vm5513_vm0 = vcmp.gt.f32.partialorder %v5321_v45, 0.0  ;;  %v4836_v42 = vmax.f32 %v24124_v12, %v3412_v36  ;;  %v4407_v26 = vpop.f32.mrb[35].mxu1  ;;  %v17030_v31 = vld [vmem:[%s23510_s3 + $0x2a4] ss:$16 sps:$4 sm:$0xff]  }
 0x3bb   : > { %v5898_v18 = vsel %vm5514_vm4, %v5322_v1, %v5706_v10  ;;  %v4838_v27 = vmax.f32 %v24125_v30, %v4405_v16  ;;  %vm5515_vm5 = vcmp.gt.f32.partialorder %v5323_v20, 0.0  ;;  %v5707_v25 = vmul.f32 0.01, %v5323_v20  ;;  %8075 = vmatmul.mubr.bf16.gmra.mrb[140].mxu0 %v19734_v47  ;;  %v17033_v1 = vld [vmem:[%s23510_s3 + $0x2ac] ss:$16 sps:$4 sm:$0xff]   ;;  %v24126_v44 = vld [vmem:[#allocation157_spill] sm:$0xff]  ;;  %8375 = vmatprep.subr.bf16.mxu0 %v17030_v31 }
 0x3bc   : > { %v20212_v32 = vpack.c.bf16 %v5898_v18, %v5896_v59  ;;  %v5324_v34 = vadd.f32 %v19630_v58, %v5120_v19  ;;  %v5121_v6 = vmax.f32 %v4833_v62, %v4835_v29  ;;  %v4837_v10 = vmax.f32 %v24126_v44, %v3414_v43  ;;  %v24127_v8 = vld [vmem:[#allocation158_spill] sm:$0xff]  ;;  %9840 = vmatmul.mubr.bf16.gmra.mrb[140].mxu1 %v19734_v47  ;;  %v17036_v33 = vld [vmem:[%s23510_s3 + $0x2c4] ss:$16 sps:$4 sm:$0xff]   ;;  %v24130_v30 = vld [vmem:[#allocation160_spill] sm:$0xff] }
 0x3bd   : > { %v5122_v52 = vmax.f32 %v4836_v42, %v4838_v27  ;;  %v4839_v56 = vmax.f32 %v24127_v8, %v4407_v26  ;;  %v17031_v59 = vld [vmem:[%s23510_s3 + $0x2a8] ss:$16 sps:$4 sm:$0xff]   ;;  %v5897_v19 = vsel %vm5513_vm0, %v5321_v45, %v5705_v37  ;;  %v5899_v36 = vsel %vm5515_vm5, %v5323_v20, %v5707_v25  ;;  %8084 = vmatprep.mubr.bf16.mxu0 %v19768_v57  ;;  %v17039_v47 = vld [vmem:[%s23510_s3 + $0x2cc] ss:$16 sps:$4 sm:$0xff]   ;;  %v24129_v37 = vld [vmem:[#allocation159_spill] sm:$0xff] }
 0x3be   : > { %vm5516_vm6 = vcmp.gt.f32.partialorder %v5324_v34, 0.0  ;;  %v5708_v62 = vmul.f32 0.01, %v5324_v34  ;;  %9849 = vmatprep.mubr.bf16.mxu1 %v19768_v57  ;;  %v20234_v29 = vpack.c.bf16 %v5899_v36, %v5897_v19  ;;  %v5325_v16 = vadd.f32 %v19635_v61, %v5121_v6  ;;  %v3418_v42 = vpop.f32.mrb[36].mxu0  ;;  %v4411_v45 = vpop.f32.mrb[36].mxu1  ;;  %10140 = vmatprep.subr.bf16.mxu1 %v17033_v1  ;;  %v24133_v1 = vld [vmem:[#allocation163_spill] sm:$0xff] }
 0x3bf   : > { %v5326_v18 = vadd.f32 %v19630_v58, %v5122_v52  ;;  %v5123_v12 = vmax.f32 %v4837_v10, %v4839_v56  ;;  %v4840_v20 = vmax.f32 %v24129_v37, %v3418_v42  ;;  %v4842_v27 = vmax.f32 %v24130_v30, %v4411_v45  ;;  %v3420_v43 = vpop.f32.mrb[37].mxu0  ;;  %v4413_v26 = vpop.f32.mrb[37].mxu1  ;;  %8376 = vmatpush1.bf16.msra.mxu0 %v17028_v4  ;;  %v24131_v10 = vld [vmem:[#allocation161_spill] sm:$0xff]  ;;  %v24132_v56 = vld [vmem:[#allocation162_spill] sm:$0xff] }
 0x3c0   : > { %24128 = vst [vmem:[#allocation29_spill] sm:$0xff] %v20234_v29  ;;  %v5900_v25 = vsel %vm5516_vm6, %v5324_v34, %v5708_v62  ;;  %v5709_v44 = vmul.f32 0.01, %v5325_v16  ;;  %10141 = vmatpush1.bf16.msra.mxu1 %v17031_v59  ;;  %8377 = vmatprep.subr.bf16.mxu0 %v17036_v33  ;;  %v4841_v31 = vmax.f32 %v24131_v10, %v3420_v43  ;;  %v3422_v36 = vpop.f32.mrb[38].mxu0  ;;  %v4415_v42 = vpop.f32.mrb[38].mxu1  ;;  %vm5517_vm8 = vcmp.gt.f32.partialorder %v5325_v16, 0.0 }
 0x3c1   : > { %vm5518_vm7 = vcmp.gt.f32.partialorder %v5326_v18, 0.0  ;;  %v5710_v8 = vmul.f32 0.01, %v5326_v18  ;;  %v5327_v6 = vadd.f32 %v19635_v61, %v5123_v12  ;;  %v5124_v52 = vmax.f32 %v4840_v20, %v4842_v27  ;;  %v17034_v4 = vld [vmem:[%s23510_s3 + $0x2c0] ss:$16 sps:$4 sm:$0xff]   ;;  %10142 = vmatprep.subr.bf16.mxu1 %v17039_v47  ;;  %v24134_v59 = vld [vmem:[#allocation164_spill] sm:$0xff] }
 0x3c2   : > { %v4843_v19 = vmax.f32 %v24132_v56, %v4413_v26  ;;  %v4844_v62 = vmax.f32 %v24133_v1, %v3422_v36  ;;  %v4846_v33 = vmax.f32 %v24134_v59, %v4415_v42  ;;  %v3424_v45 = vpop.f32.mrb[39].mxu0  ;;  %v4417_v12 = vpop.f32.mrb[39].mxu1  ;;  %v17037_v37 = vld [vmem:[%s23510_s3 + $0x2c8] ss:$16 sps:$4 sm:$0xff]   ;;  %v17042_v47 = vld [vmem:[%s23510_s3 + $0x2e4] ss:$16 sps:$4 sm:$0xff]  }
 0x3c3   : > { %v5902_v34 = vsel %vm5518_vm7, %v5326_v18, %v5710_v8  ;;  %vm5519_vm9 = vcmp.gt.f32.partialorder %v5327_v6, 0.0  ;;  %v5711_v30 = vmul.f32 0.01, %v5327_v6  ;;  %v5328_v27 = vadd.f32 %v19630_v58, %v5124_v52  ;;  %8085 = vmatmul.mubr.bf16.gmra.mrb[144].mxu0 %v19755_v17  ;;  %v24135_v26 = vld [vmem:[#allocation165_spill] sm:$0xff]  ;;  %v24136_v10 = vld [vmem:[#allocation166_spill] sm:$0xff] }
 0x3c4   : > { %v20252_v20 = vpack.c.bf16 %v5902_v34, %v5900_v25  ;;  %v5125_v18 = vmax.f32 %v4841_v31, %v4843_v19  ;;  %v5126_v43 = vmax.f32 %v4844_v62, %v4846_v33  ;;  %v4845_v8 = vmax.f32 %v24135_v26, %v3424_v45  ;;  %9850 = vmatmul.mubr.bf16.gmra.mrb[144].mxu1 %v19755_v17  ;;  %v17045_v25 = vld [vmem:[%s23510_s3 + $0x2ec] ss:$16 sps:$4 sm:$0xff]  }
 0x3c5   : > { %v4847_v56 = vmax.f32 %v24136_v10, %v4417_v12  ;;  %v5901_v52 = vsel %vm5517_vm8, %v5325_v16, %v5709_v44  ;;  %v5903_v36 = vsel %vm5519_vm9, %v5327_v6, %v5711_v30  ;;  %vm5520_vm10 = vcmp.gt.f32.partialorder %v5328_v27, 0.0  ;;  %8094 = vmatprep.mubr.bf16.mxu0 %v19796_v60  ;;  %9859 = vmatprep.mubr.bf16.mxu1 %v19796_v60  ;;  %v17040_v16 = vld [vmem:[%s23510_s3 + $0x2e0] ss:$16 sps:$4 sm:$0xff]   ;;  %v24138_v33 = vld [vmem:[#allocation168_spill] sm:$0xff] }
 0x3c6   : > { %v5712_v42 = vmul.f32 0.01, %v5328_v27  ;;  %v20268_v31 = vpack.c.bf16 %v5903_v36, %v5901_v52  ;;  %v5329_v19 = vadd.f32 %v19635_v61, %v5125_v18  ;;  %v5330_v34 = vadd.f32 %v19630_v58, %v5126_v43  ;;  %v3428_v62 = vpop.f32.mrb[40].mxu0  ;;  %v4421_v59 = vpop.f32.mrb[40].mxu1  ;;  %8378 = vmatpush1.bf16.msra.mxu0 %v17034_v4  ;;  %v24137_v44 = vld [vmem:[#allocation167_spill] sm:$0xff]  ;;  %10143 = vmatpush1.bf16.msra.mxu1 %v17037_v37  ;;  %v24140_v36 = vld [vmem:[#allocation170_spill] sm:$0xff] }
 0x3c7   : > { %v5127_v1 = vmax.f32 %v4845_v8, %v4847_v56  ;;  %v4848_v6 = vmax.f32 %v24137_v44, %v3428_v62  ;;  %v4850_v45 = vmax.f32 %v24138_v33, %v4421_v59  ;;  %v3430_v12 = vpop.f32.mrb[41].mxu0  ;;  %v4423_v30 = vpop.f32.mrb[41].mxu1  ;;  %8379 = vmatprep.subr.bf16.mxu0 %v17042_v47  ;;  %v17043_v18 = vld [vmem:[%s23510_s3 + $0x2e8] ss:$16 sps:$4 sm:$0xff]   ;;  %10144 = vmatprep.subr.bf16.mxu1 %v17045_v25  ;;  %v24139_v56 = vld [vmem:[#allocation169_spill] sm:$0xff] }
 0x3c8   : > { %v5904_v43 = vsel %vm5520_vm10, %v5328_v27, %v5712_v42  ;;  %v5713_v26 = vmul.f32 0.01, %v5329_v19  ;;  %vm5522_vm11 = vcmp.gt.f32.partialorder %v5330_v34, 0.0  ;;  %v5714_v4 = vmul.f32 0.01, %v5330_v34  ;;  %v3432_v59 = vpop.f32.mrb[42].mxu0 }
 0x3c9   : > { %v5331_v8 = vadd.f32 %v19635_v61, %v5127_v1  ;;  %v5128_v10 = vmax.f32 %v4848_v6, %v4850_v45  ;;  %v4849_v52 = vmax.f32 %v24139_v56, %v3430_v12  ;;  %v4851_v62 = vmax.f32 %v24140_v36, %v4423_v30  ;;  %v4425_v37 = vpop.f32.mrb[42].mxu1  ;;  %v17046_v47 = vld [vmem:[%s23510_s3 + $0x300] ss:$16 sps:$4 sm:$0xff]   ;;  %v24142_v33 = vld [vmem:[#allocation172_spill] sm:$0xff]  ;;  %v3434_v25 = vpop.f32.mrb[43].mxu0  ;;  %v24144_v36 = vld [vmem:[#allocation174_spill] sm:$0xff] }
 0x3ca   : > { %vm5521_vm12 = vcmp.gt.f32.partialorder %v5329_v19, 0.0  ;;  %v5906_v44 = vsel %vm5522_vm11, %v5330_v34, %v5714_v4  ;;  %v24141_v27 = vld [vmem:[#allocation171_spill] sm:$0xff]  ;;  %v4854_v60 = vmax.f32 %v24142_v33, %v4425_v37  ;;  %v4427_v17 = vpop.f32.mrb[43].mxu1  ;;  %8380 = vmatpush1.bf16.msra.mxu0 %v17040_v16  ;;  %10145 = vmatpush1.bf16.msra.mxu1 %v17043_v18  ;;  %v17051_v34 = vld [vmem:[%s23510_s3 + $0x30c] ss:$16 sps:$4 sm:$0xff]   ;;  %v24143_v16 = vld [vmem:[#allocation173_spill] sm:$0xff] }
 0x3cb   : > { %v4852_v42 = vmax.f32 %v24141_v27, %v3432_v59  ;;  %v17048_v1 = vld [vmem:[%s23510_s3 + $0x304] ss:$16 sps:$4 sm:$0xff]   ;;  %v20292_v6 = vpack.c.bf16 %v5906_v44, %v5904_v43  ;;  %vm5523_vm13 = vcmp.gt.f32.partialorder %v5331_v8, 0.0  ;;  %v5715_v45 = vmul.f32 0.01, %v5331_v8  ;;  %8095 = vmatmul.mubr.bf16.gmra.mrb[148].mxu0 %v19776_v48  ;;  %v24146_v33 = vld [vmem:[#allocation176_spill] sm:$0xff]  ;;  %10146 = vmatprep.subr.bf16.mxu1 %v17051_v34 }
 0x3cc   : > { %v5332_v12 = vadd.f32 %v19630_v58, %v5128_v10  ;;  %v5129_v30 = vmax.f32 %v4849_v52, %v4851_v62  ;;  %v4853_v56 = vmax.f32 %v24143_v16, %v3434_v25  ;;  %v4855_v59 = vmax.f32 %v24144_v36, %v4427_v17  ;;  %9860 = vmatmul.mubr.bf16.gmra.mrb[148].mxu1 %v19776_v48  ;;  %v17049_v43 = vld [vmem:[%s23510_s3 + $0x308] ss:$16 sps:$4 sm:$0xff]   ;;  %v17054_v18 = vld [vmem:[%s23510_s3 + $0x324] ss:$16 sps:$4 sm:$0xff]   ;;  %v17057_v17 = vld [vmem:[%s23510_s3 + $0x32c] ss:$16 sps:$4 sm:$0xff]  }
 0x3cd   : > { %v5130_v4 = vmax.f32 %v4852_v42, %v4854_v60  ;;  %v5905_v10 = vsel %vm5521_vm12, %v5329_v19, %v5713_v26  ;;  %v5907_v37 = vsel %vm5523_vm13, %v5331_v8, %v5715_v45  ;;  %8104 = vmatprep.mubr.bf16.mxu0 %v19810_v14  ;;  %9869 = vmatprep.mubr.bf16.mxu1 %v19810_v14  ;;  %v24145_v26 = vld [vmem:[#allocation175_spill] sm:$0xff]  ;;  %v24158_v14 = vld [vmem:[#allocation188_spill] sm:$0xff] }
 0x3ce   : > { %vm5524_vm14 = vcmp.gt.f32.partialorder %v5332_v12, 0.0  ;;  %v5716_v52 = vmul.f32 0.01, %v5332_v12  ;;  %v20314_v60 = vpack.c.bf16 %v5907_v37, %v5905_v10  ;;  %v5333_v62 = vadd.f32 %v19635_v61, %v5129_v30  ;;  %v3438_v42 = vpop.f32.mrb[44].mxu0  ;;  %v4431_v19 = vpop.f32.mrb[44].mxu1  ;;  %8381 = vmatprep.subr.bf16.mxu0 %v17048_v1  ;;  %10147 = vmatpush1.bf16.msra.mxu1 %v17049_v43  ;;  %v24149_v34 = vld [vmem:[#allocation179_spill] sm:$0xff] }
 0x3cf   : > { %v5334_v44 = vadd.f32 %v19630_v58, %v5130_v4  ;;  %v5131_v27 = vmax.f32 %v4853_v56, %v4855_v59  ;;  %v4856_v8 = vmax.f32 %v24145_v26, %v3438_v42  ;;  %v4858_v25 = vmax.f32 %v24146_v33, %v4431_v19  ;;  %v3440_v45 = vpop.f32.mrb[45].mxu0  ;;  %v4433_v16 = vpop.f32.mrb[45].mxu1  ;;  %8382 = vmatpush1.bf16.msra.mxu0 %v17046_v47  ;;  %v24147_v56 = vld [vmem:[#allocation177_spill] sm:$0xff]  ;;  %v24148_v59 = vld [vmem:[#allocation178_spill] sm:$0xff]  ;;  %v24150_v43 = vld [vmem:[#allocation180_spill] sm:$0xff] }
 0x3d0   : > { %v5908_v36 = vsel %vm5524_vm14, %v5332_v12, %v5716_v52  ;;  %v5717_v10 = vmul.f32 0.01, %v5333_v62  ;;  %8383 = vmatprep.subr.bf16.mxu0 %v17054_v18  ;;  %v4857_v1 = vmax.f32 %v24147_v56, %v3440_v45  ;;  %v4859_v42 = vmax.f32 %v24148_v59, %v4433_v16  ;;  %v3442_v26 = vpop.f32.mrb[46].mxu0  ;;  %v4435_v19 = vpop.f32.mrb[46].mxu1  ;;  %v17052_v47 = vld [vmem:[%s23510_s3 + $0x320] ss:$16 sps:$4 sm:$0xff]   ;;  %10148 = vmatprep.subr.bf16.mxu1 %v17057_v17 }
 0x3d1   : > { %vm5526_vm15 = vcmp.gt.f32.partialorder %v5334_v44, 0.0  ;;  %v5718_v37 = vmul.f32 0.01, %v5334_v44  ;;  %v5335_v30 = vadd.f32 %v19635_v61, %v5131_v27  ;;  %v5132_v4 = vmax.f32 %v4856_v8, %v4858_v25  ;;  %v3444_v33 = vpop.f32.mrb[47].mxu0  ;;  %v4437_v27 = vpop.f32.mrb[47].mxu1  ;;  %v24151_v56 = vld [vmem:[#allocation181_spill] sm:$0xff] }
 0x3d2   : > { %vm5525_vm1 = vcmp.gt.f32.partialorder %v5333_v62, 0.0  ;;  %v4860_v52 = vmax.f32 %v24149_v34, %v3442_v26  ;;  %v4862_v18 = vmax.f32 %v24150_v43, %v4435_v19  ;;  %v17055_v8 = vld [vmem:[%s23510_s3 + $0x328] ss:$16 sps:$4 sm:$0xff]   ;;  %v17060_v17 = vld [vmem:[%s23510_s3 + $0x344] ss:$16 sps:$4 sm:$0xff]   ;;  %v4861_v59 = vmax.f32 %v24151_v56, %v3444_v33 }
 0x3d3   : > { %v5910_v12 = vsel %vm5526_vm15, %v5334_v44, %v5718_v37  ;;  %vm5527_vm2 = vcmp.gt.f32.partialorder %v5335_v30, 0.0  ;;  %v5719_v45 = vmul.f32 0.01, %v5335_v30  ;;  %v5336_v16 = vadd.f32 %v19630_v58, %v5132_v4  ;;  %8105 = vmatmul.mubr.bf16.gmra.mrb[152].mxu0 %v19802_v13  ;;  %v24152_v26 = vld [vmem:[#allocation182_spill] sm:$0xff]  ;;  %10149 = vmatpush1.bf16.msra.mxu1 %v17055_v8 }
 0x3d4   : > { %v20332_v25 = vpack.c.bf16 %v5910_v12, %v5908_v36  ;;  %v5133_v44 = vmax.f32 %v4857_v1, %v4859_v42  ;;  %v5134_v37 = vmax.f32 %v4860_v52, %v4862_v18  ;;  %v4863_v19 = vmax.f32 %v24152_v26, %v4437_v27  ;;  %9870 = vmatmul.mubr.bf16.gmra.mrb[152].mxu1 %v19802_v13  ;;  %v17063_v36 = vld [vmem:[%s23510_s3 + $0x34c] ss:$16 sps:$4 sm:$0xff]  }
 0x3d5   : > { %v5909_v4 = vsel %vm5525_vm1, %v5333_v62, %v5717_v10  ;;  %v5911_v12 = vsel %vm5527_vm2, %v5335_v30, %v5719_v45  ;;  %vm5528_vm3 = vcmp.gt.f32.partialorder %v5336_v16, 0.0  ;;  %v5720_v34 = vmul.f32 0.01, %v5336_v16  ;;  %8114 = vmatprep.mubr.bf16.mxu0 %v19839_v55  ;;  %9879 = vmatprep.mubr.bf16.mxu1 %v19839_v55  ;;  %v17058_v62 = vld [vmem:[%s23510_s3 + $0x340] ss:$16 sps:$4 sm:$0xff]   ;;  %v24154_v27 = vld [vmem:[#allocation184_spill] sm:$0xff] }
 0x3d6   : > { %v20348_v1 = vpack.c.bf16 %v5911_v12, %v5909_v4  ;;  %v5337_v42 = vadd.f32 %v19635_v61, %v5133_v44  ;;  %v5338_v52 = vadd.f32 %v19630_v58, %v5134_v37  ;;  %v5135_v43 = vmax.f32 %v4861_v59, %v4863_v19  ;;  %v3448_v18 = vpop.f32.mrb[48].mxu0  ;;  %v4441_v33 = vpop.f32.mrb[48].mxu1  ;;  %8384 = vmatpush1.bf16.msra.mxu0 %v17052_v47  ;;  %v24153_v10 = vld [vmem:[#allocation183_spill] sm:$0xff]  ;;  %v17061_v44 = vld [vmem:[%s23510_s3 + $0x348] ss:$16 sps:$4 sm:$0xff]   ;;  %v24155_v12 = vld [vmem:[#allocation185_spill] sm:$0xff] }
 0x3d7   : > { %v4864_v30 = vmax.f32 %v24153_v10, %v3448_v18  ;;  %v4866_v45 = vmax.f32 %v24154_v27, %v4441_v33  ;;  %v3450_v56 = vpop.f32.mrb[49].mxu0  ;;  %v4443_v26 = vpop.f32.mrb[49].mxu1  ;;  %8385 = vmatprep.subr.bf16.mxu0 %v17060_v17  ;;  %v5912_v37 = vsel %vm5528_vm3, %v5336_v16, %v5720_v34  ;;  %10150 = vmatprep.subr.bf16.mxu1 %v17063_v36  ;;  %v24156_v33 = vld [vmem:[#allocation186_spill] sm:$0xff]  ;;  %v24157_v55 = vld [vmem:[#allocation187_spill] sm:$0xff] }
 0x3d8   : > { %v5721_v59 = vmul.f32 0.01, %v5337_v42  ;;  %vm5530_vm4 = vcmp.gt.f32.partialorder %v5338_v52, 0.0  ;;  %v5722_v47 = vmul.f32 0.01, %v5338_v52  ;;  %v5339_v19 = vadd.f32 %v19635_v61, %v5135_v43  ;;  %v3452_v27 = vpop.f32.mrb[50].mxu0  ;;  %10151 = vmatpush1.bf16.msra.mxu1 %v17061_v44 }
 0x3d9   : > { %v5136_v4 = vmax.f32 %v4864_v30, %v4866_v45  ;;  %v4865_v18 = vmax.f32 %v24155_v12, %v3450_v56  ;;  %v4867_v10 = vmax.f32 %v24156_v33, %v4443_v26  ;;  %v4445_v8 = vpop.f32.mrb[50].mxu1  ;;  %vm5529_vm0 = vcmp.gt.f32.partialorder %v5337_v42, 0.0  ;;  %v3454_v16 = vpop.f32.mrb[51].mxu0  ;;  %v24159_v56 = vld [vmem:[#allocation189_spill] sm:$0xff]  ;;  %v24160_v26 = vld [vmem:[#allocation190_spill] sm:$0xff] }
 0x3da   : > { %v5914_v17 = vsel %vm5530_vm4, %v5338_v52, %v5722_v47  ;;  %v4868_v13 = vmax.f32 %v24157_v55, %v3452_v27  ;;  %v4870_v48 = vmax.f32 %v24158_v14, %v4445_v8  ;;  %v4447_v34 = vpop.f32.mrb[51].mxu1  ;;  %8386 = vmatpush1.bf16.msra.mxu0 %v17058_v62  ;;  %vm5531_vm5 = vcmp.gt.f32.partialorder %v5339_v19, 0.0  ;;  %v17064_v14 = vld [vmem:[%s23510_s3 + $0x360] ss:$16 sps:$4 sm:$0xff]   ;;  %v17066_v62 = vld [vmem:[%s23510_s3 + $0x364] ss:$16 sps:$4 sm:$0xff]  }
 0x3db   : > { %v20366_v57 = vpack.c.bf16 %v5914_v17, %v5912_v37  ;;  %v5723_v36 = vmul.f32 0.01, %v5339_v19  ;;  %v5340_v43 = vadd.f32 %v19630_v58, %v5136_v4  ;;  %8115 = vmatmul.mubr.bf16.gmra.mrb[156].mxu0 %v19826_v11  ;;  %v5137_v30 = vmax.f32 %v4865_v18, %v4867_v10  ;;  %v17067_v44 = vld [vmem:[%s23510_s3 + $0x368] ss:$16 sps:$4 sm:$0xff]   ;;  %v17069_v47 = vld [vmem:[%s23510_s3 + $0x36c] ss:$16 sps:$4 sm:$0xff]   ;;  %8387 = vmatprep.subr.bf16.mxu0 %v17066_v62 }
 0x3dc   : > { %v5138_v45 = vmax.f32 %v4868_v13, %v4870_v48  ;;  %v4869_v52 = vmax.f32 %v24159_v56, %v3454_v16  ;;  %v4871_v55 = vmax.f32 %v24160_v26, %v4447_v34  ;;  %9880 = vmatmul.mubr.bf16.gmra.mrb[156].mxu1 %v19826_v11  ;;  %v5913_v48 = vsel %vm5529_vm0, %v5337_v42, %v5721_v59  ;;  %v24161_v59 = vld [vmem:[#allocation191_spill] sm:$0xff]  ;;  %v24162_v27 = vld [vmem:[#allocation192_spill] sm:$0xff] }
 0x3dd   : > { %v5915_v13 = vsel %vm5531_vm5, %v5339_v19, %v5723_v36  ;;  %vm5532_vm6 = vcmp.gt.f32.partialorder %v5340_v43, 0.0  ;;  %v5724_v37 = vmul.f32 0.01, %v5340_v43  ;;  %8124 = vmatprep.mubr.bf16.mxu0 %v19855_v49  ;;  %9889 = vmatprep.mubr.bf16.mxu1 %v19855_v49  ;;  %v5341_v12 = vadd.f32 %v19635_v61, %v5137_v30 }
 0x3de   : > { %v20388_v4 = vpack.c.bf16 %v5915_v13, %v5913_v48  ;;  %v5342_v18 = vadd.f32 %v19630_v58, %v5138_v45  ;;  %v5139_v33 = vmax.f32 %v4869_v52, %v4871_v55  ;;  %v3458_v10 = vpop.f32.mrb[52].mxu0  ;;  %v4451_v42 = vpop.f32.mrb[52].mxu1  ;;  %10152 = vmatprep.subr.bf16.mxu1 %v17069_v47  ;;  %8388 = vmatpush1.bf16.msra.mxu0 %v17064_v14  ;;  %v24163_v52 = vld [vmem:[#allocation193_spill] sm:$0xff]  ;;  %v24164_v55 = vld [vmem:[#allocation194_spill] sm:$0xff]  ;;  %v24166_v14 = vld [vmem:[#allocation196_spill] sm:$0xff] }
 0x3df   : > { %v4872_v19 = vmax.f32 %v24161_v59, %v3458_v10  ;;  %v4874_v8 = vmax.f32 %v24162_v27, %v4451_v42  ;;  %v3460_v17 = vpop.f32.mrb[53].mxu0  ;;  %v4453_v16 = vpop.f32.mrb[53].mxu1  ;;  %v5916_v34 = vsel %vm5532_vm6, %v5340_v43, %v5724_v37  ;;  %v5725_v36 = vmul.f32 0.01, %v5341_v12  ;;  %10153 = vmatpush1.bf16.msra.mxu1 %v17067_v44  ;;  %v24165_v42 = vld [vmem:[#allocation195_spill] sm:$0xff] }
 0x3e0   : > { %vm5534_vm7 = vcmp.gt.f32.partialorder %v5342_v18, 0.0  ;;  %v5726_v56 = vmul.f32 0.01, %v5342_v18  ;;  %v5343_v30 = vadd.f32 %v19635_v61, %v5139_v33  ;;  %v4873_v26 = vmax.f32 %v24163_v52, %v3460_v17  ;;  %v3462_v48 = vpop.f32.mrb[54].mxu0  ;;  %v4455_v13 = vpop.f32.mrb[54].mxu1  ;;  %v24167_v17 = vld [vmem:[#allocation197_spill] sm:$0xff] }
 0x3e1   : > { %v5140_v45 = vmax.f32 %v4872_v19, %v4874_v8  ;;  %v4875_v62 = vmax.f32 %v24164_v55, %v4453_v16  ;;  %vm5533_vm8 = vcmp.gt.f32.partialorder %v5341_v12, 0.0  ;;  %v4876_v47 = vmax.f32 %v24165_v42, %v3462_v48  ;;  %v3464_v43 = vpop.f32.mrb[55].mxu0  ;;  %v4457_v37 = vpop.f32.mrb[55].mxu1  ;;  %v24168_v52 = vld [vmem:[#allocation198_spill] sm:$0xff]  ;;  %v24169_v42 = vld [vmem:[#allocation199_spill] sm:$0xff] }
 0x3e2   : > { %v5918_v10 = vsel %vm5534_vm7, %v5342_v18, %v5726_v56  ;;  %v4878_v59 = vmax.f32 %v24166_v14, %v4455_v13  ;;  %vm5535_vm9 = vcmp.gt.f32.partialorder %v5343_v30, 0.0  ;;  %v5727_v44 = vmul.f32 0.01, %v5343_v30  ;;  %v24170_v14 = vld [vmem:[#allocation200_spill] sm:$0xff] }
 0x3e3   : > { %v20400_v27 = vpack.c.bf16 %v5918_v10, %v5916_v34  ;;  %v5344_v33 = vadd.f32 %v19630_v58, %v5140_v45  ;;  %8125 = vmatmul.mubr.bf16.gmra.mrb[160].mxu0 %v19852_v2  ;;  %v5141_v19 = vmax.f32 %v4873_v26, %v4875_v62  ;;  %v4877_v16 = vmax.f32 %v24167_v17, %v3464_v43 }
 0x3e4   : > { %v5142_v8 = vmax.f32 %v4876_v47, %v4878_v59  ;;  %v4879_v18 = vmax.f32 %v24168_v52, %v4457_v37  ;;  %9890 = vmatmul.mubr.bf16.gmra.mrb[160].mxu1 %v19852_v2  ;;  %v5917_v56 = vsel %vm5533_vm8, %v5341_v12, %v5725_v36  ;;  %v5919_v55 = vsel %vm5535_vm9, %v5343_v30, %v5727_v44  ;;  %v24171_v52 = vld [vmem:[#allocation201_spill] sm:$0xff] }
 0x3e5   : > { %vm5536_vm10 = vcmp.gt.f32.partialorder %v5344_v33, 0.0  ;;  %v5728_v34 = vmul.f32 0.01, %v5344_v33  ;;  %8134 = vmatprep.mubr.bf16.mxu0 %v19882_v40  ;;  %9899 = vmatprep.mubr.bf16.mxu1 %v19882_v40  ;;  %v20410_v45 = vpack.c.bf16 %v5919_v55, %v5917_v56  ;;  %v5345_v26 = vadd.f32 %v19635_v61, %v5141_v19  ;;  %v24172_v56 = vld [vmem:[#allocation202_spill] sm:$0xff] }
 0x3e6   : > { %v5346_v62 = vadd.f32 %v19630_v58, %v5142_v8  ;;  %v5143_v48 = vmax.f32 %v4877_v16, %v4879_v18  ;;  %v3468_v13 = vpop.f32.mrb[56].mxu0  ;;  %v4461_v10 = vpop.f32.mrb[56].mxu1 }
 0x3e7   : > { %v4880_v47 = vmax.f32 %v24169_v42, %v3468_v13  ;;  %v4882_v12 = vmax.f32 %v24170_v14, %v4461_v10  ;;  %v3470_v36 = vpop.f32.mrb[57].mxu0  ;;  %v4463_v30 = vpop.f32.mrb[57].mxu1  ;;  %v5920_v59 = vsel %vm5536_vm10, %v5344_v33, %v5728_v34  ;;  %v5729_v43 = vmul.f32 0.01, %v5345_v26  ;;  %v24173_v13 = vld [vmem:[#allocation203_spill] sm:$0xff]  ;;  %v24174_v10 = vld [vmem:[#allocation204_spill] sm:$0xff] }
 0x3e8   : > { %vm5538_vm11 = vcmp.gt.f32.partialorder %v5346_v62, 0.0  ;;  %v5730_v37 = vmul.f32 0.01, %v5346_v62  ;;  %v5347_v44 = vadd.f32 %v19635_v61, %v5143_v48  ;;  %v4881_v19 = vmax.f32 %v24171_v52, %v3470_v36  ;;  %v3472_v16 = vpop.f32.mrb[58].mxu0  ;;  %v4465_v18 = vpop.f32.mrb[58].mxu1  ;;  %v24175_v36 = vld [vmem:[#allocation205_spill] sm:$0xff] }
 0x3e9   : > { %v5144_v17 = vmax.f32 %v4880_v47, %v4882_v12  ;;  %v4883_v8 = vmax.f32 %v24172_v56, %v4463_v30  ;;  %vm5537_vm12 = vcmp.gt.f32.partialorder %v5345_v26, 0.0  ;;  %v4884_v42 = vmax.f32 %v24173_v13, %v3472_v16  ;;  %v3474_v40 = vpop.f32.mrb[59].mxu0  ;;  %v4467_v33 = vpop.f32.mrb[59].mxu1  ;;  %v17070_v47 = vld [vmem:[%s23510_s3 + $0x380] ss:$16 sps:$4 sm:$0xff]  }
 0x3ea   : > { %v5922_v55 = vsel %vm5538_vm11, %v5346_v62, %v5730_v37  ;;  %v4886_v14 = vmax.f32 %v24174_v10, %v4465_v18  ;;  %vm5539_vm13 = vcmp.gt.f32.partialorder %v5347_v44, 0.0  ;;  %v5731_v2 = vmul.f32 0.01, %v5347_v44  ;;  %v24176_v37 = vld [vmem:[#allocation206_spill] sm:$0xff] }
 0x3eb   : > { %v20421_v34 = vpack.c.bf16 %v5922_v55, %v5920_v59  ;;  %v5348_v48 = vadd.f32 %v19630_v58, %v5144_v17  ;;  %8135 = vmatmul.mubr.bf16.gmra.mrb[164].mxu0 %v19869_v9  ;;  %v5145_v12 = vmax.f32 %v4881_v19, %v4883_v8  ;;  %v4885_v30 = vmax.f32 %v24175_v36, %v3474_v40  ;;  %v17072_v59 = vld [vmem:[%s23510_s3 + $0x384] ss:$16 sps:$4 sm:$0xff]   ;;  %v17073_v17 = vld [vmem:[%s23510_s3 + $0x388] ss:$16 sps:$4 sm:$0xff]   ;;  %v17075_v56 = vld [vmem:[%s23510_s3 + $0x38c] ss:$16 sps:$4 sm:$0xff]  }
 0x3ec   : > { %v5146_v62 = vmax.f32 %v4884_v42, %v4886_v14  ;;  %v4887_v52 = vmax.f32 %v24176_v37, %v4467_v33  ;;  %9900 = vmatmul.mubr.bf16.gmra.mrb[164].mxu1 %v19869_v9  ;;  %v5921_v19 = vsel %vm5537_vm12, %v5345_v26, %v5729_v43  ;;  %v5923_v8 = vsel %vm5539_vm13, %v5347_v44, %v5731_v2  ;;  %v24177_v14 = vld [vmem:[#allocation207_spill] sm:$0xff]  ;;  %v24178_v26 = vld [vmem:[#allocation208_spill] sm:$0xff] }
 0x3ed   : > { %vm5540_vm14 = vcmp.gt.f32.partialorder %v5348_v48, 0.0  ;;  %v5732_v40 = vmul.f32 0.01, %v5348_v48  ;;  %8144 = vmatprep.mubr.bf16.mxu0 %v19898_v53  ;;  %9909 = vmatprep.mubr.bf16.mxu1 %v19898_v53  ;;  %v20443_v16 = vpack.c.bf16 %v5923_v8, %v5921_v19  ;;  %v5349_v18 = vadd.f32 %v19635_v61, %v5145_v12 }
 0x3ee   : > { %v5350_v55 = vadd.f32 %v19630_v58, %v5146_v62  ;;  %v5147_v13 = vmax.f32 %v4885_v30, %v4887_v52  ;;  %v3478_v42 = vpop.f32.mrb[60].mxu0  ;;  %v4471_v10 = vpop.f32.mrb[60].mxu1  ;;  %8389 = vmatprep.subr.bf16.mxu0 %v17072_v59  ;;  %10154 = vmatprep.subr.bf16.mxu1 %v17075_v56  ;;  %v24179_v30 = vld [vmem:[#allocation209_spill] sm:$0xff]  ;;  %v24180_v59 = vld [vmem:[#allocation210_spill] sm:$0xff] }
 0x3ef   : > { %v4888_v33 = vmax.f32 %v24177_v14, %v3478_v42  ;;  %v4890_v2 = vmax.f32 %v24178_v26, %v4471_v10  ;;  %v3480_v43 = vpop.f32.mrb[61].mxu0  ;;  %v4473_v44 = vpop.f32.mrb[61].mxu1  ;;  %8390 = vmatpush1.bf16.msra.mxu0 %v17070_v47  ;;  %v5924_v36 = vsel %vm5540_vm14, %v5348_v48, %v5732_v40  ;;  %v5733_v37 = vmul.f32 0.01, %v5349_v18  ;;  %10155 = vmatpush1.bf16.msra.mxu1 %v17073_v17  ;;  %v24181_v26 = vld [vmem:[#allocation211_spill] sm:$0xff]  ;;  %v24182_v47 = vld [vmem:[#allocation212_spill] sm:$0xff] }
 0x3f0   : > { %vm5542_vm15 = vcmp.gt.f32.partialorder %v5350_v55, 0.0  ;;  %v5734_v19 = vmul.f32 0.01, %v5350_v55  ;;  %v5351_v12 = vadd.f32 %v19635_v61, %v5147_v13  ;;  %v4889_v52 = vmax.f32 %v24179_v30, %v3480_v43  ;;  %v3482_v42 = vpop.f32.mrb[62].mxu0  ;;  %v4475_v14 = vpop.f32.mrb[62].mxu1  ;;  %v24183_v43 = vld [vmem:[#allocation213_spill] sm:$0xff] }
 0x3f1   : > { %v5148_v62 = vmax.f32 %v4888_v33, %v4890_v2  ;;  %v4891_v8 = vmax.f32 %v24180_v59, %v4473_v44  ;;  %vm5541_vm1 = vcmp.gt.f32.partialorder %v5349_v18, 0.0  ;;  %v4892_v56 = vmax.f32 %v24181_v26, %v3482_v42  ;;  %v3484_v48 = vpop.f32.mrb[63].mxu0  ;;  %v4477_v40 = vpop.f32.mrb[63].mxu1  ;;  %v24184_v30 = vld [vmem:[#allocation214_spill] sm:$0xff] }
 0x3f2   : > { %v5926_v10 = vsel %vm5542_vm15, %v5350_v55, %v5734_v19  ;;  %v4894_v53 = vmax.f32 %v24182_v47, %v4475_v14  ;;  %vm5543_vm2 = vcmp.gt.f32.partialorder %v5351_v12, 0.0  ;;  %v5735_v17 = vmul.f32 0.01, %v5351_v12 }
 0x3f3   : > { %v20455_v9 = vpack.c.bf16 %v5926_v10, %v5924_v36  ;;  %v5352_v13 = vadd.f32 %v19630_v58, %v5148_v62  ;;  %8145 = vmatmul.mubr.bf16.gmra.mrb[168].mxu0 %v19895_v50  ;;  %v5149_v33 = vmax.f32 %v4889_v52, %v4891_v8  ;;  %v4893_v44 = vmax.f32 %v24183_v43, %v3484_v48  ;;  %v24185_v10 = vld [vmem:[#allocation215_spill] sm:$0xff] }
 0x3f4   : > { %v5150_v2 = vmax.f32 %v4892_v56, %v4894_v53  ;;  %v4895_v55 = vmax.f32 %v24184_v30, %v4477_v40  ;;  %9910 = vmatmul.mubr.bf16.gmra.mrb[168].mxu1 %v19895_v50  ;;  %v5925_v19 = vsel %vm5541_vm1, %v5349_v18, %v5733_v37  ;;  %v5927_v59 = vsel %vm5543_vm2, %v5351_v12, %v5735_v17  ;;  %v24186_v56 = vld [vmem:[#allocation216_spill] sm:$0xff]  ;;  %v24187_v30 = vld [vmem:[#allocation217_spill] sm:$0xff] }
 0x3f5   : > { %vm5544_vm3 = vcmp.gt.f32.partialorder %v5352_v13, 0.0  ;;  %v5736_v36 = vmul.f32 0.01, %v5352_v13  ;;  %8154 = vmatprep.mubr.bf16.mxu0 %v19935_v51  ;;  %9919 = vmatprep.mubr.bf16.mxu1 %v19935_v51  ;;  %v20465_v62 = vpack.c.bf16 %v5927_v59, %v5925_v19  ;;  %v5353_v52 = vadd.f32 %v19635_v61, %v5149_v33  ;;  %v24188_v19 = vld [vmem:[#allocation218_spill] sm:$0xff] }
 0x3f6   : > { %v5354_v53 = vadd.f32 %v19630_v58, %v5150_v2  ;;  %v5151_v8 = vmax.f32 %v4893_v44, %v4895_v55  ;;  %v3488_v42 = vpop.f32.mrb[64].mxu0  ;;  %v4481_v14 = vpop.f32.mrb[64].mxu1 }
 0x3f7   : > { %v4896_v26 = vmax.f32 %v24185_v10, %v3488_v42  ;;  %v4898_v18 = vmax.f32 %v24186_v56, %v4481_v14  ;;  %v3490_v37 = vpop.f32.mrb[65].mxu0  ;;  %v4483_v12 = vpop.f32.mrb[65].mxu1  ;;  %v5928_v47 = vsel %vm5544_vm3, %v5352_v13, %v5736_v36  ;;  %v5737_v48 = vmul.f32 0.01, %v5353_v52  ;;  %v24189_v42 = vld [vmem:[#allocation219_spill] sm:$0xff]  ;;  %v24190_v14 = vld [vmem:[#allocation220_spill] sm:$0xff] }
 0x3f8   : > { %vm5546_vm4 = vcmp.gt.f32.partialorder %v5354_v53, 0.0  ;;  %v5738_v40 = vmul.f32 0.01, %v5354_v53  ;;  %v5355_v17 = vadd.f32 %v19635_v61, %v5151_v8  ;;  %v4897_v33 = vmax.f32 %v24187_v30, %v3490_v37  ;;  %v3492_v44 = vpop.f32.mrb[66].mxu0  ;;  %v4485_v55 = vpop.f32.mrb[66].mxu1  ;;  %v24191_v37 = vld [vmem:[#allocation221_spill] sm:$0xff] }
 0x3f9   : > { %v5152_v43 = vmax.f32 %v4896_v26, %v4898_v18  ;;  %v4899_v2 = vmax.f32 %v24188_v19, %v4483_v12  ;;  %vm5545_vm0 = vcmp.gt.f32.partialorder %v5353_v52, 0.0  ;;  %v4900_v10 = vmax.f32 %v24189_v42, %v3492_v44  ;;  %v3494_v51 = vpop.f32.mrb[67].mxu0  ;;  %v4487_v13 = vpop.f32.mrb[67].mxu1  ;;  %v17076_v26 = vld [vmem:[%s23510_s3 + $0x3a0] ss:$16 sps:$4 sm:$0xff]  }
 0x3fa   : > { %v5930_v59 = vsel %vm5546_vm4, %v5354_v53, %v5738_v40  ;;  %v4902_v56 = vmax.f32 %v24190_v14, %v4485_v55  ;;  %vm5547_vm5 = vcmp.gt.f32.partialorder %v5355_v17, 0.0  ;;  %v5739_v50 = vmul.f32 0.01, %v5355_v17  ;;  %v24192_v40 = vld [vmem:[#allocation222_spill] sm:$0xff] }
 0x3fb   : > { %v20476_v36 = vpack.c.bf16 %v5930_v59, %v5928_v47  ;;  %v5356_v8 = vadd.f32 %v19630_v58, %v5152_v43  ;;  %8155 = vmatmul.mubr.bf16.gmra.mrb[172].mxu0 %v19913_v23  ;;  %v5153_v18 = vmax.f32 %v4897_v33, %v4899_v2  ;;  %v4901_v12 = vmax.f32 %v24191_v37, %v3494_v51  ;;  %v17078_v47 = vld [vmem:[%s23510_s3 + $0x3a4] ss:$16 sps:$4 sm:$0xff]   ;;  %v17079_v43 = vld [vmem:[%s23510_s3 + $0x3a8] ss:$16 sps:$4 sm:$0xff]   ;;  %v17081_v19 = vld [vmem:[%s23510_s3 + $0x3ac] ss:$16 sps:$4 sm:$0xff]  }
 0x3fc   : > { %v5154_v53 = vmax.f32 %v4900_v10, %v4902_v56  ;;  %v4903_v30 = vmax.f32 %v24192_v40, %v4487_v13  ;;  %9920 = vmatmul.mubr.bf16.gmra.mrb[172].mxu1 %v19913_v23  ;;  %v5929_v33 = vsel %vm5545_vm0, %v5353_v52, %v5737_v48  ;;  %v5931_v2 = vsel %vm5547_vm5, %v5355_v17, %v5739_v50  ;;  %v24193_v56 = vld [vmem:[#allocation223_spill] sm:$0xff]  ;;  %v24194_v52 = vld [vmem:[#allocation224_spill] sm:$0xff] }
 0x3fd   : > { %vm5548_vm6 = vcmp.gt.f32.partialorder %v5356_v8, 0.0  ;;  %v5740_v51 = vmul.f32 0.01, %v5356_v8  ;;  %8164 = vmatprep.mubr.bf16.mxu0 %v19929_v0  ;;  %9929 = vmatprep.mubr.bf16.mxu1 %v19929_v0  ;;  %v20498_v44 = vpack.c.bf16 %v5931_v2, %v5929_v33  ;;  %v5357_v55 = vadd.f32 %v19635_v61, %v5153_v18 }
 0x3fe   : > { %v5358_v59 = vadd.f32 %v19630_v58, %v5154_v53  ;;  %v5155_v42 = vmax.f32 %v4901_v12, %v4903_v30  ;;  %v3498_v10 = vpop.f32.mrb[68].mxu0  ;;  %v4491_v14 = vpop.f32.mrb[68].mxu1  ;;  %8391 = vmatprep.subr.bf16.mxu0 %v17078_v47  ;;  %10156 = vmatprep.subr.bf16.mxu1 %v17081_v19  ;;  %v24195_v12 = vld [vmem:[#allocation225_spill] sm:$0xff]  ;;  %v24196_v47 = vld [vmem:[#allocation226_spill] sm:$0xff] }
 0x3ff   : > { %v4904_v13 = vmax.f32 %v24193_v56, %v3498_v10  ;;  %v4906_v50 = vmax.f32 %v24194_v52, %v4491_v14  ;;  %v3500_v48 = vpop.f32.mrb[69].mxu0  ;;  %v4493_v17 = vpop.f32.mrb[69].mxu1  ;;  %8392 = vmatpush1.bf16.msra.mxu0 %v17076_v26  ;;  %v5932_v37 = vsel %vm5548_vm6, %v5356_v8, %v5740_v51  ;;  %v5741_v40 = vmul.f32 0.01, %v5357_v55  ;;  %10157 = vmatpush1.bf16.msra.mxu1 %v17079_v43  ;;  %v24197_v52 = vld [vmem:[#allocation227_spill] sm:$0xff]  ;;  %v24198_v26 = vld [vmem:[#allocation228_spill] sm:$0xff] }
 0x400   : > { %vm5550_vm7 = vcmp.gt.f32.partialorder %v5358_v59, 0.0  ;;  %v5742_v33 = vmul.f32 0.01, %v5358_v59  ;;  %v5359_v18 = vadd.f32 %v19635_v61, %v5155_v42  ;;  %v4905_v30 = vmax.f32 %v24195_v12, %v3500_v48  ;;  %v3502_v10 = vpop.f32.mrb[70].mxu0  ;;  %v4495_v56 = vpop.f32.mrb[70].mxu1  ;;  %v24200_v48 = vld [vmem:[#allocation229_spill] sm:$0xff] }
 0x401   : > { %v5156_v53 = vmax.f32 %v4904_v13, %v4906_v50  ;;  %v4907_v2 = vmax.f32 %v24196_v47, %v4493_v17  ;;  %vm5549_vm8 = vcmp.gt.f32.partialorder %v5357_v55, 0.0  ;;  %v4908_v19 = vmax.f32 %v24197_v52, %v3502_v10  ;;  %v3504_v8 = vpop.f32.mrb[71].mxu0  ;;  %v4497_v51 = vpop.f32.mrb[71].mxu1  ;;  %v17082_v13 = vld [vmem:[%s23510_s3 + $0x3c0] ss:$16 sps:$4 sm:$0xff]  }
 0x402   : > { %v5934_v14 = vsel %vm5550_vm7, %v5358_v59, %v5742_v33  ;;  %v4910_v0 = vmax.f32 %v24198_v26, %v4495_v56  ;;  %vm5551_vm9 = vcmp.gt.f32.partialorder %v5359_v18, 0.0  ;;  %v5743_v43 = vmul.f32 0.01, %v5359_v18  ;;  %v24201_v33 = vld [vmem:[#allocation230_spill] sm:$0xff] }
 0x403   : > { %v20510_v23 = vpack.c.bf16 %v5934_v14, %v5932_v37  ;;  %v5360_v42 = vadd.f32 %v19630_v58, %v5156_v53  ;;  %8165 = vmatmul.mubr.bf16.gmra.mrb[176].mxu0 %v19926_v63  ;;  %v5157_v50 = vmax.f32 %v4905_v30, %v4907_v2  ;;  %v4909_v17 = vmax.f32 %v24200_v48, %v3504_v8  ;;  %v17084_v37 = vld [vmem:[%s23510_s3 + $0x3c4] ss:$16 sps:$4 sm:$0xff]   ;;  %v17085_v53 = vld [vmem:[%s23510_s3 + $0x3c8] ss:$16 sps:$4 sm:$0xff]   ;;  %v17087_v47 = vld [vmem:[%s23510_s3 + $0x3cc] ss:$16 sps:$4 sm:$0xff]  }
 0x404   : > { %v5158_v59 = vmax.f32 %v4908_v19, %v4910_v0  ;;  %v4911_v12 = vmax.f32 %v24201_v33, %v4497_v51  ;;  %9930 = vmatmul.mubr.bf16.gmra.mrb[176].mxu1 %v19926_v63  ;;  %v5933_v0 = vsel %vm5549_vm8, %v5357_v55, %v5741_v40  ;;  %v5935_v30 = vsel %vm5551_vm9, %v5359_v18, %v5743_v43  ;;  %v24203_v8 = vld [vmem:[#allocation231_spill] sm:$0xff]  ;;  %v24204_v55 = vld [vmem:[#allocation232_spill] sm:$0xff] }
 0x405   : > { %24199 = vst [vmem:[#allocation30_spill] sm:$0xff] %v20510_v23  ;;  %vm5552_vm10 = vcmp.gt.f32.partialorder %v5360_v42, 0.0  ;;  %v5744_v2 = vmul.f32 0.01, %v5360_v42  ;;  %8174 = vmatprep.mubr.bf16.mxu0 %v19952_v7  ;;  %9939 = vmatprep.mubr.bf16.mxu1 %v19952_v7  ;;  %v20532_v10 = vpack.c.bf16 %v5935_v30, %v5933_v0  ;;  %v5361_v56 = vadd.f32 %v19635_v61, %v5157_v50 }
 0x406   : > { %v5362_v14 = vadd.f32 %v19630_v58, %v5158_v59  ;;  %v5159_v52 = vmax.f32 %v4909_v17, %v4911_v12  ;;  %v3508_v19 = vpop.f32.mrb[72].mxu0  ;;  %v4501_v26 = vpop.f32.mrb[72].mxu1  ;;  %8393 = vmatprep.subr.bf16.mxu0 %v17084_v37  ;;  %10158 = vmatprep.subr.bf16.mxu1 %v17087_v47  ;;  %v24205_v17 = vld [vmem:[#allocation233_spill] sm:$0xff]  ;;  %v24206_v37 = vld [vmem:[#allocation234_spill] sm:$0xff] }
 0x407   : > { %24202 = vst [vmem:[#allocation31_spill] sm:$0xff] %v20532_v10  ;;  %v4912_v51 = vmax.f32 %v24203_v8, %v3508_v19  ;;  %v4914_v40 = vmax.f32 %v24204_v55, %v4501_v26  ;;  %v3510_v18 = vpop.f32.mrb[73].mxu0  ;;  %v4503_v43 = vpop.f32.mrb[73].mxu1  ;;  %8394 = vmatpush1.bf16.msra.mxu0 %v17082_v13  ;;  %v5936_v48 = vsel %vm5552_vm10, %v5360_v42, %v5744_v2  ;;  %v5745_v33 = vmul.f32 0.01, %v5361_v56  ;;  %v24207_v55 = vld [vmem:[#allocation235_spill] sm:$0xff] }
 0x408   : > { %vm5554_vm11 = vcmp.gt.f32.partialorder %v5362_v14, 0.0  ;;  %v5746_v0 = vmul.f32 0.01, %v5362_v14  ;;  %10159 = vmatpush1.bf16.msra.mxu1 %v17085_v53  ;;  %v5363_v50 = vadd.f32 %v19635_v61, %v5159_v52  ;;  %v4913_v12 = vmax.f32 %v24205_v17, %v3510_v18  ;;  %v3512_v19 = vpop.f32.mrb[74].mxu0  ;;  %v4505_v8 = vpop.f32.mrb[74].mxu1  ;;  %v24208_v13 = vld [vmem:[#allocation236_spill] sm:$0xff] }
 0x409   : > { %v5160_v59 = vmax.f32 %v4912_v51, %v4914_v40  ;;  %v4915_v30 = vmax.f32 %v24206_v37, %v4503_v43  ;;  %vm5553_vm12 = vcmp.gt.f32.partialorder %v5361_v56, 0.0  ;;  %v4916_v47 = vmax.f32 %v24207_v55, %v3512_v19  ;;  %v3514_v42 = vpop.f32.mrb[75].mxu0  ;;  %v4507_v2 = vpop.f32.mrb[75].mxu1  ;;  %v24210_v18 = vld [vmem:[#allocation237_spill] sm:$0xff]  ;;  %v24211_v17 = vld [vmem:[#allocation238_spill] sm:$0xff] }
 0x40a   : > { %v5938_v26 = vsel %vm5554_vm11, %v5362_v14, %v5746_v0  ;;  %v4918_v23 = vmax.f32 %v24208_v13, %v4505_v8  ;;  %vm5555_vm13 = vcmp.gt.f32.partialorder %v5363_v50, 0.0  ;;  %v5747_v53 = vmul.f32 0.01, %v5363_v50 }
 0x40b   : > { %v20544_v10 = vpack.c.bf16 %v5938_v26, %v5936_v48  ;;  %v5364_v52 = vadd.f32 %v19630_v58, %v5160_v59  ;;  %8175 = vmatmul.mubr.bf16.gmra.mrb[180].mxu0 %v19948_v15  ;;  %v5161_v51 = vmax.f32 %v4913_v12, %v4915_v30  ;;  %v4917_v43 = vmax.f32 %v24210_v18, %v3514_v42  ;;  %v24213_v26 = vld [vmem:[#allocation239_spill] sm:$0xff] }
 0x40c   : > { %v5162_v40 = vmax.f32 %v4916_v47, %v4918_v23  ;;  %v4919_v14 = vmax.f32 %v24211_v17, %v4507_v2  ;;  %9940 = vmatmul.mubr.bf16.gmra.mrb[180].mxu1 %v19948_v15  ;;  %v5937_v0 = vsel %vm5553_vm12, %v5361_v56, %v5745_v33  ;;  %v5939_v37 = vsel %vm5555_vm13, %v5363_v50, %v5747_v53  ;;  %v24214_v47 = vld [vmem:[#allocation240_spill] sm:$0xff]  ;;  %v24215_v17 = vld [vmem:[#allocation241_spill] sm:$0xff] }
 0x40d   : > { %24209 = vst [vmem:[#allocation32_spill] sm:$0xff] %v20544_v10  ;;  %vm5556_vm14 = vcmp.gt.f32.partialorder %v5364_v52, 0.0  ;;  %v5748_v48 = vmul.f32 0.01, %v5364_v52  ;;  %8184 = vmatprep.mubr.bf16.mxu0 %v19973_v35  ;;  %9949 = vmatprep.mubr.bf16.mxu1 %v19973_v35  ;;  %v20554_v59 = vpack.c.bf16 %v5939_v37, %v5937_v0  ;;  %v5365_v12 = vadd.f32 %v19635_v61, %v5161_v51  ;;  %v24216_v0 = vld [vmem:[#allocation242_spill] sm:$0xff] }
 0x40e   : > { %v5366_v23 = vadd.f32 %v19630_v58, %v5162_v40  ;;  %v5163_v30 = vmax.f32 %v4917_v43, %v4919_v14  ;;  %v3518_v19 = vpop.f32.mrb[76].mxu0  ;;  %v4511_v8 = vpop.f32.mrb[76].mxu1 }
 0x40f   : > { %24212 = vst [vmem:[#allocation33_spill] sm:$0xff] %v20554_v59  ;;  %v4920_v55 = vmax.f32 %v24213_v26, %v3518_v19  ;;  %v4922_v56 = vmax.f32 %v24214_v47, %v4511_v8  ;;  %v3520_v33 = vpop.f32.mrb[77].mxu0  ;;  %v4513_v50 = vpop.f32.mrb[77].mxu1  ;;  %v5940_v13 = vsel %vm5556_vm14, %v5364_v52, %v5748_v48  ;;  %v5749_v42 = vmul.f32 0.01, %v5365_v12  ;;  %v24217_v19 = vld [vmem:[#allocation243_spill] sm:$0xff] }
 0x410   : > { %vm5558_vm15 = vcmp.gt.f32.partialorder %v5366_v23, 0.0  ;;  %v5750_v2 = vmul.f32 0.01, %v5366_v23  ;;  %v5367_v53 = vadd.f32 %v19635_v61, %v5163_v30  ;;  %v4921_v51 = vmax.f32 %v24215_v17, %v3520_v33  ;;  %v3522_v43 = vpop.f32.mrb[78].mxu0  ;;  %v4515_v14 = vpop.f32.mrb[78].mxu1  ;;  %v24218_v8 = vld [vmem:[#allocation244_spill] sm:$0xff] }
 0x411   : > { %v5164_v18 = vmax.f32 %v4920_v55, %v4922_v56  ;;  %v4923_v40 = vmax.f32 %v24216_v0, %v4513_v50  ;;  %vm5557_vm1 = vcmp.gt.f32.partialorder %v5365_v12, 0.0  ;;  %v4924_v26 = vmax.f32 %v24217_v19, %v3522_v43  ;;  %v3524_v10 = vpop.f32.mrb[79].mxu0  ;;  %v4517_v52 = vpop.f32.mrb[79].mxu1  ;;  %v24220_v55 = vld [vmem:[#allocation18_spill] sm:$0xff]  ;;  %v17088_v56 = vld [vmem:[%s23510_s3 + $0x3e0] ss:$16 sps:$4 sm:$0xff]  }
 0x412   : > { %v5942_v37 = vsel %vm5558_vm15, %v5366_v23, %v5750_v2  ;;  %v4926_v47 = vmax.f32 %v24218_v8, %v4515_v14  ;;  %vm5559_vm2 = vcmp.gt.f32.partialorder %v5367_v53, 0.0  ;;  %v5751_v59 = vmul.f32 0.01, %v5367_v53  ;;  %v24221_v50 = vld [vmem:[#allocation245_spill] sm:$0xff]  ;;  %v24222_v17 = vld [vmem:[#allocation246_spill] sm:$0xff]  ;;  %v24223_v14 = vld [vmem:[#allocation20_spill] sm:$0xff] }
 0x413   : > { %v20565_v48 = vpack.c.bf16 %v5942_v37, %v5940_v13  ;;  %v5368_v30 = vadd.f32 %v19630_v58, %v5164_v18  ;;  %8185 = vmatmul.mubr.bf16.gmra.mrb[184].mxu0 %v24220_v55  ;;  %v5165_v33 = vmax.f32 %v4921_v51, %v4923_v40  ;;  %v4925_v2 = vmax.f32 %v24221_v50, %v3524_v10  ;;  %v17090_v13 = vld [vmem:[%s23510_s3 + $0x3e4] ss:$16 sps:$4 sm:$0xff]   ;;  %v17091_v18 = vld [vmem:[%s23510_s3 + $0x3e8] ss:$16 sps:$4 sm:$0xff]   ;;  %v17093_v43 = vld [vmem:[%s23510_s3 + $0x3ec] ss:$16 sps:$4 sm:$0xff]  }
 0x414   : > { %v5166_v23 = vmax.f32 %v4924_v26, %v4926_v47  ;;  %v4927_v0 = vmax.f32 %v24222_v17, %v4517_v52  ;;  %9950 = vmatmul.mubr.bf16.gmra.mrb[184].mxu1 %v24220_v55  ;;  %v5941_v51 = vsel %vm5557_vm1, %v5365_v12, %v5749_v42  ;;  %v5943_v40 = vsel %vm5559_vm2, %v5367_v53, %v5751_v59  ;;  %v24225_v50 = vld [vmem:[#allocation247_spill] sm:$0xff]  ;;  %v24226_v12 = vld [vmem:[#allocation248_spill] sm:$0xff] }
 0x415   : > { %24219 = vst [vmem:[#allocation34_spill] sm:$0xff] %v20565_v48  ;;  %vm5560_vm3 = vcmp.gt.f32.partialorder %v5368_v30, 0.0  ;;  %v5752_v10 = vmul.f32 0.01, %v5368_v30  ;;  %8194 = vmatprep.mubr.bf16.mxu0 %v24223_v14  ;;  %9959 = vmatprep.mubr.bf16.mxu1 %v24223_v14  ;;  %v20587_v37 = vpack.c.bf16 %v5943_v40, %v5941_v51  ;;  %v5369_v19 = vadd.f32 %v19635_v61, %v5165_v33 }
 0x416   : > { %v5370_v26 = vadd.f32 %v19630_v58, %v5166_v23  ;;  %v5167_v8 = vmax.f32 %v4925_v2, %v4927_v0  ;;  %v3528_v47 = vpop.f32.mrb[80].mxu0  ;;  %v4521_v52 = vpop.f32.mrb[80].mxu1  ;;  %8395 = vmatprep.subr.bf16.mxu0 %v17090_v13  ;;  %10160 = vmatprep.subr.bf16.mxu1 %v17093_v43  ;;  %v24227_v2 = vld [vmem:[#allocation249_spill] sm:$0xff]  ;;  %v24228_v13 = vld [vmem:[#allocation250_spill] sm:$0xff] }
 0x417   : > { %24224 = vst [vmem:[#allocation35_spill] sm:$0xff] %v20587_v37  ;;  %v4928_v17 = vmax.f32 %v24225_v50, %v3528_v47  ;;  %v4930_v59 = vmax.f32 %v24226_v12, %v4521_v52  ;;  %v3530_v42 = vpop.f32.mrb[81].mxu0  ;;  %v4523_v53 = vpop.f32.mrb[81].mxu1  ;;  %8396 = vmatpush1.bf16.msra.mxu0 %v17088_v56  ;;  %v5944_v48 = vsel %vm5560_vm3, %v5368_v30, %v5752_v10  ;;  %v5753_v51 = vmul.f32 0.01, %v5369_v19  ;;  %v24229_v12 = vld [vmem:[#allocation251_spill] sm:$0xff] }
 0x418   : > { %vm5562_vm4 = vcmp.gt.f32.partialorder %v5370_v26, 0.0  ;;  %v5754_v40 = vmul.f32 0.01, %v5370_v26  ;;  %10161 = vmatpush1.bf16.msra.mxu1 %v17091_v18  ;;  %v5371_v33 = vadd.f32 %v19635_v61, %v5167_v8  ;;  %v4929_v0 = vmax.f32 %v24227_v2, %v3530_v42  ;;  %v3532_v47 = vpop.f32.mrb[82].mxu0  ;;  %v4525_v50 = vpop.f32.mrb[82].mxu1  ;;  %v24230_v56 = vld [vmem:[#allocation252_spill] sm:$0xff] }
 0x419   : > { %v5168_v23 = vmax.f32 %v4928_v17, %v4930_v59  ;;  %v4931_v37 = vmax.f32 %v24228_v13, %v4523_v53  ;;  %vm5561_vm0 = vcmp.gt.f32.partialorder %v5369_v19, 0.0  ;;  %v4932_v43 = vmax.f32 %v24229_v12, %v3532_v47  ;;  %v3534_v30 = vpop.f32.mrb[83].mxu0  ;;  %v4527_v10 = vpop.f32.mrb[83].mxu1  ;;  %v24232_v17 = vld [vmem:[#allocation19_spill] sm:$0xff]  ;;  %v24233_v53 = vld [vmem:[#allocation253_spill] sm:$0xff]  ;;  %v24234_v13 = vld [vmem:[#allocation254_spill] sm:$0xff] }
 0x41a   : > { %v5946_v52 = vsel %vm5562_vm4, %v5370_v26, %v5754_v40  ;;  %v4934_v14 = vmax.f32 %v24230_v56, %v4525_v50  ;;  %vm5563_vm5 = vcmp.gt.f32.partialorder %v5371_v33, 0.0  ;;  %v5755_v18 = vmul.f32 0.01, %v5371_v33  ;;  %v24236_v12 = vld [vmem:[#allocation255_spill] sm:$0xff]  ;;  %v24237_v56 = vld [vmem:[#allocation256_spill] sm:$0xff] }
 0x41b   : > { %v20599_v55 = vpack.c.bf16 %v5946_v52, %v5944_v48  ;;  %v5372_v8 = vadd.f32 %v19630_v58, %v5168_v23  ;;  %8195 = vmatmul.mubr.bf16.gmra.mrb[188].mxu0 %v24232_v17  ;;  %v5169_v59 = vmax.f32 %v4929_v0, %v4931_v37  ;;  %v4933_v2 = vmax.f32 %v24233_v53, %v3534_v30 }
 0x41c   : > { %v5170_v42 = vmax.f32 %v4932_v43, %v4934_v14  ;;  %v4935_v26 = vmax.f32 %v24234_v13, %v4527_v10  ;;  %9960 = vmatmul.mubr.bf16.gmra.mrb[188].mxu1 %v24232_v17  ;;  %v5945_v40 = vsel %vm5561_vm0, %v5369_v19, %v5753_v51  ;;  %v5947_v47 = vsel %vm5563_vm5, %v5371_v33, %v5755_v18 }
 0x41d   : > { %24231 = vst [vmem:[#allocation36_spill] sm:$0xff] %v20599_v55  ;;  %vm5564_vm6 = vcmp.gt.f32.partialorder %v5372_v8, 0.0  ;;  %v5756_v48 = vmul.f32 0.01, %v5372_v8  ;;  %8204 = vmatprep.mubr.bf16.mxu0 %v20021_v46  ;;  %9969 = vmatprep.mubr.bf16.mxu1 %v20021_v46  ;;  %v20609_v23 = vpack.c.bf16 %v5947_v47, %v5945_v40  ;;  %v5373_v37 = vadd.f32 %v19635_v61, %v5169_v59  ;;  %v24238_v40 = vld [vmem:[#allocation257_spill] sm:$0xff]  ;;  %v24239_v47 = vld [vmem:[#allocation258_spill] sm:$0xff] }
 0x41e   : > { %v5374_v14 = vadd.f32 %v19630_v58, %v5170_v42  ;;  %v5171_v0 = vmax.f32 %v4933_v2, %v4935_v26  ;;  %v3538_v50 = vpop.f32.mrb[84].mxu0  ;;  %v4531_v52 = vpop.f32.mrb[84].mxu1 }
 0x41f   : > { %24235 = vst [vmem:[#allocation37_spill] sm:$0xff] %v20609_v23  ;;  %v4936_v43 = vmax.f32 %v24236_v12, %v3538_v50  ;;  %v4938_v19 = vmax.f32 %v24237_v56, %v4531_v52  ;;  %v3540_v51 = vpop.f32.mrb[85].mxu0  ;;  %v4533_v33 = vpop.f32.mrb[85].mxu1  ;;  %v5948_v30 = vsel %vm5564_vm6, %v5372_v8, %v5756_v48  ;;  %v5757_v10 = vmul.f32 0.01, %v5373_v37  ;;  %v24240_v50 = vld [vmem:[#allocation259_spill] sm:$0xff] }
 0x420   : > { %vm5566_vm7 = vcmp.gt.f32.partialorder %v5374_v14, 0.0  ;;  %v5758_v18 = vmul.f32 0.01, %v5374_v14  ;;  %v5375_v53 = vadd.f32 %v19635_v61, %v5171_v0  ;;  %v4937_v59 = vmax.f32 %v24238_v40, %v3540_v51  ;;  %v3542_v2 = vpop.f32.mrb[86].mxu0  ;;  %v4535_v26 = vpop.f32.mrb[86].mxu1  ;;  %v24241_v52 = vld [vmem:[#allocation260_spill] sm:$0xff] }
 0x421   : > { %v5172_v13 = vmax.f32 %v4936_v43, %v4938_v19  ;;  %v4939_v42 = vmax.f32 %v24239_v47, %v4533_v33  ;;  %vm5565_vm8 = vcmp.gt.f32.partialorder %v5373_v37, 0.0  ;;  %v4940_v12 = vmax.f32 %v24240_v50, %v3542_v2  ;;  %v3544_v23 = vpop.f32.mrb[87].mxu0  ;;  %v4537_v8 = vpop.f32.mrb[87].mxu1  ;;  %v24243_v51 = vld [vmem:[#allocation261_spill] sm:$0xff]  ;;  %v24244_v40 = vld [vmem:[#allocation262_spill] sm:$0xff]  ;;  %v24245_v47 = vld [vmem:[#allocation23_spill] sm:$0xff] }
 0x422   : > { %v5950_v55 = vsel %vm5566_vm7, %v5374_v14, %v5758_v18  ;;  %v4942_v56 = vmax.f32 %v24241_v52, %v4535_v26  ;;  %vm5567_vm9 = vcmp.gt.f32.partialorder %v5375_v53, 0.0  ;;  %v5759_v46 = vmul.f32 0.01, %v5375_v53  ;;  %v17096_v18 = vld [vmem:[%s23510_s3 + $0x404] ss:$16 sps:$4 sm:$0xff]  }
 0x423   : > { %v20620_v48 = vpack.c.bf16 %v5950_v55, %v5948_v30  ;;  %v5376_v0 = vadd.f32 %v19630_v58, %v5172_v13  ;;  %8205 = vmatmul.mubr.bf16.gmra.mrb[192].mxu0 %v20010_v38  ;;  %v5173_v43 = vmax.f32 %v4937_v59, %v4939_v42  ;;  %v4941_v33 = vmax.f32 %v24243_v51, %v3544_v23  ;;  %v17099_v55 = vld [vmem:[%s23510_s3 + $0x40c] ss:$16 sps:$4 sm:$0xff]   ;;  %v24247_v52 = vld [vmem:[#allocation263_spill] sm:$0xff] }
 0x424   : > { %v5174_v19 = vmax.f32 %v4940_v12, %v4942_v56  ;;  %v4943_v14 = vmax.f32 %v24244_v40, %v4537_v8  ;;  %9970 = vmatmul.mubr.bf16.gmra.mrb[192].mxu1 %v20010_v38  ;;  %v5949_v30 = vsel %vm5565_vm8, %v5373_v37, %v5757_v10  ;;  %v5951_v13 = vsel %vm5567_vm9, %v5375_v53, %v5759_v46  ;;  %v24248_v37 = vld [vmem:[#allocation264_spill] sm:$0xff] }
 0x425   : > { %24242 = vst [vmem:[#allocation38_spill] sm:$0xff] %v20620_v48  ;;  %vm5568_vm10 = vcmp.gt.f32.partialorder %v5376_v0, 0.0  ;;  %v5760_v59 = vmul.f32 0.01, %v5376_v0  ;;  %8214 = vmatprep.mubr.bf16.mxu0 %v24245_v47  ;;  %9979 = vmatprep.mubr.bf16.mxu1 %v24245_v47  ;;  %v20636_v23 = vpack.c.bf16 %v5951_v13, %v5949_v30  ;;  %v5377_v42 = vadd.f32 %v19635_v61, %v5173_v43 }
 0x426   : > { %v5378_v2 = vadd.f32 %v19630_v58, %v5174_v19  ;;  %v5175_v26 = vmax.f32 %v4941_v33, %v4943_v14  ;;  %v3548_v50 = vpop.f32.mrb[88].mxu0  ;;  %v4541_v12 = vpop.f32.mrb[88].mxu1  ;;  %8718 = vmatprep.subr.bf16.mxu0 %v17096_v18  ;;  %10483 = vmatprep.subr.bf16.mxu1 %v17099_v55  ;;  %v24249_v19 = vld [vmem:[#allocation265_spill] sm:$0xff]  ;;  %v24250_v14 = vld [vmem:[#allocation266_spill] sm:$0xff] }
 0x427   : > { %24246 = vst [vmem:[#allocation39_spill] sm:$0xff] %v20636_v23  ;;  %v4944_v56 = vmax.f32 %v24247_v52, %v3548_v50  ;;  %v4946_v46 = vmax.f32 %v24248_v37, %v4541_v12  ;;  %v3550_v10 = vpop.f32.mrb[89].mxu0  ;;  %v4543_v53 = vpop.f32.mrb[89].mxu1  ;;  %v5952_v8 = vsel %vm5568_vm10, %v5376_v0, %v5760_v59  ;;  %v5761_v51 = vmul.f32 0.01, %v5377_v42  ;;  %v24251_v12 = vld [vmem:[#allocation267_spill] sm:$0xff] }
 0x428   : > { %vm5570_vm11 = vcmp.gt.f32.partialorder %v5378_v2, 0.0  ;;  %v5762_v40 = vmul.f32 0.01, %v5378_v2  ;;  %v5379_v43 = vadd.f32 %v19635_v61, %v5175_v26  ;;  %v4945_v33 = vmax.f32 %v24249_v19, %v3550_v10  ;;  %v3552_v18 = vpop.f32.mrb[90].mxu0  ;;  %v4545_v48 = vpop.f32.mrb[90].mxu1  ;;  %v24252_v37 = vld [vmem:[#allocation268_spill] sm:$0xff] }
 0x429   : > { %v5176_v30 = vmax.f32 %v4944_v56, %v4946_v46  ;;  %v4947_v13 = vmax.f32 %v24250_v14, %v4543_v53  ;;  %vm5569_vm12 = vcmp.gt.f32.partialorder %v5377_v42, 0.0  ;;  %v4948_v52 = vmax.f32 %v24251_v12, %v3552_v18  ;;  %v3554_v23 = vpop.f32.mrb[91].mxu0  ;;  %v4547_v0 = vpop.f32.mrb[91].mxu1  ;;  %v24254_v56 = vld [vmem:[#allocation22_spill] sm:$0xff]  ;;  %v24255_v53 = vld [vmem:[#allocation269_spill] sm:$0xff]  ;;  %v24258_v12 = vld [vmem:[#allocation271_spill] sm:$0xff] }
 0x42a   : > { %v5954_v50 = vsel %vm5570_vm11, %v5378_v2, %v5762_v40  ;;  %v4950_v55 = vmax.f32 %v24252_v37, %v4545_v48  ;;  %vm5571_vm13 = vcmp.gt.f32.partialorder %v5379_v43, 0.0  ;;  %v5763_v47 = vmul.f32 0.01, %v5379_v43  ;;  %v24256_v14 = vld [vmem:[#allocation270_spill] sm:$0xff]  ;;  %v24259_v37 = vld [vmem:[#allocation272_spill] sm:$0xff] }
 0x42b   : > { %v20648_v59 = vpack.c.bf16 %v5954_v50, %v5952_v8  ;;  %v5380_v26 = vadd.f32 %v19630_v58, %v5176_v30  ;;  %8215 = vmatmul.mubr.bf16.gmra.mrb[196].mxu0 %v24254_v56  ;;  %v5177_v46 = vmax.f32 %v4945_v33, %v4947_v13  ;;  %v4949_v19 = vmax.f32 %v24255_v53, %v3554_v23 }
 0x42c   : > { %v5178_v10 = vmax.f32 %v4948_v52, %v4950_v55  ;;  %v4951_v2 = vmax.f32 %v24256_v14, %v4547_v0  ;;  %9980 = vmatmul.mubr.bf16.gmra.mrb[196].mxu1 %v24254_v56  ;;  %v5953_v48 = vsel %vm5569_vm12, %v5377_v42, %v5761_v51  ;;  %v5955_v40 = vsel %vm5571_vm13, %v5379_v43, %v5763_v47 }
 0x42d   : > { %24253 = vst [vmem:[#allocation40_spill] sm:$0xff] %v20648_v59  ;;  %vm5572_vm14 = vcmp.gt.f32.partialorder %v5380_v26, 0.0  ;;  %v5764_v8 = vmul.f32 0.01, %v5380_v26  ;;  %8224 = vmatprep.mubr.bf16.mxu0 %v20054_v39  ;;  %9989 = vmatprep.mubr.bf16.mxu1 %v20054_v39  ;;  %v20658_v30 = vpack.c.bf16 %v5955_v40, %v5953_v48  ;;  %v5381_v33 = vadd.f32 %v19635_v61, %v5177_v46  ;;  %v24260_v48 = vld [vmem:[#allocation273_spill] sm:$0xff]  ;;  %v24261_v40 = vld [vmem:[#allocation274_spill] sm:$0xff] }
 0x42e   : > { %v5382_v13 = vadd.f32 %v19630_v58, %v5178_v10  ;;  %v5179_v23 = vmax.f32 %v4949_v19, %v4951_v2  ;;  %v3558_v18 = vpop.f32.mrb[92].mxu0  ;;  %v4551_v50 = vpop.f32.mrb[92].mxu1 }
 0x42f   : > { %24257 = vst [vmem:[#allocation41_spill] sm:$0xff] %v20658_v30  ;;  %v4952_v52 = vmax.f32 %v24258_v12, %v3558_v18  ;;  %v4954_v42 = vmax.f32 %v24259_v37, %v4551_v50  ;;  %v3560_v47 = vpop.f32.mrb[93].mxu0  ;;  %v4553_v51 = vpop.f32.mrb[93].mxu1  ;;  %v5956_v43 = vsel %vm5572_vm14, %v5380_v26, %v5764_v8  ;;  %v5765_v55 = vmul.f32 0.01, %v5381_v33  ;;  %v24262_v18 = vld [vmem:[#allocation275_spill] sm:$0xff] }
 0x430   : > { %vm5574_vm15 = vcmp.gt.f32.partialorder %v5382_v13, 0.0  ;;  %v5766_v0 = vmul.f32 0.01, %v5382_v13  ;;  %v5383_v53 = vadd.f32 %v19635_v61, %v5179_v23  ;;  %v4953_v46 = vmax.f32 %v24260_v48, %v3560_v47  ;;  %v3562_v19 = vpop.f32.mrb[94].mxu0  ;;  %v4555_v2 = vpop.f32.mrb[94].mxu1  ;;  %v24263_v50 = vld [vmem:[#allocation276_spill] sm:$0xff] }
 0x431   : > { %v5180_v14 = vmax.f32 %v4952_v52, %v4954_v42  ;;  %v4955_v10 = vmax.f32 %v24261_v40, %v4553_v51  ;;  %vm5573_vm1 = vcmp.gt.f32.partialorder %v5381_v33, 0.0  ;;  %v4956_v12 = vmax.f32 %v24262_v18, %v3562_v19  ;;  %v3564_v30 = vpop.f32.mrb[95].mxu0  ;;  %v4557_v26 = vpop.f32.mrb[95].mxu1  ;;  %v24265_v47 = vld [vmem:[#allocation277_spill] sm:$0xff]  ;;  %v24266_v48 = vld [vmem:[#allocation278_spill] sm:$0xff]  ;;  %v24268_v19 = vld [vmem:[#allocation279_spill] sm:$0xff] }
 0x432   : > { %v5958_v59 = vsel %vm5574_vm15, %v5382_v13, %v5766_v0  ;;  %v4958_v37 = vmax.f32 %v24263_v50, %v4555_v2  ;;  %vm5575_vm2 = vcmp.gt.f32.partialorder %v5383_v53, 0.0  ;;  %v5767_v39 = vmul.f32 0.01, %v5383_v53  ;;  %v24269_v50 = vld [vmem:[#allocation280_spill] sm:$0xff] }
 0x433   : > { %v20669_v8 = vpack.c.bf16 %v5958_v59, %v5956_v43  ;;  %v5384_v23 = vadd.f32 %v19630_v58, %v5180_v14  ;;  %8225 = vmatmul.mubr.bf16.gmra.mrb[200].mxu0 %v20052_v21  ;;  %v5181_v52 = vmax.f32 %v4953_v46, %v4955_v10  ;;  %v4957_v51 = vmax.f32 %v24265_v47, %v3564_v30 }
 0x434   : > { %v5182_v42 = vmax.f32 %v4956_v12, %v4958_v37  ;;  %v4959_v13 = vmax.f32 %v24266_v48, %v4557_v26  ;;  %9990 = vmatmul.mubr.bf16.gmra.mrb[200].mxu1 %v20052_v21  ;;  %v5957_v0 = vsel %vm5573_vm1, %v5381_v33, %v5765_v55  ;;  %v5959_v40 = vsel %vm5575_vm2, %v5383_v53, %v5767_v39  ;;  %v24270_v26 = vld [vmem:[#allocation281_spill] sm:$0xff] }
 0x435   : > { %24264 = vst [vmem:[#allocation42_spill] sm:$0xff] %v20669_v8  ;;  %vm5576_vm3 = vcmp.gt.f32.partialorder %v5384_v23, 0.0  ;;  %v5768_v59 = vmul.f32 0.01, %v5384_v23  ;;  %8234 = vmatprep.mubr.bf16.mxu0 %v20079_v22  ;;  %9999 = vmatprep.mubr.bf16.mxu1 %v20079_v22  ;;  %v20679_v43 = vpack.c.bf16 %v5959_v40, %v5957_v0  ;;  %v5385_v14 = vadd.f32 %v19635_v61, %v5181_v52  ;;  %v24272_v0 = vld [vmem:[#allocation283_spill] sm:$0xff] }
 0x436   : > { %v5386_v46 = vadd.f32 %v19630_v58, %v5182_v42  ;;  %v5183_v30 = vmax.f32 %v4957_v51, %v4959_v13  ;;  %v3568_v10 = vpop.f32.mrb[96].mxu0  ;;  %v24271_v51 = vld [vmem:[#allocation282_spill] sm:$0xff] }
 0x437   : > { %24267 = vst [vmem:[#allocation43_spill] sm:$0xff] %v20679_v43  ;;  %v4960_v2 = vmax.f32 %v24268_v19, %v3568_v10  ;;  %v4561_v18 = vpop.f32.mrb[96].mxu1  ;;  %v3570_v12 = vpop.f32.mrb[97].mxu0  ;;  %v5960_v33 = vsel %vm5576_vm3, %v5384_v23, %v5768_v59  ;;  %v5769_v55 = vmul.f32 0.01, %v5385_v14  ;;  %vm5577_vm0 = vcmp.gt.f32.partialorder %v5385_v14, 0.0 }
 0x438   : > { %vm5578_vm4 = vcmp.gt.f32.partialorder %v5386_v46, 0.0  ;;  %v5770_v39 = vmul.f32 0.01, %v5386_v46  ;;  %v5387_v53 = vadd.f32 %v19635_v61, %v5183_v30  ;;  %v4962_v37 = vmax.f32 %v24269_v50, %v4561_v18  ;;  %v4563_v48 = vpop.f32.mrb[97].mxu1  ;;  %v3572_v52 = vpop.f32.mrb[98].mxu0  ;;  %v24274_v43 = vld [vmem:[#allocation25_spill] sm:$0xff] }
 0x439   : > { %v4961_v47 = vmax.f32 %v24270_v26, %v3570_v12  ;;  %v4963_v13 = vmax.f32 %v24271_v51, %v4563_v48  ;;  %v4964_v40 = vmax.f32 %v24272_v0, %v3572_v52  ;;  %v4565_v10 = vpop.f32.mrb[98].mxu1  ;;  %v3574_v19 = vpop.f32.mrb[99].mxu0  ;;  %v24275_v12 = vld [vmem:[#allocation284_spill] sm:$0xff]  ;;  %v24276_v26 = vld [vmem:[#allocation285_spill] sm:$0xff]  ;;  %v5961_v48 = vsel %vm5577_vm0, %v5385_v14, %v5769_v55  ;;  %v24279_v0 = vld [vmem:[#allocation287_spill] sm:$0xff] }
 0x43a   : > { %v5962_v42 = vsel %vm5578_vm4, %v5386_v46, %v5770_v39  ;;  %vm5579_vm5 = vcmp.gt.f32.partialorder %v5387_v53, 0.0  ;;  %v5771_v59 = vmul.f32 0.01, %v5387_v53  ;;  %v5184_v8 = vmax.f32 %v4960_v2, %v4962_v37  ;;  %v4567_v30 = vpop.f32.mrb[99].mxu1  ;;  %v24277_v46 = vld [vmem:[#allocation286_spill] sm:$0xff] }
 0x43b   : > { %v20689_v23 = vpack.c.bf16 %v5962_v42, %v5960_v33  ;;  %8235 = vmatmul.mubr.bf16.gmra.mrb[204].mxu0 %v24274_v43  ;;  %v5185_v18 = vmax.f32 %v4961_v47, %v4963_v13  ;;  %v4966_v50 = vmax.f32 %v24275_v12, %v4565_v10  ;;  %v4965_v22 = vmax.f32 %v24276_v26, %v3574_v19  ;;  %v24280_v26 = vld [vmem:[#allocation288_spill] sm:$0xff] }
 0x43c   : > { %v4967_v39 = vmax.f32 %v24277_v46, %v4567_v30  ;;  %10000 = vmatmul.mubr.bf16.gmra.mrb[204].mxu1 %v24274_v43  ;;  %v5963_v52 = vsel %vm5579_vm5, %v5387_v53, %v5771_v59  ;;  %v5388_v33 = vadd.f32 %v19630_v58, %v5184_v8  ;;  %8244 = vmatprep.mubr.bf16.mxu0 %v20121_v54 }
 0x43d   : > { %24273 = vst [vmem:[#allocation44_spill] sm:$0xff] %v20689_v23  ;;  %10009 = vmatprep.mubr.bf16.mxu1 %v20121_v54  ;;  %v20700_v2 = vpack.c.bf16 %v5963_v52, %v5961_v48  ;;  %v5389_v37 = vadd.f32 %v19635_v61, %v5185_v18  ;;  %v5186_v47 = vmax.f32 %v4964_v40, %v4966_v50  ;;  %v24281_v18 = vld [vmem:[#allocation289_spill] sm:$0xff] }
 0x43e   : > { %v5187_v42 = vmax.f32 %v4965_v22, %v4967_v39  ;;  %v3578_v51 = vpop.f32.mrb[100].mxu0  ;;  %vm5580_vm6 = vcmp.gt.f32.partialorder %v5388_v33, 0.0  ;;  %v5772_v13 = vmul.f32 0.01, %v5388_v33  ;;  %v24282_v22 = vld [vmem:[#allocation290_spill] sm:$0xff] }
 0x43f   : > { %24278 = vst [vmem:[#allocation45_spill] sm:$0xff] %v20700_v2  ;;  %v4968_v10 = vmax.f32 %v24279_v0, %v3578_v51  ;;  %v4571_v19 = vpop.f32.mrb[100].mxu1  ;;  %v3580_v14 = vpop.f32.mrb[101].mxu0  ;;  %v5773_v55 = vmul.f32 0.01, %v5389_v37  ;;  %v5390_v8 = vadd.f32 %v19630_v58, %v5186_v47  ;;  %v24283_v47 = vld [vmem:[#allocation291_spill] sm:$0xff] }
 0x440   : > { %v5391_v53 = vadd.f32 %v19635_v61, %v5187_v42  ;;  %v4573_v59 = vpop.f32.mrb[101].mxu1  ;;  %v3582_v30 = vpop.f32.mrb[102].mxu0  ;;  %v5964_v12 = vsel %vm5580_vm6, %v5388_v33, %v5772_v13  ;;  %v4970_v46 = vmax.f32 %v24280_v26, %v4571_v19  ;;  %v4969_v40 = vmax.f32 %v24281_v18, %v3580_v14  ;;  %v24284_v42 = vld [vmem:[#allocation292_spill] sm:$0xff]  ;;  %v24285_v13 = vld [vmem:[#allocation293_spill] sm:$0xff]  ;;  %v24286_v14 = vld [vmem:[#allocation294_spill] sm:$0xff] }
 0x441   : > { %v4971_v50 = vmax.f32 %v24282_v22, %v4573_v59  ;;  %v4575_v39 = vpop.f32.mrb[102].mxu1  ;;  %v3584_v48 = vpop.f32.mrb[103].mxu0  ;;  %vm5582_vm7 = vcmp.gt.f32.partialorder %v5390_v8, 0.0  ;;  %v5774_v52 = vmul.f32 0.01, %v5390_v8  ;;  %v4972_v2 = vmax.f32 %v24283_v47, %v3582_v30  ;;  %v24291_v47 = vld [vmem:[#allocation297_spill] sm:$0xff] }
 0x442   : > { %vm5583_vm8 = vcmp.gt.f32.partialorder %v5391_v53, 0.0  ;;  %v5775_v51 = vmul.f32 0.01, %v5391_v53  ;;  %v5188_v0 = vmax.f32 %v4968_v10, %v4970_v46  ;;  %v4974_v54 = vmax.f32 %v24284_v42, %v4575_v39  ;;  %v4577_v43 = vpop.f32.mrb[103].mxu1  ;;  %v24288_v39 = vld [vmem:[#allocation295_spill] sm:$0xff] }
 0x443   : > { %v5189_v23 = vmax.f32 %v4969_v40, %v4971_v50  ;;  %8245 = vmatmul.mubr.bf16.gmra.mrb[208].mxu0 %v20105_v5  ;;  %vm5581_vm9 = vcmp.gt.f32.partialorder %v5389_v37, 0.0  ;;  %v5966_v33 = vsel %vm5582_vm7, %v5390_v8, %v5774_v52  ;;  %v4973_v19 = vmax.f32 %v24285_v13, %v3584_v48 }
 0x444   : > { %v4975_v59 = vmax.f32 %v24286_v14, %v4577_v43  ;;  %10010 = vmatmul.mubr.bf16.gmra.mrb[208].mxu1 %v20105_v5  ;;  %8254 = vmatprep.mubr.bf16.mxu0 %v20149_v28  ;;  %v20716_v26 = vpack.c.bf16 %v5966_v33, %v5964_v12  ;;  %v5392_v10 = vadd.f32 %v19630_v58, %v5188_v0  ;;  %v24290_v0 = vld [vmem:[#allocation296_spill] sm:$0xff] }
 0x445   : > { %v5190_v30 = vmax.f32 %v4972_v2, %v4974_v54  ;;  %10019 = vmatprep.mubr.bf16.mxu1 %v20149_v28  ;;  %v5393_v46 = vadd.f32 %v19635_v61, %v5189_v23  ;;  %v5967_v8 = vsel %vm5583_vm8, %v5391_v53, %v5775_v51  ;;  %v5965_v43 = vsel %vm5581_vm9, %v5389_v37, %v5773_v55 }
 0x446   : > { %24287 = vst [vmem:[#allocation46_spill] sm:$0xff] %v20716_v26  ;;  %v5191_v18 = vmax.f32 %v4973_v19, %v4975_v59  ;;  %v3588_v40 = vpop.f32.mrb[104].mxu0  ;;  %vm5584_vm10 = vcmp.gt.f32.partialorder %v5392_v10, 0.0  ;;  %v5776_v22 = vmul.f32 0.01, %v5392_v10  ;;  %v20726_v2 = vpack.c.bf16 %v5967_v8, %v5965_v43  ;;  %v24292_v19 = vld [vmem:[#allocation298_spill] sm:$0xff] }
 0x447   : > { %v5394_v50 = vadd.f32 %v19630_v58, %v5190_v30  ;;  %v4976_v48 = vmax.f32 %v24288_v39, %v3588_v40  ;;  %v4581_v52 = vpop.f32.mrb[104].mxu1  ;;  %v3590_v54 = vpop.f32.mrb[105].mxu0  ;;  %vm5585_vm11 = vcmp.gt.f32.partialorder %v5393_v46, 0.0  ;;  %v5777_v51 = vmul.f32 0.01, %v5393_v46  ;;  %v24293_v59 = vld [vmem:[#allocation299_spill] sm:$0xff] }
 0x448   : > { %v5395_v12 = vadd.f32 %v19635_v61, %v5191_v18  ;;  %24289 = vst [vmem:[#allocation47_spill] sm:$0xff] %v20726_v2  ;;  %v4978_v23 = vmax.f32 %v24290_v0, %v4581_v52  ;;  %v4977_v42 = vmax.f32 %v24291_v47, %v3590_v54  ;;  %v4583_v33 = vpop.f32.mrb[105].mxu1  ;;  %v3592_v53 = vpop.f32.mrb[106].mxu0  ;;  %v5968_v55 = vsel %vm5584_vm10, %v5392_v10, %v5776_v22  ;;  %v24294_v39 = vld [vmem:[#allocation300_spill] sm:$0xff]  ;;  %v24295_v54 = vld [vmem:[#allocation301_spill] sm:$0xff] }
 0x449   : > { %vm5586_vm12 = vcmp.gt.f32.partialorder %v5394_v50, 0.0  ;;  %v5778_v37 = vmul.f32 0.01, %v5394_v50  ;;  %v4979_v14 = vmax.f32 %v24292_v19, %v4583_v33  ;;  %v4980_v30 = vmax.f32 %v24293_v59, %v3592_v53  ;;  %v4585_v18 = vpop.f32.mrb[106].mxu1  ;;  %v3594_v40 = vpop.f32.mrb[107].mxu0 }
 0x44a   : > { %v5192_v13 = vmax.f32 %v4976_v48, %v4978_v23  ;;  %v5779_v43 = vmul.f32 0.01, %v5395_v12  ;;  %v4982_v52 = vmax.f32 %v24294_v39, %v4585_v18  ;;  %v4981_v0 = vmax.f32 %v24295_v54, %v3594_v40  ;;  %v4587_v47 = vpop.f32.mrb[107].mxu1  ;;  %v24297_v23 = vld [vmem:[#allocation302_spill] sm:$0xff]  ;;  %v24300_v54 = vld [vmem:[#allocation305_spill] sm:$0xff] }
 0x44b   : > { %8255 = vmatmul.mubr.bf16.gmra.mrb[212].mxu0 %v20139_v24  ;;  %v5970_v8 = vsel %vm5586_vm12, %v5394_v50, %v5778_v37  ;;  %v5193_v48 = vmax.f32 %v4977_v42, %v4979_v14  ;;  %v4983_v33 = vmax.f32 %v24297_v23, %v4587_v47  ;;  %vm5587_vm13 = vcmp.gt.f32.partialorder %v5395_v12, 0.0  ;;  %v24299_v14 = vld [vmem:[#allocation304_spill] sm:$0xff] }
 0x44c   : > { %10020 = vmatmul.mubr.bf16.gmra.mrb[212].mxu1 %v20139_v24  ;;  %8264 = vmatprep.mubr.bf16.mxu0 %v20188_v3  ;;  %v20738_v10 = vpack.c.bf16 %v5970_v8, %v5968_v55  ;;  %v5396_v22 = vadd.f32 %v19630_v58, %v5192_v13  ;;  %v5194_v50 = vmax.f32 %v4980_v30, %v4982_v52  ;;  %v24298_v13 = vld [vmem:[#allocation303_spill] sm:$0xff] }
 0x44d   : > { %10029 = vmatprep.mubr.bf16.mxu1 %v20188_v3  ;;  %v5969_v37 = vsel %vm5585_vm11, %v5393_v46, %v5777_v51  ;;  %v5397_v59 = vadd.f32 %v19635_v61, %v5193_v48  ;;  %v5195_v18 = vmax.f32 %v4981_v0, %v4983_v33  ;;  %v5971_v0 = vsel %vm5587_vm13, %v5395_v12, %v5779_v43  ;;  %v24304_v12 = vld [vmem:[#allocation309_spill] sm:$0xff] }
 0x44e   : > { %24296 = vst [vmem:[#allocation48_spill] sm:$0xff] %v20738_v10  ;;  %v3598_v53 = vpop.f32.mrb[108].mxu0  ;;  %vm5588_vm14 = vcmp.gt.f32.partialorder %v5396_v22, 0.0  ;;  %v5780_v19 = vmul.f32 0.01, %v5396_v22  ;;  %v5398_v8 = vadd.f32 %v19630_v58, %v5194_v50  ;;  %v24301_v10 = vld [vmem:[#allocation306_spill] sm:$0xff] }
 0x44f   : > { %v4591_v40 = vpop.f32.mrb[108].mxu1  ;;  %v3600_v55 = vpop.f32.mrb[109].mxu0  ;;  %v4984_v42 = vmax.f32 %v24298_v13, %v3598_v53  ;;  %vm5589_vm15 = vcmp.gt.f32.partialorder %v5397_v59, 0.0  ;;  %v20750_v46 = vadd.f32 %v19635_v61, %v5195_v18 }
 0x450   : > { %v4986_v39 = vmax.f32 %v24299_v14, %v4591_v40  ;;  %v4985_v47 = vmax.f32 %v24300_v54, %v3600_v55  ;;  %v4593_v23 = vpop.f32.mrb[109].mxu1  ;;  %v3602_v30 = vpop.f32.mrb[110].mxu0  ;;  %v5972_v52 = vsel %vm5588_vm14, %v5396_v22, %v5780_v19  ;;  %vm5590_vm1 = vcmp.gt.f32.partialorder %v5398_v8, 0.0  ;;  %v24302_v55 = vld [vmem:[#allocation307_spill] sm:$0xff]  ;;  %v24303_v22 = vld [vmem:[#allocation308_spill] sm:$0xff] }
 0x451   : > { %v4595_v51 = vpop.f32.mrb[110].mxu1  ;;  %v3604_v48 = vpop.f32.mrb[111].mxu0  ;;  %v5782_v33 = vmul.f32 0.01, %v5398_v8  ;;  %v4987_v53 = vmax.f32 %v24301_v10, %v4593_v23  ;;  %v5781_v40 = vmul.f32 0.01, %v5397_v59  ;;  %v4988_v14 = vmax.f32 %v24302_v55, %v3602_v30 }
 0x452   : > { %v5196_v50 = vmax.f32 %v4984_v42, %v4986_v39  ;;  %v4597_v13 = vpop.f32.mrb[111].mxu1  ;;  %vm5591_vm2 = vcmp.gt.f32.partialorder %v20750_v46, 0.0  ;;  %v4990_v19 = vmax.f32 %v24303_v22, %v4595_v51  ;;  %v4989_v43 = vmax.f32 %v24304_v12, %v3604_v48  ;;  %v24306_v23 = vld [vmem:[#allocation310_spill] sm:$0xff] }
 0x453   : > { %8265 = vmatmul.mubr.bf16.gmra.mrb[216].mxu0 %v20178_v41  ;;  %v5974_v18 = vsel %vm5590_vm1, %v5398_v8, %v5782_v33  ;;  %v5197_v26 = vmax.f32 %v4985_v47, %v4987_v53  ;;  %v5783_v10 = vmul.f32 0.01, %v20750_v46  ;;  %v4991_v2 = vmax.f32 %v24306_v23, %v4597_v13  ;;  %v24308_v33 = vld [vmem:[#allocation311_spill] sm:$0xff] }
 0x454   : > { %v5400_v54 = vadd.f32 %v19630_v58, %v5196_v50  ;;  %10030 = vmatmul.mubr.bf16.gmra.mrb[216].mxu1 %v20178_v41  ;;  %v20761_v42 = vpack.c.bf16 %v5974_v18, %v5972_v52  ;;  %v5198_v39 = vmax.f32 %v4988_v14, %v4990_v19  ;;  %8274 = vmatprep.mubr.bf16.mxu0 %v20234_v29  ;;  %v24309_v19 = vld [vmem:[#allocation312_spill] sm:$0xff] }
 0x455   : > { %10039 = vmatprep.mubr.bf16.mxu1 %v20234_v29  ;;  %v5401_v30 = vadd.f32 %v19635_v61, %v5197_v26  ;;  %v20768_v51 = vpack.c.bf16 %v5971_v0, %v5969_v37  ;;  %v5199_v52 = vmax.f32 %v4989_v43, %v4991_v2  ;;  %v5973_v13 = vsel %vm5589_vm15, %v5397_v59, %v5781_v40  ;;  %v24310_v0 = vld [vmem:[#allocation313_spill] sm:$0xff]  ;;  %v24313_v40 = vld [vmem:[#allocation316_spill] sm:$0xff] }
 0x456   : > { %24305 = vst [vmem:[#allocation49_spill] sm:$0xff] %v20761_v42  ;;  %vm5592_vm3 = vcmp.gt.f32.partialorder %v5400_v54, 0.0  ;;  %v5784_v8 = vmul.f32 0.01, %v5400_v54  ;;  %v3608_v47 = vpop.f32.mrb[112].mxu0  ;;  %v5402_v48 = vadd.f32 %v19630_v58, %v5198_v39 }
 0x457   : > { %24307 = vst [vmem:[#allocation50_spill] sm:$0xff] %v20768_v51  ;;  %v4992_v50 = vmax.f32 %v24308_v33, %v3608_v47  ;;  %v4601_v53 = vpop.f32.mrb[112].mxu1  ;;  %v3610_v55 = vpop.f32.mrb[113].mxu0  ;;  %vm5593_vm4 = vcmp.gt.f32.partialorder %v5401_v30, 0.0  ;;  %v5785_v22 = vmul.f32 0.01, %v5401_v30  ;;  %v5403_v37 = vadd.f32 %v19635_v61, %v5199_v52 }
 0x458   : > { %v5976_v14 = vsel %vm5592_vm3, %v5400_v54, %v5784_v8  ;;  %v4994_v18 = vmax.f32 %v24309_v19, %v4601_v53  ;;  %v4603_v12 = vpop.f32.mrb[113].mxu1  ;;  %v3612_v23 = vpop.f32.mrb[114].mxu0  ;;  %vm5594_vm0 = vcmp.gt.f32.partialorder %v5402_v48, 0.0  ;;  %v5786_v26 = vmul.f32 0.01, %v5402_v48  ;;  %v24311_v33 = vld [vmem:[#allocation314_spill] sm:$0xff] }
 0x459   : > { %v4993_v39 = vmax.f32 %v24310_v0, %v3610_v55  ;;  %v4605_v2 = vpop.f32.mrb[114].mxu1  ;;  %v3614_v43 = vpop.f32.mrb[115].mxu0  ;;  %v4995_v42 = vmax.f32 %v24311_v33, %v4603_v12  ;;  %v24312_v51 = vld [vmem:[#allocation315_spill] sm:$0xff]  ;;  %vm5595_vm5 = vcmp.gt.f32.partialorder %v5403_v37, 0.0  ;;  %v5787_v53 = vmul.f32 0.01, %v5403_v37 }
 0x45a   : > { %v5200_v47 = vmax.f32 %v4992_v50, %v4994_v18  ;;  %v4996_v59 = vmax.f32 %v24312_v51, %v3612_v23  ;;  %v4998_v54 = vmax.f32 %v24313_v40, %v4605_v2  ;;  %v4607_v8 = vpop.f32.mrb[115].mxu1  ;;  %v5978_v29 = vsel %vm5594_vm0, %v5402_v48, %v5786_v26  ;;  %v24314_v19 = vld [vmem:[#allocation317_spill] sm:$0xff]  ;;  %v24316_v18 = vld [vmem:[#allocation318_spill] sm:$0xff] }
 0x45b   : > { %v4997_v41 = vmax.f32 %v24314_v19, %v3614_v43  ;;  %8275 = vmatmul.mubr.bf16.gmra.mrb[220].mxu0 %v20212_v32  ;;  %v20781_v52 = vpack.c.bf16 %v5978_v29, %v5976_v14  ;;  %v5201_v0 = vmax.f32 %v4993_v39, %v4995_v42  ;;  %v4999_v51 = vmax.f32 %v24316_v18, %v4607_v8  ;;  %v24317_v39 = vld [vmem:[#allocation319_spill] sm:$0xff]  ;;  %v24320_v19 = vld [vmem:[#allocation321_spill] sm:$0xff] }
 0x45c   : > { %v5404_v55 = vadd.f32 %v19630_v58, %v5200_v47  ;;  %v5202_v50 = vmax.f32 %v4996_v59, %v4998_v54  ;;  %10040 = vmatmul.mubr.bf16.gmra.mrb[220].mxu1 %v20212_v32  ;;  %8284 = vmatprep.mubr.bf16.mxu0 %v20268_v31  ;;  %v5975_v48 = vsel %vm5591_vm2, %v20750_v46, %v5783_v10  ;;  %v24319_v54 = vld [vmem:[#allocation320_spill] sm:$0xff] }
 0x45d   : > { %24315 = vst [vmem:[#allocation51_spill] sm:$0xff] %v20781_v52  ;;  %10049 = vmatprep.mubr.bf16.mxu1 %v20268_v31  ;;  %v5977_v12 = vsel %vm5593_vm4, %v5401_v30, %v5785_v22  ;;  %v5405_v14 = vadd.f32 %v19635_v61, %v5201_v0  ;;  %v5203_v26 = vmax.f32 %v4997_v41, %v4999_v51  ;;  %v24321_v41 = vld [vmem:[#allocation322_spill] sm:$0xff] }
 0x45e   : > { %vm5596_vm6 = vcmp.gt.f32.partialorder %v5404_v55, 0.0  ;;  %v5788_v29 = vmul.f32 0.01, %v5404_v55  ;;  %v5406_v42 = vadd.f32 %v19630_v58, %v5202_v50  ;;  %v3618_v23 = vpop.f32.mrb[116].mxu0  ;;  %v20795_v33 = vpack.c.bf16 %v5975_v48, %v5973_v13  ;;  %v24322_v13 = vld [vmem:[#allocation323_spill] sm:$0xff] }
 0x45f   : > { %v5000_v2 = vmax.f32 %v24317_v39, %v3618_v23  ;;  %v4611_v43 = vpop.f32.mrb[116].mxu1  ;;  %v3620_v47 = vpop.f32.mrb[117].mxu0  ;;  %v5979_v59 = vsel %vm5595_vm5, %v5403_v37, %v5787_v53  ;;  %v5789_v46 = vmul.f32 0.01, %v5405_v14  ;;  %v5407_v22 = vadd.f32 %v19635_v61, %v5203_v26  ;;  %v24323_v39 = vld [vmem:[#allocation324_spill] sm:$0xff] }
 0x460   : > { %24318 = vst [vmem:[#allocation52_spill] sm:$0xff] %v20795_v33  ;;  %v5980_v40 = vsel %vm5596_vm6, %v5404_v55, %v5788_v29  ;;  %vm5598_vm7 = vcmp.gt.f32.partialorder %v5406_v42, 0.0  ;;  %v5790_v10 = vmul.f32 0.01, %v5406_v42  ;;  %v4613_v30 = vpop.f32.mrb[117].mxu1  ;;  %v5002_v8 = vmax.f32 %v24319_v54, %v4611_v43  ;;  %v3622_v18 = vpop.f32.mrb[118].mxu0 }
 0x461   : > { %v5001_v0 = vmax.f32 %v24320_v19, %v3620_v47  ;;  %v5003_v50 = vmax.f32 %v24321_v41, %v4613_v30  ;;  %v4615_v51 = vpop.f32.mrb[118].mxu1  ;;  %v5004_v48 = vmax.f32 %v24322_v13, %v3622_v18  ;;  %v3624_v53 = vpop.f32.mrb[119].mxu0  ;;  %v20804_v29 = vpack.c.bf16 %v5979_v59, %v5977_v12  ;;  %v24326_v30 = vld [vmem:[#allocation325_spill] sm:$0xff]  ;;  %v24327_v19 = vld [vmem:[#allocation326_spill] sm:$0xff]  ;;  %v24328_v18 = vld [vmem:[#allocation327_spill] sm:$0xff] }
 0x462   : > { %v5982_v23 = vsel %vm5598_vm7, %v5406_v42, %v5790_v10  ;;  %v5006_v37 = vmax.f32 %v24323_v39, %v4615_v51  ;;  %v4617_v55 = vpop.f32.mrb[119].mxu1  ;;  %v5791_v26 = vmul.f32 0.01, %v5407_v22  ;;  %v5204_v33 = vmax.f32 %v5000_v2, %v5002_v8 }
 0x463   : > { %24324 = vst [vmem:[#allocation53_spill] sm:$0xff] %v20804_v29  ;;  %v20806_v52 = vpack.c.bf16 %v5982_v23, %v5980_v40  ;;  %v5205_v43 = vmax.f32 %v5001_v0, %v5003_v50  ;;  %8285 = vmatmul.mubr.bf16.gmra.mrb[224].mxu0 %v20252_v20  ;;  %v5005_v54 = vmax.f32 %v24326_v30, %v3624_v53  ;;  %vm5597_vm8 = vcmp.gt.f32.partialorder %v5405_v14, 0.0  ;;  %v24331_v30 = vld [vmem:[#allocation330_spill] sm:$0xff] }
 0x464   : > { %v5206_v47 = vmax.f32 %v5004_v48, %v5006_v37  ;;  %v5007_v42 = vmax.f32 %v24327_v19, %v4617_v55  ;;  %10050 = vmatmul.mubr.bf16.gmra.mrb[224].mxu1 %v20252_v20  ;;  %8294 = vmatprep.mubr.bf16.mxu0 %v20314_v60  ;;  %v5408_v12 = vadd.f32 %v19630_v58, %v5204_v33  ;;  %vm5599_vm9 = vcmp.gt.f32.partialorder %v5407_v22, 0.0  ;;  %v24329_v48 = vld [vmem:[#allocation328_spill] sm:$0xff] }
 0x465   : > { %24325 = vst [vmem:[#allocation54_spill] sm:$0xff] %v20806_v52  ;;  %v5409_v59 = vadd.f32 %v19635_v61, %v5205_v43  ;;  %10059 = vmatprep.mubr.bf16.mxu1 %v20314_v60  ;;  %v5981_v8 = vsel %vm5597_vm8, %v5405_v14, %v5789_v46  ;;  %v5983_v0 = vsel %vm5599_vm9, %v5407_v22, %v5791_v26  ;;  %v24330_v43 = vld [vmem:[#allocation329_spill] sm:$0xff] }
 0x466   : > { %v5410_v2 = vadd.f32 %v19630_v58, %v5206_v47  ;;  %v5207_v40 = vmax.f32 %v5005_v54, %v5007_v42  ;;  %v3628_v10 = vpop.f32.mrb[120].mxu0  ;;  %vm5600_vm10 = vcmp.gt.f32.partialorder %v5408_v12, 0.0  ;;  %v5792_v41 = vmul.f32 0.01, %v5408_v12 }
 0x467   : > { %v5793_v50 = vmul.f32 0.01, %v5409_v59  ;;  %v5008_v51 = vmax.f32 %v24328_v18, %v3628_v10  ;;  %v4621_v23 = vpop.f32.mrb[120].mxu1  ;;  %v3630_v37 = vpop.f32.mrb[121].mxu0  ;;  %v20822_v26 = vpack.c.bf16 %v5983_v0, %v5981_v8  ;;  %v24332_v10 = vld [vmem:[#allocation331_spill] sm:$0xff]  ;;  %v24336_v8 = vld [vmem:[#allocation334_spill] sm:$0xff] }
 0x468   : > { %vm5602_vm11 = vcmp.gt.f32.partialorder %v5410_v2, 0.0  ;;  %v5794_v13 = vmul.f32 0.01, %v5410_v2  ;;  %v5411_v33 = vadd.f32 %v19635_v61, %v5207_v40  ;;  %v5010_v39 = vmax.f32 %v24329_v48, %v4621_v23  ;;  %v4623_v53 = vpop.f32.mrb[121].mxu1  ;;  %v3632_v46 = vpop.f32.mrb[122].mxu0  ;;  %v24334_v48 = vld [vmem:[#allocation332_spill] sm:$0xff] }
 0x469   : > { %v5984_v55 = vsel %vm5600_vm10, %v5408_v12, %v5792_v41  ;;  %v5009_v47 = vmax.f32 %v24330_v43, %v3630_v37  ;;  %v5011_v14 = vmax.f32 %v24331_v30, %v4623_v53  ;;  %v4625_v22 = vpop.f32.mrb[122].mxu1  ;;  %v5012_v18 = vmax.f32 %v24332_v10, %v3632_v46  ;;  %v3634_v52 = vpop.f32.mrb[123].mxu0  ;;  %v24335_v41 = vld [vmem:[#allocation333_spill] sm:$0xff]  ;;  %v24337_v46 = vld [vmem:[#allocation335_spill] sm:$0xff] }
 0x46a   : > { %v5986_v54 = vsel %vm5602_vm11, %v5410_v2, %v5794_v13  ;;  %v5795_v19 = vmul.f32 0.01, %v5411_v33  ;;  %v5208_v42 = vmax.f32 %v5008_v51, %v5010_v39  ;;  %v4627_v40 = vpop.f32.mrb[123].mxu1  ;;  %v5014_v12 = vmax.f32 %v24334_v48, %v4625_v22 }
 0x46b   : > { %v20825_v29 = vpack.c.bf16 %v5986_v54, %v5984_v55  ;;  %v5209_v23 = vmax.f32 %v5009_v47, %v5011_v14  ;;  %v5013_v37 = vmax.f32 %v24335_v41, %v3634_v52  ;;  %8295 = vmatmul.mubr.bf16.gmra.mrb[228].mxu0 %v20292_v6  ;;  %v5015_v0 = vmax.f32 %v24336_v8, %v4627_v40  ;;  %v24338_v40 = vld [vmem:[#allocation336_spill] sm:$0xff] }
 0x46c   : > { %v5412_v53 = vadd.f32 %v19630_v58, %v5208_v42  ;;  %10060 = vmatmul.mubr.bf16.gmra.mrb[228].mxu1 %v20292_v6  ;;  %8304 = vmatprep.mubr.bf16.mxu0 %v20348_v1  ;;  %vm5601_vm12 = vcmp.gt.f32.partialorder %v5409_v59, 0.0  ;;  %vm5603_vm13 = vcmp.gt.f32.partialorder %v5411_v33, 0.0  ;;  %v5210_v51 = vmax.f32 %v5012_v18, %v5014_v12  ;;  %v24340_v12 = vld [vmem:[#allocation338_spill] sm:$0xff] }
 0x46d   : > { %24333 = vst [vmem:[#allocation55_spill] sm:$0xff] %v20825_v29  ;;  %v5413_v2 = vadd.f32 %v19635_v61, %v5209_v23  ;;  %10069 = vmatprep.mubr.bf16.mxu1 %v20348_v1  ;;  %v5985_v13 = vsel %vm5601_vm12, %v5409_v59, %v5793_v50  ;;  %v5987_v39 = vsel %vm5603_vm13, %v5411_v33, %v5795_v19  ;;  %v24339_v50 = vld [vmem:[#allocation337_spill] sm:$0xff] }
 0x46e   : > { %vm5604_vm14 = vcmp.gt.f32.partialorder %v5412_v53, 0.0  ;;  %v5796_v52 = vmul.f32 0.01, %v5412_v53  ;;  %v5211_v55 = vmax.f32 %v5013_v37, %v5015_v0  ;;  %v3638_v43 = vpop.f32.mrb[124].mxu0  ;;  %v20836_v47 = vpack.c.bf16 %v5987_v39, %v5985_v13  ;;  %v24341_v37 = vld [vmem:[#allocation340_spill] sm:$0xff] }
 0x46f   : > { %v5797_v30 = vmul.f32 0.01, %v5413_v2  ;;  %v5414_v14 = vadd.f32 %v19630_v58, %v5210_v51  ;;  %v5016_v22 = vmax.f32 %v24337_v46, %v3638_v43  ;;  %v4631_v54 = vpop.f32.mrb[124].mxu1  ;;  %v3640_v42 = vpop.f32.mrb[125].mxu0  ;;  %vm5605_vm15 = vcmp.gt.f32.partialorder %v5413_v2, 0.0  ;;  %v24342_v43 = vld [vmem:[#allocation341_spill] sm:$0xff] }
 0x470   : > { %v5988_v10 = vsel %vm5604_vm14, %v5412_v53, %v5796_v52  ;;  %v5415_v18 = vadd.f32 %v19635_v61, %v5211_v55  ;;  %v5018_v59 = vmax.f32 %v24338_v40, %v4631_v54  ;;  %v5017_v33 = vmax.f32 %v24339_v50, %v3640_v42  ;;  %v4633_v19 = vpop.f32.mrb[125].mxu1  ;;  %v3642_v23 = vpop.f32.mrb[126].mxu0  ;;  %v24343_v52 = vld [vmem:[#allocation342_spill] sm:$0xff]  ;;  %v24344_v42 = vld [vmem:[#allocation343_spill] sm:$0xff] }
 0x471   : > { %vm5606_vm1 = vcmp.gt.f32.partialorder %v5414_v14, 0.0  ;;  %v5798_v48 = vmul.f32 0.01, %v5414_v14  ;;  %v5019_v41 = vmax.f32 %v24340_v12, %v4633_v19  ;;  %v5020_v8 = vmax.f32 %v24341_v37, %v3642_v23  ;;  %v4635_v0 = vpop.f32.mrb[126].mxu1  ;;  %v3644_v51 = vpop.f32.mrb[127].mxu0 }
 0x472   : > { %v5799_v13 = vmul.f32 0.01, %v5415_v18  ;;  %v5212_v39 = vmax.f32 %v5016_v22, %v5018_v59  ;;  %v5022_v53 = vmax.f32 %v24342_v43, %v4635_v0  ;;  %v5021_v55 = vmax.f32 %v24343_v52, %v3644_v51  ;;  %v4637_v46 = vpop.f32.mrb[127].mxu1  ;;  %v24350_v52 = vld [vmem:[#allocation3_spill] sm:$0xff] }
 0x473   : > { %v5990_v54 = vsel %vm5606_vm1, %v5414_v14, %v5798_v48  ;;  %v5213_v40 = vmax.f32 %v5017_v33, %v5019_v41  ;;  %v5023_v50 = vmax.f32 %v24344_v42, %v4637_v46  ;;  %8305 = vmatmul.mubr.bf16.gmra.mrb[232].mxu0 %v20332_v25  ;;  %vm5607_vm2 = vcmp.gt.f32.partialorder %v5415_v18, 0.0  ;;  %v24351_v46 = vld [vmem:[#allocation6_spill] sm:$0xff]  ;;  %v17108_v42 = vld [vmem:[%s23510_s3 + $0x444] ss:$16 sps:$4 sm:$0xff]  }
 0x474   : > { %v20849_v29 = vpack.c.bf16 %v5990_v54, %v5988_v10  ;;  %v5416_v19 = vadd.f32 %v19630_v58, %v5212_v39  ;;  %v5214_v23 = vmax.f32 %v5020_v8, %v5022_v53  ;;  %10070 = vmatmul.mubr.bf16.gmra.mrb[232].mxu1 %v20332_v25  ;;  %8314 = vmatprep.mubr.bf16.mxu0 %v20388_v4  ;;  %v17102_v53 = vld [vmem:[%s23510_s3 + $0x424] ss:$16 sps:$4 sm:$0xff]   ;;  %v17100_v54 = vld [vmem:[%s23510_s3 + $0x420] ss:$16 sps:$4 sm:$0xff]  }
 0x475   : > { %v5417_v22 = vadd.f32 %v19635_v61, %v5213_v40  ;;  %v5215_v59 = vmax.f32 %v5021_v55, %v5023_v50  ;;  %10079 = vmatprep.mubr.bf16.mxu1 %v20388_v4  ;;  %v5989_v14 = vsel %vm5605_vm15, %v5413_v2, %v5797_v30  ;;  %v5991_v33 = vsel %vm5607_vm2, %v5415_v18, %v5799_v13  ;;  %v17094_v18 = vld [vmem:[%s23510_s3 + $0x400] ss:$16 sps:$4 sm:$0xff]   ;;  %v17097_v13 = vld [vmem:[%s23510_s3 + $0x408] ss:$16 sps:$4 sm:$0xff]   ;;  %v17105_v55 = vld [vmem:[%s23510_s3 + $0x42c] ss:$16 sps:$4 sm:$0xff]  }
 0x476   : > { %24345 = vst [vmem:[#allocation56_spill] sm:$0xff] %v20849_v29  ;;  %v5800_v48 = vmul.f32 0.01, %v5416_v19  ;;  %v5418_v12 = vadd.f32 %v19630_v58, %v5214_v23  ;;  %v20858_v10 = vpack.c.bf16 %v5991_v33, %v5989_v14  ;;  %vm5608_vm3 = vcmp.gt.f32.partialorder %v5416_v19, 0.0  ;;  %v17103_v40 = vld [vmem:[%s23510_s3 + $0x428] ss:$16 sps:$4 sm:$0xff]  }
 0x477   : > { %v5801_v41 = vmul.f32 0.01, %v5417_v22  ;;  %v5419_v37 = vadd.f32 %v19635_v61, %v5215_v59  ;;  %vm5609_vm0 = vcmp.gt.f32.partialorder %v5417_v22, 0.0  ;;  %v24349_v61 = vld [vmem:[#allocation4_spill] sm:$0xff]  ;;  %v24352_v59 = vld [vmem:[#allocation5_spill] sm:$0xff] }
 0x478   : > { %24346 = vst [vmem:[#allocation57_spill] sm:$0xff] %v20858_v10  ;;  %vm5610_vm4 = vcmp.gt.f32.partialorder %v5418_v12, 0.0  ;;  %v5802_v8 = vmul.f32 0.01, %v5418_v12  ;;  %v5992_v51 = vsel %vm5608_vm3, %v5416_v19, %v5800_v48  ;;  %v17111_v50 = vld [vmem:[%s23510_s3 + $0x44c] ss:$16 sps:$4 sm:$0xff]  }
 0x479   : > { %v5803_v0 = vmul.f32 0.01, %v5419_v37  ;;  %vm5611_vm5 = vcmp.gt.f32.partialorder %v5419_v37, 0.0  ;;  %v5993_v2 = vsel %vm5609_vm0, %v5417_v22, %v5801_v41  ;;  %v17106_v19 = vld [vmem:[%s23510_s3 + $0x440] ss:$16 sps:$4 sm:$0xff]   ;;  %v24353_v33 = vld [vmem:[#allocation8_spill] sm:$0xff] }
 0x47a   : > { %v5994_v39 = vsel %vm5610_vm4, %v5418_v12, %v5802_v8  ;;  %v17109_v23 = vld [vmem:[%s23510_s3 + $0x448] ss:$16 sps:$4 sm:$0xff]   ;;  %v17114_v22 = vld [vmem:[%s23510_s3 + $0x464] ss:$16 sps:$4 sm:$0xff]   ;;  %v17117_v14 = vld [vmem:[%s23510_s3 + $0x46c] ss:$16 sps:$4 sm:$0xff]  }
 0x47b   : > { %v20861_v43 = vpack.c.bf16 %v5994_v39, %v5992_v51  ;;  %8315 = vmatmul.mubr.bf16.gmra.mrb[236].mxu0 %v20366_v57  ;;  %v5995_v30 = vsel %vm5611_vm5, %v5419_v37, %v5803_v0  ;;  %v17112_v48 = vld [vmem:[%s23510_s3 + $0x460] ss:$16 sps:$4 sm:$0xff]   ;;  %v17115_v12 = vld [vmem:[%s23510_s3 + $0x468] ss:$16 sps:$4 sm:$0xff]   ;;  %v17120_v41 = vld [vmem:[%s23510_s3 + $0x484] ss:$16 sps:$4 sm:$0xff]  }
 0x47c   : > { %10080 = vmatmul.mubr.bf16.gmra.mrb[236].mxu1 %v20366_v57  ;;  %8324 = vmatprep.mubr.bf16.mxu0 %v20410_v45  ;;  %v20866_v58 = vpack.c.bf16 %v5995_v30, %v5993_v2  ;;  %v17123_v37 = vld [vmem:[%s23510_s3 + $0x48c] ss:$16 sps:$4 sm:$0xff]   ;;  %v17118_v8 = vld [vmem:[%s23510_s3 + $0x480] ss:$16 sps:$4 sm:$0xff]   ;;  %v17121_v0 = vld [vmem:[%s23510_s3 + $0x488] ss:$16 sps:$4 sm:$0xff]  }
 0x47d   : > { %24347 = vst [vmem:[#allocation58_spill] sm:$0xff] %v20861_v43  ;;  %10089 = vmatprep.mubr.bf16.mxu1 %v20410_v45  ;;  %v17126_v51 = vld [vmem:[%s23510_s3 + $0x4a4] ss:$16 sps:$4 sm:$0xff]   ;;  %v17129_v2 = vld [vmem:[%s23510_s3 + $0x4ac] ss:$16 sps:$4 sm:$0xff]  }
 0x47e   : > { %24348 = vst [vmem:[#allocation59_spill] sm:$0xff] %v20866_v58  ;;  %v24354_v39 = vld [vmem:[#allocation7_spill] sm:$0xff]  ;;  %v24355_v30 = vld [vmem:[#allocation9_spill] sm:$0xff]  ;;  %v17201_v58 = vld [vmem:[%s23510_s3 + $0x62c] ss:$16 sps:$4 sm:$0xff]  }
 0x47f   : > { %v17198_v43 = vld [vmem:[%s23510_s3 + $0x624] ss:$16 sps:$4 sm:$0xff]   ;;  %v17199_v29 = vld [vmem:[%s23510_s3 + $0x628] ss:$16 sps:$4 sm:$0xff]  }
 0x480   : > { %v17204_v10 = vld [vmem:[%s23510_s3 + $0x644] ss:$16 sps:$4 sm:$0xff]  }
 0x483   : > { %8325 = vmatmul.mubr.bf16.gmra.mrb[240].mxu0 %v20400_v27 }
 0x484   : > { %10090 = vmatmul.mubr.bf16.gmra.mrb[240].mxu1 %v20400_v27  ;;  %8334 = vmatprep.mubr.bf16.mxu0 %v20443_v16 }
 0x485   : > { %10099 = vmatprep.mubr.bf16.mxu1 %v20443_v16 }
 0x48b   : > { %8335 = vmatmul.mubr.bf16.gmra.mrb[244].mxu0 %v20421_v34 }
 0x48c   : > { %10100 = vmatmul.mubr.bf16.gmra.mrb[244].mxu1 %v20421_v34  ;;  %8344 = vmatprep.mubr.bf16.mxu0 %v20465_v62 }
 0x48d   : > { %10109 = vmatprep.mubr.bf16.mxu1 %v20465_v62 }
 0x493   : > { %8345 = vmatmul.mubr.bf16.gmra.mrb[248].mxu0 %v20455_v9 }
 0x494   : > { %10110 = vmatmul.mubr.bf16.gmra.mrb[248].mxu1 %v20455_v9  ;;  %8354 = vmatprep.mubr.bf16.mxu0 %v20498_v44 }
 0x495   : > { %10119 = vmatprep.mubr.bf16.mxu1 %v20498_v44 }
 0x49b   : > { %8355 = vmatmul.mubr.bf16.gmra.mrb[252].mxu0 %v20476_v36 }
 0x49c   : > { %10120 = vmatmul.mubr.bf16.gmra.mrb[252].mxu1 %v20476_v36  ;;  %8397 = vmatprep.mubr.bf16.mxu0 %v24349_v61 }
 0x49d   : > { %10162 = vmatprep.mubr.bf16.mxu1 %v24349_v61  ;;  %v17124_v61 = vld [vmem:[%s23510_s3 + $0x4a0] ss:$16 sps:$4 sm:$0xff]  }
 0x4a3   : > { %8398 = vmatmul.mubr.bf16.vlgmr.msra.gmra.mrb[128].mxu0 %v24350_v52 }
 0x4a4   : > { %10163 = vmatmul.mubr.bf16.vlgmr.msra.gmra.mrb[128].mxu1 %v24350_v52  ;;  %8407 = vmatprep.mubr.bf16.mxu0 %v24351_v46  ;;  %v17130_v52 = vld [vmem:[%s23510_s3 + $0x4c0] ss:$16 sps:$4 sm:$0xff]  }
 0x4a5   : > { %8719 = vmatpush1.bf16.msra.mxu0 %v17094_v18  ;;  %10172 = vmatprep.mubr.bf16.mxu1 %v24351_v46  ;;  %v17127_v18 = vld [vmem:[%s23510_s3 + $0x4a8] ss:$16 sps:$4 sm:$0xff]   ;;  %v17138_v46 = vld [vmem:[%s23510_s3 + $0x4e4] ss:$16 sps:$4 sm:$0xff]  }
 0x4a6   : > { %10484 = vmatpush1.bf16.msra.mxu1 %v17097_v13  ;;  %8720 = vmatprep.subr.bf16.mxu0 %v17102_v53  ;;  %v17132_v13 = vld [vmem:[%s23510_s3 + $0x4c4] ss:$16 sps:$4 sm:$0xff]   ;;  %v17135_v53 = vld [vmem:[%s23510_s3 + $0x4cc] ss:$16 sps:$4 sm:$0xff]  }
 0x4a7   : > { %10485 = vmatprep.subr.bf16.mxu1 %v17105_v55  ;;  %v17133_v55 = vld [vmem:[%s23510_s3 + $0x4c8] ss:$16 sps:$4 sm:$0xff]  }
 0x4a9   : > { %8721 = vmatpush1.bf16.msra.mxu0 %v17100_v54  ;;  %v17141_v54 = vld [vmem:[%s23510_s3 + $0x4ec] ss:$16 sps:$4 sm:$0xff]  }
 0x4aa   : > { %10486 = vmatpush1.bf16.msra.mxu1 %v17103_v40  ;;  %8722 = vmatprep.subr.bf16.mxu0 %v17108_v42  ;;  %v17136_v40 = vld [vmem:[%s23510_s3 + $0x4e0] ss:$16 sps:$4 sm:$0xff]   ;;  %v17139_v42 = vld [vmem:[%s23510_s3 + $0x4e8] ss:$16 sps:$4 sm:$0xff]  }
 0x4ab   : > { %8408 = vmatmul.mubr.bf16.gmra.mrb[132].mxu0 %v24352_v59  ;;  %10487 = vmatprep.subr.bf16.mxu1 %v17111_v50  ;;  %v17144_v50 = vld [vmem:[%s23510_s3 + $0x504] ss:$16 sps:$4 sm:$0xff]  }
 0x4ac   : > { %10173 = vmatmul.mubr.bf16.gmra.mrb[132].mxu1 %v24352_v59  ;;  %8417 = vmatprep.mubr.bf16.mxu0 %v24353_v33  ;;  %v24356_v59 = vld [vmem:[#allocation10_spill] sm:$0xff] }
 0x4ad   : > { %10182 = vmatprep.mubr.bf16.mxu1 %v24353_v33  ;;  %8723 = vmatpush1.bf16.msra.mxu0 %v17106_v19  ;;  %v17142_v19 = vld [vmem:[%s23510_s3 + $0x500] ss:$16 sps:$4 sm:$0xff]   ;;  %v24357_v33 = vld [vmem:[#allocation12_spill] sm:$0xff] }
 0x4ae   : > { %10488 = vmatpush1.bf16.msra.mxu1 %v17109_v23  ;;  %8724 = vmatprep.subr.bf16.mxu0 %v17114_v22  ;;  %v17145_v23 = vld [vmem:[%s23510_s3 + $0x508] ss:$16 sps:$4 sm:$0xff]   ;;  %v17150_v22 = vld [vmem:[%s23510_s3 + $0x524] ss:$16 sps:$4 sm:$0xff]  }
 0x4af   : > { %10489 = vmatprep.subr.bf16.mxu1 %v17117_v14  ;;  %v17153_v14 = vld [vmem:[%s23510_s3 + $0x52c] ss:$16 sps:$4 sm:$0xff]  }
 0x4b1   : > { %8725 = vmatpush1.bf16.msra.mxu0 %v17112_v48  ;;  %v17148_v48 = vld [vmem:[%s23510_s3 + $0x520] ss:$16 sps:$4 sm:$0xff]  }
 0x4b2   : > { %10490 = vmatpush1.bf16.msra.mxu1 %v17115_v12  ;;  %8726 = vmatprep.subr.bf16.mxu0 %v17120_v41  ;;  %v17151_v12 = vld [vmem:[%s23510_s3 + $0x528] ss:$16 sps:$4 sm:$0xff]   ;;  %v17156_v41 = vld [vmem:[%s23510_s3 + $0x544] ss:$16 sps:$4 sm:$0xff]  }
 0x4b3   : > { %8418 = vmatmul.mubr.bf16.gmra.mrb[136].mxu0 %v24354_v39  ;;  %10491 = vmatprep.subr.bf16.mxu1 %v17123_v37  ;;  %v17159_v37 = vld [vmem:[%s23510_s3 + $0x54c] ss:$16 sps:$4 sm:$0xff]  }
 0x4b4   : > { %10183 = vmatmul.mubr.bf16.gmra.mrb[136].mxu1 %v24354_v39  ;;  %8427 = vmatprep.mubr.bf16.mxu0 %v24355_v30  ;;  %v24359_v39 = vld [vmem:[#allocation14_spill] sm:$0xff] }
 0x4b5   : > { %10192 = vmatprep.mubr.bf16.mxu1 %v24355_v30  ;;  %8727 = vmatpush1.bf16.msra.mxu0 %v17118_v8  ;;  %v17154_v8 = vld [vmem:[%s23510_s3 + $0x540] ss:$16 sps:$4 sm:$0xff]  }
 0x4b6   : > { %10492 = vmatpush1.bf16.msra.mxu1 %v17121_v0  ;;  %8728 = vmatprep.subr.bf16.mxu0 %v17126_v51  ;;  %v17157_v0 = vld [vmem:[%s23510_s3 + $0x548] ss:$16 sps:$4 sm:$0xff]   ;;  %v24358_v51 = vld [vmem:[#allocation11_spill] sm:$0xff] }
 0x4b7   : > { %10493 = vmatprep.subr.bf16.mxu1 %v17129_v2  ;;  %v24360_v2 = vld [vmem:[#allocation13_spill] sm:$0xff] }
 0x4b8   : > { %v17160_v30 = vld [vmem:[%s23510_s3 + $0x560] ss:$16 sps:$4 sm:$0xff]  }
 0x4b9   : > { %8729 = vmatpush1.bf16.msra.mxu0 %v17124_v61  ;;  %v17162_v61 = vld [vmem:[%s23510_s3 + $0x564] ss:$16 sps:$4 sm:$0xff]  }
 0x4ba   : > { %10494 = vmatpush1.bf16.msra.mxu1 %v17127_v18  ;;  %8730 = vmatprep.subr.bf16.mxu0 %v17132_v13  ;;  %v24361_v18 = vld [vmem:[#allocation17_spill] sm:$0xff]  ;;  %v17163_v13 = vld [vmem:[%s23510_s3 + $0x568] ss:$16 sps:$4 sm:$0xff]  }
 0x4bb   : > { %8428 = vmatmul.mubr.bf16.gmra.mrb[140].mxu0 %v19826_v11  ;;  %10495 = vmatprep.subr.bf16.mxu1 %v17135_v53  ;;  %v17165_v53 = vld [vmem:[%s23510_s3 + $0x56c] ss:$16 sps:$4 sm:$0xff]  }
 0x4bc   : > { %10193 = vmatmul.mubr.bf16.gmra.mrb[140].mxu1 %v19826_v11  ;;  %8437 = vmatprep.mubr.bf16.mxu0 %v19855_v49  ;;  %v17147_v11 = vld [vmem:[%s23510_s3 + $0x50c] ss:$16 sps:$4 sm:$0xff]  }
 0x4bd   : > { %10202 = vmatprep.mubr.bf16.mxu1 %v19855_v49  ;;  %8731 = vmatpush1.bf16.msra.mxu0 %v17130_v52  ;;  %v24362_v52 = vld [vmem:[#allocation15_spill] sm:$0xff] }
 0x4be   : > { %10496 = vmatpush1.bf16.msra.mxu1 %v17133_v55  ;;  %8732 = vmatprep.subr.bf16.mxu0 %v17138_v46  ;;  %v24363_v55 = vld [vmem:[#allocation16_spill] sm:$0xff]  ;;  %v17166_v46 = vld [vmem:[%s23510_s3 + $0x580] ss:$16 sps:$4 sm:$0xff]  }
 0x4bf   : > { %10497 = vmatprep.subr.bf16.mxu1 %v17141_v54  ;;  %v17168_v54 = vld [vmem:[%s23510_s3 + $0x584] ss:$16 sps:$4 sm:$0xff]  }
 0x4c1   : > { %8733 = vmatpush1.bf16.msra.mxu0 %v17136_v40  ;;  %v17169_v40 = vld [vmem:[%s23510_s3 + $0x588] ss:$16 sps:$4 sm:$0xff]  }
 0x4c2   : > { %10498 = vmatpush1.bf16.msra.mxu1 %v17139_v42  ;;  %8734 = vmatprep.subr.bf16.mxu0 %v17144_v50  ;;  %v17171_v42 = vld [vmem:[%s23510_s3 + $0x58c] ss:$16 sps:$4 sm:$0xff]  }
 0x4c3   : > { %8438 = vmatmul.mubr.bf16.gmra.mrb[144].mxu0 %v24356_v59  ;;  %10499 = vmatprep.subr.bf16.mxu1 %v17147_v11  ;;  %v24364_v50 = vld [vmem:[#allocation18_spill] sm:$0xff]  ;;  %v17172_v11 = vld [vmem:[%s23510_s3 + $0x5a0] ss:$16 sps:$4 sm:$0xff]  }
 0x4c4   : > { %10203 = vmatmul.mubr.bf16.gmra.mrb[144].mxu1 %v24356_v59  ;;  %8447 = vmatprep.mubr.bf16.mxu0 %v24357_v33 }
 0x4c5   : > { %10212 = vmatprep.mubr.bf16.mxu1 %v24357_v33  ;;  %8735 = vmatpush1.bf16.msra.mxu0 %v17142_v19  ;;  %v17174_v19 = vld [vmem:[%s23510_s3 + $0x5a4] ss:$16 sps:$4 sm:$0xff]  }
 0x4c6   : > { %10500 = vmatpush1.bf16.msra.mxu1 %v17145_v23  ;;  %8736 = vmatprep.subr.bf16.mxu0 %v17150_v22  ;;  %v24365_v23 = vld [vmem:[#allocation20_spill] sm:$0xff] }
 0x4c7   : > { %10501 = vmatprep.subr.bf16.mxu1 %v17153_v14  ;;  %v17175_v22 = vld [vmem:[%s23510_s3 + $0x5a8] ss:$16 sps:$4 sm:$0xff]   ;;  %v17177_v14 = vld [vmem:[%s23510_s3 + $0x5ac] ss:$16 sps:$4 sm:$0xff]  }
 0x4c9   : > { %8737 = vmatpush1.bf16.msra.mxu0 %v17148_v48  ;;  %v24366_v48 = vld [vmem:[#allocation21_spill] sm:$0xff] }
 0x4ca   : > { %10502 = vmatpush1.bf16.msra.mxu1 %v17151_v12  ;;  %8738 = vmatprep.subr.bf16.mxu0 %v17156_v41  ;;  %v17178_v12 = vld [vmem:[%s23510_s3 + $0x5c0] ss:$16 sps:$4 sm:$0xff]   ;;  %v17180_v41 = vld [vmem:[%s23510_s3 + $0x5c4] ss:$16 sps:$4 sm:$0xff]  }
 0x4cb   : > { %8448 = vmatmul.mubr.bf16.gmra.mrb[148].mxu0 %v24358_v51  ;;  %10503 = vmatprep.subr.bf16.mxu1 %v17159_v37  ;;  %v24367_v37 = vld [vmem:[#allocation23_spill] sm:$0xff] }
 0x4cc   : > { %10213 = vmatmul.mubr.bf16.gmra.mrb[148].mxu1 %v24358_v51  ;;  %8457 = vmatprep.mubr.bf16.mxu0 %v24359_v39 }
 0x4cd   : > { %10222 = vmatprep.mubr.bf16.mxu1 %v24359_v39  ;;  %8739 = vmatpush1.bf16.msra.mxu0 %v17154_v8  ;;  %v17181_v8 = vld [vmem:[%s23510_s3 + $0x5c8] ss:$16 sps:$4 sm:$0xff]  }
 0x4ce   : > { %10504 = vmatpush1.bf16.msra.mxu1 %v17157_v0  ;;  %8740 = vmatprep.subr.bf16.mxu0 %v17162_v61  ;;  %v17183_v0 = vld [vmem:[%s23510_s3 + $0x5cc] ss:$16 sps:$4 sm:$0xff]   ;;  %v17184_v61 = vld [vmem:[%s23510_s3 + $0x5e0] ss:$16 sps:$4 sm:$0xff]  }
 0x4cf   : > { %10505 = vmatprep.subr.bf16.mxu1 %v17165_v53  ;;  %v24369_v53 = vld [vmem:[#allocation26_spill] sm:$0xff] }
 0x4d1   : > { %8741 = vmatpush1.bf16.msra.mxu0 %v17160_v30  ;;  %v24368_v30 = vld [vmem:[#allocation24_spill] sm:$0xff] }
 0x4d2   : > { %10506 = vmatpush1.bf16.msra.mxu1 %v17163_v13  ;;  %8742 = vmatprep.subr.bf16.mxu0 %v17168_v54  ;;  %v17186_v13 = vld [vmem:[%s23510_s3 + $0x5e4] ss:$16 sps:$4 sm:$0xff]   ;;  %v17189_v54 = vld [vmem:[%s23510_s3 + $0x5ec] ss:$16 sps:$4 sm:$0xff]  }
 0x4d3   : > { %8458 = vmatmul.mubr.bf16.gmra.mrb[152].mxu0 %v24360_v2  ;;  %10507 = vmatprep.subr.bf16.mxu1 %v17171_v42  ;;  %v24371_v42 = vld [vmem:[#allocation27_spill] sm:$0xff] }
 0x4d4   : > { %10223 = vmatmul.mubr.bf16.gmra.mrb[152].mxu1 %v24360_v2  ;;  %8467 = vmatprep.mubr.bf16.mxu0 %v24361_v18 }
 0x4d5   : > { %10232 = vmatprep.mubr.bf16.mxu1 %v24361_v18  ;;  %8743 = vmatpush1.bf16.msra.mxu0 %v17166_v46  ;;  %v17187_v46 = vld [vmem:[%s23510_s3 + $0x5e8] ss:$16 sps:$4 sm:$0xff]  }
 0x4d6   : > { %10508 = vmatpush1.bf16.msra.mxu1 %v17169_v40  ;;  %8744 = vmatprep.subr.bf16.mxu0 %v17174_v19  ;;  %v24370_v40 = vld [vmem:[#allocation25_spill] sm:$0xff]  ;;  %v17195_v19 = vld [vmem:[%s23510_s3 + $0x60c] ss:$16 sps:$4 sm:$0xff]  }
 0x4d7   : > { %10509 = vmatprep.subr.bf16.mxu1 %v17177_v14  ;;  %v24373_v14 = vld [vmem:[#allocation29_spill] sm:$0xff] }
 0x4d9   : > { %8745 = vmatpush1.bf16.msra.mxu0 %v17172_v11  ;;  %v17192_v11 = vld [vmem:[%s23510_s3 + $0x604] ss:$16 sps:$4 sm:$0xff]  }
 0x4da   : > { %10510 = vmatpush1.bf16.msra.mxu1 %v17175_v22  ;;  %8746 = vmatprep.subr.bf16.mxu0 %v17180_v41  ;;  %v24372_v22 = vld [vmem:[#allocation28_spill] sm:$0xff]  ;;  %v24375_v41 = vld [vmem:[#allocation30_spill] sm:$0xff] }
 0x4db   : > { %8468 = vmatmul.mubr.bf16.gmra.mrb[156].mxu0 %v24362_v52  ;;  %10511 = vmatprep.subr.bf16.mxu1 %v17183_v0  ;;  %v24377_v0 = vld [vmem:[#allocation32_spill] sm:$0xff] }
 0x4dc   : > { %10233 = vmatmul.mubr.bf16.gmra.mrb[156].mxu1 %v24362_v52  ;;  %8477 = vmatprep.mubr.bf16.mxu0 %v24363_v55 }
 0x4dd   : > { %10242 = vmatprep.mubr.bf16.mxu1 %v24363_v55  ;;  %8747 = vmatpush1.bf16.msra.mxu0 %v17178_v12  ;;  %v24374_v12 = vld [vmem:[#allocation31_spill] sm:$0xff] }
 0x4de   : > { %10512 = vmatpush1.bf16.msra.mxu1 %v17181_v8  ;;  %8748 = vmatprep.subr.bf16.mxu0 %v17186_v13  ;;  %v24376_v8 = vld [vmem:[#allocation33_spill] sm:$0xff]  ;;  %v24379_v13 = vld [vmem:[#allocation34_spill] sm:$0xff] }
 0x4df   : > { %10513 = vmatprep.subr.bf16.mxu1 %v17189_v54  ;;  %v24381_v54 = vld [vmem:[#allocation36_spill] sm:$0xff] }
 0x4e1   : > { %8749 = vmatpush1.bf16.msra.mxu0 %v17184_v61  ;;  %v24378_v61 = vld [vmem:[#allocation35_spill] sm:$0xff] }
 0x4e2   : > { %10514 = vmatpush1.bf16.msra.mxu1 %v17187_v46  ;;  %9071 = vmatprep.subr.bf16.mxu0 %v17192_v11  ;;  %v24380_v46 = vld [vmem:[#allocation37_spill] sm:$0xff] }
 0x4e3   : > { %8478 = vmatmul.mubr.bf16.gmra.mrb[160].mxu0 %v19926_v63  ;;  %10836 = vmatprep.subr.bf16.mxu1 %v17195_v19  ;;  %v17190_v11 = vld [vmem:[%s23510_s3 + $0x600] ss:$16 sps:$4 sm:$0xff]   ;;  %v17193_v19 = vld [vmem:[%s23510_s3 + $0x608] ss:$16 sps:$4 sm:$0xff]  }
 0x4e4   : > { %10243 = vmatmul.mubr.bf16.gmra.mrb[160].mxu1 %v19926_v63  ;;  %8487 = vmatprep.mubr.bf16.mxu0 %v19952_v7 }
 0x4e5   : > { %10252 = vmatprep.mubr.bf16.mxu1 %v19952_v7 }
 0x4eb   : > { %8488 = vmatmul.mubr.bf16.gmra.mrb[164].mxu0 %v19948_v15 }
 0x4ec   : > { %10253 = vmatmul.mubr.bf16.gmra.mrb[164].mxu1 %v19948_v15  ;;  %8497 = vmatprep.mubr.bf16.mxu0 %v19973_v35 }
 0x4ed   : > { %10262 = vmatprep.mubr.bf16.mxu1 %v19973_v35 }
 0x4f3   : > { %8498 = vmatmul.mubr.bf16.gmra.mrb[168].mxu0 %v24364_v50 }
 0x4f4   : > { %10263 = vmatmul.mubr.bf16.gmra.mrb[168].mxu1 %v24364_v50  ;;  %8507 = vmatprep.mubr.bf16.mxu0 %v24365_v23 }
 0x4f5   : > { %10272 = vmatprep.mubr.bf16.mxu1 %v24365_v23 }
 0x4fb   : > { %8508 = vmatmul.mubr.bf16.gmra.mrb[172].mxu0 %v24232_v17 }
 0x4fc   : > { %10273 = vmatmul.mubr.bf16.gmra.mrb[172].mxu1 %v24232_v17  ;;  %8517 = vmatprep.mubr.bf16.mxu0 %v24366_v48 }
 0x4fd   : > { %10282 = vmatprep.mubr.bf16.mxu1 %v24366_v48 }
 0x503   : > { %8518 = vmatmul.mubr.bf16.gmra.mrb[176].mxu0 %v20010_v38 }
 0x504   : > { %10283 = vmatmul.mubr.bf16.gmra.mrb[176].mxu1 %v20010_v38  ;;  %8527 = vmatprep.mubr.bf16.mxu0 %v24367_v37 }
 0x505   : > { %10292 = vmatprep.mubr.bf16.mxu1 %v24367_v37 }
 0x50b   : > { %8528 = vmatmul.mubr.bf16.gmra.mrb[180].mxu0 %v24254_v56 }
 0x50c   : > { %10293 = vmatmul.mubr.bf16.gmra.mrb[180].mxu1 %v24254_v56  ;;  %8537 = vmatprep.mubr.bf16.mxu0 %v24368_v30 }
 0x50d   : > { %10302 = vmatprep.mubr.bf16.mxu1 %v24368_v30 }
 0x513   : > { %8538 = vmatmul.mubr.bf16.gmra.mrb[184].mxu0 %v20052_v21 }
 0x514   : > { %10303 = vmatmul.mubr.bf16.gmra.mrb[184].mxu1 %v20052_v21  ;;  %8547 = vmatprep.mubr.bf16.mxu0 %v24369_v53 }
 0x515   : > { %10312 = vmatprep.mubr.bf16.mxu1 %v24369_v53 }
 0x51b   : > { %8548 = vmatmul.mubr.bf16.gmra.mrb[188].mxu0 %v24370_v40 }
 0x51c   : > { %10313 = vmatmul.mubr.bf16.gmra.mrb[188].mxu1 %v24370_v40  ;;  %8557 = vmatprep.mubr.bf16.mxu0 %v24371_v42 }
 0x51d   : > { %10322 = vmatprep.mubr.bf16.mxu1 %v24371_v42 }
 0x523   : > { %8558 = vmatmul.mubr.bf16.gmra.mrb[192].mxu0 %v20105_v5 }
 0x524   : > { %10323 = vmatmul.mubr.bf16.gmra.mrb[192].mxu1 %v20105_v5  ;;  %8567 = vmatprep.mubr.bf16.mxu0 %v20149_v28 }
 0x525   : > { %10332 = vmatprep.mubr.bf16.mxu1 %v20149_v28 }
 0x52b   : > { %8568 = vmatmul.mubr.bf16.gmra.mrb[196].mxu0 %v20139_v24 }
 0x52c   : > { %10333 = vmatmul.mubr.bf16.gmra.mrb[196].mxu1 %v20139_v24  ;;  %8577 = vmatprep.mubr.bf16.mxu0 %v20188_v3 }
 0x52d   : > { %10342 = vmatprep.mubr.bf16.mxu1 %v20188_v3 }
 0x533   : > { %8578 = vmatmul.mubr.bf16.gmra.mrb[200].mxu0 %v24372_v22 }
 0x534   : > { %10343 = vmatmul.mubr.bf16.gmra.mrb[200].mxu1 %v24372_v22  ;;  %8587 = vmatprep.mubr.bf16.mxu0 %v24373_v14 }
 0x535   : > { %10352 = vmatprep.mubr.bf16.mxu1 %v24373_v14 }
 0x53b   : > { %8588 = vmatmul.mubr.bf16.gmra.mrb[204].mxu0 %v20212_v32 }
 0x53c   : > { %10353 = vmatmul.mubr.bf16.gmra.mrb[204].mxu1 %v20212_v32  ;;  %8597 = vmatprep.mubr.bf16.mxu0 %v20268_v31 }
 0x53d   : > { %10362 = vmatprep.mubr.bf16.mxu1 %v20268_v31 }
 0x543   : > { %8598 = vmatmul.mubr.bf16.gmra.mrb[208].mxu0 %v20252_v20 }
 0x544   : > { %10363 = vmatmul.mubr.bf16.gmra.mrb[208].mxu1 %v20252_v20  ;;  %8607 = vmatprep.mubr.bf16.mxu0 %v20314_v60 }
 0x545   : > { %10372 = vmatprep.mubr.bf16.mxu1 %v20314_v60 }
 0x54b   : > { %8608 = vmatmul.mubr.bf16.gmra.mrb[212].mxu0 %v20292_v6 }
 0x54c   : > { %10373 = vmatmul.mubr.bf16.gmra.mrb[212].mxu1 %v20292_v6  ;;  %8617 = vmatprep.mubr.bf16.mxu0 %v20348_v1 }
 0x54d   : > { %10382 = vmatprep.mubr.bf16.mxu1 %v20348_v1 }
 0x553   : > { %8618 = vmatmul.mubr.bf16.gmra.mrb[216].mxu0 %v20332_v25 }
 0x554   : > { %10383 = vmatmul.mubr.bf16.gmra.mrb[216].mxu1 %v20332_v25  ;;  %8627 = vmatprep.mubr.bf16.mxu0 %v20388_v4 }
 0x555   : > { %10392 = vmatprep.mubr.bf16.mxu1 %v20388_v4 }
 0x55b   : > { %8628 = vmatmul.mubr.bf16.gmra.mrb[220].mxu0 %v20366_v57 }
 0x55c   : > { %10393 = vmatmul.mubr.bf16.gmra.mrb[220].mxu1 %v20366_v57  ;;  %8637 = vmatprep.mubr.bf16.mxu0 %v20410_v45 }
 0x55d   : > { %10402 = vmatprep.mubr.bf16.mxu1 %v20410_v45 }
 0x563   : > { %8638 = vmatmul.mubr.bf16.gmra.mrb[224].mxu0 %v20400_v27 }
 0x564   : > { %10403 = vmatmul.mubr.bf16.gmra.mrb[224].mxu1 %v20400_v27  ;;  %8647 = vmatprep.mubr.bf16.mxu0 %v20443_v16 }
 0x565   : > { %10412 = vmatprep.mubr.bf16.mxu1 %v20443_v16 }
 0x56b   : > { %8648 = vmatmul.mubr.bf16.gmra.mrb[228].mxu0 %v20421_v34 }
 0x56c   : > { %10413 = vmatmul.mubr.bf16.gmra.mrb[228].mxu1 %v20421_v34  ;;  %8657 = vmatprep.mubr.bf16.mxu0 %v20465_v62 }
 0x56d   : > { %10422 = vmatprep.mubr.bf16.mxu1 %v20465_v62 }
 0x573   : > { %8658 = vmatmul.mubr.bf16.gmra.mrb[232].mxu0 %v20455_v9 }
 0x574   : > { %10423 = vmatmul.mubr.bf16.gmra.mrb[232].mxu1 %v20455_v9  ;;  %8667 = vmatprep.mubr.bf16.mxu0 %v20498_v44 }
 0x575   : > { %10432 = vmatprep.mubr.bf16.mxu1 %v20498_v44 }
 0x57b   : > { %8668 = vmatmul.mubr.bf16.gmra.mrb[236].mxu0 %v20476_v36 }
 0x57c   : > { %10433 = vmatmul.mubr.bf16.gmra.mrb[236].mxu1 %v20476_v36  ;;  %8677 = vmatprep.mubr.bf16.mxu0 %v24374_v12 }
 0x57d   : > { %10442 = vmatprep.mubr.bf16.mxu1 %v24374_v12 }
 0x583   : > { %8678 = vmatmul.mubr.bf16.gmra.mrb[240].mxu0 %v24375_v41 }
 0x584   : > { %10443 = vmatmul.mubr.bf16.gmra.mrb[240].mxu1 %v24375_v41  ;;  %8687 = vmatprep.mubr.bf16.mxu0 %v24376_v8 }
 0x585   : > { %10452 = vmatprep.mubr.bf16.mxu1 %v24376_v8 }
 0x58b   : > { %8688 = vmatmul.mubr.bf16.gmra.mrb[244].mxu0 %v24377_v0 }
 0x58c   : > { %10453 = vmatmul.mubr.bf16.gmra.mrb[244].mxu1 %v24377_v0  ;;  %8697 = vmatprep.mubr.bf16.mxu0 %v24378_v61 }
 0x58d   : > { %10462 = vmatprep.mubr.bf16.mxu1 %v24378_v61 }
 0x593   : > { %8698 = vmatmul.mubr.bf16.gmra.mrb[248].mxu0 %v24379_v13 }
 0x594   : > { %10463 = vmatmul.mubr.bf16.gmra.mrb[248].mxu1 %v24379_v13  ;;  %8707 = vmatprep.mubr.bf16.mxu0 %v24380_v46 }
 0x595   : > { %10472 = vmatprep.mubr.bf16.mxu1 %v24380_v46 }
 0x59b   : > { %8708 = vmatmul.mubr.bf16.gmra.mrb[252].mxu0 %v24381_v54 }
 0x59c   : > { %10473 = vmatmul.mubr.bf16.gmra.mrb[252].mxu1 %v24381_v54  ;;  %8750 = vmatprep.mubr.bf16.mxu0 %v19855_v49 }
 0x59d   : > { %10515 = vmatprep.mubr.bf16.mxu1 %v19855_v49  ;;  %v17196_v49 = vld [vmem:[%s23510_s3 + $0x620] ss:$16 sps:$4 sm:$0xff]  }
 0x5a3   : > { %8751 = vmatmul.mubr.bf16.vlgmr.msra.gmra.mrb[128].mxu0 %v24356_v59 }
 0x5a4   : > { %10516 = vmatmul.mubr.bf16.vlgmr.msra.gmra.mrb[128].mxu1 %v24356_v59  ;;  %8760 = vmatprep.mubr.bf16.mxu0 %v24357_v33  ;;  %v17207_v59 = vld [vmem:[%s23510_s3 + $0x64c] ss:$16 sps:$4 sm:$0xff]  }
 0x5a5   : > { %9072 = vmatpush1.bf16.msra.mxu0 %v17190_v11  ;;  %10525 = vmatprep.mubr.bf16.mxu1 %v24357_v33  ;;  %v17202_v33 = vld [vmem:[%s23510_s3 + $0x640] ss:$16 sps:$4 sm:$0xff]   ;;  %v17210_v11 = vld [vmem:[%s23510_s3 + $0x664] ss:$16 sps:$4 sm:$0xff]  }
 0x5a6   : > { %10837 = vmatpush1.bf16.msra.mxu1 %v17193_v19  ;;  %9073 = vmatprep.subr.bf16.mxu0 %v17198_v43  ;;  %v17205_v43 = vld [vmem:[%s23510_s3 + $0x648] ss:$16 sps:$4 sm:$0xff]   ;;  %v17216_v19 = vld [vmem:[%s23510_s3 + $0x684] ss:$16 sps:$4 sm:$0xff]  }
 0x5a7   : > { %10838 = vmatprep.subr.bf16.mxu1 %v17201_v58  ;;  %v17213_v58 = vld [vmem:[%s23510_s3 + $0x66c] ss:$16 sps:$4 sm:$0xff]  }
 0x5a9   : > { %9074 = vmatpush1.bf16.msra.mxu0 %v17196_v49  ;;  %v17217_v49 = vld [vmem:[%s23510_s3 + $0x688] ss:$16 sps:$4 sm:$0xff]  }
 0x5aa   : > { %10839 = vmatpush1.bf16.msra.mxu1 %v17199_v29  ;;  %9075 = vmatprep.subr.bf16.mxu0 %v17204_v10  ;;  %v17208_v29 = vld [vmem:[%s23510_s3 + $0x660] ss:$16 sps:$4 sm:$0xff]   ;;  %v17211_v10 = vld [vmem:[%s23510_s3 + $0x668] ss:$16 sps:$4 sm:$0xff]  }
 0x5ab   : > { %8761 = vmatmul.mubr.bf16.gmra.mrb[132].mxu0 %v24358_v51  ;;  %10840 = vmatprep.subr.bf16.mxu1 %v17207_v59  ;;  %v17222_v59 = vld [vmem:[%s23510_s3 + $0x6a4] ss:$16 sps:$4 sm:$0xff]  }
 0x5ac   : > { %10526 = vmatmul.mubr.bf16.gmra.mrb[132].mxu1 %v24358_v51  ;;  %8770 = vmatprep.mubr.bf16.mxu0 %v24359_v39  ;;  %v17219_v51 = vld [vmem:[%s23510_s3 + $0x68c] ss:$16 sps:$4 sm:$0xff]  }
 0x5ad   : > { %10535 = vmatprep.mubr.bf16.mxu1 %v24359_v39  ;;  %9076 = vmatpush1.bf16.msra.mxu0 %v17202_v33  ;;  %v17214_v39 = vld [vmem:[%s23510_s3 + $0x680] ss:$16 sps:$4 sm:$0xff]   ;;  %v17225_v33 = vld [vmem:[%s23510_s3 + $0x6ac] ss:$16 sps:$4 sm:$0xff]  }
 0x5ae   : > { %10841 = vmatpush1.bf16.msra.mxu1 %v17205_v43  ;;  %9077 = vmatprep.subr.bf16.mxu0 %v17210_v11  ;;  %v17220_v43 = vld [vmem:[%s23510_s3 + $0x6a0] ss:$16 sps:$4 sm:$0xff]   ;;  %v17223_v11 = vld [vmem:[%s23510_s3 + $0x6a8] ss:$16 sps:$4 sm:$0xff]  }
 0x5af   : > { %10842 = vmatprep.subr.bf16.mxu1 %v17213_v58  ;;  %v17228_v58 = vld [vmem:[%s23510_s3 + $0x6c4] ss:$16 sps:$4 sm:$0xff]  }
 0x5b1   : > { %9078 = vmatpush1.bf16.msra.mxu0 %v17208_v29  ;;  %v17229_v29 = vld [vmem:[%s23510_s3 + $0x6c8] ss:$16 sps:$4 sm:$0xff]  }
 0x5b2   : > { %10843 = vmatpush1.bf16.msra.mxu1 %v17211_v10  ;;  %9079 = vmatprep.subr.bf16.mxu0 %v17216_v19  ;;  %v17234_v10 = vld [vmem:[%s23510_s3 + $0x6e4] ss:$16 sps:$4 sm:$0xff]   ;;  %v17237_v19 = vld [vmem:[%s23510_s3 + $0x6ec] ss:$16 sps:$4 sm:$0xff]  }
 0x5b3   : > { %8771 = vmatmul.mubr.bf16.gmra.mrb[136].mxu0 %v24360_v2  ;;  %10844 = vmatprep.subr.bf16.mxu1 %v17219_v51  ;;  %v17232_v51 = vld [vmem:[%s23510_s3 + $0x6e0] ss:$16 sps:$4 sm:$0xff]  }
 0x5b4   : > { %10536 = vmatmul.mubr.bf16.gmra.mrb[136].mxu1 %v24360_v2  ;;  %8780 = vmatprep.mubr.bf16.mxu0 %v24361_v18  ;;  %v17231_v2 = vld [vmem:[%s23510_s3 + $0x6cc] ss:$16 sps:$4 sm:$0xff]  }
 0x5b5   : > { %10545 = vmatprep.mubr.bf16.mxu1 %v24361_v18  ;;  %9080 = vmatpush1.bf16.msra.mxu0 %v17214_v39  ;;  %v17226_v18 = vld [vmem:[%s23510_s3 + $0x6c0] ss:$16 sps:$4 sm:$0xff]   ;;  %v17235_v39 = vld [vmem:[%s23510_s3 + $0x6e8] ss:$16 sps:$4 sm:$0xff]  }
 0x5b6   : > { %10845 = vmatpush1.bf16.msra.mxu1 %v17217_v49  ;;  %9081 = vmatprep.subr.bf16.mxu0 %v17222_v59  ;;  %v17240_v49 = vld [vmem:[%s23510_s3 + $0x704] ss:$16 sps:$4 sm:$0xff]   ;;  %v17238_v59 = vld [vmem:[%s23510_s3 + $0x700] ss:$16 sps:$4 sm:$0xff]  }
 0x5b7   : > { %10846 = vmatprep.subr.bf16.mxu1 %v17225_v33  ;;  %v17241_v33 = vld [vmem:[%s23510_s3 + $0x708] ss:$16 sps:$4 sm:$0xff]  }
 0x5b9   : > { %9082 = vmatpush1.bf16.msra.mxu0 %v17220_v43  ;;  %v17246_v43 = vld [vmem:[%s23510_s3 + $0x724] ss:$16 sps:$4 sm:$0xff]  }
 0x5ba   : > { %10847 = vmatpush1.bf16.msra.mxu1 %v17223_v11  ;;  %9083 = vmatprep.subr.bf16.mxu0 %v17228_v58  ;;  %v17249_v11 = vld [vmem:[%s23510_s3 + $0x72c] ss:$16 sps:$4 sm:$0xff]   ;;  %v17244_v58 = vld [vmem:[%s23510_s3 + $0x720] ss:$16 sps:$4 sm:$0xff]  }
 0x5bb   : > { %8781 = vmatmul.mubr.bf16.gmra.mrb[140].mxu0 %v24362_v52  ;;  %10848 = vmatprep.subr.bf16.mxu1 %v17231_v2  ;;  %v17247_v2 = vld [vmem:[%s23510_s3 + $0x728] ss:$16 sps:$4 sm:$0xff]  }
 0x5bc   : > { %10546 = vmatmul.mubr.bf16.gmra.mrb[140].mxu1 %v24362_v52  ;;  %8790 = vmatprep.mubr.bf16.mxu0 %v24363_v55  ;;  %v17243_v52 = vld [vmem:[%s23510_s3 + $0x70c] ss:$16 sps:$4 sm:$0xff]  }
 0x5bd   : > { %10555 = vmatprep.mubr.bf16.mxu1 %v24363_v55  ;;  %9084 = vmatpush1.bf16.msra.mxu0 %v17226_v18  ;;  %v17252_v18 = vld [vmem:[%s23510_s3 + $0x744] ss:$16 sps:$4 sm:$0xff]  }
 0x5be   : > { %10849 = vmatpush1.bf16.msra.mxu1 %v17229_v29  ;;  %9085 = vmatprep.subr.bf16.mxu0 %v17234_v10  ;;  %v17255_v29 = vld [vmem:[%s23510_s3 + $0x74c] ss:$16 sps:$4 sm:$0xff]   ;;  %v17250_v10 = vld [vmem:[%s23510_s3 + $0x740] ss:$16 sps:$4 sm:$0xff]  }
 0x5bf   : > { %10850 = vmatprep.subr.bf16.mxu1 %v17237_v19  ;;  %v17253_v19 = vld [vmem:[%s23510_s3 + $0x748] ss:$16 sps:$4 sm:$0xff]  }
 0x5c1   : > { %9086 = vmatpush1.bf16.msra.mxu0 %v17232_v51  ;;  %v17256_v51 = vld [vmem:[%s23510_s3 + $0x760] ss:$16 sps:$4 sm:$0xff]  }
 0x5c2   : > { %10851 = vmatpush1.bf16.msra.mxu1 %v17235_v39  ;;  %9087 = vmatprep.subr.bf16.mxu0 %v17240_v49  ;;  %v17258_v39 = vld [vmem:[%s23510_s3 + $0x764] ss:$16 sps:$4 sm:$0xff]   ;;  %v17259_v49 = vld [vmem:[%s23510_s3 + $0x768] ss:$16 sps:$4 sm:$0xff]  }
 0x5c3   : > { %8791 = vmatmul.mubr.bf16.gmra.mrb[144].mxu0 %v19926_v63  ;;  %10852 = vmatprep.subr.bf16.mxu1 %v17243_v52  ;;  %v17261_v52 = vld [vmem:[%s23510_s3 + $0x76c] ss:$16 sps:$4 sm:$0xff]  }
 0x5c4   : > { %10556 = vmatmul.mubr.bf16.gmra.mrb[144].mxu1 %v19926_v63  ;;  %8800 = vmatprep.mubr.bf16.mxu0 %v19952_v7 }
 0x5c5   : > { %10565 = vmatprep.mubr.bf16.mxu1 %v19952_v7  ;;  %9088 = vmatpush1.bf16.msra.mxu0 %v17238_v59  ;;  %v17262_v59 = vld [vmem:[%s23510_s3 + $0x780] ss:$16 sps:$4 sm:$0xff]  }
 0x5c6   : > { %10853 = vmatpush1.bf16.msra.mxu1 %v17241_v33  ;;  %9089 = vmatprep.subr.bf16.mxu0 %v17246_v43  ;;  %v17264_v33 = vld [vmem:[%s23510_s3 + $0x784] ss:$16 sps:$4 sm:$0xff]   ;;  %v17265_v43 = vld [vmem:[%s23510_s3 + $0x788] ss:$16 sps:$4 sm:$0xff]  }
 0x5c7   : > { %10854 = vmatprep.subr.bf16.mxu1 %v17249_v11  ;;  %v17267_v11 = vld [vmem:[%s23510_s3 + $0x78c] ss:$16 sps:$4 sm:$0xff]  }
 0x5c9   : > { %9090 = vmatpush1.bf16.msra.mxu0 %v17244_v58  ;;  %v17268_v58 = vld [vmem:[%s23510_s3 + $0x7a0] ss:$16 sps:$4 sm:$0xff]  }
 0x5ca   : > { %10855 = vmatpush1.bf16.msra.mxu1 %v17247_v2  ;;  %9091 = vmatprep.subr.bf16.mxu0 %v17252_v18  ;;  %v17270_v2 = vld [vmem:[%s23510_s3 + $0x7a4] ss:$16 sps:$4 sm:$0xff]   ;;  %v17271_v18 = vld [vmem:[%s23510_s3 + $0x7a8] ss:$16 sps:$4 sm:$0xff]  }
 0x5cb   : > { %8801 = vmatmul.mubr.bf16.gmra.mrb[148].mxu0 %v19948_v15  ;;  %10856 = vmatprep.subr.bf16.mxu1 %v17255_v29  ;;  %v17273_v29 = vld [vmem:[%s23510_s3 + $0x7ac] ss:$16 sps:$4 sm:$0xff]  }
 0x5cc   : > { %10566 = vmatmul.mubr.bf16.gmra.mrb[148].mxu1 %v19948_v15  ;;  %8810 = vmatprep.mubr.bf16.mxu0 %v19973_v35 }
 0x5cd   : > { %10575 = vmatprep.mubr.bf16.mxu1 %v19973_v35  ;;  %9092 = vmatpush1.bf16.msra.mxu0 %v17250_v10  ;;  %v17274_v10 = vld [vmem:[%s23510_s3 + $0x7c0] ss:$16 sps:$4 sm:$0xff]  }
 0x5ce   : > { %10857 = vmatpush1.bf16.msra.mxu1 %v17253_v19  ;;  %9093 = vmatprep.subr.bf16.mxu0 %v17258_v39  ;;  %v17276_v19 = vld [vmem:[%s23510_s3 + $0x7c4] ss:$16 sps:$4 sm:$0xff]   ;;  %v17279_v39 = vld [vmem:[%s23510_s3 + $0x7cc] ss:$16 sps:$4 sm:$0xff]  }
 0x5cf   : > { %10858 = vmatprep.subr.bf16.mxu1 %v17261_v52  ;;  %v17282_v52 = vld [vmem:[%s23510_s3 + $0x7e4] ss:$16 sps:$4 sm:$0xff]  }
 0x5d1   : > { %9094 = vmatpush1.bf16.msra.mxu0 %v17256_v51  ;;  %v17277_v51 = vld [vmem:[%s23510_s3 + $0x7c8] ss:$16 sps:$4 sm:$0xff]  }
 0x5d2   : > { %10859 = vmatpush1.bf16.msra.mxu1 %v17259_v49  ;;  %9095 = vmatprep.subr.bf16.mxu0 %v17264_v33  ;;  %v17280_v49 = vld [vmem:[%s23510_s3 + $0x7e0] ss:$16 sps:$4 sm:$0xff]   ;;  %v17285_v33 = vld [vmem:[%s23510_s3 + $0x7ec] ss:$16 sps:$4 sm:$0xff]  }
 0x5d3   : > { %8811 = vmatmul.mubr.bf16.gmra.mrb[152].mxu0 %v24364_v50  ;;  %10860 = vmatprep.subr.bf16.mxu1 %v17267_v11  ;;  %v17291_v11 = vld [vmem:[%s23510_s3 + $0x80c] ss:$16 sps:$4 sm:$0xff]  }
 0x5d4   : > { %10576 = vmatmul.mubr.bf16.gmra.mrb[152].mxu1 %v24364_v50  ;;  %8820 = vmatprep.mubr.bf16.mxu0 %v24365_v23 }
 0x5d5   : > { %10585 = vmatprep.mubr.bf16.mxu1 %v24365_v23  ;;  %9096 = vmatpush1.bf16.msra.mxu0 %v17262_v59  ;;  %v17283_v59 = vld [vmem:[%s23510_s3 + $0x7e8] ss:$16 sps:$4 sm:$0xff]  }
 0x5d6   : > { %10861 = vmatpush1.bf16.msra.mxu1 %v17265_v43  ;;  %9097 = vmatprep.subr.bf16.mxu0 %v17270_v2  ;;  %v17288_v43 = vld [vmem:[%s23510_s3 + $0x804] ss:$16 sps:$4 sm:$0xff]   ;;  %v24383_v2 = vld [vmem:[#allocation38_spill] sm:$0xff] }
 0x5d7   : > { %10862 = vmatprep.subr.bf16.mxu1 %v17273_v29  ;;  %v24385_v29 = vld [vmem:[#allocation40_spill] sm:$0xff] }
 0x5d9   : > { %9098 = vmatpush1.bf16.msra.mxu0 %v17268_v58  ;;  %v24382_v58 = vld [vmem:[#allocation39_spill] sm:$0xff] }
 0x5da   : > { %10863 = vmatpush1.bf16.msra.mxu1 %v17271_v18  ;;  %9099 = vmatprep.subr.bf16.mxu0 %v17276_v19  ;;  %v24384_v18 = vld [vmem:[#allocation41_spill] sm:$0xff]  ;;  %v24387_v19 = vld [vmem:[#allocation42_spill] sm:$0xff] }
 0x5db   : > { %8821 = vmatmul.mubr.bf16.gmra.mrb[156].mxu0 %v24232_v17  ;;  %10864 = vmatprep.subr.bf16.mxu1 %v17279_v39  ;;  %v24389_v39 = vld [vmem:[#allocation44_spill] sm:$0xff] }
 0x5dc   : > { %10586 = vmatmul.mubr.bf16.gmra.mrb[156].mxu1 %v24232_v17  ;;  %8830 = vmatprep.mubr.bf16.mxu0 %v24366_v48 }
 0x5dd   : > { %10595 = vmatprep.mubr.bf16.mxu1 %v24366_v48  ;;  %9100 = vmatpush1.bf16.msra.mxu0 %v17274_v10  ;;  %v24386_v10 = vld [vmem:[#allocation43_spill] sm:$0xff] }
 0x5de   : > { %10865 = vmatpush1.bf16.msra.mxu1 %v17277_v51  ;;  %9101 = vmatprep.subr.bf16.mxu0 %v17282_v52  ;;  %v24388_v51 = vld [vmem:[#allocation45_spill] sm:$0xff]  ;;  %v17289_v52 = vld [vmem:[%s23510_s3 + $0x808] ss:$16 sps:$4 sm:$0xff]  }
 0x5df   : > { %10866 = vmatprep.subr.bf16.mxu1 %v17285_v33  ;;  %v17297_v33 = vld [vmem:[%s23510_s3 + $0x82c] ss:$16 sps:$4 sm:$0xff]  }
 0x5e1   : > { %9102 = vmatpush1.bf16.msra.mxu0 %v17280_v49  ;;  %v17286_v49 = vld [vmem:[%s23510_s3 + $0x800] ss:$16 sps:$4 sm:$0xff]  }
 0x5e2   : > { %10867 = vmatpush1.bf16.msra.mxu1 %v17283_v59  ;;  %9424 = vmatprep.subr.bf16.mxu0 %v17288_v43  ;;  %v17294_v59 = vld [vmem:[%s23510_s3 + $0x824] ss:$16 sps:$4 sm:$0xff]   ;;  %v17295_v43 = vld [vmem:[%s23510_s3 + $0x828] ss:$16 sps:$4 sm:$0xff]  }
 0x5e3   : > { %8831 = vmatmul.mubr.bf16.gmra.mrb[160].mxu0 %v20010_v38  ;;  %11189 = vmatprep.subr.bf16.mxu1 %v17291_v11  ;;  %v17300_v11 = vld [vmem:[%s23510_s3 + $0x844] ss:$16 sps:$4 sm:$0xff]  }
 0x5e4   : > { %10596 = vmatmul.mubr.bf16.gmra.mrb[160].mxu1 %v20010_v38  ;;  %8840 = vmatprep.mubr.bf16.mxu0 %v24367_v37 }
 0x5e5   : > { %10605 = vmatprep.mubr.bf16.mxu1 %v24367_v37 }
 0x5eb   : > { %8841 = vmatmul.mubr.bf16.gmra.mrb[164].mxu0 %v24254_v56 }
 0x5ec   : > { %10606 = vmatmul.mubr.bf16.gmra.mrb[164].mxu1 %v24254_v56  ;;  %8850 = vmatprep.mubr.bf16.mxu0 %v24368_v30 }
 0x5ed   : > { %10615 = vmatprep.mubr.bf16.mxu1 %v24368_v30 }
 0x5f3   : > { %8851 = vmatmul.mubr.bf16.gmra.mrb[168].mxu0 %v20052_v21 }
 0x5f4   : > { %10616 = vmatmul.mubr.bf16.gmra.mrb[168].mxu1 %v20052_v21  ;;  %8860 = vmatprep.mubr.bf16.mxu0 %v24369_v53 }
 0x5f5   : > { %10625 = vmatprep.mubr.bf16.mxu1 %v24369_v53 }
 0x5fb   : > { %8861 = vmatmul.mubr.bf16.gmra.mrb[172].mxu0 %v24370_v40 }
 0x5fc   : > { %10626 = vmatmul.mubr.bf16.gmra.mrb[172].mxu1 %v24370_v40  ;;  %8870 = vmatprep.mubr.bf16.mxu0 %v24371_v42 }
 0x5fd   : > { %10635 = vmatprep.mubr.bf16.mxu1 %v24371_v42 }
 0x603   : > { %8871 = vmatmul.mubr.bf16.gmra.mrb[176].mxu0 %v20105_v5 }
 0x604   : > { %10636 = vmatmul.mubr.bf16.gmra.mrb[176].mxu1 %v20105_v5  ;;  %8880 = vmatprep.mubr.bf16.mxu0 %v20149_v28 }
 0x605   : > { %10645 = vmatprep.mubr.bf16.mxu1 %v20149_v28 }
 0x60b   : > { %8881 = vmatmul.mubr.bf16.gmra.mrb[180].mxu0 %v20139_v24 }
 0x60c   : > { %10646 = vmatmul.mubr.bf16.gmra.mrb[180].mxu1 %v20139_v24  ;;  %8890 = vmatprep.mubr.bf16.mxu0 %v20188_v3 }
 0x60d   : > { %10655 = vmatprep.mubr.bf16.mxu1 %v20188_v3 }
 0x613   : > { %8891 = vmatmul.mubr.bf16.gmra.mrb[184].mxu0 %v24372_v22 }
 0x614   : > { %10656 = vmatmul.mubr.bf16.gmra.mrb[184].mxu1 %v24372_v22  ;;  %8900 = vmatprep.mubr.bf16.mxu0 %v24373_v14 }
 0x615   : > { %10665 = vmatprep.mubr.bf16.mxu1 %v24373_v14 }
 0x61b   : > { %8901 = vmatmul.mubr.bf16.gmra.mrb[188].mxu0 %v20212_v32 }
 0x61c   : > { %10666 = vmatmul.mubr.bf16.gmra.mrb[188].mxu1 %v20212_v32  ;;  %8910 = vmatprep.mubr.bf16.mxu0 %v20268_v31 }
 0x61d   : > { %10675 = vmatprep.mubr.bf16.mxu1 %v20268_v31 }
 0x623   : > { %8911 = vmatmul.mubr.bf16.gmra.mrb[192].mxu0 %v20252_v20 }
 0x624   : > { %10676 = vmatmul.mubr.bf16.gmra.mrb[192].mxu1 %v20252_v20  ;;  %8920 = vmatprep.mubr.bf16.mxu0 %v20314_v60 }
 0x625   : > { %10685 = vmatprep.mubr.bf16.mxu1 %v20314_v60 }
 0x62b   : > { %8921 = vmatmul.mubr.bf16.gmra.mrb[196].mxu0 %v20292_v6 }
 0x62c   : > { %10686 = vmatmul.mubr.bf16.gmra.mrb[196].mxu1 %v20292_v6  ;;  %8930 = vmatprep.mubr.bf16.mxu0 %v20348_v1 }
 0x62d   : > { %10695 = vmatprep.mubr.bf16.mxu1 %v20348_v1 }
 0x633   : > { %8931 = vmatmul.mubr.bf16.gmra.mrb[200].mxu0 %v20332_v25 }
 0x634   : > { %10696 = vmatmul.mubr.bf16.gmra.mrb[200].mxu1 %v20332_v25  ;;  %8940 = vmatprep.mubr.bf16.mxu0 %v20388_v4 }
 0x635   : > { %10705 = vmatprep.mubr.bf16.mxu1 %v20388_v4 }
 0x63b   : > { %8941 = vmatmul.mubr.bf16.gmra.mrb[204].mxu0 %v20366_v57 }
 0x63c   : > { %10706 = vmatmul.mubr.bf16.gmra.mrb[204].mxu1 %v20366_v57  ;;  %8950 = vmatprep.mubr.bf16.mxu0 %v20410_v45 }
 0x63d   : > { %10715 = vmatprep.mubr.bf16.mxu1 %v20410_v45 }
 0x643   : > { %8951 = vmatmul.mubr.bf16.gmra.mrb[208].mxu0 %v20400_v27 }
 0x644   : > { %10716 = vmatmul.mubr.bf16.gmra.mrb[208].mxu1 %v20400_v27  ;;  %8960 = vmatprep.mubr.bf16.mxu0 %v20443_v16 }
 0x645   : > { %10725 = vmatprep.mubr.bf16.mxu1 %v20443_v16 }
 0x64b   : > { %8961 = vmatmul.mubr.bf16.gmra.mrb[212].mxu0 %v20421_v34 }
 0x64c   : > { %10726 = vmatmul.mubr.bf16.gmra.mrb[212].mxu1 %v20421_v34  ;;  %8970 = vmatprep.mubr.bf16.mxu0 %v20465_v62 }
 0x64d   : > { %10735 = vmatprep.mubr.bf16.mxu1 %v20465_v62 }
 0x653   : > { %8971 = vmatmul.mubr.bf16.gmra.mrb[216].mxu0 %v20455_v9 }
 0x654   : > { %10736 = vmatmul.mubr.bf16.gmra.mrb[216].mxu1 %v20455_v9  ;;  %8980 = vmatprep.mubr.bf16.mxu0 %v20498_v44 }
 0x655   : > { %10745 = vmatprep.mubr.bf16.mxu1 %v20498_v44 }
 0x65b   : > { %8981 = vmatmul.mubr.bf16.gmra.mrb[220].mxu0 %v20476_v36 }
 0x65c   : > { %10746 = vmatmul.mubr.bf16.gmra.mrb[220].mxu1 %v20476_v36  ;;  %8990 = vmatprep.mubr.bf16.mxu0 %v24374_v12 }
 0x65d   : > { %10755 = vmatprep.mubr.bf16.mxu1 %v24374_v12 }
 0x663   : > { %8991 = vmatmul.mubr.bf16.gmra.mrb[224].mxu0 %v24375_v41 }
 0x664   : > { %10756 = vmatmul.mubr.bf16.gmra.mrb[224].mxu1 %v24375_v41  ;;  %9000 = vmatprep.mubr.bf16.mxu0 %v24376_v8 }
 0x665   : > { %10765 = vmatprep.mubr.bf16.mxu1 %v24376_v8 }
 0x66b   : > { %9001 = vmatmul.mubr.bf16.gmra.mrb[228].mxu0 %v24377_v0 }
 0x66c   : > { %10766 = vmatmul.mubr.bf16.gmra.mrb[228].mxu1 %v24377_v0  ;;  %9010 = vmatprep.mubr.bf16.mxu0 %v24378_v61 }
 0x66d   : > { %10775 = vmatprep.mubr.bf16.mxu1 %v24378_v61 }
 0x673   : > { %9011 = vmatmul.mubr.bf16.gmra.mrb[232].mxu0 %v24379_v13 }
 0x674   : > { %10776 = vmatmul.mubr.bf16.gmra.mrb[232].mxu1 %v24379_v13  ;;  %9020 = vmatprep.mubr.bf16.mxu0 %v24380_v46 }
 0x675   : > { %10785 = vmatprep.mubr.bf16.mxu1 %v24380_v46 }
 0x67b   : > { %9021 = vmatmul.mubr.bf16.gmra.mrb[236].mxu0 %v24381_v54 }
 0x67c   : > { %10786 = vmatmul.mubr.bf16.gmra.mrb[236].mxu1 %v24381_v54  ;;  %9030 = vmatprep.mubr.bf16.mxu0 %v24382_v58 }
 0x67d   : > { %10795 = vmatprep.mubr.bf16.mxu1 %v24382_v58 }
 0x683   : > { %9031 = vmatmul.mubr.bf16.gmra.mrb[240].mxu0 %v24383_v2 }
 0x684   : > { %10796 = vmatmul.mubr.bf16.gmra.mrb[240].mxu1 %v24383_v2  ;;  %9040 = vmatprep.mubr.bf16.mxu0 %v24384_v18 }
 0x685   : > { %10805 = vmatprep.mubr.bf16.mxu1 %v24384_v18 }
 0x68b   : > { %9041 = vmatmul.mubr.bf16.gmra.mrb[244].mxu0 %v24385_v29 }
 0x68c   : > { %10806 = vmatmul.mubr.bf16.gmra.mrb[244].mxu1 %v24385_v29  ;;  %9050 = vmatprep.mubr.bf16.mxu0 %v24386_v10 }
 0x68d   : > { %10815 = vmatprep.mubr.bf16.mxu1 %v24386_v10 }
 0x693   : > { %9051 = vmatmul.mubr.bf16.gmra.mrb[248].mxu0 %v24387_v19 }
 0x694   : > { %10816 = vmatmul.mubr.bf16.gmra.mrb[248].mxu1 %v24387_v19  ;;  %9060 = vmatprep.mubr.bf16.mxu0 %v24388_v51 }
 0x695   : > { %10825 = vmatprep.mubr.bf16.mxu1 %v24388_v51 }
 0x69b   : > { %9061 = vmatmul.mubr.bf16.gmra.mrb[252].mxu0 %v24389_v39 }
 0x69c   : > { %10826 = vmatmul.mubr.bf16.gmra.mrb[252].mxu1 %v24389_v39  ;;  %9103 = vmatprep.mubr.bf16.mxu0 %v24363_v55 }
 0x69d   : > { %10868 = vmatprep.mubr.bf16.mxu1 %v24363_v55  ;;  %v17292_v55 = vld [vmem:[%s23510_s3 + $0x820] ss:$16 sps:$4 sm:$0xff]  }
 0x6a3   : > { %9104 = vmatmul.mubr.bf16.vlgmr.msra.gmra.mrb[128].mxu0 %v19926_v63 }
 0x6a4   : > { %10869 = vmatmul.mubr.bf16.vlgmr.msra.gmra.mrb[128].mxu1 %v19926_v63  ;;  %9113 = vmatprep.mubr.bf16.mxu0 %v19952_v7  ;;  %v17303_v63 = vld [vmem:[%s23510_s3 + $0x84c] ss:$16 sps:$4 sm:$0xff]  }
 0x6a5   : > { %9425 = vmatpush1.bf16.msra.mxu0 %v17286_v49  ;;  %10878 = vmatprep.mubr.bf16.mxu1 %v19952_v7  ;;  %v17298_v7 = vld [vmem:[%s23510_s3 + $0x840] ss:$16 sps:$4 sm:$0xff]   ;;  %v17301_v49 = vld [vmem:[%s23510_s3 + $0x848] ss:$16 sps:$4 sm:$0xff]  }
 0x6a6   : > { %11190 = vmatpush1.bf16.msra.mxu1 %v17289_v52  ;;  %9426 = vmatprep.subr.bf16.mxu0 %v17294_v59  ;;  %v17306_v52 = vld [vmem:[%s23510_s3 + $0x864] ss:$16 sps:$4 sm:$0xff]   ;;  %v17309_v59 = vld [vmem:[%s23510_s3 + $0x86c] ss:$16 sps:$4 sm:$0xff]  }
 0x6a7   : > { %11191 = vmatprep.subr.bf16.mxu1 %v17297_v33  ;;  %v17304_v33 = vld [vmem:[%s23510_s3 + $0x860] ss:$16 sps:$4 sm:$0xff]  }
 0x6a9   : > { %9427 = vmatpush1.bf16.msra.mxu0 %v17292_v55  ;;  %v17307_v55 = vld [vmem:[%s23510_s3 + $0x868] ss:$16 sps:$4 sm:$0xff]  }
 0x6aa   : > { %11192 = vmatpush1.bf16.msra.mxu1 %v17295_v43  ;;  %9428 = vmatprep.subr.bf16.mxu0 %v17300_v11  ;;  %v17312_v43 = vld [vmem:[%s23510_s3 + $0x884] ss:$16 sps:$4 sm:$0xff]   ;;  %v17313_v11 = vld [vmem:[%s23510_s3 + $0x888] ss:$16 sps:$4 sm:$0xff]  }
 0x6ab   : > { %9114 = vmatmul.mubr.bf16.gmra.mrb[132].mxu0 %v19948_v15  ;;  %11193 = vmatprep.subr.bf16.mxu1 %v17303_v63  ;;  %v17318_v63 = vld [vmem:[%s23510_s3 + $0x8a4] ss:$16 sps:$4 sm:$0xff]  }
 0x6ac   : > { %10879 = vmatmul.mubr.bf16.gmra.mrb[132].mxu1 %v19948_v15  ;;  %9123 = vmatprep.mubr.bf16.mxu0 %v19973_v35  ;;  %v17315_v15 = vld [vmem:[%s23510_s3 + $0x88c] ss:$16 sps:$4 sm:$0xff]  }
 0x6ad   : > { %10888 = vmatprep.mubr.bf16.mxu1 %v19973_v35  ;;  %9429 = vmatpush1.bf16.msra.mxu0 %v17298_v7  ;;  %v17310_v35 = vld [vmem:[%s23510_s3 + $0x880] ss:$16 sps:$4 sm:$0xff]   ;;  %v17321_v7 = vld [vmem:[%s23510_s3 + $0x8ac] ss:$16 sps:$4 sm:$0xff]  }
 0x6ae   : > { %11194 = vmatpush1.bf16.msra.mxu1 %v17301_v49  ;;  %9430 = vmatprep.subr.bf16.mxu0 %v17306_v52  ;;  %v17316_v49 = vld [vmem:[%s23510_s3 + $0x8a0] ss:$16 sps:$4 sm:$0xff]   ;;  %v17319_v52 = vld [vmem:[%s23510_s3 + $0x8a8] ss:$16 sps:$4 sm:$0xff]  }
 0x6af   : > { %11195 = vmatprep.subr.bf16.mxu1 %v17309_v59  ;;  %v17324_v59 = vld [vmem:[%s23510_s3 + $0x8c4] ss:$16 sps:$4 sm:$0xff]  }
 0x6b1   : > { %9431 = vmatpush1.bf16.msra.mxu0 %v17304_v33  ;;  %v17325_v33 = vld [vmem:[%s23510_s3 + $0x8c8] ss:$16 sps:$4 sm:$0xff]  }
 0x6b2   : > { %11196 = vmatpush1.bf16.msra.mxu1 %v17307_v55  ;;  %9432 = vmatprep.subr.bf16.mxu0 %v17312_v43  ;;  %v17330_v55 = vld [vmem:[%s23510_s3 + $0x8e4] ss:$16 sps:$4 sm:$0xff]   ;;  %v17333_v43 = vld [vmem:[%s23510_s3 + $0x8ec] ss:$16 sps:$4 sm:$0xff]  }
 0x6b3   : > { %9124 = vmatmul.mubr.bf16.gmra.mrb[136].mxu0 %v24364_v50  ;;  %11197 = vmatprep.subr.bf16.mxu1 %v17315_v15  ;;  %v17328_v15 = vld [vmem:[%s23510_s3 + $0x8e0] ss:$16 sps:$4 sm:$0xff]  }
 0x6b4   : > { %10889 = vmatmul.mubr.bf16.gmra.mrb[136].mxu1 %v24364_v50  ;;  %9133 = vmatprep.mubr.bf16.mxu0 %v24365_v23  ;;  %v17327_v50 = vld [vmem:[%s23510_s3 + $0x8cc] ss:$16 sps:$4 sm:$0xff]  }
 0x6b5   : > { %10898 = vmatprep.mubr.bf16.mxu1 %v24365_v23  ;;  %9433 = vmatpush1.bf16.msra.mxu0 %v17310_v35  ;;  %v17322_v23 = vld [vmem:[%s23510_s3 + $0x8c0] ss:$16 sps:$4 sm:$0xff]   ;;  %v17331_v35 = vld [vmem:[%s23510_s3 + $0x8e8] ss:$16 sps:$4 sm:$0xff]  }
 0x6b6   : > { %11198 = vmatpush1.bf16.msra.mxu1 %v17313_v11  ;;  %9434 = vmatprep.subr.bf16.mxu0 %v17318_v63  ;;  %v17336_v11 = vld [vmem:[%s23510_s3 + $0x904] ss:$16 sps:$4 sm:$0xff]   ;;  %v17334_v63 = vld [vmem:[%s23510_s3 + $0x900] ss:$16 sps:$4 sm:$0xff]  }
 0x6b7   : > { %11199 = vmatprep.subr.bf16.mxu1 %v17321_v7  ;;  %v17337_v7 = vld [vmem:[%s23510_s3 + $0x908] ss:$16 sps:$4 sm:$0xff]  }
 0x6b9   : > { %9435 = vmatpush1.bf16.msra.mxu0 %v17316_v49  ;;  %v17342_v49 = vld [vmem:[%s23510_s3 + $0x924] ss:$16 sps:$4 sm:$0xff]  }
 0x6ba   : > { %11200 = vmatpush1.bf16.msra.mxu1 %v17319_v52  ;;  %9436 = vmatprep.subr.bf16.mxu0 %v17324_v59  ;;  %v17345_v52 = vld [vmem:[%s23510_s3 + $0x92c] ss:$16 sps:$4 sm:$0xff]   ;;  %v17340_v59 = vld [vmem:[%s23510_s3 + $0x920] ss:$16 sps:$4 sm:$0xff]  }
 0x6bb   : > { %9134 = vmatmul.mubr.bf16.gmra.mrb[140].mxu0 %v24232_v17  ;;  %11201 = vmatprep.subr.bf16.mxu1 %v17327_v50  ;;  %v17343_v50 = vld [vmem:[%s23510_s3 + $0x928] ss:$16 sps:$4 sm:$0xff]  }
 0x6bc   : > { %10899 = vmatmul.mubr.bf16.gmra.mrb[140].mxu1 %v24232_v17  ;;  %9143 = vmatprep.mubr.bf16.mxu0 %v24366_v48  ;;  %v17339_v17 = vld [vmem:[%s23510_s3 + $0x90c] ss:$16 sps:$4 sm:$0xff]  }
 0x6bd   : > { %10908 = vmatprep.mubr.bf16.mxu1 %v24366_v48  ;;  %9437 = vmatpush1.bf16.msra.mxu0 %v17322_v23  ;;  %v17348_v23 = vld [vmem:[%s23510_s3 + $0x944] ss:$16 sps:$4 sm:$0xff]  }
 0x6be   : > { %11202 = vmatpush1.bf16.msra.mxu1 %v17325_v33  ;;  %9438 = vmatprep.subr.bf16.mxu0 %v17330_v55  ;;  %v17351_v33 = vld [vmem:[%s23510_s3 + $0x94c] ss:$16 sps:$4 sm:$0xff]   ;;  %v17346_v55 = vld [vmem:[%s23510_s3 + $0x940] ss:$16 sps:$4 sm:$0xff]  }
 0x6bf   : > { %11203 = vmatprep.subr.bf16.mxu1 %v17333_v43  ;;  %v17349_v43 = vld [vmem:[%s23510_s3 + $0x948] ss:$16 sps:$4 sm:$0xff]  }
 0x6c1   : > { %9439 = vmatpush1.bf16.msra.mxu0 %v17328_v15  ;;  %v17352_v15 = vld [vmem:[%s23510_s3 + $0x960] ss:$16 sps:$4 sm:$0xff]  }
 0x6c2   : > { %11204 = vmatpush1.bf16.msra.mxu1 %v17331_v35  ;;  %9440 = vmatprep.subr.bf16.mxu0 %v17336_v11  ;;  %v17354_v35 = vld [vmem:[%s23510_s3 + $0x964] ss:$16 sps:$4 sm:$0xff]   ;;  %v17355_v11 = vld [vmem:[%s23510_s3 + $0x968] ss:$16 sps:$4 sm:$0xff]  }
 0x6c3   : > { %9144 = vmatmul.mubr.bf16.gmra.mrb[144].mxu0 %v20010_v38  ;;  %11205 = vmatprep.subr.bf16.mxu1 %v17339_v17  ;;  %v17357_v17 = vld [vmem:[%s23510_s3 + $0x96c] ss:$16 sps:$4 sm:$0xff]  }
 0x6c4   : > { %10909 = vmatmul.mubr.bf16.gmra.mrb[144].mxu1 %v20010_v38  ;;  %9153 = vmatprep.mubr.bf16.mxu0 %v24367_v37 }
 0x6c5   : > { %10918 = vmatprep.mubr.bf16.mxu1 %v24367_v37  ;;  %9441 = vmatpush1.bf16.msra.mxu0 %v17334_v63  ;;  %v17358_v63 = vld [vmem:[%s23510_s3 + $0x980] ss:$16 sps:$4 sm:$0xff]  }
 0x6c6   : > { %11206 = vmatpush1.bf16.msra.mxu1 %v17337_v7  ;;  %9442 = vmatprep.subr.bf16.mxu0 %v17342_v49  ;;  %v17360_v7 = vld [vmem:[%s23510_s3 + $0x984] ss:$16 sps:$4 sm:$0xff]   ;;  %v17361_v49 = vld [vmem:[%s23510_s3 + $0x988] ss:$16 sps:$4 sm:$0xff]  }
 0x6c7   : > { %11207 = vmatprep.subr.bf16.mxu1 %v17345_v52  ;;  %v17363_v52 = vld [vmem:[%s23510_s3 + $0x98c] ss:$16 sps:$4 sm:$0xff]  }
 0x6c9   : > { %9443 = vmatpush1.bf16.msra.mxu0 %v17340_v59  ;;  %v17364_v59 = vld [vmem:[%s23510_s3 + $0x9a0] ss:$16 sps:$4 sm:$0xff]  }
 0x6ca   : > { %11208 = vmatpush1.bf16.msra.mxu1 %v17343_v50  ;;  %9444 = vmatprep.subr.bf16.mxu0 %v17348_v23  ;;  %v17366_v50 = vld [vmem:[%s23510_s3 + $0x9a4] ss:$16 sps:$4 sm:$0xff]   ;;  %v17367_v23 = vld [vmem:[%s23510_s3 + $0x9a8] ss:$16 sps:$4 sm:$0xff]  }
 0x6cb   : > { %9154 = vmatmul.mubr.bf16.gmra.mrb[148].mxu0 %v24254_v56  ;;  %11209 = vmatprep.subr.bf16.mxu1 %v17351_v33  ;;  %v17369_v33 = vld [vmem:[%s23510_s3 + $0x9ac] ss:$16 sps:$4 sm:$0xff]  }
 0x6cc   : > { %10919 = vmatmul.mubr.bf16.gmra.mrb[148].mxu1 %v24254_v56  ;;  %9163 = vmatprep.mubr.bf16.mxu0 %v24368_v30 }
 0x6cd   : > { %10928 = vmatprep.mubr.bf16.mxu1 %v24368_v30  ;;  %9445 = vmatpush1.bf16.msra.mxu0 %v17346_v55  ;;  %v17370_v55 = vld [vmem:[%s23510_s3 + $0x9c0] ss:$16 sps:$4 sm:$0xff]  }
 0x6ce   : > { %11210 = vmatpush1.bf16.msra.mxu1 %v17349_v43  ;;  %9446 = vmatprep.subr.bf16.mxu0 %v17354_v35  ;;  %v17372_v43 = vld [vmem:[%s23510_s3 + $0x9c4] ss:$16 sps:$4 sm:$0xff]   ;;  %v17375_v35 = vld [vmem:[%s23510_s3 + $0x9cc] ss:$16 sps:$4 sm:$0xff]  }
 0x6cf   : > { %11211 = vmatprep.subr.bf16.mxu1 %v17357_v17  ;;  %v17378_v17 = vld [vmem:[%s23510_s3 + $0x9e4] ss:$16 sps:$4 sm:$0xff]  }
 0x6d1   : > { %9447 = vmatpush1.bf16.msra.mxu0 %v17352_v15  ;;  %v17373_v15 = vld [vmem:[%s23510_s3 + $0x9c8] ss:$16 sps:$4 sm:$0xff]  }
 0x6d2   : > { %11212 = vmatpush1.bf16.msra.mxu1 %v17355_v11  ;;  %9448 = vmatprep.subr.bf16.mxu0 %v17360_v7  ;;  %v17376_v11 = vld [vmem:[%s23510_s3 + $0x9e0] ss:$16 sps:$4 sm:$0xff]   ;;  %v17381_v7 = vld [vmem:[%s23510_s3 + $0x9ec] ss:$16 sps:$4 sm:$0xff]  }
 0x6d3   : > { %9164 = vmatmul.mubr.bf16.gmra.mrb[152].mxu0 %v20052_v21  ;;  %11213 = vmatprep.subr.bf16.mxu1 %v17363_v52  ;;  %v17387_v52 = vld [vmem:[%s23512_s5 + $0xc] ss:$16 sps:$4 sm:$0xff]  }
 0x6d4   : > { %10929 = vmatmul.mubr.bf16.gmra.mrb[152].mxu1 %v20052_v21  ;;  %9173 = vmatprep.mubr.bf16.mxu0 %v24369_v53 }
 0x6d5   : > { %10938 = vmatprep.mubr.bf16.mxu1 %v24369_v53  ;;  %9449 = vmatpush1.bf16.msra.mxu0 %v17358_v63  ;;  %v17379_v63 = vld [vmem:[%s23510_s3 + $0x9e8] ss:$16 sps:$4 sm:$0xff]  }
 0x6d6   : > { %11214 = vmatpush1.bf16.msra.mxu1 %v17361_v49  ;;  %9450 = vmatprep.subr.bf16.mxu0 %v17366_v50  ;;  %v17384_v49 = vld [vmem:[%s23512_s5 + $0x4] ss:$16 sps:$4 sm:$0xff]   ;;  %v24391_v50 = vld [vmem:[#allocation46_spill] sm:$0xff] }
 0x6d7   : > { %11215 = vmatprep.subr.bf16.mxu1 %v17369_v33  ;;  %v24393_v33 = vld [vmem:[#allocation48_spill] sm:$0xff] }
 0x6d9   : > { %9451 = vmatpush1.bf16.msra.mxu0 %v17364_v59  ;;  %v24390_v59 = vld [vmem:[#allocation47_spill] sm:$0xff] }
 0x6da   : > { %11216 = vmatpush1.bf16.msra.mxu1 %v17367_v23  ;;  %9452 = vmatprep.subr.bf16.mxu0 %v17372_v43  ;;  %v24392_v23 = vld [vmem:[#allocation50_spill] sm:$0xff]  ;;  %v24395_v43 = vld [vmem:[#allocation49_spill] sm:$0xff] }
 0x6db   : > { %9174 = vmatmul.mubr.bf16.gmra.mrb[156].mxu0 %v24370_v40  ;;  %11217 = vmatprep.subr.bf16.mxu1 %v17375_v35  ;;  %v24397_v35 = vld [vmem:[#allocation51_spill] sm:$0xff] }
 0x6dc   : > { %10939 = vmatmul.mubr.bf16.gmra.mrb[156].mxu1 %v24370_v40  ;;  %9183 = vmatprep.mubr.bf16.mxu0 %v24371_v42 }
 0x6dd   : > { %10948 = vmatprep.mubr.bf16.mxu1 %v24371_v42  ;;  %9453 = vmatpush1.bf16.msra.mxu0 %v17370_v55  ;;  %v24394_v55 = vld [vmem:[#allocation52_spill] sm:$0xff] }
 0x6de   : > { %11218 = vmatpush1.bf16.msra.mxu1 %v17373_v15  ;;  %9454 = vmatprep.subr.bf16.mxu0 %v17378_v17  ;;  %v24396_v15 = vld [vmem:[#allocation53_spill] sm:$0xff]  ;;  %v17385_v17 = vld [vmem:[%s23512_s5 + $0x8] ss:$16 sps:$4 sm:$0xff]  }
 0x6df   : > { %11219 = vmatprep.subr.bf16.mxu1 %v17381_v7  ;;  %v17393_v7 = vld [vmem:[%s23512_s5 + $0x2c] ss:$16 sps:$4 sm:$0xff]  }
 0x6e1   : > { %9455 = vmatpush1.bf16.msra.mxu0 %v17376_v11  ;;  %v17382_v11 = vld [vmem:[%s23512_s5] ss:$16 sps:$4 sm:$0xff]  }
 0x6e2   : > { %11220 = vmatpush1.bf16.msra.mxu1 %v17379_v63  ;;  %13592 = vmatprep.subr.bf16.mxu0 %v17384_v49  ;;  %v17390_v63 = vld [vmem:[%s23512_s5 + $0x24] ss:$16 sps:$4 sm:$0xff]   ;;  %v17391_v49 = vld [vmem:[%s23512_s5 + $0x28] ss:$16 sps:$4 sm:$0xff]  }
 0x6e3   : > { %9184 = vmatmul.mubr.bf16.gmra.mrb[160].mxu0 %v20105_v5  ;;  %13884 = vmatprep.subr.bf16.mxu1 %v17387_v52  ;;  %v17396_v52 = vld [vmem:[%s23512_s5 + $0x44] ss:$16 sps:$4 sm:$0xff]  }
 0x6e4   : > { %10949 = vmatmul.mubr.bf16.gmra.mrb[160].mxu1 %v20105_v5  ;;  %9193 = vmatprep.mubr.bf16.mxu0 %v20149_v28 }
 0x6e5   : > { %10958 = vmatprep.mubr.bf16.mxu1 %v20149_v28 }
 0x6eb   : > { %9194 = vmatmul.mubr.bf16.gmra.mrb[164].mxu0 %v20139_v24 }
 0x6ec   : > { %10959 = vmatmul.mubr.bf16.gmra.mrb[164].mxu1 %v20139_v24  ;;  %9203 = vmatprep.mubr.bf16.mxu0 %v20188_v3 }
 0x6ed   : > { %10968 = vmatprep.mubr.bf16.mxu1 %v20188_v3 }
 0x6f3   : > { %9204 = vmatmul.mubr.bf16.gmra.mrb[168].mxu0 %v24372_v22 }
 0x6f4   : > { %10969 = vmatmul.mubr.bf16.gmra.mrb[168].mxu1 %v24372_v22  ;;  %9213 = vmatprep.mubr.bf16.mxu0 %v24373_v14 }
 0x6f5   : > { %10978 = vmatprep.mubr.bf16.mxu1 %v24373_v14 }
 0x6fb   : > { %9214 = vmatmul.mubr.bf16.gmra.mrb[172].mxu0 %v20212_v32 }
 0x6fc   : > { %10979 = vmatmul.mubr.bf16.gmra.mrb[172].mxu1 %v20212_v32  ;;  %9223 = vmatprep.mubr.bf16.mxu0 %v20268_v31 }
 0x6fd   : > { %10988 = vmatprep.mubr.bf16.mxu1 %v20268_v31 }
 0x703   : > { %9224 = vmatmul.mubr.bf16.gmra.mrb[176].mxu0 %v20252_v20 }
 0x704   : > { %10989 = vmatmul.mubr.bf16.gmra.mrb[176].mxu1 %v20252_v20  ;;  %9233 = vmatprep.mubr.bf16.mxu0 %v20314_v60 }
 0x705   : > { %10998 = vmatprep.mubr.bf16.mxu1 %v20314_v60 }
 0x70b   : > { %9234 = vmatmul.mubr.bf16.gmra.mrb[180].mxu0 %v20292_v6 }
 0x70c   : > { %10999 = vmatmul.mubr.bf16.gmra.mrb[180].mxu1 %v20292_v6  ;;  %9243 = vmatprep.mubr.bf16.mxu0 %v20348_v1 }
 0x70d   : > { %11008 = vmatprep.mubr.bf16.mxu1 %v20348_v1 }
 0x713   : > { %9244 = vmatmul.mubr.bf16.gmra.mrb[184].mxu0 %v20332_v25 }
 0x714   : > { %11009 = vmatmul.mubr.bf16.gmra.mrb[184].mxu1 %v20332_v25  ;;  %9253 = vmatprep.mubr.bf16.mxu0 %v20388_v4 }
 0x715   : > { %11018 = vmatprep.mubr.bf16.mxu1 %v20388_v4 }
 0x71b   : > { %9254 = vmatmul.mubr.bf16.gmra.mrb[188].mxu0 %v20366_v57 }
 0x71c   : > { %11019 = vmatmul.mubr.bf16.gmra.mrb[188].mxu1 %v20366_v57  ;;  %9263 = vmatprep.mubr.bf16.mxu0 %v20410_v45 }
 0x71d   : > { %11028 = vmatprep.mubr.bf16.mxu1 %v20410_v45 }
 0x723   : > { %9264 = vmatmul.mubr.bf16.gmra.mrb[192].mxu0 %v20400_v27 }
 0x724   : > { %11029 = vmatmul.mubr.bf16.gmra.mrb[192].mxu1 %v20400_v27  ;;  %9273 = vmatprep.mubr.bf16.mxu0 %v20443_v16 }
 0x725   : > { %11038 = vmatprep.mubr.bf16.mxu1 %v20443_v16 }
 0x72b   : > { %9274 = vmatmul.mubr.bf16.gmra.mrb[196].mxu0 %v20421_v34 }
 0x72c   : > { %11039 = vmatmul.mubr.bf16.gmra.mrb[196].mxu1 %v20421_v34  ;;  %9283 = vmatprep.mubr.bf16.mxu0 %v20465_v62 }
 0x72d   : > { %11048 = vmatprep.mubr.bf16.mxu1 %v20465_v62 }
 0x733   : > { %9284 = vmatmul.mubr.bf16.gmra.mrb[200].mxu0 %v20455_v9 }
 0x734   : > { %11049 = vmatmul.mubr.bf16.gmra.mrb[200].mxu1 %v20455_v9  ;;  %9293 = vmatprep.mubr.bf16.mxu0 %v20498_v44 }
 0x735   : > { %11058 = vmatprep.mubr.bf16.mxu1 %v20498_v44 }
 0x73b   : > { %9294 = vmatmul.mubr.bf16.gmra.mrb[204].mxu0 %v20476_v36 }
 0x73c   : > { %11059 = vmatmul.mubr.bf16.gmra.mrb[204].mxu1 %v20476_v36  ;;  %9303 = vmatprep.mubr.bf16.mxu0 %v24374_v12 }
 0x73d   : > { %11068 = vmatprep.mubr.bf16.mxu1 %v24374_v12 }
 0x743   : > { %9304 = vmatmul.mubr.bf16.gmra.mrb[208].mxu0 %v24375_v41 }
 0x744   : > { %11069 = vmatmul.mubr.bf16.gmra.mrb[208].mxu1 %v24375_v41  ;;  %9313 = vmatprep.mubr.bf16.mxu0 %v24376_v8 }
 0x745   : > { %11078 = vmatprep.mubr.bf16.mxu1 %v24376_v8 }
 0x74b   : > { %9314 = vmatmul.mubr.bf16.gmra.mrb[212].mxu0 %v24377_v0 }
 0x74c   : > { %11079 = vmatmul.mubr.bf16.gmra.mrb[212].mxu1 %v24377_v0  ;;  %9323 = vmatprep.mubr.bf16.mxu0 %v24378_v61 }
 0x74d   : > { %11088 = vmatprep.mubr.bf16.mxu1 %v24378_v61 }
 0x753   : > { %9324 = vmatmul.mubr.bf16.gmra.mrb[216].mxu0 %v24379_v13 }
 0x754   : > { %11089 = vmatmul.mubr.bf16.gmra.mrb[216].mxu1 %v24379_v13  ;;  %9333 = vmatprep.mubr.bf16.mxu0 %v24380_v46 }
 0x755   : > { %11098 = vmatprep.mubr.bf16.mxu1 %v24380_v46 }
 0x75b   : > { %9334 = vmatmul.mubr.bf16.gmra.mrb[220].mxu0 %v24381_v54 }
 0x75c   : > { %11099 = vmatmul.mubr.bf16.gmra.mrb[220].mxu1 %v24381_v54  ;;  %9343 = vmatprep.mubr.bf16.mxu0 %v24382_v58 }
 0x75d   : > { %11108 = vmatprep.mubr.bf16.mxu1 %v24382_v58 }
 0x763   : > { %9344 = vmatmul.mubr.bf16.gmra.mrb[224].mxu0 %v24383_v2 }
 0x764   : > { %11109 = vmatmul.mubr.bf16.gmra.mrb[224].mxu1 %v24383_v2  ;;  %9353 = vmatprep.mubr.bf16.mxu0 %v24384_v18 }
 0x765   : > { %11118 = vmatprep.mubr.bf16.mxu1 %v24384_v18 }
 0x76b   : > { %9354 = vmatmul.mubr.bf16.gmra.mrb[228].mxu0 %v24385_v29 }
 0x76c   : > { %11119 = vmatmul.mubr.bf16.gmra.mrb[228].mxu1 %v24385_v29  ;;  %9363 = vmatprep.mubr.bf16.mxu0 %v24386_v10 }
 0x76d   : > { %11128 = vmatprep.mubr.bf16.mxu1 %v24386_v10 }
 0x773   : > { %9364 = vmatmul.mubr.bf16.gmra.mrb[232].mxu0 %v24387_v19 }
 0x774   : > { %11129 = vmatmul.mubr.bf16.gmra.mrb[232].mxu1 %v24387_v19  ;;  %9373 = vmatprep.mubr.bf16.mxu0 %v24388_v51 }
 0x775   : > { %11138 = vmatprep.mubr.bf16.mxu1 %v24388_v51 }
 0x77b   : > { %9374 = vmatmul.mubr.bf16.gmra.mrb[236].mxu0 %v24389_v39 }
 0x77c   : > { %11139 = vmatmul.mubr.bf16.gmra.mrb[236].mxu1 %v24389_v39  ;;  %9383 = vmatprep.mubr.bf16.mxu0 %v24390_v59 }
 0x77d   : > { %11148 = vmatprep.mubr.bf16.mxu1 %v24390_v59 }
 0x783   : > { %9384 = vmatmul.mubr.bf16.gmra.mrb[240].mxu0 %v24391_v50 }
 0x784   : > { %11149 = vmatmul.mubr.bf16.gmra.mrb[240].mxu1 %v24391_v50  ;;  %9393 = vmatprep.mubr.bf16.mxu0 %v24392_v23 }
 0x785   : > { %11158 = vmatprep.mubr.bf16.mxu1 %v24392_v23 }
 0x78b   : > { %9394 = vmatmul.mubr.bf16.gmra.mrb[244].mxu0 %v24393_v33 }
 0x78c   : > { %11159 = vmatmul.mubr.bf16.gmra.mrb[244].mxu1 %v24393_v33  ;;  %9403 = vmatprep.mubr.bf16.mxu0 %v24394_v55 }
 0x78d   : > { %11168 = vmatprep.mubr.bf16.mxu1 %v24394_v55 }
 0x793   : > { %9404 = vmatmul.mubr.bf16.gmra.mrb[248].mxu0 %v24395_v43 }
 0x794   : > { %11169 = vmatmul.mubr.bf16.gmra.mrb[248].mxu1 %v24395_v43  ;;  %9413 = vmatprep.mubr.bf16.mxu0 %v24396_v15 }
 0x795   : > { %11178 = vmatprep.mubr.bf16.mxu1 %v24396_v15 }
 0x79b   : > { %9414 = vmatmul.mubr.bf16.gmra.mrb[252].mxu0 %v24397_v35 }
 0x79c   : > { %11179 = vmatmul.mubr.bf16.gmra.mrb[252].mxu1 %v24397_v35  ;;  %9456 = vmatprep.mubr.bf16.mxu0 %v24366_v48 }
 0x79d   : > { %11221 = vmatprep.mubr.bf16.mxu1 %v24366_v48  ;;  %v17388_v48 = vld [vmem:[%s23512_s5 + $0x20] ss:$16 sps:$4 sm:$0xff]  }
 0x7a3   : > { %9457 = vmatmul.mubr.bf16.vlgmr.msra.gmra.mrb[128].mxu0 %v20010_v38 }
 0x7a4   : > { %11222 = vmatmul.mubr.bf16.vlgmr.msra.gmra.mrb[128].mxu1 %v20010_v38  ;;  %9466 = vmatprep.mubr.bf16.mxu0 %v24367_v37  ;;  %v17399_v38 = vld [vmem:[%s23512_s5 + $0x4c] ss:$16 sps:$4 sm:$0xff]  }
 0x7a5   : > { %11231 = vmatprep.mubr.bf16.mxu1 %v24367_v37  ;;  %13593 = vmatpush1.bf16.msra.mxu0 %v17382_v11  ;;  %v17394_v37 = vld [vmem:[%s23512_s5 + $0x40] ss:$16 sps:$4 sm:$0xff]   ;;  %v17397_v11 = vld [vmem:[%s23512_s5 + $0x48] ss:$16 sps:$4 sm:$0xff]  }
 0x7a6   : > { %13885 = vmatpush1.bf16.msra.mxu1 %v17385_v17  ;;  %13594 = vmatprep.subr.bf16.mxu0 %v17390_v63  ;;  %v17402_v17 = vld [vmem:[%s23512_s5 + $0x64] ss:$16 sps:$4 sm:$0xff]   ;;  %v17405_v63 = vld [vmem:[%s23512_s5 + $0x6c] ss:$16 sps:$4 sm:$0xff]  }
 0x7a7   : > { %13886 = vmatprep.subr.bf16.mxu1 %v17393_v7  ;;  %v17400_v7 = vld [vmem:[%s23512_s5 + $0x60] ss:$16 sps:$4 sm:$0xff]  }
 0x7a9   : > { %13595 = vmatpush1.bf16.msra.mxu0 %v17388_v48  ;;  %v17403_v48 = vld [vmem:[%s23512_s5 + $0x68] ss:$16 sps:$4 sm:$0xff]  }
 0x7aa   : > { %13887 = vmatpush1.bf16.msra.mxu1 %v17391_v49  ;;  %13596 = vmatprep.subr.bf16.mxu0 %v17396_v52  ;;  %v17408_v49 = vld [vmem:[%s23512_s5 + $0x84] ss:$16 sps:$4 sm:$0xff]   ;;  %v17409_v52 = vld [vmem:[%s23512_s5 + $0x88] ss:$16 sps:$4 sm:$0xff]  }
 0x7ab   : > { %9467 = vmatmul.mubr.bf16.gmra.mrb[132].mxu0 %v24254_v56  ;;  %13888 = vmatprep.subr.bf16.mxu1 %v17399_v38  ;;  %v17414_v38 = vld [vmem:[%s23512_s5 + $0xa4] ss:$16 sps:$4 sm:$0xff]  }
 0x7ac   : > { %11232 = vmatmul.mubr.bf16.gmra.mrb[132].mxu1 %v24254_v56  ;;  %9476 = vmatprep.mubr.bf16.mxu0 %v24368_v30  ;;  %v17411_v56 = vld [vmem:[%s23512_s5 + $0x8c] ss:$16 sps:$4 sm:$0xff]  }
 0x7ad   : > { %11241 = vmatprep.mubr.bf16.mxu1 %v24368_v30  ;;  %13597 = vmatpush1.bf16.msra.mxu0 %v17394_v37  ;;  %v17406_v30 = vld [vmem:[%s23512_s5 + $0x80] ss:$16 sps:$4 sm:$0xff]   ;;  %v17417_v37 = vld [vmem:[%s23512_s5 + $0xac] ss:$16 sps:$4 sm:$0xff]  }
 0x7ae   : > { %13889 = vmatpush1.bf16.msra.mxu1 %v17397_v11  ;;  %13598 = vmatprep.subr.bf16.mxu0 %v17402_v17  ;;  %v17412_v11 = vld [vmem:[%s23512_s5 + $0xa0] ss:$16 sps:$4 sm:$0xff]   ;;  %v17415_v17 = vld [vmem:[%s23512_s5 + $0xa8] ss:$16 sps:$4 sm:$0xff]  }
 0x7af   : > { %13890 = vmatprep.subr.bf16.mxu1 %v17405_v63  ;;  %v17420_v63 = vld [vmem:[%s23512_s5 + $0xc4] ss:$16 sps:$4 sm:$0xff]  }
 0x7b1   : > { %13599 = vmatpush1.bf16.msra.mxu0 %v17400_v7  ;;  %v17421_v7 = vld [vmem:[%s23512_s5 + $0xc8] ss:$16 sps:$4 sm:$0xff]  }
 0x7b2   : > { %13891 = vmatpush1.bf16.msra.mxu1 %v17403_v48  ;;  %13600 = vmatprep.subr.bf16.mxu0 %v17408_v49  ;;  %v17426_v48 = vld [vmem:[%s23512_s5 + $0xe4] ss:$16 sps:$4 sm:$0xff]   ;;  %v17429_v49 = vld [vmem:[%s23512_s5 + $0xec] ss:$16 sps:$4 sm:$0xff]  }
 0x7b3   : > { %9477 = vmatmul.mubr.bf16.gmra.mrb[136].mxu0 %v20052_v21  ;;  %13892 = vmatprep.subr.bf16.mxu1 %v17411_v56  ;;  %v17424_v56 = vld [vmem:[%s23512_s5 + $0xe0] ss:$16 sps:$4 sm:$0xff]  }
 0x7b4   : > { %11242 = vmatmul.mubr.bf16.gmra.mrb[136].mxu1 %v20052_v21  ;;  %9486 = vmatprep.mubr.bf16.mxu0 %v24369_v53  ;;  %v17423_v21 = vld [vmem:[%s23512_s5 + $0xcc] ss:$16 sps:$4 sm:$0xff]  }
 0x7b5   : > { %11251 = vmatprep.mubr.bf16.mxu1 %v24369_v53  ;;  %13601 = vmatpush1.bf16.msra.mxu0 %v17406_v30  ;;  %v17418_v53 = vld [vmem:[%s23512_s5 + $0xc0] ss:$16 sps:$4 sm:$0xff]   ;;  %v17427_v30 = vld [vmem:[%s23512_s5 + $0xe8] ss:$16 sps:$4 sm:$0xff]  }
 0x7b6   : > { %13893 = vmatpush1.bf16.msra.mxu1 %v17409_v52  ;;  %13602 = vmatprep.subr.bf16.mxu0 %v17414_v38  ;;  %v17432_v52 = vld [vmem:[%s23512_s5 + $0x104] ss:$16 sps:$4 sm:$0xff]   ;;  %v17433_v38 = vld [vmem:[%s23512_s5 + $0x108] ss:$16 sps:$4 sm:$0xff]  }
 0x7b7   : > { %13894 = vmatprep.subr.bf16.mxu1 %v17417_v37  ;;  %v17438_v37 = vld [vmem:[%s23512_s5 + $0x124] ss:$16 sps:$4 sm:$0xff]  }
 0x7b9   : > { %13603 = vmatpush1.bf16.msra.mxu0 %v17412_v11  ;;  %v17441_v11 = vld [vmem:[%s23512_s5 + $0x12c] ss:$16 sps:$4 sm:$0xff]  }
 0x7ba   : > { %13895 = vmatpush1.bf16.msra.mxu1 %v17415_v17  ;;  %13604 = vmatprep.subr.bf16.mxu0 %v17420_v63  ;;  %v17436_v17 = vld [vmem:[%s23512_s5 + $0x120] ss:$16 sps:$4 sm:$0xff]   ;;  %v17439_v63 = vld [vmem:[%s23512_s5 + $0x128] ss:$16 sps:$4 sm:$0xff]  }
 0x7bb   : > { %9487 = vmatmul.mubr.bf16.gmra.mrb[140].mxu0 %v24370_v40  ;;  %13896 = vmatprep.subr.bf16.mxu1 %v17423_v21  ;;  %v17444_v21 = vld [vmem:[%s23512_s5 + $0x144] ss:$16 sps:$4 sm:$0xff]  }
 0x7bc   : > { %11252 = vmatmul.mubr.bf16.gmra.mrb[140].mxu1 %v24370_v40  ;;  %9496 = vmatprep.mubr.bf16.mxu0 %v24371_v42  ;;  %v17435_v40 = vld [vmem:[%s23512_s5 + $0x10c] ss:$16 sps:$4 sm:$0xff]  }
 0x7bd   : > { %11261 = vmatprep.mubr.bf16.mxu1 %v24371_v42  ;;  %13605 = vmatpush1.bf16.msra.mxu0 %v17418_v53  ;;  %v17430_v42 = vld [vmem:[%s23512_s5 + $0x100] ss:$16 sps:$4 sm:$0xff]   ;;  %v17445_v53 = vld [vmem:[%s23512_s5 + $0x148] ss:$16 sps:$4 sm:$0xff]  }
 0x7be   : > { %13897 = vmatpush1.bf16.msra.mxu1 %v17421_v7  ;;  %13606 = vmatprep.subr.bf16.mxu0 %v17426_v48  ;;  %v17448_v7 = vld [vmem:[%s23512_s5 + $0x160] ss:$16 sps:$4 sm:$0xff]  }
 0x7bf   : > { %13898 = vmatprep.subr.bf16.mxu1 %v17429_v49 }
 0x7c1   : > { %13607 = vmatpush1.bf16.msra.mxu0 %v17424_v56 }
 0x7c2   : > { %13899 = vmatpush1.bf16.msra.mxu1 %v17427_v30  ;;  %13608 = vmatprep.subr.bf16.mxu0 %v17432_v52 }
 0x7c3   : > { %9497 = vmatmul.mubr.bf16.gmra.mrb[144].mxu0 %v20105_v5  ;;  %13900 = vmatprep.subr.bf16.mxu1 %v17435_v40 }
 0x7c4   : > { %11262 = vmatmul.mubr.bf16.gmra.mrb[144].mxu1 %v20105_v5  ;;  %9506 = vmatprep.mubr.bf16.mxu0 %v20149_v28  ;;  %v17447_v5 = vld [vmem:[%s23512_s5 + $0x14c] ss:$16 sps:$4 sm:$0xff]  }
 0x7c5   : > { %11271 = vmatprep.mubr.bf16.mxu1 %v20149_v28  ;;  %13609 = vmatpush1.bf16.msra.mxu0 %v17430_v42  ;;  %v17442_v28 = vld [vmem:[%s23512_s5 + $0x140] ss:$16 sps:$4 sm:$0xff]  }
 0x7c6   : > { %13901 = vmatpush1.bf16.msra.mxu1 %v17433_v38  ;;  %13610 = vmatprep.subr.bf16.mxu0 %v17438_v37 }
 0x7c7   : > { %13902 = vmatprep.subr.bf16.mxu1 %v17441_v11 }
 0x7c9   : > { %13611 = vmatpush1.bf16.msra.mxu0 %v17436_v17 }
 0x7ca   : > { %13903 = vmatpush1.bf16.msra.mxu1 %v17439_v63  ;;  %13612 = vmatprep.subr.bf16.mxu0 %v17444_v21  ;;  %v24399_v63 = vld [vmem:[#allocation55_spill] sm:$0xff]  ;;  %v24400_v21 = vld [vmem:[#allocation57_spill] sm:$0xff] }
 0x7cb   : > { %9507 = vmatmul.mubr.bf16.gmra.mrb[148].mxu0 %v20139_v24  ;;  %13904 = vmatprep.subr.bf16.mxu1 %v17447_v5 }
 0x7cc   : > { %11272 = vmatmul.mubr.bf16.gmra.mrb[148].mxu1 %v20139_v24  ;;  %9516 = vmatprep.mubr.bf16.mxu0 %v20188_v3  ;;  %v17450_v24 = vld [vmem:[%s23512_s5 + $0x164] ss:$16 sps:$4 sm:$0xff]  }
 0x7cd   : > { %11281 = vmatprep.mubr.bf16.mxu1 %v20188_v3  ;;  %13613 = vmatpush1.bf16.msra.mxu0 %v17442_v28  ;;  %v17451_v3 = vld [vmem:[%s23512_s5 + $0x168] ss:$16 sps:$4 sm:$0xff]  }
 0x7ce   : > { %13905 = vmatpush1.bf16.msra.mxu1 %v17445_v53  ;;  %13614 = vmatprep.subr.bf16.mxu0 %v17450_v24 }
 0x7d1   : > { %13615 = vmatpush1.bf16.msra.mxu0 %v17448_v7 }
 0x7d3   : > { %9517 = vmatmul.mubr.bf16.gmra.mrb[152].mxu0 %v24372_v22 }
 0x7d4   : > { %11282 = vmatmul.mubr.bf16.gmra.mrb[152].mxu1 %v24372_v22  ;;  %9526 = vmatprep.mubr.bf16.mxu0 %v24373_v14  ;;  %v17453_v22 = vld [vmem:[%s23512_s5 + $0x16c] ss:$16 sps:$4 sm:$0xff]  }
 0x7d5   : > { %11291 = vmatprep.mubr.bf16.mxu1 %v24373_v14  ;;  %13906 = vmatprep.subr.bf16.mxu1 %v17453_v22  ;;  %v17454_v14 = vld [vmem:[%s23512_s5 + $0x180] ss:$16 sps:$4 sm:$0xff]  }
 0x7d6   : > { %13907 = vmatpush1.bf16.msra.mxu1 %v17451_v3 }
 0x7db   : > { %9527 = vmatmul.mubr.bf16.gmra.mrb[156].mxu0 %v20212_v32 }
 0x7dc   : > { %11292 = vmatmul.mubr.bf16.gmra.mrb[156].mxu1 %v20212_v32  ;;  %9536 = vmatprep.mubr.bf16.mxu0 %v20268_v31  ;;  %v17456_v32 = vld [vmem:[%s23512_s5 + $0x184] ss:$16 sps:$4 sm:$0xff]  }
 0x7dd   : > { %11301 = vmatprep.mubr.bf16.mxu1 %v20268_v31  ;;  %v17457_v31 = vld [vmem:[%s23512_s5 + $0x188] ss:$16 sps:$4 sm:$0xff]   ;;  %13616 = vmatprep.subr.bf16.mxu0 %v17456_v32 }
 0x7de   : > { %13617 = vmatpush1.bf16.msra.mxu0 %v17454_v14 }
 0x7e3   : > { %9537 = vmatmul.mubr.bf16.gmra.mrb[160].mxu0 %v20252_v20 }
 0x7e4   : > { %11302 = vmatmul.mubr.bf16.gmra.mrb[160].mxu1 %v20252_v20  ;;  %9546 = vmatprep.mubr.bf16.mxu0 %v20314_v60  ;;  %v17459_v20 = vld [vmem:[%s23512_s5 + $0x18c] ss:$16 sps:$4 sm:$0xff]  }
 0x7e5   : > { %11311 = vmatprep.mubr.bf16.mxu1 %v20314_v60  ;;  %13908 = vmatprep.subr.bf16.mxu1 %v17459_v20  ;;  %v17462_v60 = vld [vmem:[%s23512_s5 + $0x1a4] ss:$16 sps:$4 sm:$0xff]  }
 0x7e6   : > { %13909 = vmatpush1.bf16.msra.mxu1 %v17457_v31  ;;  %13618 = vmatprep.subr.bf16.mxu0 %v17462_v60  ;;  %v24405_v31 = vld [vmem:[#allocation58_spill] sm:$0xff] }
 0x7eb   : > { %9547 = vmatmul.mubr.bf16.gmra.mrb[164].mxu0 %v20292_v6 }
 0x7ec   : > { %11312 = vmatmul.mubr.bf16.gmra.mrb[164].mxu1 %v20292_v6  ;;  %9556 = vmatprep.mubr.bf16.mxu0 %v20348_v1  ;;  %v17460_v6 = vld [vmem:[%s23512_s5 + $0x1a0] ss:$16 sps:$4 sm:$0xff]  }
 0x7ed   : > { %11321 = vmatprep.mubr.bf16.mxu1 %v20348_v1  ;;  %v17463_v1 = vld [vmem:[%s23512_s5 + $0x1a8] ss:$16 sps:$4 sm:$0xff]   ;;  %13619 = vmatpush1.bf16.msra.mxu0 %v17460_v6 }
 0x7ee   : > { %v24401_v6 = vld [vmem:[#allocation56_spill] sm:$0xff] }
 0x7f3   : > { %9557 = vmatmul.mubr.bf16.gmra.mrb[168].mxu0 %v20332_v25 }
 0x7f4   : > { %11322 = vmatmul.mubr.bf16.gmra.mrb[168].mxu1 %v20332_v25  ;;  %9566 = vmatprep.mubr.bf16.mxu0 %v20388_v4  ;;  %v17465_v25 = vld [vmem:[%s23512_s5 + $0x1ac] ss:$16 sps:$4 sm:$0xff]  }
 0x7f5   : > { %11331 = vmatprep.mubr.bf16.mxu1 %v20388_v4  ;;  %13910 = vmatprep.subr.bf16.mxu1 %v17465_v25  ;;  %v17468_v4 = vld [vmem:[%s23512_s5 + $0x1c4] ss:$16 sps:$4 sm:$0xff]   ;;  %v11734_v25 = vld [vmem:[%s23511_s4] sm:$0x3] }
 0x7f6   : > { %13911 = vmatpush1.bf16.msra.mxu1 %v17463_v1  ;;  %13620 = vmatprep.subr.bf16.mxu0 %v17468_v4  ;;  %v24402_v1 = vld [vmem:[#allocation59_spill] sm:$0xff] }
 0x7fb   : > { %9567 = vmatmul.mubr.bf16.gmra.mrb[172].mxu0 %v20366_v57 }
 0x7fc   : > { %11332 = vmatmul.mubr.bf16.gmra.mrb[172].mxu1 %v20366_v57  ;;  %9576 = vmatprep.mubr.bf16.mxu0 %v20410_v45  ;;  %v17466_v57 = vld [vmem:[%s23512_s5 + $0x1c0] ss:$16 sps:$4 sm:$0xff]  }
 0x7fd   : > { %11341 = vmatprep.mubr.bf16.mxu1 %v20410_v45  ;;  %v17469_v45 = vld [vmem:[%s23512_s5 + $0x1c8] ss:$16 sps:$4 sm:$0xff]   ;;  %13621 = vmatpush1.bf16.msra.mxu0 %v17466_v57 }
 0x803   : > { %9577 = vmatmul.mubr.bf16.gmra.mrb[176].mxu0 %v20400_v27 }
 0x804   : > { %11342 = vmatmul.mubr.bf16.gmra.mrb[176].mxu1 %v20400_v27  ;;  %9586 = vmatprep.mubr.bf16.mxu0 %v20443_v16  ;;  %v17471_v27 = vld [vmem:[%s23512_s5 + $0x1cc] ss:$16 sps:$4 sm:$0xff]  }
 0x805   : > { %11351 = vmatprep.mubr.bf16.mxu1 %v20443_v16  ;;  %13912 = vmatprep.subr.bf16.mxu1 %v17471_v27  ;;  %v17477_v16 = vld [vmem:[%s23512_s5 + $0x1ec] ss:$16 sps:$4 sm:$0xff]  }
 0x806   : > { %13913 = vmatpush1.bf16.msra.mxu1 %v17469_v45 }
 0x807   : > { %13914 = vmatprep.subr.bf16.mxu1 %v17477_v16 }
 0x80b   : > { %9587 = vmatmul.mubr.bf16.gmra.mrb[180].mxu0 %v20421_v34 }
 0x80c   : > { %11352 = vmatmul.mubr.bf16.gmra.mrb[180].mxu1 %v20421_v34  ;;  %9596 = vmatprep.mubr.bf16.mxu0 %v20465_v62  ;;  %v17474_v34 = vld [vmem:[%s23512_s5 + $0x1e4] ss:$16 sps:$4 sm:$0xff]  }
 0x80d   : > { %11361 = vmatprep.mubr.bf16.mxu1 %v20465_v62  ;;  %13622 = vmatprep.subr.bf16.mxu0 %v17474_v34  ;;  %v17475_v62 = vld [vmem:[%s23512_s5 + $0x1e8] ss:$16 sps:$4 sm:$0xff]  }
 0x80e   : > { %13915 = vmatpush1.bf16.msra.mxu1 %v17475_v62  ;;  %v24403_v34 = vld [vmem:[#allocation344_spill] sm:$0xff] }
 0x813   : > { %9597 = vmatmul.mubr.bf16.gmra.mrb[184].mxu0 %v20455_v9 }
 0x814   : > { %11362 = vmatmul.mubr.bf16.gmra.mrb[184].mxu1 %v20455_v9  ;;  %9606 = vmatprep.mubr.bf16.mxu0 %v20498_v44  ;;  %v17472_v9 = vld [vmem:[%s23512_s5 + $0x1e0] ss:$16 sps:$4 sm:$0xff]  }
 0x815   : > { %11371 = vmatprep.mubr.bf16.mxu1 %v20498_v44  ;;  %13623 = vmatpush1.bf16.msra.mxu0 %v17472_v9  ;;  %v17483_v44 = vld [vmem:[%s23512_s5 + $0x20c] ss:$16 sps:$4 sm:$0xff]   ;;  %v22261_v9 = vrot.slane %v11734_v25, %v24403_v34 }
 0x816   : > { %13957 = vmatprep.subr.bf16.mxu1 %v17483_v44  ;;  %v24404_v44 = vld [vmem:[#allocation345_spill] sm:$0xff] }
 0x81b   : > { %9607 = vmatmul.mubr.bf16.gmra.mrb[188].mxu0 %v20476_v36 }
 0x81c   : > { %11372 = vmatmul.mubr.bf16.gmra.mrb[188].mxu1 %v20476_v36  ;;  %9616 = vmatprep.mubr.bf16.mxu0 %v24374_v12  ;;  %v17480_v36 = vld [vmem:[%s23512_s5 + $0x204] ss:$16 sps:$4 sm:$0xff]  }
 0x81d   : > { %11381 = vmatprep.mubr.bf16.mxu1 %v24374_v12  ;;  %13665 = vmatprep.subr.bf16.mxu0 %v17480_v36 }
 0x823   : > { %9617 = vmatmul.mubr.bf16.gmra.mrb[192].mxu0 %v24375_v41 }
 0x824   : > { %11382 = vmatmul.mubr.bf16.gmra.mrb[192].mxu1 %v24375_v41  ;;  %9626 = vmatprep.mubr.bf16.mxu0 %v24376_v8 }
 0x825   : > { %11391 = vmatprep.mubr.bf16.mxu1 %v24376_v8 }
 0x82b   : > { %9627 = vmatmul.mubr.bf16.gmra.mrb[196].mxu0 %v24377_v0 }
 0x82c   : > { %11392 = vmatmul.mubr.bf16.gmra.mrb[196].mxu1 %v24377_v0  ;;  %9636 = vmatprep.mubr.bf16.mxu0 %v24378_v61 }
 0x82d   : > { %11401 = vmatprep.mubr.bf16.mxu1 %v24378_v61 }
 0x833   : > { %9637 = vmatmul.mubr.bf16.gmra.mrb[200].mxu0 %v24379_v13 }
 0x834   : > { %11402 = vmatmul.mubr.bf16.gmra.mrb[200].mxu1 %v24379_v13  ;;  %9646 = vmatprep.mubr.bf16.mxu0 %v24380_v46 }
 0x835   : > { %11411 = vmatprep.mubr.bf16.mxu1 %v24380_v46 }
 0x83b   : > { %9647 = vmatmul.mubr.bf16.gmra.mrb[204].mxu0 %v24381_v54 }
 0x83c   : > { %11412 = vmatmul.mubr.bf16.gmra.mrb[204].mxu1 %v24381_v54  ;;  %9656 = vmatprep.mubr.bf16.mxu0 %v24382_v58 }
 0x83d   : > { %11421 = vmatprep.mubr.bf16.mxu1 %v24382_v58 }
 0x843   : > { %9657 = vmatmul.mubr.bf16.gmra.mrb[208].mxu0 %v24383_v2 }
 0x844   : > { %11422 = vmatmul.mubr.bf16.gmra.mrb[208].mxu1 %v24383_v2  ;;  %9666 = vmatprep.mubr.bf16.mxu0 %v24384_v18 }
 0x845   : > { %11431 = vmatprep.mubr.bf16.mxu1 %v24384_v18 }
 0x84b   : > { %9667 = vmatmul.mubr.bf16.gmra.mrb[212].mxu0 %v24385_v29 }
 0x84c   : > { %11432 = vmatmul.mubr.bf16.gmra.mrb[212].mxu1 %v24385_v29  ;;  %9676 = vmatprep.mubr.bf16.mxu0 %v24386_v10 }
 0x84d   : > { %11441 = vmatprep.mubr.bf16.mxu1 %v24386_v10 }
 0x853   : > { %9677 = vmatmul.mubr.bf16.gmra.mrb[216].mxu0 %v24387_v19 }
 0x854   : > { %11442 = vmatmul.mubr.bf16.gmra.mrb[216].mxu1 %v24387_v19  ;;  %9686 = vmatprep.mubr.bf16.mxu0 %v24388_v51 }
 0x855   : > { %11451 = vmatprep.mubr.bf16.mxu1 %v24388_v51 }
 0x85b   : > { %9687 = vmatmul.mubr.bf16.gmra.mrb[220].mxu0 %v24389_v39 }
 0x85c   : > { %11452 = vmatmul.mubr.bf16.gmra.mrb[220].mxu1 %v24389_v39  ;;  %9696 = vmatprep.mubr.bf16.mxu0 %v24390_v59 }
 0x85d   : > { %11461 = vmatprep.mubr.bf16.mxu1 %v24390_v59 }
 0x863   : > { %9697 = vmatmul.mubr.bf16.gmra.mrb[224].mxu0 %v24391_v50 }
 0x864   : > { %11462 = vmatmul.mubr.bf16.gmra.mrb[224].mxu1 %v24391_v50  ;;  %9706 = vmatprep.mubr.bf16.mxu0 %v24392_v23 }
 0x865   : > { %11471 = vmatprep.mubr.bf16.mxu1 %v24392_v23 }
 0x86b   : > { %9707 = vmatmul.mubr.bf16.gmra.mrb[228].mxu0 %v24393_v33 }
 0x86c   : > { %11472 = vmatmul.mubr.bf16.gmra.mrb[228].mxu1 %v24393_v33  ;;  %9716 = vmatprep.mubr.bf16.mxu0 %v24394_v55 }
 0x86d   : > { %11481 = vmatprep.mubr.bf16.mxu1 %v24394_v55 }
 0x873   : > { %9717 = vmatmul.mubr.bf16.gmra.mrb[232].mxu0 %v24395_v43 }
 0x874   : > { %11482 = vmatmul.mubr.bf16.gmra.mrb[232].mxu1 %v24395_v43  ;;  %9726 = vmatprep.mubr.bf16.mxu0 %v24396_v15 }
 0x875   : > { %11491 = vmatprep.mubr.bf16.mxu1 %v24396_v15 }
 0x876   : > { %v22145_v12 = vpop.f32.mrb[128].mxu0 }
 0x877   : > { %v22147_v41 = vpop.f32.mrb[128].mxu1  ;;  %v22149_v8 = vpop.f32.mrb[129].mxu0 }
 0x878   : > { %v11542_v0 = vmax.f32 %v22145_v12, %v22147_v41  ;;  %v22153_v61 = vpop.f32.mrb[129].mxu1  ;;  %v22155_v13 = vpop.f32.mrb[130].mxu0 }
 0x879   : > { %v11543_v46 = vmax.f32 %v22149_v8, %v22153_v61  ;;  %v22159_v54 = vpop.f32.mrb[130].mxu1  ;;  %v22161_v58 = vpop.f32.mrb[131].mxu0 }
 0x87a   : > { %v11544_v2 = vmax.f32 %v22155_v13, %v22159_v54  ;;  %v22165_v18 = vpop.f32.mrb[131].mxu1 }
 0x87b   : > { %v11545_v29 = vmax.f32 %v22161_v58, %v22165_v18  ;;  %9727 = vmatmul.mubr.bf16.gmra.mrb[236].mxu0 %v24397_v35 }
 0x87c   : > { %11492 = vmatmul.mubr.bf16.gmra.mrb[236].mxu1 %v24397_v35  ;;  %9736 = vmatprep.mubr.bf16.mxu0 %v20822_v26  ;;  %v24398_v35 = vld [vmem:[#allocation54_spill] sm:$0xff] }
 0x87d   : > { %11501 = vmatprep.mubr.bf16.mxu1 %v20822_v26 }
 0x87e   : > { %v22173_v10 = vpop.f32.mrb[132].mxu0 }
 0x87f   : > { %v22175_v19 = vpop.f32.mrb[132].mxu1  ;;  %v22177_v51 = vpop.f32.mrb[133].mxu0 }
 0x880   : > { %v11546_v39 = vmax.f32 %v22173_v10, %v22175_v19  ;;  %v22181_v59 = vpop.f32.mrb[133].mxu1  ;;  %v22183_v50 = vpop.f32.mrb[134].mxu0  ;;  %v17478_v10 = vld [vmem:[%s23512_s5 + $0x200] ss:$16 sps:$4 sm:$0xff]   ;;  %v17481_v19 = vld [vmem:[%s23512_s5 + $0x208] ss:$16 sps:$4 sm:$0xff]  }
 0x881   : > { %v11547_v23 = vmax.f32 %v22177_v51, %v22181_v59  ;;  %v22187_v33 = vpop.f32.mrb[134].mxu1  ;;  %v22189_v55 = vpop.f32.mrb[135].mxu0  ;;  %v17486_v59 = vld [vmem:[%s23512_s5 + $0x224] ss:$16 sps:$4 sm:$0xff]  }
 0x882   : > { %v11548_v26 = vmax.f32 %v22183_v50, %v22187_v33  ;;  %v22193_v43 = vpop.f32.mrb[135].mxu1  ;;  %v17489_v50 = vld [vmem:[%s23512_s5 + $0x22c] ss:$16 sps:$4 sm:$0xff]  }
 0x883   : > { %v11549_v15 = vmax.f32 %v22189_v55, %v22193_v43  ;;  %9737 = vmatmul.mubr.bf16.gmra.mrb[240].mxu0 %v24398_v35  ;;  %v17484_v55 = vld [vmem:[%s23512_s5 + $0x220] ss:$16 sps:$4 sm:$0xff]   ;;  %v17487_v43 = vld [vmem:[%s23512_s5 + $0x228] ss:$16 sps:$4 sm:$0xff]  }
 0x884   : > { %11502 = vmatmul.mubr.bf16.gmra.mrb[240].mxu1 %v24398_v35  ;;  %9746 = vmatprep.mubr.bf16.mxu0 %v20836_v47  ;;  %v22264_v35 = vrot.slane %v11734_v25, %v24404_v44 }
 0x885   : > { %11511 = vmatprep.mubr.bf16.mxu1 %v20836_v47 }
 0x886   : > { %v22201_v48 = vpop.f32.mrb[136].mxu0 }
 0x887   : > { %v22203_v49 = vpop.f32.mrb[136].mxu1  ;;  %v22205_v56 = vpop.f32.mrb[137].mxu0 }
 0x888   : > { %v11550_v30 = vmax.f32 %v22201_v48, %v22203_v49  ;;  %v22209_v52 = vpop.f32.mrb[137].mxu1  ;;  %v22211_v40 = vpop.f32.mrb[138].mxu0  ;;  %v17490_v49 = vld [vmem:[%s23512_s5 + $0x240] ss:$16 sps:$4 sm:$0xff]  }
 0x889   : > { %v11551_v42 = vmax.f32 %v22205_v56, %v22209_v52  ;;  %v22215_v38 = vpop.f32.mrb[138].mxu1  ;;  %v22217_v37 = vpop.f32.mrb[139].mxu0  ;;  %v17493_v56 = vld [vmem:[%s23512_s5 + $0x248] ss:$16 sps:$4 sm:$0xff]  }
 0x88a   : > { %v11552_v47 = vmax.f32 %v22211_v40, %v22215_v38  ;;  %v22221_v11 = vpop.f32.mrb[139].mxu1  ;;  %v17498_v40 = vld [vmem:[%s23512_s5 + $0x264] ss:$16 sps:$4 sm:$0xff]  }
 0x88b   : > { %v11553_v17 = vmax.f32 %v22217_v37, %v22221_v11  ;;  %9747 = vmatmul.mubr.bf16.gmra.mrb[244].mxu0 %v24399_v63  ;;  %v17496_v37 = vld [vmem:[%s23512_s5 + $0x260] ss:$16 sps:$4 sm:$0xff]   ;;  %v17499_v11 = vld [vmem:[%s23512_s5 + $0x268] ss:$16 sps:$4 sm:$0xff]  }
 0x88c   : > { %11512 = vmatmul.mubr.bf16.gmra.mrb[244].mxu1 %v24399_v63  ;;  %9756 = vmatprep.mubr.bf16.mxu0 %v24400_v21 }
 0x88d   : > { %11521 = vmatprep.mubr.bf16.mxu1 %v24400_v21 }
 0x88e   : > { %v22229_v5 = vpop.f32.mrb[140].mxu0 }
 0x88f   : > { %v22231_v28 = vpop.f32.mrb[140].mxu1  ;;  %v22233_v53 = vpop.f32.mrb[141].mxu0 }
 0x890   : > { %v11554_v7 = vmax.f32 %v22229_v5, %v22231_v28  ;;  %v22237_v24 = vpop.f32.mrb[141].mxu1  ;;  %v22239_v3 = vpop.f32.mrb[142].mxu0  ;;  %v17502_v28 = vld [vmem:[%s23512_s5 + $0x280] ss:$16 sps:$4 sm:$0xff]  }
 0x891   : > { %v11555_v22 = vmax.f32 %v22233_v53, %v22237_v24  ;;  %v22243_v14 = vpop.f32.mrb[142].mxu1  ;;  %v22245_v32 = vpop.f32.mrb[143].mxu0  ;;  %v17505_v53 = vld [vmem:[%s23512_s5 + $0x288] ss:$16 sps:$4 sm:$0xff]  }
 0x892   : > { %v22249_v20 = vpop.f32.mrb[143].mxu1 }
 0x893   : > { %9757 = vmatmul.mubr.bf16.gmra.mrb[248].mxu0 %v24401_v6  ;;  %v24407_v24 = vmax.f32 %v22245_v32, %v22249_v20  ;;  %v17508_v32 = vld [vmem:[%s23512_s5 + $0x2a0] ss:$16 sps:$4 sm:$0xff]   ;;  %v17511_v20 = vld [vmem:[%s23512_s5 + $0x2a8] ss:$16 sps:$4 sm:$0xff]  }
 0x894   : > { %11522 = vmatmul.mubr.bf16.gmra.mrb[248].mxu1 %v24401_v6  ;;  %9766 = vmatprep.mubr.bf16.mxu0 %v24402_v1 }
 0x895   : > { %11531 = vmatprep.mubr.bf16.mxu1 %v24402_v1 }
 0x896   : > { %v9498_v4 = vpop.f32.mrb[144].mxu0 }
 0x897   : > { %v11263_v57 = vpop.f32.mrb[144].mxu1  ;;  %v9500_v45 = vpop.f32.mrb[145].mxu0 }
 0x898   : > { %v11558_v27 = vmax.f32 %v9498_v4, %v11263_v57  ;;  %v11265_v16 = vpop.f32.mrb[145].mxu1  ;;  %v9502_v62 = vpop.f32.mrb[146].mxu0 }
 0x899   : > { %v11559_v36 = vmax.f32 %v9500_v45, %v11265_v16  ;;  %v11267_v63 = vpop.f32.mrb[146].mxu1  ;;  %v9504_v21 = vpop.f32.mrb[147].mxu0 }
 0x89a   : > { %v11670_v6 = vmax.f32 %v11542_v0, %v11558_v27  ;;  %v11560_v1 = vmax.f32 %v9502_v62, %v11267_v63  ;;  %v11269_v60 = vpop.f32.mrb[147].mxu1 }
 0x89b   : > { %v11671_v4 = vmax.f32 %v11543_v46, %v11559_v36  ;;  %v11561_v57 = vmax.f32 %v9504_v21, %v11269_v60  ;;  %9767 = vmatmul.mubr.bf16.gmra.mrb[252].mxu0 %v24405_v31 }
 0x89c   : > { %v11746_v45 = vadd.f32 %v22261_v9, %v11670_v6  ;;  %v11672_v25 = vmax.f32 %v11544_v2, %v11560_v1  ;;  %11532 = vmatmul.mubr.bf16.gmra.mrb[252].mxu1 %v24405_v31 }
 0x89d   : > { %v11747_v12 = vadd.f32 %v22264_v35, %v11671_v4  ;;  %v11673_v41 = vmax.f32 %v11545_v29, %v11561_v57 }
 0x89e   : > { %vm11810_vm6 = vcmp.gt.f32.partialorder %v11746_v45, 0.0  ;;  %v11874_v8 = vmul.f32 0.01, %v11746_v45  ;;  %v11748_v0 = vadd.f32 %v22261_v9, %v11672_v25  ;;  %v9508_v61 = vpop.f32.mrb[148].mxu0 }
 0x89f   : > { %v11875_v46 = vmul.f32 0.01, %v11747_v12  ;;  %v11749_v60 = vadd.f32 %v22264_v35, %v11673_v41  ;;  %v11273_v27 = vpop.f32.mrb[148].mxu1  ;;  %v9510_v16 = vpop.f32.mrb[149].mxu0  ;;  %vm11811_vm7 = vcmp.gt.f32.partialorder %v11747_v12, 0.0 }
 0x8a0   : > { %vm11812_vm8 = vcmp.gt.f32.partialorder %v11748_v0, 0.0  ;;  %v11876_v13 = vmul.f32 0.01, %v11748_v0  ;;  %v11562_v54 = vmax.f32 %v9508_v61, %v11273_v27  ;;  %v11275_v2 = vpop.f32.mrb[149].mxu1  ;;  %v9512_v31 = vpop.f32.mrb[150].mxu0  ;;  %v11938_v62 = vsel %vm11810_vm6, %v11746_v45, %v11874_v8 }
 0x8a1   : > { %v11877_v36 = vmul.f32 0.01, %v11749_v60  ;;  %v11563_v58 = vmax.f32 %v9510_v16, %v11275_v2  ;;  %v11277_v18 = vpop.f32.mrb[150].mxu1  ;;  %v9514_v29 = vpop.f32.mrb[151].mxu0  ;;  %vm11813_vm9 = vcmp.gt.f32.partialorder %v11749_v60, 0.0  ;;  %v11939_v4 = vsel %vm11811_vm7, %v11747_v12, %v11875_v46 }
 0x8a2   : > { %v11940_v63 = vsel %vm11812_vm8, %v11748_v0, %v11876_v13  ;;  %v11674_v21 = vmax.f32 %v11546_v39, %v11562_v54  ;;  %v11564_v6 = vmax.f32 %v9512_v31, %v11277_v18  ;;  %v11279_v1 = vpop.f32.mrb[151].mxu1  ;;  %v17492_v27 = vld [vmem:[%s23512_s5 + $0x244] ss:$16 sps:$4 sm:$0xff]   ;;  %v17495_v16 = vld [vmem:[%s23512_s5 + $0x24c] ss:$16 sps:$4 sm:$0xff]  }
 0x8a3   : > { %v12002_v57 = vpack.c.bf16 %v11940_v63, %v11938_v62  ;;  %v11675_v25 = vmax.f32 %v11547_v23, %v11563_v58  ;;  %v11565_v45 = vmax.f32 %v9514_v29, %v11279_v1  ;;  %v11941_v41 = vsel %vm11813_vm9, %v11749_v60, %v11877_v36 }
 0x8a4   : > { %v11750_v8 = vadd.f32 %v22261_v9, %v11674_v21  ;;  %v11676_v0 = vmax.f32 %v11548_v26, %v11564_v6  ;;  %v12003_v61 = vpack.c.bf16 %v11941_v41, %v11939_v4 }
 0x8a5   : > { %v11751_v51 = vadd.f32 %v22264_v35, %v11675_v25  ;;  %v11677_v39 = vmax.f32 %v11549_v15, %v11565_v45 }
 0x8a6   : > { %vm11814_vm10 = vcmp.gt.f32.partialorder %v11750_v8, 0.0  ;;  %v11878_v23 = vmul.f32 0.01, %v11750_v8  ;;  %v11752_v33 = vadd.f32 %v22261_v9, %v11676_v0  ;;  %13624 = vmatprep.mubr.bf16.mxu0 %v12003_v61  ;;  %13916 = vmatprep.mubr.bf16.mxu1 %v12003_v61  ;;  %v9518_v26 = vpop.f32.mrb[152].mxu0 }
 0x8a7   : > { %v11879_v15 = vmul.f32 0.01, %v11751_v51  ;;  %v11753_v12 = vadd.f32 %v22264_v35, %v11677_v39  ;;  %v11283_v46 = vpop.f32.mrb[152].mxu1  ;;  %13625 = vmatmul.mubr.bf16.vlgmr.msra.gmra.mrb[0].mxu0 %v12002_v57  ;;  %13917 = vmatmul.mubr.bf16.vlgmr.msra.gmra.mrb[0].mxu1 %v12002_v57  ;;  %v9520_v60 = vpop.f32.mrb[153].mxu0  ;;  %vm11815_vm11 = vcmp.gt.f32.partialorder %v11751_v51, 0.0 }
 0x8a8   : > { %vm11816_vm12 = vcmp.gt.f32.partialorder %v11752_v33, 0.0  ;;  %v11880_v13 = vmul.f32 0.01, %v11752_v33  ;;  %v11566_v54 = vmax.f32 %v9518_v26, %v11283_v46  ;;  %v11285_v2 = vpop.f32.mrb[153].mxu1  ;;  %13666 = vmatpush1.bf16.msra.mxu0 %v17478_v10  ;;  %13958 = vmatpush1.bf16.msra.mxu1 %v17481_v19  ;;  %v9522_v31 = vpop.f32.mrb[154].mxu0  ;;  %v11942_v62 = vsel %vm11814_vm10, %v11750_v8, %v11878_v23 }
 0x8a9   : > { %v11881_v36 = vmul.f32 0.01, %v11753_v12  ;;  %v11567_v58 = vmax.f32 %v9520_v60, %v11285_v2  ;;  %v11287_v18 = vpop.f32.mrb[154].mxu1  ;;  %v9524_v29 = vpop.f32.mrb[155].mxu0  ;;  %13667 = vmatprep.subr.bf16.mxu0 %v17486_v59  ;;  %13959 = vmatprep.subr.bf16.mxu1 %v17489_v50  ;;  %vm11817_vm13 = vcmp.gt.f32.partialorder %v11753_v12, 0.0  ;;  %v11943_v4 = vsel %vm11815_vm11, %v11751_v51, %v11879_v15 }
 0x8aa   : > { %v11944_v63 = vsel %vm11816_vm12, %v11752_v33, %v11880_v13  ;;  %v11678_v21 = vmax.f32 %v11550_v30, %v11566_v54  ;;  %v11568_v6 = vmax.f32 %v9522_v31, %v11287_v18  ;;  %v11289_v1 = vpop.f32.mrb[155].mxu1  ;;  %v17504_v39 = vld [vmem:[%s23512_s5 + $0x284] ss:$16 sps:$4 sm:$0xff]   ;;  %v17507_v59 = vld [vmem:[%s23512_s5 + $0x28c] ss:$16 sps:$4 sm:$0xff]   ;;  %v24406_v18 = vmax.f32 %v22239_v3, %v22243_v14 }
 0x8ab   : > { %v12010_v57 = vpack.c.bf16 %v11944_v63, %v11942_v62  ;;  %v11679_v25 = vmax.f32 %v11551_v42, %v11567_v58  ;;  %v11569_v45 = vmax.f32 %v9524_v29, %v11289_v1  ;;  %v11945_v41 = vsel %vm11817_vm13, %v11753_v12, %v11881_v36  ;;  %v17501_v42 = vld [vmem:[%s23512_s5 + $0x26c] ss:$16 sps:$4 sm:$0xff]   ;;  %v17510_v3 = vld [vmem:[%s23512_s5 + $0x2a4] ss:$16 sps:$4 sm:$0xff]  }
 0x8ac   : > { %v11754_v8 = vadd.f32 %v22261_v9, %v11678_v21  ;;  %v11680_v0 = vmax.f32 %v11552_v47, %v11568_v6  ;;  %13668 = vmatpush1.bf16.msra.mxu0 %v17484_v55  ;;  %13960 = vmatpush1.bf16.msra.mxu1 %v17487_v43  ;;  %v12011_v48 = vpack.c.bf16 %v11945_v41, %v11943_v4  ;;  %v17513_v14 = vld [vmem:[%s23512_s5 + $0x2ac] ss:$16 sps:$4 sm:$0xff]  }
 0x8ad   : > { %v11755_v30 = vadd.f32 %v22264_v35, %v11679_v25  ;;  %v11681_v52 = vmax.f32 %v11553_v17, %v11569_v45  ;;  %13669 = vmatprep.subr.bf16.mxu0 %v17492_v27  ;;  %13961 = vmatprep.subr.bf16.mxu1 %v17495_v16  ;;  %v17516_v45 = vld [vmem:[%s23512_s5 + $0x2c4] ss:$16 sps:$4 sm:$0xff]   ;;  %v17519_v41 = vld [vmem:[%s23512_s5 + $0x2cc] ss:$16 sps:$4 sm:$0xff]  }
 0x8ae   : > { %vm11818_vm14 = vcmp.gt.f32.partialorder %v11754_v8, 0.0  ;;  %v11882_v38 = vmul.f32 0.01, %v11754_v8  ;;  %v11756_v47 = vadd.f32 %v22261_v9, %v11680_v0  ;;  %13634 = vmatprep.mubr.bf16.mxu0 %v12011_v48  ;;  %13926 = vmatprep.mubr.bf16.mxu1 %v12011_v48  ;;  %v9528_v61 = vpop.f32.mrb[156].mxu0 }
 0x8af   : > { %v11883_v17 = vmul.f32 0.01, %v11755_v30  ;;  %v11757_v10 = vadd.f32 %v22264_v35, %v11681_v52  ;;  %v11293_v19 = vpop.f32.mrb[156].mxu1  ;;  %13635 = vmatmul.mubr.bf16.gmra.mrb[4].mxu0 %v12010_v57  ;;  %13927 = vmatmul.mubr.bf16.gmra.mrb[4].mxu1 %v12010_v57  ;;  %v9530_v51 = vpop.f32.mrb[157].mxu0  ;;  %vm11819_vm15 = vcmp.gt.f32.partialorder %v11755_v30, 0.0 }
 0x8b0   : > { %vm11820_vm1 = vcmp.gt.f32.partialorder %v11756_v47, 0.0  ;;  %v11884_v50 = vmul.f32 0.01, %v11756_v47  ;;  %v11570_v23 = vmax.f32 %v9528_v61, %v11293_v19  ;;  %v11295_v33 = vpop.f32.mrb[157].mxu1  ;;  %13670 = vmatpush1.bf16.msra.mxu0 %v17490_v49  ;;  %13962 = vmatpush1.bf16.msra.mxu1 %v17493_v56  ;;  %v9532_v26 = vpop.f32.mrb[158].mxu0  ;;  %v11946_v55 = vsel %vm11818_vm14, %v11754_v8, %v11882_v38 }
 0x8b1   : > { %v11885_v43 = vmul.f32 0.01, %v11757_v10  ;;  %v11571_v15 = vmax.f32 %v9530_v51, %v11295_v33  ;;  %v11297_v12 = vpop.f32.mrb[158].mxu1  ;;  %v9534_v46 = vpop.f32.mrb[159].mxu0  ;;  %13671 = vmatprep.subr.bf16.mxu0 %v17498_v40  ;;  %13963 = vmatprep.subr.bf16.mxu1 %v17501_v42  ;;  %vm11821_vm2 = vcmp.gt.f32.partialorder %v11757_v10, 0.0  ;;  %v11947_v54 = vsel %vm11819_vm15, %v11755_v30, %v11883_v17 }
 0x8b2   : > { %v11948_v60 = vsel %vm11820_vm1, %v11756_v47, %v11884_v50  ;;  %v11682_v27 = vmax.f32 %v11554_v7, %v11570_v23  ;;  %v11572_v16 = vmax.f32 %v9532_v26, %v11297_v12  ;;  %v11299_v13 = vpop.f32.mrb[159].mxu1  ;;  %v17514_v51 = vld [vmem:[%s23512_s5 + $0x2c0] ss:$16 sps:$4 sm:$0xff]   ;;  %v17525_v50 = vld [vmem:[%s23512_s5 + $0x2ec] ss:$16 sps:$4 sm:$0xff]  }
 0x8b3   : > { %v12018_v2 = vpack.c.bf16 %v11948_v60, %v11946_v55  ;;  %v11683_v31 = vmax.f32 %v11555_v22, %v11571_v15  ;;  %v11573_v62 = vmax.f32 %v9534_v46, %v11299_v13  ;;  %v11949_v36 = vsel %vm11821_vm2, %v11757_v10, %v11885_v43  ;;  %v17520_v12 = vld [vmem:[%s23512_s5 + $0x2e0] ss:$16 sps:$4 sm:$0xff]   ;;  %v17523_v46 = vld [vmem:[%s23512_s5 + $0x2e8] ss:$16 sps:$4 sm:$0xff]   ;;  %v17528_v13 = vld [vmem:[%s23512_s5 + $0x304] ss:$16 sps:$4 sm:$0xff]  }
 0x8b4   : > { %v11758_v58 = vadd.f32 %v22261_v9, %v11682_v27  ;;  %v11684_v29 = vmax.f32 %v24406_v18, %v11572_v16  ;;  %13672 = vmatpush1.bf16.msra.mxu0 %v17496_v37  ;;  %13964 = vmatpush1.bf16.msra.mxu1 %v17499_v11  ;;  %v12019_v5 = vpack.c.bf16 %v11949_v36, %v11947_v54  ;;  %v17531_v54 = vld [vmem:[%s23512_s5 + $0x30c] ss:$16 sps:$4 sm:$0xff]   ;;  %v17526_v36 = vld [vmem:[%s23512_s5 + $0x300] ss:$16 sps:$4 sm:$0xff]   ;;  %v17534_v18 = vld [vmem:[%s23512_s5 + $0x324] ss:$16 sps:$4 sm:$0xff]  }
 0x8b5   : > { %v11759_v7 = vadd.f32 %v22264_v35, %v11683_v31  ;;  %v11685_v22 = vmax.f32 %v24407_v24, %v11573_v62  ;;  %13673 = vmatprep.subr.bf16.mxu0 %v17504_v39  ;;  %13965 = vmatprep.subr.bf16.mxu1 %v17507_v59  ;;  %v17517_v39 = vld [vmem:[%s23512_s5 + $0x2c8] ss:$16 sps:$4 sm:$0xff]   ;;  %v17522_v59 = vld [vmem:[%s23512_s5 + $0x2e4] ss:$16 sps:$4 sm:$0xff]  }
 0x8b6   : > { %v11886_v63 = vmul.f32 0.01, %v11758_v58  ;;  %v11760_v21 = vadd.f32 %v22261_v9, %v11684_v29  ;;  %13644 = vmatprep.mubr.bf16.mxu0 %v12019_v5  ;;  %13936 = vmatprep.mubr.bf16.mxu1 %v12019_v5  ;;  %v22396_v6 = vpop.f32.mrb[160].mxu0  ;;  %vm11822_vm3 = vcmp.gt.f32.partialorder %v11758_v58, 0.0  ;;  %v17537_v29 = vld [vmem:[%s23512_s5 + $0x32c] ss:$16 sps:$4 sm:$0xff]  }
 0x8b7   : > { %v11887_v1 = vmul.f32 0.01, %v11759_v7  ;;  %v11761_v4 = vadd.f32 %v22264_v35, %v11685_v22  ;;  %v22405_v57 = vpop.f32.mrb[160].mxu1  ;;  %13645 = vmatmul.mubr.bf16.gmra.mrb[8].mxu0 %v12018_v2  ;;  %13937 = vmatmul.mubr.bf16.gmra.mrb[8].mxu1 %v12018_v2  ;;  %v22407_v25 = vpop.f32.mrb[161].mxu0  ;;  %vm11823_vm0 = vcmp.gt.f32.partialorder %v11759_v7, 0.0 }
 0x8b8   : > { %vm11824_vm4 = vcmp.gt.f32.partialorder %v11760_v21, 0.0  ;;  %v11888_v8 = vmul.f32 0.01, %v11760_v21  ;;  %v11574_v0 = vmax.f32 %v22396_v6, %v22405_v57  ;;  %v22417_v48 = vpop.f32.mrb[161].mxu1  ;;  %13674 = vmatpush1.bf16.msra.mxu0 %v17502_v28  ;;  %13966 = vmatpush1.bf16.msra.mxu1 %v17505_v53  ;;  %v22419_v49 = vpop.f32.mrb[162].mxu0  ;;  %v11950_v42 = vsel %vm11822_vm3, %v11758_v58, %v11886_v63 }
 0x8b9   : > { %v11889_v56 = vmul.f32 0.01, %v11761_v4  ;;  %v11575_v30 = vmax.f32 %v22407_v25, %v22417_v48  ;;  %v22423_v52 = vpop.f32.mrb[162].mxu1  ;;  %v22425_v40 = vpop.f32.mrb[163].mxu0  ;;  %13675 = vmatprep.subr.bf16.mxu0 %v17510_v3  ;;  %13967 = vmatprep.subr.bf16.mxu1 %v17513_v14  ;;  %vm11825_vm5 = vcmp.gt.f32.partialorder %v11761_v4, 0.0  ;;  %v11951_v17 = vsel %vm11823_vm0, %v11759_v7, %v11887_v1 }
 0x8ba   : > { %v11952_v38 = vsel %vm11824_vm4, %v11760_v21, %v11888_v8  ;;  %v11576_v47 = vmax.f32 %v22419_v49, %v22423_v52  ;;  %v22431_v61 = vpop.f32.mrb[163].mxu1  ;;  %v17529_v58 = vld [vmem:[%s23512_s5 + $0x308] ss:$16 sps:$4 sm:$0xff]   ;;  %v17532_v3 = vld [vmem:[%s23512_s5 + $0x320] ss:$16 sps:$4 sm:$0xff]  }
 0x8bb   : > { %v12026_v37 = vpack.c.bf16 %v11952_v38, %v11950_v42  ;;  %v11577_v11 = vmax.f32 %v22425_v40, %v22431_v61  ;;  %v11953_v10 = vsel %vm11825_vm5, %v11761_v4, %v11889_v56  ;;  %v17535_v14 = vld [vmem:[%s23512_s5 + $0x328] ss:$16 sps:$4 sm:$0xff]   ;;  %v17543_v1 = vld [vmem:[%s23512_s5 + $0x34c] ss:$16 sps:$4 sm:$0xff]   ;;  %v17538_v8 = vld [vmem:[%s23512_s5 + $0x340] ss:$16 sps:$4 sm:$0xff]  }
 0x8bc   : > { %13676 = vmatpush1.bf16.msra.mxu0 %v17508_v32  ;;  %13968 = vmatpush1.bf16.msra.mxu1 %v17511_v20  ;;  %v12027_v19 = vpack.c.bf16 %v11953_v10, %v11951_v17  ;;  %v17540_v20 = vld [vmem:[%s23512_s5 + $0x344] ss:$16 sps:$4 sm:$0xff]   ;;  %v17541_v56 = vld [vmem:[%s23512_s5 + $0x348] ss:$16 sps:$4 sm:$0xff]   ;;  %v17549_v38 = vld [vmem:[%s23512_s5 + $0x36c] ss:$16 sps:$4 sm:$0xff]  }
 0x8bd   : > { %13677 = vmatprep.subr.bf16.mxu0 %v17516_v45  ;;  %13969 = vmatprep.subr.bf16.mxu1 %v17519_v41  ;;  %v17546_v42 = vld [vmem:[%s23512_s5 + $0x364] ss:$16 sps:$4 sm:$0xff]   ;;  %v17562_v6 = vld [vmem:[%s23512_s5 + $0x3c0] ss:$16 sps:$4 sm:$0xff]   ;;  %v17565_v57 = vld [vmem:[%s23512_s5 + $0x3c8] ss:$16 sps:$4 sm:$0xff]  }
 0x8be   : > { %13654 = vmatprep.mubr.bf16.mxu0 %v12027_v19  ;;  %13946 = vmatprep.mubr.bf16.mxu1 %v12027_v19  ;;  %v22447_v23 = vpop.f32.mrb[164].mxu0  ;;  %v17570_v48 = vld [vmem:[%s23512_s5 + $0x3e4] ss:$16 sps:$4 sm:$0xff]   ;;  %v17573_v49 = vld [vmem:[%s23512_s5 + $0x3ec] ss:$16 sps:$4 sm:$0xff]  }
 0x8bf   : > { %v22449_v33 = vpop.f32.mrb[164].mxu1  ;;  %13655 = vmatmul.mubr.bf16.gmra.mrb[12].mxu0 %v12026_v37  ;;  %13947 = vmatmul.mubr.bf16.gmra.mrb[12].mxu1 %v12026_v37  ;;  %v22451_v26 = vpop.f32.mrb[165].mxu0  ;;  %v17568_v40 = vld [vmem:[%s23512_s5 + $0x3e0] ss:$16 sps:$4 sm:$0xff]   ;;  %v17571_v61 = vld [vmem:[%s23512_s5 + $0x3e8] ss:$16 sps:$4 sm:$0xff]  }
 0x8c0   : > { %v11578_v55 = vmax.f32 %v22447_v23, %v22449_v33  ;;  %v22455_v43 = vpop.f32.mrb[165].mxu1  ;;  %13678 = vmatpush1.bf16.msra.mxu0 %v17514_v51  ;;  %13970 = vmatpush1.bf16.msra.mxu1 %v17517_v39  ;;  %v22457_v15 = vpop.f32.mrb[166].mxu0  ;;  %v17574_v33 = vld [vmem:[%s23512_s5 + $0x400] ss:$16 sps:$4 sm:$0xff]  }
 0x8c1   : > { %v11579_v60 = vmax.f32 %v22451_v26, %v22455_v43  ;;  %v22467_v27 = vpop.f32.mrb[166].mxu1  ;;  %v22469_v16 = vpop.f32.mrb[167].mxu0  ;;  %13679 = vmatprep.subr.bf16.mxu0 %v17522_v59  ;;  %13971 = vmatprep.subr.bf16.mxu1 %v17525_v50  ;;  %v17544_v59 = vld [vmem:[%s23512_s5 + $0x360] ss:$16 sps:$4 sm:$0xff]   ;;  %v17547_v50 = vld [vmem:[%s23512_s5 + $0x368] ss:$16 sps:$4 sm:$0xff]  }
 0x8c2   : > { %v11580_v2 = vmax.f32 %v22457_v15, %v22467_v27  ;;  %v22479_v31 = vpop.f32.mrb[167].mxu1  ;;  %v17577_v26 = vld [vmem:[%s23512_s5 + $0x408] ss:$16 sps:$4 sm:$0xff]   ;;  %v17582_v15 = vld [vmem:[%s23512_s5 + $0x424] ss:$16 sps:$4 sm:$0xff]  }
 0x8c3   : > { %v11581_v62 = vmax.f32 %v22469_v16, %v22479_v31  ;;  %v17580_v16 = vld [vmem:[%s23512_s5 + $0x420] ss:$16 sps:$4 sm:$0xff]   ;;  %v17583_v31 = vld [vmem:[%s23512_s5 + $0x428] ss:$16 sps:$4 sm:$0xff]  }
 0x8c4   : > { %13680 = vmatpush1.bf16.msra.mxu0 %v17520_v12  ;;  %13972 = vmatpush1.bf16.msra.mxu1 %v17523_v46 }
 0x8c5   : > { %13681 = vmatprep.subr.bf16.mxu0 %v17528_v13  ;;  %13973 = vmatprep.subr.bf16.mxu1 %v17531_v54  ;;  %v17552_v54 = vld [vmem:[%s23512_s5 + $0x384] ss:$16 sps:$4 sm:$0xff]  }
 0x8c6   : > { %v22495_v5 = vpop.f32.mrb[168].mxu0 }
 0x8c7   : > { %v22497_v28 = vpop.f32.mrb[168].mxu1  ;;  %v22499_v53 = vpop.f32.mrb[169].mxu0 }
 0x8c8   : > { %v11582_v7 = vmax.f32 %v22495_v5, %v22497_v28  ;;  %v22503_v24 = vpop.f32.mrb[169].mxu1  ;;  %13682 = vmatpush1.bf16.msra.mxu0 %v17526_v36  ;;  %13974 = vmatpush1.bf16.msra.mxu1 %v17529_v58  ;;  %v22505_v22 = vpop.f32.mrb[170].mxu0  ;;  %v17555_v36 = vld [vmem:[%s23512_s5 + $0x38c] ss:$16 sps:$4 sm:$0xff]   ;;  %v17586_v28 = vld [vmem:[%s23512_s5 + $0x440] ss:$16 sps:$4 sm:$0xff]  }
 0x8c9   : > { %v11583_v63 = vmax.f32 %v22499_v53, %v22503_v24  ;;  %v22515_v21 = vpop.f32.mrb[170].mxu1  ;;  %v22517_v32 = vpop.f32.mrb[171].mxu0  ;;  %13683 = vmatprep.subr.bf16.mxu0 %v17534_v18  ;;  %13975 = vmatprep.subr.bf16.mxu1 %v17537_v29  ;;  %v17589_v53 = vld [vmem:[%s23512_s5 + $0x448] ss:$16 sps:$4 sm:$0xff]  }
 0x8ca   : > { %v11584_v4 = vmax.f32 %v22505_v22, %v22515_v21  ;;  %v22527_v45 = vpop.f32.mrb[171].mxu1  ;;  %v17594_v22 = vld [vmem:[%s23512_s5 + $0x464] ss:$16 sps:$4 sm:$0xff]   ;;  %v17597_v21 = vld [vmem:[%s23512_s5 + $0x46c] ss:$16 sps:$4 sm:$0xff]  }
 0x8cb   : > { %v24408_v24 = vmax.f32 %v22517_v32, %v22527_v45  ;;  %v17592_v32 = vld [vmem:[%s23512_s5 + $0x460] ss:$16 sps:$4 sm:$0xff]   ;;  %v17595_v45 = vld [vmem:[%s23512_s5 + $0x468] ss:$16 sps:$4 sm:$0xff]  }
 0x8cc   : > { %13684 = vmatpush1.bf16.msra.mxu0 %v17532_v3  ;;  %13976 = vmatpush1.bf16.msra.mxu1 %v17535_v14  ;;  %v17550_v3 = vld [vmem:[%s23512_s5 + $0x380] ss:$16 sps:$4 sm:$0xff]   ;;  %v17553_v14 = vld [vmem:[%s23512_s5 + $0x388] ss:$16 sps:$4 sm:$0xff]  }
 0x8cd   : > { %13685 = vmatprep.subr.bf16.mxu0 %v17540_v20  ;;  %13977 = vmatprep.subr.bf16.mxu1 %v17543_v1  ;;  %v17558_v20 = vld [vmem:[%s23512_s5 + $0x3a4] ss:$16 sps:$4 sm:$0xff]   ;;  %v17561_v1 = vld [vmem:[%s23512_s5 + $0x3ac] ss:$16 sps:$4 sm:$0xff]  }
 0x8ce   : > { %v22543_v37 = vpop.f32.mrb[172].mxu0 }
 0x8cf   : > { %v22545_v17 = vpop.f32.mrb[172].mxu1  ;;  %v22547_v10 = vpop.f32.mrb[173].mxu0 }
 0x8d0   : > { %v22551_v51 = vpop.f32.mrb[173].mxu1  ;;  %13686 = vmatpush1.bf16.msra.mxu0 %v17538_v8  ;;  %13978 = vmatpush1.bf16.msra.mxu1 %v17541_v56  ;;  %v22553_v39 = vpop.f32.mrb[174].mxu0 }
 0x8d1   : > { %v22563_v46 = vpop.f32.mrb[174].mxu1  ;;  %v22565_v13 = vpop.f32.mrb[175].mxu0  ;;  %13687 = vmatprep.subr.bf16.mxu0 %v17546_v42  ;;  %13979 = vmatprep.subr.bf16.mxu1 %v17549_v38 }
 0x8d2   : > { %v22575_v18 = vpop.f32.mrb[175].mxu1 }
 0x8d4   : > { %13688 = vmatpush1.bf16.msra.mxu0 %v17544_v59  ;;  %13980 = vmatpush1.bf16.msra.mxu1 %v17547_v50 }
 0x8d5   : > { %13689 = vmatprep.subr.bf16.mxu0 %v17552_v54  ;;  %13981 = vmatprep.subr.bf16.mxu1 %v17555_v36  ;;  %v17556_v54 = vld [vmem:[%s23512_s5 + $0x3a0] ss:$16 sps:$4 sm:$0xff]   ;;  %v17559_v36 = vld [vmem:[%s23512_s5 + $0x3a8] ss:$16 sps:$4 sm:$0xff]  }
 0x8d6   : > { %v9578_v8 = vpop.f32.mrb[176].mxu0 }
 0x8d7   : > { %v11343_v56 = vpop.f32.mrb[176].mxu1  ;;  %v9580_v42 = vpop.f32.mrb[177].mxu0 }
 0x8d8   : > { %v11590_v38 = vmax.f32 %v9578_v8, %v11343_v56  ;;  %v11345_v59 = vpop.f32.mrb[177].mxu1  ;;  %13690 = vmatpush1.bf16.msra.mxu0 %v17550_v3  ;;  %13982 = vmatpush1.bf16.msra.mxu1 %v17553_v14  ;;  %v9582_v50 = vpop.f32.mrb[178].mxu0  ;;  %v17564_v8 = vld [vmem:[%s23512_s5 + $0x3c4] ss:$16 sps:$4 sm:$0xff]   ;;  %v17567_v3 = vld [vmem:[%s23512_s5 + $0x3cc] ss:$16 sps:$4 sm:$0xff]  }
 0x8d9   : > { %v11591_v29 = vmax.f32 %v9580_v42, %v11345_v59  ;;  %v11347_v58 = vpop.f32.mrb[178].mxu1  ;;  %v9584_v12 = vpop.f32.mrb[179].mxu0  ;;  %13691 = vmatprep.subr.bf16.mxu0 %v17558_v20  ;;  %13983 = vmatprep.subr.bf16.mxu1 %v17561_v1 }
 0x8da   : > { %v11686_v14 = vmax.f32 %v11574_v0, %v11590_v38  ;;  %v11592_v56 = vmax.f32 %v9582_v50, %v11347_v58  ;;  %v11349_v19 = vpop.f32.mrb[179].mxu1  ;;  %v17579_v38 = vld [vmem:[%s23512_s5 + $0x40c] ss:$16 sps:$4 sm:$0xff]  }
 0x8db   : > { %v11687_v42 = vmax.f32 %v11575_v30, %v11591_v29  ;;  %v11593_v20 = vmax.f32 %v9584_v12, %v11349_v19  ;;  %v17576_v29 = vld [vmem:[%s23512_s5 + $0x404] ss:$16 sps:$4 sm:$0xff]  }
 0x8dc   : > { %v11762_v1 = vadd.f32 %v22261_v9, %v11686_v14  ;;  %v11688_v59 = vmax.f32 %v11576_v47, %v11592_v56  ;;  %13692 = vmatpush1.bf16.msra.mxu0 %v17556_v54  ;;  %13984 = vmatpush1.bf16.msra.mxu1 %v17559_v36 }
 0x8dd   : > { %v11763_v25 = vadd.f32 %v22264_v35, %v11687_v42  ;;  %v11689_v0 = vmax.f32 %v11577_v11, %v11593_v20  ;;  %13693 = vmatprep.subr.bf16.mxu0 %v17564_v8  ;;  %13985 = vmatprep.subr.bf16.mxu1 %v17567_v3 }
 0x8de   : > { %vm11826_vm6 = vcmp.gt.f32.partialorder %v11762_v1, 0.0  ;;  %v11890_v30 = vmul.f32 0.01, %v11762_v1  ;;  %v11764_v52 = vadd.f32 %v22261_v9, %v11688_v59  ;;  %v9588_v47 = vpop.f32.mrb[180].mxu0 }
 0x8df   : > { %v11891_v11 = vmul.f32 0.01, %v11763_v25  ;;  %v11765_v19 = vadd.f32 %v22264_v35, %v11689_v0  ;;  %v11353_v12 = vpop.f32.mrb[180].mxu1  ;;  %v9590_v58 = vpop.f32.mrb[181].mxu0  ;;  %vm11827_vm7 = vcmp.gt.f32.partialorder %v11763_v25, 0.0 }
 0x8e0   : > { %vm11828_vm8 = vcmp.gt.f32.partialorder %v11764_v52, 0.0  ;;  %v11892_v50 = vmul.f32 0.01, %v11764_v52  ;;  %v11594_v54 = vmax.f32 %v9588_v47, %v11353_v12  ;;  %v11355_v36 = vpop.f32.mrb[181].mxu1  ;;  %13694 = vmatpush1.bf16.msra.mxu0 %v17562_v6  ;;  %13986 = vmatpush1.bf16.msra.mxu1 %v17565_v57  ;;  %v9592_v8 = vpop.f32.mrb[182].mxu0  ;;  %v11954_v3 = vsel %vm11826_vm6, %v11762_v1, %v11890_v30 }
 0x8e1   : > { %v11893_v14 = vmul.f32 0.01, %v11765_v19  ;;  %v11595_v56 = vmax.f32 %v9590_v58, %v11355_v36  ;;  %v11357_v42 = vpop.f32.mrb[182].mxu1  ;;  %v9594_v20 = vpop.f32.mrb[183].mxu0  ;;  %13695 = vmatprep.subr.bf16.mxu0 %v17570_v48  ;;  %13987 = vmatprep.subr.bf16.mxu1 %v17573_v49  ;;  %vm11829_vm9 = vcmp.gt.f32.partialorder %v11765_v19, 0.0  ;;  %v11955_v6 = vsel %vm11827_vm7, %v11763_v25, %v11891_v11 }
 0x8e2   : > { %v11956_v59 = vsel %vm11828_vm8, %v11764_v52, %v11892_v50  ;;  %v11690_v0 = vmax.f32 %v11578_v55, %v11594_v54  ;;  %v11596_v41 = vmax.f32 %v9592_v8, %v11357_v42  ;;  %v11359_v47 = vpop.f32.mrb[183].mxu1  ;;  %v17591_v11 = vld [vmem:[%s23512_s5 + $0x44c] ss:$16 sps:$4 sm:$0xff]  }
 0x8e3   : > { %v12004_v57 = vpack.c.bf16 %v11956_v59, %v11954_v3  ;;  %v11691_v1 = vmax.f32 %v11579_v60, %v11595_v56  ;;  %v11597_v30 = vmax.f32 %v9594_v20, %v11359_v47  ;;  %v11957_v12 = vsel %vm11829_vm9, %v11765_v19, %v11893_v14  ;;  %v17585_v60 = vld [vmem:[%s23512_s5 + $0x42c] ss:$16 sps:$4 sm:$0xff]  }
 0x8e4   : > { %v11766_v48 = vadd.f32 %v22261_v9, %v11690_v0  ;;  %v11692_v49 = vmax.f32 %v11580_v2, %v11596_v41  ;;  %13696 = vmatpush1.bf16.msra.mxu0 %v17568_v40  ;;  %13988 = vmatpush1.bf16.msra.mxu1 %v17571_v61  ;;  %v12005_v23 = vpack.c.bf16 %v11957_v12, %v11955_v6  ;;  %v17588_v61 = vld [vmem:[%s23512_s5 + $0x444] ss:$16 sps:$4 sm:$0xff]  }
 0x8e5   : > { %v11767_v55 = vadd.f32 %v22264_v35, %v11691_v1  ;;  %v11693_v43 = vmax.f32 %v11581_v62, %v11597_v30  ;;  %13738 = vmatprep.subr.bf16.mxu0 %v17576_v29  ;;  %14030 = vmatprep.subr.bf16.mxu1 %v17579_v38 }
 0x8e6   : > { %vm11830_vm10 = vcmp.gt.f32.partialorder %v11766_v48, 0.0  ;;  %v11894_v27 = vmul.f32 0.01, %v11766_v48  ;;  %v11768_v2 = vadd.f32 %v22261_v9, %v11692_v49  ;;  %13697 = vmatprep.mubr.bf16.mxu0 %v12005_v23  ;;  %13989 = vmatprep.mubr.bf16.mxu1 %v12005_v23  ;;  %v9598_v41 = vpop.f32.mrb[184].mxu0 }
 0x8e7   : > { %v11895_v62 = vmul.f32 0.01, %v11767_v55  ;;  %v11769_v25 = vadd.f32 %v22264_v35, %v11693_v43  ;;  %v11363_v52 = vpop.f32.mrb[184].mxu1  ;;  %13698 = vmatmul.mubr.bf16.vlgmr.msra.gmra.mrb[0].mxu0 %v12004_v57  ;;  %13990 = vmatmul.mubr.bf16.vlgmr.msra.gmra.mrb[0].mxu1 %v12004_v57  ;;  %v9600_v40 = vpop.f32.mrb[185].mxu0  ;;  %vm11831_vm11 = vcmp.gt.f32.partialorder %v11767_v55, 0.0 }
 0x8e8   : > { %vm11832_vm12 = vcmp.gt.f32.partialorder %v11768_v2, 0.0  ;;  %v11896_v19 = vmul.f32 0.01, %v11768_v2  ;;  %v11598_v58 = vmax.f32 %v9598_v41, %v11363_v52  ;;  %v11365_v29 = vpop.f32.mrb[185].mxu1  ;;  %13739 = vmatpush1.bf16.msra.mxu0 %v17574_v33  ;;  %14031 = vmatpush1.bf16.msra.mxu1 %v17577_v26  ;;  %v9602_v38 = vpop.f32.mrb[186].mxu0  ;;  %v11958_v50 = vsel %vm11830_vm10, %v11766_v48, %v11894_v27 }
 0x8e9   : > { %v11897_v54 = vmul.f32 0.01, %v11769_v25  ;;  %v11599_v36 = vmax.f32 %v9600_v40, %v11365_v29  ;;  %v11367_v8 = vpop.f32.mrb[186].mxu1  ;;  %v9604_v3 = vpop.f32.mrb[187].mxu0  ;;  %13740 = vmatprep.subr.bf16.mxu0 %v17582_v15  ;;  %14032 = vmatprep.subr.bf16.mxu1 %v17585_v60  ;;  %vm11833_vm13 = vcmp.gt.f32.partialorder %v11769_v25, 0.0  ;;  %v11959_v59 = vsel %vm11831_vm11, %v11767_v55, %v11895_v62 }
 0x8ea   : > { %v11960_v14 = vsel %vm11832_vm12, %v11768_v2, %v11896_v19  ;;  %v11694_v56 = vmax.f32 %v11582_v7, %v11598_v58  ;;  %v11600_v42 = vmax.f32 %v9602_v38, %v11367_v8  ;;  %v11369_v20 = vpop.f32.mrb[187].mxu1  ;;  %v17600_v55 = vld [vmem:[%s23512_s5 + $0x484] ss:$16 sps:$4 sm:$0xff]   ;;  %v17603_v43 = vld [vmem:[%s23512_s5 + $0x48c] ss:$16 sps:$4 sm:$0xff]   ;;  %v24409_v40 = vmax.f32 %v22543_v37, %v22545_v17 }
 0x8eb   : > { %v12012_v0 = vpack.c.bf16 %v11960_v14, %v11958_v50  ;;  %v11695_v47 = vmax.f32 %v11583_v63, %v11599_v36  ;;  %v11601_v6 = vmax.f32 %v9604_v3, %v11369_v20  ;;  %v11961_v57 = vsel %vm11833_vm13, %v11769_v25, %v11897_v54  ;;  %v17598_v17 = vld [vmem:[%s23512_s5 + $0x480] ss:$16 sps:$4 sm:$0xff]  }
 0x8ec   : > { %v11770_v1 = vadd.f32 %v22261_v9, %v11694_v56  ;;  %v11696_v30 = vmax.f32 %v11584_v4, %v11600_v42  ;;  %13741 = vmatpush1.bf16.msra.mxu0 %v17580_v16  ;;  %14033 = vmatpush1.bf16.msra.mxu1 %v17583_v31  ;;  %v12013_v5 = vpack.c.bf16 %v11961_v57, %v11959_v59 }
 0x8ed   : > { %v11771_v7 = vadd.f32 %v22264_v35, %v11695_v47  ;;  %v11697_v63 = vmax.f32 %v24408_v24, %v11601_v6  ;;  %13742 = vmatprep.subr.bf16.mxu0 %v17588_v61  ;;  %14034 = vmatprep.subr.bf16.mxu1 %v17591_v11  ;;  %v24410_v38 = vmax.f32 %v22547_v10, %v22551_v51  ;;  %v17601_v10 = vld [vmem:[%s23512_s5 + $0x488] ss:$16 sps:$4 sm:$0xff]  }
 0x8ee   : > { %vm11834_vm14 = vcmp.gt.f32.partialorder %v11770_v1, 0.0  ;;  %v11898_v4 = vmul.f32 0.01, %v11770_v1  ;;  %v11772_v12 = vadd.f32 %v22261_v9, %v11696_v30  ;;  %13707 = vmatprep.mubr.bf16.mxu0 %v12013_v5  ;;  %13999 = vmatprep.mubr.bf16.mxu1 %v12013_v5  ;;  %v9608_v48 = vpop.f32.mrb[188].mxu0  ;;  %v24411_v3 = vmax.f32 %v22553_v39, %v22563_v46  ;;  %v17606_v39 = vld [vmem:[%s23512_s5 + $0x4a4] ss:$16 sps:$4 sm:$0xff]  }
 0x8ef   : > { %v11899_v49 = vmul.f32 0.01, %v11771_v7  ;;  %v11773_v23 = vadd.f32 %v22264_v35, %v11697_v63  ;;  %v11373_v33 = vpop.f32.mrb[188].mxu1  ;;  %13708 = vmatmul.mubr.bf16.gmra.mrb[4].mxu0 %v12012_v0  ;;  %14000 = vmatmul.mubr.bf16.gmra.mrb[4].mxu1 %v12012_v0  ;;  %v9610_v26 = vpop.f32.mrb[189].mxu0  ;;  %vm11835_vm15 = vcmp.gt.f32.partialorder %v11771_v7, 0.0  ;;  %v24412_v56 = vmax.f32 %v22565_v13, %v22575_v18 }
 0x8f0   : > { %vm11836_vm1 = vcmp.gt.f32.partialorder %v11772_v12, 0.0  ;;  %v11900_v15 = vmul.f32 0.01, %v11772_v12  ;;  %v11602_v60 = vmax.f32 %v9608_v48, %v11373_v33  ;;  %v11375_v27 = vpop.f32.mrb[189].mxu1  ;;  %13743 = vmatpush1.bf16.msra.mxu0 %v17586_v28  ;;  %14035 = vmatpush1.bf16.msra.mxu1 %v17589_v53  ;;  %v9612_v2 = vpop.f32.mrb[190].mxu0  ;;  %v11962_v41 = vsel %vm11834_vm14, %v11770_v1, %v11898_v4 }
 0x8f1   : > { %v11901_v16 = vmul.f32 0.01, %v11773_v23  ;;  %v11603_v31 = vmax.f32 %v9610_v26, %v11375_v27  ;;  %v11377_v62 = vpop.f32.mrb[190].mxu1  ;;  %v9614_v25 = vpop.f32.mrb[191].mxu0  ;;  %13744 = vmatprep.subr.bf16.mxu0 %v17594_v22  ;;  %14036 = vmatprep.subr.bf16.mxu1 %v17597_v21  ;;  %vm11837_vm2 = vcmp.gt.f32.partialorder %v11773_v23, 0.0  ;;  %v11963_v58 = vsel %vm11835_vm15, %v11771_v7, %v11899_v49 }
 0x8f2   : > { %v11964_v52 = vsel %vm11836_vm1, %v11772_v12, %v11900_v15  ;;  %v11698_v61 = vmax.f32 %v24409_v40, %v11602_v60  ;;  %v11604_v11 = vmax.f32 %v9612_v2, %v11377_v62  ;;  %v11379_v19 = vpop.f32.mrb[191].mxu1  ;;  %v17609_v46 = vld [vmem:[%s23512_s5 + $0x4ac] ss:$16 sps:$4 sm:$0xff]   ;;  %v17604_v13 = vld [vmem:[%s23512_s5 + $0x4a0] ss:$16 sps:$4 sm:$0xff]  }
 0x8f3   : > { %v12020_v29 = vpack.c.bf16 %v11964_v52, %v11962_v41  ;;  %v11699_v50 = vmax.f32 %v24410_v38, %v11603_v31  ;;  %v11605_v54 = vmax.f32 %v9614_v25, %v11379_v19  ;;  %v11965_v36 = vsel %vm11837_vm2, %v11773_v23, %v11901_v16  ;;  %v17607_v18 = vld [vmem:[%s23512_s5 + $0x4a8] ss:$16 sps:$4 sm:$0xff]   ;;  %v17612_v30 = vld [vmem:[%s23512_s5 + $0x4c4] ss:$16 sps:$4 sm:$0xff]   ;;  %v17615_v5 = vld [vmem:[%s23512_s5 + $0x4cc] ss:$16 sps:$4 sm:$0xff]  }
 0x8f4   : > { %v11774_v8 = vadd.f32 %v22261_v9, %v11698_v61  ;;  %v11700_v14 = vmax.f32 %v24411_v3, %v11604_v11  ;;  %13745 = vmatpush1.bf16.msra.mxu0 %v17592_v32  ;;  %14037 = vmatpush1.bf16.msra.mxu1 %v17595_v45  ;;  %v12021_v37 = vpack.c.bf16 %v11965_v36, %v11963_v58  ;;  %v17613_v15 = vld [vmem:[%s23512_s5 + $0x4c8] ss:$16 sps:$4 sm:$0xff]   ;;  %v17618_v60 = vld [vmem:[%s23512_s5 + $0x4e4] ss:$16 sps:$4 sm:$0xff]   ;;  %v17621_v27 = vld [vmem:[%s23512_s5 + $0x4ec] ss:$16 sps:$4 sm:$0xff]  }
 0x8f5   : > { %v11775_v51 = vadd.f32 %v22264_v35, %v11699_v50  ;;  %v11701_v42 = vmax.f32 %v24412_v56, %v11605_v54  ;;  %13746 = vmatprep.subr.bf16.mxu0 %v17600_v55  ;;  %14038 = vmatprep.subr.bf16.mxu1 %v17603_v43  ;;  %v17610_v43 = vld [vmem:[%s23512_s5 + $0x4c0] ss:$16 sps:$4 sm:$0xff]   ;;  %v17619_v40 = vld [vmem:[%s23512_s5 + $0x4e8] ss:$16 sps:$4 sm:$0xff]   ;;  %v17624_v58 = vld [vmem:[%s23512_s5 + $0x504] ss:$16 sps:$4 sm:$0xff]  }
 0x8f6   : > { %v11902_v20 = vmul.f32 0.01, %v11774_v8  ;;  %v11776_v59 = vadd.f32 %v22261_v9, %v11700_v14  ;;  %13717 = vmatprep.mubr.bf16.mxu0 %v12021_v37  ;;  %14009 = vmatprep.mubr.bf16.mxu1 %v12021_v37  ;;  %v22756_v0 = vpop.f32.mrb[192].mxu0  ;;  %vm11838_vm3 = vcmp.gt.f32.partialorder %v11774_v8, 0.0  ;;  %v17616_v52 = vld [vmem:[%s23512_s5 + $0x4e0] ss:$16 sps:$4 sm:$0xff]  }
 0x8f7   : > { %v11903_v47 = vmul.f32 0.01, %v11775_v51  ;;  %v11777_v6 = vadd.f32 %v22264_v35, %v11701_v42  ;;  %v22765_v57 = vpop.f32.mrb[192].mxu1  ;;  %13718 = vmatmul.mubr.bf16.gmra.mrb[8].mxu0 %v12020_v29  ;;  %14010 = vmatmul.mubr.bf16.gmra.mrb[8].mxu1 %v12020_v29  ;;  %v22767_v1 = vpop.f32.mrb[193].mxu0  ;;  %vm11839_vm0 = vcmp.gt.f32.partialorder %v11775_v51, 0.0 }
 0x8f8   : > { %vm11840_vm4 = vcmp.gt.f32.partialorder %v11776_v59, 0.0  ;;  %v11904_v28 = vmul.f32 0.01, %v11776_v59  ;;  %v11606_v53 = vmax.f32 %v22756_v0, %v22765_v57  ;;  %v22777_v7 = vpop.f32.mrb[193].mxu1  ;;  %13747 = vmatpush1.bf16.msra.mxu0 %v17598_v17  ;;  %14039 = vmatpush1.bf16.msra.mxu1 %v17601_v10  ;;  %v22779_v24 = vpop.f32.mrb[194].mxu0  ;;  %v11966_v12 = vsel %vm11838_vm3, %v11774_v8, %v11902_v20 }
 0x8f9   : > { %v11905_v63 = vmul.f32 0.01, %v11777_v6  ;;  %v11607_v22 = vmax.f32 %v22767_v1, %v22777_v7  ;;  %v22783_v21 = vpop.f32.mrb[194].mxu1  ;;  %v22785_v4 = vpop.f32.mrb[195].mxu0  ;;  %13748 = vmatprep.subr.bf16.mxu0 %v17606_v39  ;;  %14040 = vmatprep.subr.bf16.mxu1 %v17609_v46  ;;  %vm11841_vm5 = vcmp.gt.f32.partialorder %v11777_v6, 0.0  ;;  %v11967_v33 = vsel %vm11839_vm0, %v11775_v51, %v11903_v47 }
 0x8fa   : > { %v11968_v48 = vsel %vm11840_vm4, %v11776_v59, %v11904_v28  ;;  %v11608_v32 = vmax.f32 %v22779_v24, %v22783_v21  ;;  %v22791_v45 = vpop.f32.mrb[195].mxu1  ;;  %v17627_v29 = vld [vmem:[%s23512_s5 + $0x50c] ss:$16 sps:$4 sm:$0xff]   ;;  %v17622_v36 = vld [vmem:[%s23512_s5 + $0x500] ss:$16 sps:$4 sm:$0xff]  }
 0x8fb   : > { %v12028_v49 = vpack.c.bf16 %v11968_v48, %v11966_v12  ;;  %v11609_v23 = vmax.f32 %v22785_v4, %v22791_v45  ;;  %v11969_v26 = vsel %vm11841_vm5, %v11777_v6, %v11905_v63  ;;  %v17625_v8 = vld [vmem:[%s23512_s5 + $0x508] ss:$16 sps:$4 sm:$0xff]   ;;  %v17630_v3 = vld [vmem:[%s23512_s5 + $0x524] ss:$16 sps:$4 sm:$0xff]   ;;  %v17633_v14 = vld [vmem:[%s23512_s5 + $0x52c] ss:$16 sps:$4 sm:$0xff]  }
 0x8fc   : > { %13749 = vmatpush1.bf16.msra.mxu0 %v17604_v13  ;;  %14041 = vmatpush1.bf16.msra.mxu1 %v17607_v18  ;;  %v12029_v55 = vpack.c.bf16 %v11969_v26, %v11967_v33  ;;  %v17628_v39 = vld [vmem:[%s23512_s5 + $0x520] ss:$16 sps:$4 sm:$0xff]   ;;  %v17631_v46 = vld [vmem:[%s23512_s5 + $0x528] ss:$16 sps:$4 sm:$0xff]   ;;  %v17636_v18 = vld [vmem:[%s23512_s5 + $0x544] ss:$16 sps:$4 sm:$0xff]  }
 0x8fd   : > { %13750 = vmatprep.subr.bf16.mxu0 %v17612_v30  ;;  %14042 = vmatprep.subr.bf16.mxu1 %v17615_v5  ;;  %v17639_v47 = vld [vmem:[%s23512_s5 + $0x54c] ss:$16 sps:$4 sm:$0xff]   ;;  %v17634_v28 = vld [vmem:[%s23512_s5 + $0x540] ss:$16 sps:$4 sm:$0xff]   ;;  %v17637_v63 = vld [vmem:[%s23512_s5 + $0x548] ss:$16 sps:$4 sm:$0xff]  }
 0x8fe   : > { %13727 = vmatprep.mubr.bf16.mxu0 %v12029_v55  ;;  %14019 = vmatprep.mubr.bf16.mxu1 %v12029_v55  ;;  %v22807_v2 = vpop.f32.mrb[196].mxu0  ;;  %v17642_v12 = vld [vmem:[%s23512_s5 + $0x564] ss:$16 sps:$4 sm:$0xff]   ;;  %v17645_v48 = vld [vmem:[%s23512_s5 + $0x56c] ss:$16 sps:$4 sm:$0xff]  }
 0x8ff   : > { %v22809_v41 = vpop.f32.mrb[196].mxu1  ;;  %13728 = vmatmul.mubr.bf16.gmra.mrb[12].mxu0 %v12028_v49  ;;  %14020 = vmatmul.mubr.bf16.gmra.mrb[12].mxu1 %v12028_v49  ;;  %v22811_v16 = vpop.f32.mrb[197].mxu0  ;;  %v17658_v0 = vld [vmem:[%s23512_s5 + $0x5c0] ss:$16 sps:$4 sm:$0xff]   ;;  %v17661_v57 = vld [vmem:[%s23512_s5 + $0x5c8] ss:$16 sps:$4 sm:$0xff]  }
 0x900   : > { %v11610_v31 = vmax.f32 %v22807_v2, %v22809_v41  ;;  %v22815_v62 = vpop.f32.mrb[197].mxu1  ;;  %13751 = vmatpush1.bf16.msra.mxu0 %v17610_v43  ;;  %14043 = vmatpush1.bf16.msra.mxu1 %v17613_v15  ;;  %v22817_v25 = vpop.f32.mrb[198].mxu0  ;;  %v17666_v7 = vld [vmem:[%s23512_s5 + $0x5e4] ss:$16 sps:$4 sm:$0xff]   ;;  %v17669_v24 = vld [vmem:[%s23512_s5 + $0x5ec] ss:$16 sps:$4 sm:$0xff]  }
 0x901   : > { %v11611_v61 = vmax.f32 %v22811_v16, %v22815_v62  ;;  %v22827_v11 = vpop.f32.mrb[198].mxu1  ;;  %v22829_v19 = vpop.f32.mrb[199].mxu0  ;;  %13752 = vmatprep.subr.bf16.mxu0 %v17618_v60  ;;  %14044 = vmatprep.subr.bf16.mxu1 %v17621_v27  ;;  %v17640_v60 = vld [vmem:[%s23512_s5 + $0x560] ss:$16 sps:$4 sm:$0xff]   ;;  %v17643_v27 = vld [vmem:[%s23512_s5 + $0x568] ss:$16 sps:$4 sm:$0xff]  }
 0x902   : > { %v11612_v38 = vmax.f32 %v22817_v25, %v22827_v11  ;;  %v22839_v50 = vpop.f32.mrb[199].mxu1  ;;  %v17664_v4 = vld [vmem:[%s23512_s5 + $0x5e0] ss:$16 sps:$4 sm:$0xff]   ;;  %v17667_v45 = vld [vmem:[%s23512_s5 + $0x5e8] ss:$16 sps:$4 sm:$0xff]  }
 0x903   : > { %v11613_v54 = vmax.f32 %v22829_v19, %v22839_v50  ;;  %v17670_v41 = vld [vmem:[%s23512_s5 + $0x600] ss:$16 sps:$4 sm:$0xff]   ;;  %v17673_v16 = vld [vmem:[%s23512_s5 + $0x608] ss:$16 sps:$4 sm:$0xff]   ;;  %v17678_v25 = vld [vmem:[%s23512_s5 + $0x624] ss:$16 sps:$4 sm:$0xff]  }
 0x904   : > { %13753 = vmatpush1.bf16.msra.mxu0 %v17616_v52  ;;  %14045 = vmatpush1.bf16.msra.mxu1 %v17619_v40  ;;  %v17676_v19 = vld [vmem:[%s23512_s5 + $0x620] ss:$16 sps:$4 sm:$0xff]   ;;  %v17679_v50 = vld [vmem:[%s23512_s5 + $0x628] ss:$16 sps:$4 sm:$0xff]  }
 0x905   : > { %13754 = vmatprep.subr.bf16.mxu0 %v17624_v58  ;;  %14046 = vmatprep.subr.bf16.mxu1 %v17627_v29  ;;  %v17648_v29 = vld [vmem:[%s23512_s5 + $0x584] ss:$16 sps:$4 sm:$0xff]  }
 0x906   : > { %v22855_v37 = vpop.f32.mrb[200].mxu0 }
 0x907   : > { %v22857_v17 = vpop.f32.mrb[200].mxu1  ;;  %v22859_v10 = vpop.f32.mrb[201].mxu0 }
 0x908   : > { %v11614_v51 = vmax.f32 %v22855_v37, %v22857_v17  ;;  %v22863_v56 = vpop.f32.mrb[201].mxu1  ;;  %13755 = vmatpush1.bf16.msra.mxu0 %v17622_v36  ;;  %14047 = vmatpush1.bf16.msra.mxu1 %v17625_v8  ;;  %v22865_v42 = vpop.f32.mrb[202].mxu0  ;;  %v17651_v36 = vld [vmem:[%s23512_s5 + $0x58c] ss:$16 sps:$4 sm:$0xff]   ;;  %v17682_v17 = vld [vmem:[%s23512_s5 + $0x640] ss:$16 sps:$4 sm:$0xff]  }
 0x909   : > { %v11615_v20 = vmax.f32 %v22859_v10, %v22863_v56  ;;  %v22875_v59 = vpop.f32.mrb[202].mxu1  ;;  %v22877_v13 = vpop.f32.mrb[203].mxu0  ;;  %13756 = vmatprep.subr.bf16.mxu0 %v17630_v3  ;;  %14048 = vmatprep.subr.bf16.mxu1 %v17633_v14  ;;  %v17685_v10 = vld [vmem:[%s23512_s5 + $0x648] ss:$16 sps:$4 sm:$0xff]  }
 0x90a   : > { %v11616_v6 = vmax.f32 %v22865_v42, %v22875_v59  ;;  %v22887_v30 = vpop.f32.mrb[203].mxu1  ;;  %v17690_v42 = vld [vmem:[%s23512_s5 + $0x664] ss:$16 sps:$4 sm:$0xff]   ;;  %v17693_v59 = vld [vmem:[%s23512_s5 + $0x66c] ss:$16 sps:$4 sm:$0xff]  }
 0x90b   : > { %v24413_v56 = vmax.f32 %v22877_v13, %v22887_v30  ;;  %v17688_v13 = vld [vmem:[%s23512_s5 + $0x660] ss:$16 sps:$4 sm:$0xff]   ;;  %v17691_v30 = vld [vmem:[%s23512_s5 + $0x668] ss:$16 sps:$4 sm:$0xff]  }
 0x90c   : > { %13757 = vmatpush1.bf16.msra.mxu0 %v17628_v39  ;;  %14049 = vmatpush1.bf16.msra.mxu1 %v17631_v46  ;;  %v17646_v39 = vld [vmem:[%s23512_s5 + $0x580] ss:$16 sps:$4 sm:$0xff]   ;;  %v17649_v46 = vld [vmem:[%s23512_s5 + $0x588] ss:$16 sps:$4 sm:$0xff]  }
 0x90d   : > { %13758 = vmatprep.subr.bf16.mxu0 %v17636_v18  ;;  %14050 = vmatprep.subr.bf16.mxu1 %v17639_v47  ;;  %v17654_v18 = vld [vmem:[%s23512_s5 + $0x5a4] ss:$16 sps:$4 sm:$0xff]   ;;  %v17657_v47 = vld [vmem:[%s23512_s5 + $0x5ac] ss:$16 sps:$4 sm:$0xff]  }
 0x90e   : > { %v22903_v49 = vpop.f32.mrb[204].mxu0 }
 0x90f   : > { %v22905_v33 = vpop.f32.mrb[204].mxu1  ;;  %v22907_v26 = vpop.f32.mrb[205].mxu0 }
 0x910   : > { %v22911_v43 = vpop.f32.mrb[205].mxu1  ;;  %13759 = vmatpush1.bf16.msra.mxu0 %v17634_v28  ;;  %14051 = vmatpush1.bf16.msra.mxu1 %v17637_v63  ;;  %v22913_v15 = vpop.f32.mrb[206].mxu0 }
 0x911   : > { %v22923_v40 = vpop.f32.mrb[206].mxu1  ;;  %v22925_v58 = vpop.f32.mrb[207].mxu0  ;;  %13760 = vmatprep.subr.bf16.mxu0 %v17642_v12  ;;  %14052 = vmatprep.subr.bf16.mxu1 %v17645_v48 }
 0x912   : > { %v22935_v3 = vpop.f32.mrb[207].mxu1 }
 0x914   : > { %13761 = vmatpush1.bf16.msra.mxu0 %v17640_v60  ;;  %14053 = vmatpush1.bf16.msra.mxu1 %v17643_v27 }
 0x915   : > { %13762 = vmatprep.subr.bf16.mxu0 %v17648_v29  ;;  %14054 = vmatprep.subr.bf16.mxu1 %v17651_v36  ;;  %v17652_v29 = vld [vmem:[%s23512_s5 + $0x5a0] ss:$16 sps:$4 sm:$0xff]   ;;  %v17655_v36 = vld [vmem:[%s23512_s5 + $0x5a8] ss:$16 sps:$4 sm:$0xff]  }
 0x916   : > { %v9658_v28 = vpop.f32.mrb[208].mxu0 }
 0x917   : > { %v11423_v63 = vpop.f32.mrb[208].mxu1  ;;  %v9660_v12 = vpop.f32.mrb[209].mxu0 }
 0x918   : > { %v11622_v48 = vmax.f32 %v9658_v28, %v11423_v63  ;;  %v11425_v60 = vpop.f32.mrb[209].mxu1  ;;  %13763 = vmatpush1.bf16.msra.mxu0 %v17646_v39  ;;  %14055 = vmatpush1.bf16.msra.mxu1 %v17649_v46  ;;  %v9662_v27 = vpop.f32.mrb[210].mxu0  ;;  %v17660_v28 = vld [vmem:[%s23512_s5 + $0x5c4] ss:$16 sps:$4 sm:$0xff]   ;;  %v17663_v39 = vld [vmem:[%s23512_s5 + $0x5cc] ss:$16 sps:$4 sm:$0xff]  }
 0x919   : > { %v11623_v14 = vmax.f32 %v9660_v12, %v11425_v60  ;;  %v11427_v8 = vpop.f32.mrb[210].mxu1  ;;  %v9664_v52 = vpop.f32.mrb[211].mxu0  ;;  %13764 = vmatprep.subr.bf16.mxu0 %v17654_v18  ;;  %14056 = vmatprep.subr.bf16.mxu1 %v17657_v47 }
 0x91a   : > { %v11702_v46 = vmax.f32 %v11606_v53, %v11622_v48  ;;  %v11624_v63 = vmax.f32 %v9662_v27, %v11427_v8  ;;  %v11429_v55 = vpop.f32.mrb[211].mxu1  ;;  %v17675_v48 = vld [vmem:[%s23512_s5 + $0x60c] ss:$16 sps:$4 sm:$0xff]  }
 0x91b   : > { %v11703_v12 = vmax.f32 %v11607_v22, %v11623_v14  ;;  %v11625_v18 = vmax.f32 %v9664_v52, %v11429_v55  ;;  %v17672_v14 = vld [vmem:[%s23512_s5 + $0x604] ss:$16 sps:$4 sm:$0xff]  }
 0x91c   : > { %v11778_v47 = vadd.f32 %v22261_v9, %v11702_v46  ;;  %v11704_v60 = vmax.f32 %v11608_v32, %v11624_v63  ;;  %13765 = vmatpush1.bf16.msra.mxu0 %v17652_v29  ;;  %14057 = vmatpush1.bf16.msra.mxu1 %v17655_v36 }
 0x91d   : > { %v11779_v1 = vadd.f32 %v22264_v35, %v11703_v12  ;;  %v11705_v53 = vmax.f32 %v11609_v23, %v11625_v18  ;;  %13766 = vmatprep.subr.bf16.mxu0 %v17660_v28  ;;  %14058 = vmatprep.subr.bf16.mxu1 %v17663_v39 }
 0x91e   : > { %vm11842_vm6 = vcmp.gt.f32.partialorder %v11778_v47, 0.0  ;;  %v11906_v22 = vmul.f32 0.01, %v11778_v47  ;;  %v11780_v21 = vadd.f32 %v22261_v9, %v11704_v60  ;;  %v9668_v32 = vpop.f32.mrb[212].mxu0 }
 0x91f   : > { %v11907_v23 = vmul.f32 0.01, %v11779_v1  ;;  %v11781_v55 = vadd.f32 %v22264_v35, %v11705_v53  ;;  %v11433_v52 = vpop.f32.mrb[212].mxu1  ;;  %v9670_v8 = vpop.f32.mrb[213].mxu0  ;;  %vm11843_vm7 = vcmp.gt.f32.partialorder %v11779_v1, 0.0 }
 0x920   : > { %vm11844_vm8 = vcmp.gt.f32.partialorder %v11780_v21, 0.0  ;;  %v11908_v27 = vmul.f32 0.01, %v11780_v21  ;;  %v11626_v29 = vmax.f32 %v9668_v32, %v11433_v52  ;;  %v11435_v36 = vpop.f32.mrb[213].mxu1  ;;  %13767 = vmatpush1.bf16.msra.mxu0 %v17658_v0  ;;  %14059 = vmatpush1.bf16.msra.mxu1 %v17661_v57  ;;  %v9672_v28 = vpop.f32.mrb[214].mxu0  ;;  %v11970_v39 = vsel %vm11842_vm6, %v11778_v47, %v11906_v22 }
 0x921   : > { %v11909_v46 = vmul.f32 0.01, %v11781_v55  ;;  %v11627_v63 = vmax.f32 %v9670_v8, %v11435_v36  ;;  %v11437_v12 = vpop.f32.mrb[214].mxu1  ;;  %v9674_v18 = vpop.f32.mrb[215].mxu0  ;;  %13768 = vmatprep.subr.bf16.mxu0 %v17666_v7  ;;  %14060 = vmatprep.subr.bf16.mxu1 %v17669_v24  ;;  %vm11845_vm9 = vcmp.gt.f32.partialorder %v11781_v55, 0.0  ;;  %v11971_v0 = vsel %vm11843_vm7, %v11779_v1, %v11907_v23 }
 0x922   : > { %v11972_v60 = vsel %vm11844_vm8, %v11780_v21, %v11908_v27  ;;  %v11706_v53 = vmax.f32 %v11610_v31, %v11626_v29  ;;  %v11628_v5 = vmax.f32 %v9672_v28, %v11437_v12  ;;  %v11439_v32 = vpop.f32.mrb[215].mxu1  ;;  %v17687_v23 = vld [vmem:[%s23512_s5 + $0x64c] ss:$16 sps:$4 sm:$0xff]  }
 0x923   : > { %v12006_v57 = vpack.c.bf16 %v11972_v60, %v11970_v39  ;;  %v11707_v47 = vmax.f32 %v11611_v61, %v11627_v63  ;;  %v11629_v22 = vmax.f32 %v9674_v18, %v11439_v32  ;;  %v11973_v52 = vsel %vm11845_vm9, %v11781_v55, %v11909_v46  ;;  %v17681_v61 = vld [vmem:[%s23512_s5 + $0x62c] ss:$16 sps:$4 sm:$0xff]  }
 0x924   : > { %v11782_v7 = vadd.f32 %v22261_v9, %v11706_v53  ;;  %v11708_v24 = vmax.f32 %v11612_v38, %v11628_v5  ;;  %13769 = vmatpush1.bf16.msra.mxu0 %v17664_v4  ;;  %14061 = vmatpush1.bf16.msra.mxu1 %v17667_v45  ;;  %v12007_v2 = vpack.c.bf16 %v11973_v52, %v11971_v0  ;;  %v17684_v45 = vld [vmem:[%s23512_s5 + $0x644] ss:$16 sps:$4 sm:$0xff]  }
 0x925   : > { %v11783_v31 = vadd.f32 %v22264_v35, %v11707_v47  ;;  %v11709_v62 = vmax.f32 %v11613_v54, %v11629_v22  ;;  %13811 = vmatprep.subr.bf16.mxu0 %v17672_v14  ;;  %14103 = vmatprep.subr.bf16.mxu1 %v17675_v48 }
 0x926   : > { %vm11846_vm10 = vcmp.gt.f32.partialorder %v11782_v7, 0.0  ;;  %v11910_v11 = vmul.f32 0.01, %v11782_v7  ;;  %v11784_v38 = vadd.f32 %v22261_v9, %v11708_v24  ;;  %13770 = vmatprep.mubr.bf16.mxu0 %v12007_v2  ;;  %14062 = vmatprep.mubr.bf16.mxu1 %v12007_v2  ;;  %v9678_v5 = vpop.f32.mrb[216].mxu0 }
 0x927   : > { %v11911_v54 = vmul.f32 0.01, %v11783_v31  ;;  %v11785_v1 = vadd.f32 %v22264_v35, %v11709_v62  ;;  %v11443_v21 = vpop.f32.mrb[216].mxu1  ;;  %13771 = vmatmul.mubr.bf16.vlgmr.msra.gmra.mrb[0].mxu0 %v12006_v57  ;;  %14063 = vmatmul.mubr.bf16.vlgmr.msra.gmra.mrb[0].mxu1 %v12006_v57  ;;  %v9680_v4 = vpop.f32.mrb[217].mxu0  ;;  %vm11847_vm11 = vcmp.gt.f32.partialorder %v11783_v31, 0.0 }
 0x928   : > { %vm11848_vm12 = vcmp.gt.f32.partialorder %v11784_v38, 0.0  ;;  %v11912_v55 = vmul.f32 0.01, %v11784_v38  ;;  %v11630_v8 = vmax.f32 %v9678_v5, %v11443_v21  ;;  %v11445_v14 = vpop.f32.mrb[217].mxu1  ;;  %13812 = vmatpush1.bf16.msra.mxu0 %v17670_v41  ;;  %14104 = vmatpush1.bf16.msra.mxu1 %v17673_v16  ;;  %v9682_v48 = vpop.f32.mrb[218].mxu0  ;;  %v11974_v27 = vsel %vm11846_vm10, %v11782_v7, %v11910_v11 }
 0x929   : > { %v11913_v29 = vmul.f32 0.01, %v11785_v1  ;;  %v11631_v36 = vmax.f32 %v9680_v4, %v11445_v14  ;;  %v11447_v28 = vpop.f32.mrb[218].mxu1  ;;  %v9684_v39 = vpop.f32.mrb[219].mxu0  ;;  %13813 = vmatprep.subr.bf16.mxu0 %v17678_v25  ;;  %14105 = vmatprep.subr.bf16.mxu1 %v17681_v61  ;;  %vm11849_vm13 = vcmp.gt.f32.partialorder %v11785_v1, 0.0  ;;  %v11975_v60 = vsel %vm11847_vm11, %v11783_v31, %v11911_v54 }
 0x92a   : > { %v11976_v46 = vsel %vm11848_vm12, %v11784_v38, %v11912_v55  ;;  %v11710_v63 = vmax.f32 %v11614_v51, %v11630_v8  ;;  %v11632_v12 = vmax.f32 %v9682_v48, %v11447_v28  ;;  %v11449_v18 = vpop.f32.mrb[219].mxu1  ;;  %v17696_v31 = vld [vmem:[%s23512_s5 + $0x684] ss:$16 sps:$4 sm:$0xff]   ;;  %v17699_v62 = vld [vmem:[%s23512_s5 + $0x68c] ss:$16 sps:$4 sm:$0xff]   ;;  %v24414_v4 = vmax.f32 %v22903_v49, %v22905_v33 }
 0x92b   : > { %v12014_v53 = vpack.c.bf16 %v11976_v46, %v11974_v27  ;;  %v11711_v32 = vmax.f32 %v11615_v20, %v11631_v36  ;;  %v11633_v0 = vmax.f32 %v9684_v39, %v11449_v18  ;;  %v11977_v57 = vsel %vm11849_vm13, %v11785_v1, %v11913_v29  ;;  %v17694_v33 = vld [vmem:[%s23512_s5 + $0x680] ss:$16 sps:$4 sm:$0xff]  }
 0x92c   : > { %v11786_v47 = vadd.f32 %v22261_v9, %v11710_v63  ;;  %v11712_v22 = vmax.f32 %v11616_v6, %v11632_v12  ;;  %13814 = vmatpush1.bf16.msra.mxu0 %v17676_v19  ;;  %14106 = vmatpush1.bf16.msra.mxu1 %v17679_v50  ;;  %v12015_v37 = vpack.c.bf16 %v11977_v57, %v11975_v60 }
 0x92d   : > { %v11787_v51 = vadd.f32 %v22264_v35, %v11711_v32  ;;  %v11713_v20 = vmax.f32 %v24413_v56, %v11633_v0  ;;  %13815 = vmatprep.subr.bf16.mxu0 %v17684_v45  ;;  %14107 = vmatprep.subr.bf16.mxu1 %v17687_v23  ;;  %v24415_v48 = vmax.f32 %v22907_v26, %v22911_v43  ;;  %v17697_v26 = vld [vmem:[%s23512_s5 + $0x688] ss:$16 sps:$4 sm:$0xff]  }
 0x92e   : > { %vm11850_vm14 = vcmp.gt.f32.partialorder %v11786_v47, 0.0  ;;  %v11914_v6 = vmul.f32 0.01, %v11786_v47  ;;  %v11788_v52 = vadd.f32 %v22261_v9, %v11712_v22  ;;  %13780 = vmatprep.mubr.bf16.mxu0 %v12015_v37  ;;  %14072 = vmatprep.mubr.bf16.mxu1 %v12015_v37  ;;  %v9688_v7 = vpop.f32.mrb[220].mxu0  ;;  %v24416_v39 = vmax.f32 %v22913_v15, %v22923_v40  ;;  %v17702_v15 = vld [vmem:[%s23512_s5 + $0x6a4] ss:$16 sps:$4 sm:$0xff]  }
 0x92f   : > { %v11915_v24 = vmul.f32 0.01, %v11787_v51  ;;  %v11789_v2 = vadd.f32 %v22264_v35, %v11713_v20  ;;  %v11453_v41 = vpop.f32.mrb[220].mxu1  ;;  %13781 = vmatmul.mubr.bf16.gmra.mrb[4].mxu0 %v12014_v53  ;;  %14073 = vmatmul.mubr.bf16.gmra.mrb[4].mxu1 %v12014_v53  ;;  %v9690_v16 = vpop.f32.mrb[221].mxu0  ;;  %vm11851_vm15 = vcmp.gt.f32.partialorder %v11787_v51, 0.0  ;;  %v24417_v63 = vmax.f32 %v22925_v58, %v22935_v3 }
 0x930   : > { %vm11852_vm1 = vcmp.gt.f32.partialorder %v11788_v52, 0.0  ;;  %v11916_v25 = vmul.f32 0.01, %v11788_v52  ;;  %v11634_v61 = vmax.f32 %v9688_v7, %v11453_v41  ;;  %v11455_v11 = vpop.f32.mrb[221].mxu1  ;;  %13816 = vmatpush1.bf16.msra.mxu0 %v17682_v17  ;;  %14108 = vmatpush1.bf16.msra.mxu1 %v17685_v10  ;;  %v9692_v38 = vpop.f32.mrb[222].mxu0  ;;  %v11978_v5 = vsel %vm11850_vm14, %v11786_v47, %v11914_v6 }
 0x931   : > { %v11917_v19 = vmul.f32 0.01, %v11789_v2  ;;  %v11635_v50 = vmax.f32 %v9690_v16, %v11455_v11  ;;  %v11457_v54 = vpop.f32.mrb[222].mxu1  ;;  %v9694_v1 = vpop.f32.mrb[223].mxu0  ;;  %13817 = vmatprep.subr.bf16.mxu0 %v17690_v42  ;;  %14109 = vmatprep.subr.bf16.mxu1 %v17693_v59  ;;  %vm11853_vm2 = vcmp.gt.f32.partialorder %v11789_v2, 0.0  ;;  %v11979_v8 = vsel %vm11851_vm15, %v11787_v51, %v11915_v24 }
 0x932   : > { %v11980_v21 = vsel %vm11852_vm1, %v11788_v52, %v11916_v25  ;;  %v11714_v45 = vmax.f32 %v24414_v4, %v11634_v61  ;;  %v11636_v23 = vmax.f32 %v9692_v38, %v11457_v54  ;;  %v11459_v55 = vpop.f32.mrb[223].mxu1  ;;  %v17705_v40 = vld [vmem:[%s23512_s5 + $0x6ac] ss:$16 sps:$4 sm:$0xff]   ;;  %v17700_v58 = vld [vmem:[%s23512_s5 + $0x6a0] ss:$16 sps:$4 sm:$0xff]  }
 0x933   : > { %v12022_v14 = vpack.c.bf16 %v11980_v21, %v11978_v5  ;;  %v11715_v27 = vmax.f32 %v24415_v48, %v11635_v50  ;;  %v11637_v29 = vmax.f32 %v9694_v1, %v11459_v55  ;;  %v11981_v36 = vsel %vm11853_vm2, %v11789_v2, %v11917_v19  ;;  %v17703_v3 = vld [vmem:[%s23512_s5 + $0x6a8] ss:$16 sps:$4 sm:$0xff]   ;;  %v17708_v22 = vld [vmem:[%s23512_s5 + $0x6c4] ss:$16 sps:$4 sm:$0xff]   ;;  %v17711_v37 = vld [vmem:[%s23512_s5 + $0x6cc] ss:$16 sps:$4 sm:$0xff]  }
 0x934   : > { %v11790_v28 = vadd.f32 %v22261_v9, %v11714_v45  ;;  %v11716_v46 = vmax.f32 %v24416_v39, %v11636_v23  ;;  %13818 = vmatpush1.bf16.msra.mxu0 %v17688_v13  ;;  %14110 = vmatpush1.bf16.msra.mxu1 %v17691_v30  ;;  %v12023_v49 = vpack.c.bf16 %v11981_v36, %v11979_v8  ;;  %v17709_v25 = vld [vmem:[%s23512_s5 + $0x6c8] ss:$16 sps:$4 sm:$0xff]   ;;  %v17714_v61 = vld [vmem:[%s23512_s5 + $0x6e4] ss:$16 sps:$4 sm:$0xff]   ;;  %v17717_v11 = vld [vmem:[%s23512_s5 + $0x6ec] ss:$16 sps:$4 sm:$0xff]  }
 0x935   : > { %v11791_v43 = vadd.f32 %v22264_v35, %v11715_v27  ;;  %v11717_v12 = vmax.f32 %v24417_v63, %v11637_v29  ;;  %13819 = vmatprep.subr.bf16.mxu0 %v17696_v31  ;;  %14111 = vmatprep.subr.bf16.mxu1 %v17699_v62  ;;  %v17706_v62 = vld [vmem:[%s23512_s5 + $0x6c0] ss:$16 sps:$4 sm:$0xff]   ;;  %v17715_v4 = vld [vmem:[%s23512_s5 + $0x6e8] ss:$16 sps:$4 sm:$0xff]   ;;  %v17720_v8 = vld [vmem:[%s23512_s5 + $0x704] ss:$16 sps:$4 sm:$0xff]  }
 0x936   : > { %v11918_v18 = vmul.f32 0.01, %v11790_v28  ;;  %v11792_v60 = vadd.f32 %v22261_v9, %v11716_v46  ;;  %13790 = vmatprep.mubr.bf16.mxu0 %v12023_v49  ;;  %14082 = vmatprep.mubr.bf16.mxu1 %v12023_v49  ;;  %v23116_v53 = vpop.f32.mrb[224].mxu0  ;;  %vm11854_vm3 = vcmp.gt.f32.partialorder %v11790_v28, 0.0  ;;  %v17712_v21 = vld [vmem:[%s23512_s5 + $0x6e0] ss:$16 sps:$4 sm:$0xff]  }
 0x937   : > { %v11919_v32 = vmul.f32 0.01, %v11791_v43  ;;  %v11793_v0 = vadd.f32 %v22264_v35, %v11717_v12  ;;  %v23125_v57 = vpop.f32.mrb[224].mxu1  ;;  %13791 = vmatmul.mubr.bf16.gmra.mrb[8].mxu0 %v12022_v14  ;;  %14083 = vmatmul.mubr.bf16.gmra.mrb[8].mxu1 %v12022_v14  ;;  %v23127_v47 = vpop.f32.mrb[225].mxu0  ;;  %vm11855_vm0 = vcmp.gt.f32.partialorder %v11791_v43, 0.0 }
 0x938   : > { %vm11856_vm4 = vcmp.gt.f32.partialorder %v11792_v60, 0.0  ;;  %v11920_v17 = vmul.f32 0.01, %v11792_v60  ;;  %v11638_v10 = vmax.f32 %v23116_v53, %v23125_v57  ;;  %v23137_v51 = vpop.f32.mrb[225].mxu1  ;;  %13820 = vmatpush1.bf16.msra.mxu0 %v17694_v33  ;;  %14112 = vmatpush1.bf16.msra.mxu1 %v17697_v26  ;;  %v23139_v56 = vpop.f32.mrb[226].mxu0  ;;  %v11982_v52 = vsel %vm11854_vm3, %v11790_v28, %v11918_v18 }
 0x939   : > { %v11921_v20 = vmul.f32 0.01, %v11793_v0  ;;  %v11639_v42 = vmax.f32 %v23127_v47, %v23137_v51  ;;  %v23143_v59 = vpop.f32.mrb[226].mxu1  ;;  %v23145_v6 = vpop.f32.mrb[227].mxu0  ;;  %13821 = vmatprep.subr.bf16.mxu0 %v17702_v15  ;;  %14113 = vmatprep.subr.bf16.mxu1 %v17705_v40  ;;  %vm11857_vm5 = vcmp.gt.f32.partialorder %v11793_v0, 0.0  ;;  %v11983_v41 = vsel %vm11855_vm0, %v11791_v43, %v11919_v32 }
 0x93a   : > { %v11984_v7 = vsel %vm11856_vm4, %v11792_v60, %v11920_v17  ;;  %v11640_v13 = vmax.f32 %v23139_v56, %v23143_v59  ;;  %v23151_v30 = vpop.f32.mrb[227].mxu1  ;;  %v17723_v14 = vld [vmem:[%s23512_s5 + $0x70c] ss:$16 sps:$4 sm:$0xff]   ;;  %v17718_v36 = vld [vmem:[%s23512_s5 + $0x700] ss:$16 sps:$4 sm:$0xff]  }
 0x93b   : > { %v12030_v24 = vpack.c.bf16 %v11984_v7, %v11982_v52  ;;  %v11641_v2 = vmax.f32 %v23145_v6, %v23151_v30  ;;  %v11985_v16 = vsel %vm11857_vm5, %v11793_v0, %v11921_v20  ;;  %v17721_v28 = vld [vmem:[%s23512_s5 + $0x708] ss:$16 sps:$4 sm:$0xff]   ;;  %v17726_v39 = vld [vmem:[%s23512_s5 + $0x724] ss:$16 sps:$4 sm:$0xff]   ;;  %v17729_v46 = vld [vmem:[%s23512_s5 + $0x72c] ss:$16 sps:$4 sm:$0xff]  }
 0x93c   : > { %13822 = vmatpush1.bf16.msra.mxu0 %v17700_v58  ;;  %14114 = vmatpush1.bf16.msra.mxu1 %v17703_v3  ;;  %v12031_v31 = vpack.c.bf16 %v11985_v16, %v11983_v41  ;;  %v17724_v15 = vld [vmem:[%s23512_s5 + $0x720] ss:$16 sps:$4 sm:$0xff]   ;;  %v17727_v40 = vld [vmem:[%s23512_s5 + $0x728] ss:$16 sps:$4 sm:$0xff]   ;;  %v17732_v3 = vld [vmem:[%s23512_s5 + $0x744] ss:$16 sps:$4 sm:$0xff]  }
 0x93d   : > { %13823 = vmatprep.subr.bf16.mxu0 %v17708_v22  ;;  %14115 = vmatprep.subr.bf16.mxu1 %v17711_v37  ;;  %v17735_v32 = vld [vmem:[%s23512_s5 + $0x74c] ss:$16 sps:$4 sm:$0xff]   ;;  %v17730_v17 = vld [vmem:[%s23512_s5 + $0x740] ss:$16 sps:$4 sm:$0xff]   ;;  %v17733_v20 = vld [vmem:[%s23512_s5 + $0x748] ss:$16 sps:$4 sm:$0xff]  }
 0x93e   : > { %13800 = vmatprep.mubr.bf16.mxu0 %v12031_v31  ;;  %14092 = vmatprep.mubr.bf16.mxu1 %v12031_v31  ;;  %v23167_v38 = vpop.f32.mrb[228].mxu0  ;;  %v17738_v52 = vld [vmem:[%s23512_s5 + $0x764] ss:$16 sps:$4 sm:$0xff]   ;;  %v17741_v7 = vld [vmem:[%s23512_s5 + $0x76c] ss:$16 sps:$4 sm:$0xff]  }
 0x93f   : > { %v23169_v5 = vpop.f32.mrb[228].mxu1  ;;  %13801 = vmatmul.mubr.bf16.gmra.mrb[12].mxu0 %v12030_v24  ;;  %14093 = vmatmul.mubr.bf16.gmra.mrb[12].mxu1 %v12030_v24  ;;  %v23171_v19 = vpop.f32.mrb[229].mxu0  ;;  %v17754_v53 = vld [vmem:[%s23512_s5 + $0x7c0] ss:$16 sps:$4 sm:$0xff]   ;;  %v17757_v57 = vld [vmem:[%s23512_s5 + $0x7c8] ss:$16 sps:$4 sm:$0xff]  }
 0x940   : > { %v11642_v50 = vmax.f32 %v23167_v38, %v23169_v5  ;;  %v23175_v54 = vpop.f32.mrb[229].mxu1  ;;  %13824 = vmatpush1.bf16.msra.mxu0 %v17706_v62  ;;  %14116 = vmatpush1.bf16.msra.mxu1 %v17709_v25  ;;  %v23177_v1 = vpop.f32.mrb[230].mxu0  ;;  %v17762_v51 = vld [vmem:[%s23512_s5 + $0x7e4] ss:$16 sps:$4 sm:$0xff]   ;;  %v17765_v56 = vld [vmem:[%s23512_s5 + $0x7ec] ss:$16 sps:$4 sm:$0xff]  }
 0x941   : > { %v11643_v45 = vmax.f32 %v23171_v19, %v23175_v54  ;;  %v23187_v23 = vpop.f32.mrb[230].mxu1  ;;  %v23189_v55 = vpop.f32.mrb[231].mxu0  ;;  %13825 = vmatprep.subr.bf16.mxu0 %v17714_v61  ;;  %14117 = vmatprep.subr.bf16.mxu1 %v17717_v11  ;;  %v17736_v61 = vld [vmem:[%s23512_s5 + $0x760] ss:$16 sps:$4 sm:$0xff]   ;;  %v17739_v11 = vld [vmem:[%s23512_s5 + $0x768] ss:$16 sps:$4 sm:$0xff]  }
 0x942   : > { %v11644_v48 = vmax.f32 %v23177_v1, %v23187_v23  ;;  %v23199_v27 = vpop.f32.mrb[231].mxu1  ;;  %v17760_v6 = vld [vmem:[%s23512_s5 + $0x7e0] ss:$16 sps:$4 sm:$0xff]   ;;  %v17763_v30 = vld [vmem:[%s23512_s5 + $0x7e8] ss:$16 sps:$4 sm:$0xff]  }
 0x943   : > { %v11645_v29 = vmax.f32 %v23189_v55, %v23199_v27 }
 0x944   : > { %13826 = vmatpush1.bf16.msra.mxu0 %v17712_v21  ;;  %14118 = vmatpush1.bf16.msra.mxu1 %v17715_v4 }
 0x945   : > { %13827 = vmatprep.subr.bf16.mxu0 %v17720_v8  ;;  %14119 = vmatprep.subr.bf16.mxu1 %v17723_v14  ;;  %v17744_v14 = vld [vmem:[%s23512_s5 + $0x784] ss:$16 sps:$4 sm:$0xff]  }
 0x946   : > { %v23215_v49 = vpop.f32.mrb[232].mxu0 }
 0x947   : > { %v23217_v33 = vpop.f32.mrb[232].mxu1  ;;  %v23219_v26 = vpop.f32.mrb[233].mxu0 }
 0x948   : > { %v11646_v43 = vmax.f32 %v23215_v49, %v23217_v33  ;;  %v23223_v63 = vpop.f32.mrb[233].mxu1  ;;  %13828 = vmatpush1.bf16.msra.mxu0 %v17718_v36  ;;  %14120 = vmatpush1.bf16.msra.mxu1 %v17721_v28  ;;  %v23225_v12 = vpop.f32.mrb[234].mxu0  ;;  %v17747_v36 = vld [vmem:[%s23512_s5 + $0x78c] ss:$16 sps:$4 sm:$0xff]  }
 0x949   : > { %v11647_v18 = vmax.f32 %v23219_v26, %v23223_v63  ;;  %v23235_v60 = vpop.f32.mrb[234].mxu1  ;;  %v23237_v58 = vpop.f32.mrb[235].mxu0  ;;  %13829 = vmatprep.subr.bf16.mxu0 %v17726_v39  ;;  %14121 = vmatprep.subr.bf16.mxu1 %v17729_v46 }
 0x94a   : > { %v11648_v0 = vmax.f32 %v23225_v12, %v23235_v60  ;;  %v23247_v22 = vpop.f32.mrb[235].mxu1 }
 0x94b   : > { %v11649_v37 = vmax.f32 %v23237_v58, %v23247_v22 }
 0x94c   : > { %13830 = vmatpush1.bf16.msra.mxu0 %v17724_v15  ;;  %14122 = vmatpush1.bf16.msra.mxu1 %v17727_v40  ;;  %v17742_v15 = vld [vmem:[%s23512_s5 + $0x780] ss:$16 sps:$4 sm:$0xff]   ;;  %v17745_v40 = vld [vmem:[%s23512_s5 + $0x788] ss:$16 sps:$4 sm:$0xff]  }
 0x94d   : > { %13831 = vmatprep.subr.bf16.mxu0 %v17732_v3  ;;  %14123 = vmatprep.subr.bf16.mxu1 %v17735_v32  ;;  %v17750_v3 = vld [vmem:[%s23512_s5 + $0x7a4] ss:$16 sps:$4 sm:$0xff]   ;;  %v17753_v32 = vld [vmem:[%s23512_s5 + $0x7ac] ss:$16 sps:$4 sm:$0xff]  }
 0x94e   : > { %v23263_v24 = vpop.f32.mrb[236].mxu0 }
 0x94f   : > { %v23265_v41 = vpop.f32.mrb[236].mxu1  ;;  %v23267_v16 = vpop.f32.mrb[237].mxu0 }
 0x950   : > { %v23271_v62 = vpop.f32.mrb[237].mxu1  ;;  %13832 = vmatpush1.bf16.msra.mxu0 %v17730_v17  ;;  %14124 = vmatpush1.bf16.msra.mxu1 %v17733_v20  ;;  %v23273_v25 = vpop.f32.mrb[238].mxu0 }
 0x951   : > { %v23283_v4 = vpop.f32.mrb[238].mxu1  ;;  %v23285_v8 = vpop.f32.mrb[239].mxu0  ;;  %13833 = vmatprep.subr.bf16.mxu0 %v17738_v52  ;;  %14125 = vmatprep.subr.bf16.mxu1 %v17741_v7 }
 0x952   : > { %v23295_v39 = vpop.f32.mrb[239].mxu1 }
 0x954   : > { %13834 = vmatpush1.bf16.msra.mxu0 %v17736_v61  ;;  %14126 = vmatpush1.bf16.msra.mxu1 %v17739_v11 }
 0x955   : > { %13835 = vmatprep.subr.bf16.mxu0 %v17744_v14  ;;  %14127 = vmatprep.subr.bf16.mxu1 %v17747_v36  ;;  %v17748_v14 = vld [vmem:[%s23512_s5 + $0x7a0] ss:$16 sps:$4 sm:$0xff]   ;;  %v17751_v36 = vld [vmem:[%s23512_s5 + $0x7a8] ss:$16 sps:$4 sm:$0xff]  }
 0x956   : > { %v9738_v17 = vpop.f32.mrb[240].mxu0 }
 0x957   : > { %v11503_v20 = vpop.f32.mrb[240].mxu1  ;;  %v9740_v52 = vpop.f32.mrb[241].mxu0 }
 0x958   : > { %v11654_v7 = vmax.f32 %v9738_v17, %v11503_v20  ;;  %v11505_v61 = vpop.f32.mrb[241].mxu1  ;;  %13836 = vmatpush1.bf16.msra.mxu0 %v17742_v15  ;;  %14128 = vmatpush1.bf16.msra.mxu1 %v17745_v40  ;;  %v9742_v11 = vpop.f32.mrb[242].mxu0  ;;  %v17756_v17 = vld [vmem:[%s23512_s5 + $0x7c4] ss:$16 sps:$4 sm:$0xff]   ;;  %v17759_v15 = vld [vmem:[%s23512_s5 + $0x7cc] ss:$16 sps:$4 sm:$0xff]  }
 0x959   : > { %v11655_v46 = vmax.f32 %v9740_v52, %v11505_v61  ;;  %v11507_v28 = vpop.f32.mrb[242].mxu1  ;;  %v9744_v21 = vpop.f32.mrb[243].mxu0  ;;  %13837 = vmatprep.subr.bf16.mxu0 %v17750_v3  ;;  %14129 = vmatprep.subr.bf16.mxu1 %v17753_v32 }
 0x95a   : > { %v11718_v40 = vmax.f32 %v11638_v10, %v11654_v7  ;;  %v11656_v20 = vmax.f32 %v9742_v11, %v11507_v28  ;;  %v11509_v31 = vpop.f32.mrb[243].mxu1 }
 0x95b   : > { %v11719_v52 = vmax.f32 %v11639_v42, %v11655_v46  ;;  %v11657_v3 = vmax.f32 %v9744_v21, %v11509_v31 }
 0x95c   : > { %v11794_v32 = vadd.f32 %v22261_v9, %v11718_v40  ;;  %v11720_v61 = vmax.f32 %v11640_v13, %v11656_v20  ;;  %13838 = vmatpush1.bf16.msra.mxu0 %v17748_v14  ;;  %14130 = vmatpush1.bf16.msra.mxu1 %v17751_v36 }
 0x95d   : > { %v11795_v47 = vadd.f32 %v22264_v35, %v11719_v52  ;;  %v11721_v10 = vmax.f32 %v11641_v2, %v11657_v3  ;;  %13839 = vmatprep.subr.bf16.mxu0 %v17756_v17  ;;  %14131 = vmatprep.subr.bf16.mxu1 %v17759_v15 }
 0x95e   : > { %vm11858_vm6 = vcmp.gt.f32.partialorder %v11794_v32, 0.0  ;;  %v11922_v42 = vmul.f32 0.01, %v11794_v32  ;;  %v11796_v59 = vadd.f32 %v22261_v9, %v11720_v61  ;;  %v9748_v13 = vpop.f32.mrb[244].mxu0 }
 0x95f   : > { %v11923_v2 = vmul.f32 0.01, %v11795_v47  ;;  %v11797_v31 = vadd.f32 %v22264_v35, %v11721_v10  ;;  %v11513_v21 = vpop.f32.mrb[244].mxu1  ;;  %v9750_v28 = vpop.f32.mrb[245].mxu0  ;;  %vm11859_vm7 = vcmp.gt.f32.partialorder %v11795_v47, 0.0 }
 0x960   : > { %vm11860_vm8 = vcmp.gt.f32.partialorder %v11796_v59, 0.0  ;;  %v11924_v46 = vmul.f32 0.01, %v11796_v59  ;;  %v11658_v7 = vmax.f32 %v9748_v13, %v11513_v21  ;;  %v11515_v11 = vpop.f32.mrb[245].mxu1  ;;  %13840 = vmatpush1.bf16.msra.mxu0 %v17754_v53  ;;  %14132 = vmatpush1.bf16.msra.mxu1 %v17757_v57  ;;  %v9752_v14 = vpop.f32.mrb[246].mxu0  ;;  %v11986_v36 = vsel %vm11858_vm6, %v11794_v32, %v11922_v42 }
 0x961   : > { %v11925_v17 = vmul.f32 0.01, %v11797_v31  ;;  %v11659_v15 = vmax.f32 %v9750_v28, %v11515_v11  ;;  %v11517_v40 = vpop.f32.mrb[246].mxu1  ;;  %v9754_v20 = vpop.f32.mrb[247].mxu0  ;;  %13841 = vmatprep.subr.bf16.mxu0 %v17762_v51  ;;  %14133 = vmatprep.subr.bf16.mxu1 %v17765_v56  ;;  %vm11861_vm9 = vcmp.gt.f32.partialorder %v11797_v31, 0.0  ;;  %v11987_v53 = vsel %vm11859_vm7, %v11795_v47, %v11923_v2 }
 0x962   : > { %v11988_v52 = vsel %vm11860_vm8, %v11796_v59, %v11924_v46  ;;  %v11722_v3 = vmax.f32 %v11642_v50, %v11658_v7  ;;  %v11660_v61 = vmax.f32 %v9752_v14, %v11517_v40  ;;  %v11519_v10 = vpop.f32.mrb[247].mxu1 }
 0x963   : > { %v12008_v57 = vpack.c.bf16 %v11988_v52, %v11986_v36  ;;  %v11723_v32 = vmax.f32 %v11643_v45, %v11659_v15  ;;  %v11661_v42 = vmax.f32 %v9754_v20, %v11519_v10  ;;  %v11989_v13 = vsel %vm11861_vm9, %v11797_v31, %v11925_v17 }
 0x964   : > { %v11798_v51 = vadd.f32 %v22261_v9, %v11722_v3  ;;  %v11724_v56 = vmax.f32 %v11644_v48, %v11660_v61  ;;  %13842 = vmatpush1.bf16.msra.mxu0 %v17760_v6  ;;  %14134 = vmatpush1.bf16.msra.mxu1 %v17763_v30  ;;  %v12009_v38 = vpack.c.bf16 %v11989_v13, %v11987_v53 }
 0x965   : > { %v11799_v5 = vadd.f32 %v22264_v35, %v11723_v32  ;;  %v11725_v50 = vmax.f32 %v11645_v29, %v11661_v42 }
 0x966   : > { %vm11862_vm10 = vcmp.gt.f32.partialorder %v11798_v51, 0.0  ;;  %v11926_v19 = vmul.f32 0.01, %v11798_v51  ;;  %v11800_v54 = vadd.f32 %v22261_v9, %v11724_v56  ;;  %13843 = vmatprep.mubr.bf16.mxu0 %v12009_v38  ;;  %14135 = vmatprep.mubr.bf16.mxu1 %v12009_v38  ;;  %v9758_v45 = vpop.f32.mrb[248].mxu0 }
 0x967   : > { %v11927_v47 = vmul.f32 0.01, %v11799_v5  ;;  %v11801_v1 = vadd.f32 %v22264_v35, %v11725_v50  ;;  %v11523_v23 = vpop.f32.mrb[248].mxu1  ;;  %13844 = vmatmul.mubr.bf16.vlgmr.msra.gmra.mrb[0].mxu0 %v12008_v57  ;;  %14136 = vmatmul.mubr.bf16.vlgmr.msra.gmra.mrb[0].mxu1 %v12008_v57  ;;  %v9760_v48 = vpop.f32.mrb[249].mxu0  ;;  %vm11863_vm11 = vcmp.gt.f32.partialorder %v11799_v5, 0.0 }
 0x968   : > { %vm11864_vm12 = vcmp.gt.f32.partialorder %v11800_v54, 0.0  ;;  %v11928_v59 = vmul.f32 0.01, %v11800_v54  ;;  %v11662_v6 = vmax.f32 %v9758_v45, %v11523_v23  ;;  %v11525_v55 = vpop.f32.mrb[249].mxu1  ;;  %v9762_v27 = vpop.f32.mrb[250].mxu0  ;;  %v11990_v29 = vsel %vm11862_vm10, %v11798_v51, %v11926_v19 }
 0x969   : > { %v11929_v30 = vmul.f32 0.01, %v11801_v1  ;;  %v11663_v2 = vmax.f32 %v9760_v48, %v11525_v55  ;;  %v11527_v31 = vpop.f32.mrb[250].mxu1  ;;  %v9764_v21 = vpop.f32.mrb[251].mxu0  ;;  %vm11865_vm13 = vcmp.gt.f32.partialorder %v11801_v1, 0.0  ;;  %v11991_v14 = vsel %vm11863_vm11, %v11799_v5, %v11927_v47 }
 0x96a   : > { %v11992_v28 = vsel %vm11864_vm12, %v11800_v54, %v11928_v59  ;;  %v11726_v46 = vmax.f32 %v11646_v43, %v11662_v6  ;;  %v11664_v7 = vmax.f32 %v9762_v27, %v11527_v31  ;;  %v11529_v11 = vpop.f32.mrb[251].mxu1  ;;  %v24418_v51 = vmax.f32 %v23263_v24, %v23265_v41 }
 0x96b   : > { %v12016_v36 = vpack.c.bf16 %v11992_v28, %v11990_v29  ;;  %v11727_v17 = vmax.f32 %v11647_v18, %v11663_v2  ;;  %v11665_v15 = vmax.f32 %v9764_v21, %v11529_v11  ;;  %v11993_v40 = vsel %vm11865_vm13, %v11801_v1, %v11929_v30  ;;  %v12290_v28 = vld [vmem:[%s23513_s6] sm:$0xf] }
 0x96c   : > { %v11802_v20 = vadd.f32 %v22261_v9, %v11726_v46  ;;  %v11728_v52 = vmax.f32 %v11648_v0, %v11664_v7  ;;  %v12017_v3 = vpack.c.bf16 %v11993_v40, %v11991_v14  ;;  %v24419_v54 = vmax.f32 %v23267_v16, %v23271_v62 }
 0x96d   : > { %v11803_v49 = vadd.f32 %v22264_v35, %v11727_v17  ;;  %v11729_v33 = vmax.f32 %v11649_v37, %v11665_v15  ;;  %v24420_v48 = vmax.f32 %v23273_v25, %v23283_v4  ;;  %v24421_v41 = vmax.f32 %v23285_v8, %v23295_v39 }
 0x96e   : > { %vm11866_vm14 = vcmp.gt.f32.partialorder %v11802_v20, 0.0  ;;  %v11930_v43 = vmul.f32 0.01, %v11802_v20  ;;  %v11804_v26 = vadd.f32 %v22261_v9, %v11728_v52  ;;  %13853 = vmatprep.mubr.bf16.mxu0 %v12017_v3  ;;  %14145 = vmatprep.mubr.bf16.mxu1 %v12017_v3  ;;  %v9768_v63 = vpop.f32.mrb[252].mxu0  ;;  %v23419_v7 = vrot.slane %v12290_v28, %v24403_v34 }
 0x96f   : > { %v11931_v18 = vmul.f32 0.01, %v11803_v49  ;;  %v11805_v61 = vadd.f32 %v22264_v35, %v11729_v33  ;;  %v11533_v10 = vpop.f32.mrb[252].mxu1  ;;  %13854 = vmatmul.mubr.bf16.gmra.mrb[4].mxu0 %v12016_v36  ;;  %14146 = vmatmul.mubr.bf16.gmra.mrb[4].mxu1 %v12016_v36  ;;  %v9770_v12 = vpop.f32.mrb[253].mxu0  ;;  %vm11867_vm15 = vcmp.gt.f32.partialorder %v11803_v49, 0.0  ;;  %v23424_v14 = vrot.slane %v12290_v28, %v24404_v44 }
 0x970   : > { %vm11868_vm1 = vcmp.gt.f32.partialorder %v11804_v26, 0.0  ;;  %v11932_v60 = vmul.f32 0.01, %v11804_v26  ;;  %v11666_v0 = vmax.f32 %v9768_v63, %v11533_v10  ;;  %v11535_v58 = vpop.f32.mrb[253].mxu1  ;;  %v9772_v22 = vpop.f32.mrb[254].mxu0  ;;  %v11994_v37 = vsel %vm11866_vm14, %v11802_v20, %v11930_v43 }
 0x971   : > { %v11933_v53 = vmul.f32 0.01, %v11805_v61  ;;  %v11667_v57 = vmax.f32 %v9770_v12, %v11535_v58  ;;  %v11537_v32 = vpop.f32.mrb[254].mxu1  ;;  %v9774_v42 = vpop.f32.mrb[255].mxu0  ;;  %vm11869_vm2 = vcmp.gt.f32.partialorder %v11805_v61, 0.0  ;;  %v11995_v50 = vsel %vm11867_vm15, %v11803_v49, %v11931_v18 }
 0x972   : > { %v11996_v13 = vsel %vm11868_vm1, %v11804_v26, %v11932_v60  ;;  %v11730_v56 = vmax.f32 %v24418_v51, %v11666_v0  ;;  %v11668_v38 = vmax.f32 %v9772_v22, %v11537_v32  ;;  %v11539_v5 = vpop.f32.mrb[255].mxu1 }
 0x973   : > { %v12024_v19 = vpack.c.bf16 %v11996_v13, %v11994_v37  ;;  %v11731_v45 = vmax.f32 %v24419_v54, %v11667_v57  ;;  %v11669_v47 = vmax.f32 %v9774_v42, %v11539_v5  ;;  %v11997_v1 = vsel %vm11869_vm2, %v11805_v61, %v11933_v53 }
 0x974   : > { %v11806_v23 = vadd.f32 %v22261_v9, %v11730_v56  ;;  %v11732_v59 = vmax.f32 %v24420_v48, %v11668_v38  ;;  %v12025_v6 = vpack.c.bf16 %v11997_v1, %v11995_v50 }
 0x975   : > { %v11807_v24 = vadd.f32 %v22264_v35, %v11731_v45  ;;  %v11733_v55 = vmax.f32 %v24421_v41, %v11669_v47 }
 0x976   : > { %v11934_v27 = vmul.f32 0.01, %v11806_v23  ;;  %v11808_v29 = vadd.f32 %v22261_v9, %v11732_v59  ;;  %13863 = vmatprep.mubr.bf16.mxu0 %v12025_v6  ;;  %14155 = vmatprep.mubr.bf16.mxu1 %v12025_v6  ;;  %vm11870_vm3 = vcmp.gt.f32.partialorder %v11806_v23, 0.0 }
 0x977   : > { %v11935_v16 = vmul.f32 0.01, %v11807_v24  ;;  %v11809_v62 = vadd.f32 %v22264_v35, %v11733_v55  ;;  %13864 = vmatmul.mubr.bf16.gmra.mrb[8].mxu0 %v12024_v19  ;;  %14156 = vmatmul.mubr.bf16.gmra.mrb[8].mxu1 %v12024_v19  ;;  %vm11871_vm0 = vcmp.gt.f32.partialorder %v11807_v24, 0.0  ;;  %v24422_v35 = vld [vmem:[#allocation339_spill] sm:$0xff] }
 0x978   : > { %vm11872_vm4 = vcmp.gt.f32.partialorder %v11808_v29, 0.0  ;;  %v11936_v25 = vmul.f32 0.01, %v11808_v29  ;;  %v11998_v30 = vsel %vm11870_vm3, %v11806_v23, %v11934_v27  ;;  %v12302_v21 = vsub.s32 2, %v24422_v35 }
 0x979   : > { %v11937_v4 = vmul.f32 0.01, %v11809_v62  ;;  %vm11873_vm5 = vcmp.gt.f32.partialorder %v11809_v62, 0.0  ;;  %v11999_v2 = vsel %vm11871_vm0, %v11807_v24, %v11935_v16  ;;  %v12306_v46 = vsub.s32 3, %v24422_v35 }
 0x97a   : > { %v12000_v8 = vsel %vm11872_vm4, %v11808_v29, %v11936_v25  ;;  %v23421_v11 = vrot.slane %v12290_v28, %v12302_v21 }
 0x97b   : > { %v12032_v39 = vpack.c.bf16 %v12000_v8, %v11998_v30  ;;  %v12001_v31 = vsel %vm11873_vm5, %v11809_v62, %v11937_v4  ;;  %v23426_v36 = vrot.slane %v12290_v28, %v12306_v46 }
 0x97c   : > { %v12033_v9 = vpack.c.bf16 %v12001_v31, %v11999_v2 }
 0x97e   : > { %13873 = vmatprep.mubr.bf16.mxu0 %v12033_v9  ;;  %14165 = vmatprep.mubr.bf16.mxu1 %v12033_v9 }
 0x97f   : > { %13874 = vmatmul.mubr.bf16.gmra.mrb[12].mxu0 %v12032_v39  ;;  %14166 = vmatmul.mubr.bf16.gmra.mrb[12].mxu1 %v12032_v39 }
 0xa3a   : > { %v13845_v17 = vpop.f32.mrb[0].mxu0  ;;  %v14137_v15 = vpop.f32.mrb[0].mxu1 }
 0xa3b   : > { %v15382_v40 = vadd.f32 %v13845_v17, %v23419_v7  ;;  %v15398_v20 = vadd.f32 %v14137_v15, %v23421_v11  ;;  %v13847_v52 = vpop.f32.mrb[1].mxu0  ;;  %v14139_v3 = vpop.f32.mrb[1].mxu1 }
 0xa3c   : > { %v15383_v49 = vadd.f32 %v13847_v52, %v23424_v14  ;;  %v15399_v34 = vadd.f32 %v14139_v3, %v23426_v36  ;;  %v13849_v33 = vpop.f32.mrb[2].mxu0  ;;  %v14141_v43 = vpop.f32.mrb[2].mxu1 }
 0xa3d   : > { %vm14176_vm6 = vcmp.gt.f32.partialorder %v15382_v40, 0.0  ;;  %v14208_v44 = vmul.f32 0.01, %v15382_v40  ;;  %vm14178_vm7 = vcmp.gt.f32.partialorder %v15398_v20, 0.0  ;;  %v14210_v26 = vmul.f32 0.01, %v15398_v20 }
 0xa3e   : > { %vm14177_vm8 = vcmp.gt.f32.partialorder %v15383_v49, 0.0  ;;  %v14209_v63 = vmul.f32 0.01, %v15383_v49  ;;  %vm14179_vm9 = vcmp.gt.f32.partialorder %v15399_v34, 0.0  ;;  %v14211_v18 = vmul.f32 0.01, %v15399_v34 }
 0xa3f   : > { %v14240_v61 = vsel %vm14176_vm6, %v15382_v40, %v14208_v44  ;;  %v14242_v10 = vsel %vm14178_vm7, %v15398_v20, %v14210_v26  ;;  %v15384_v12 = vadd.f32 %v13849_v33, %v23419_v7  ;;  %v15400_v60 = vadd.f32 %v14141_v43, %v23421_v11  ;;  %v13851_v0 = vpop.f32.mrb[3].mxu0  ;;  %v14143_v58 = vpop.f32.mrb[3].mxu1 }
 0xa40   : > { %14272 = vst [vmem:[%s23435_s29] sm:$0xff] %v14240_v61  ;;  %14274 = vst [vmem:[%s23435_s29 + $0x10] sm:$0xff] %v14242_v10  ;;  %v14241_v22 = vsel %vm14177_vm8, %v15383_v49, %v14209_v63  ;;  %v14243_v37 = vsel %vm14179_vm9, %v15399_v34, %v14211_v18  ;;  %v15385_v53 = vadd.f32 %v13851_v0, %v23424_v14 }
 0xa41   : > { %v15401_v57 = vadd.f32 %v14143_v58, %v23426_v36  ;;  %14273 = vst [vmem:[%s23435_s29 + $0x8] sm:$0xff] %v14241_v22  ;;  %14275 = vst [vmem:[%s23435_s29 + $0x18] sm:$0xff] %v14243_v37  ;;  %vm14180_vm10 = vcmp.gt.f32.partialorder %v15384_v12, 0.0  ;;  %v14212_v32 = vmul.f32 0.01, %v15384_v12  ;;  %vm14182_vm11 = vcmp.gt.f32.partialorder %v15400_v60, 0.0 }
 0xa42   : > { %v14214_v42 = vmul.f32 0.01, %v15400_v60  ;;  %vm14181_vm12 = vcmp.gt.f32.partialorder %v15385_v53, 0.0  ;;  %v14213_v13 = vmul.f32 0.01, %v15385_v53  ;;  %v13855_v5 = vpop.f32.mrb[4].mxu0 }
 0xa43   : > { %vm14183_vm13 = vcmp.gt.f32.partialorder %v15401_v57, 0.0  ;;  %v14215_v51 = vmul.f32 0.01, %v15401_v57  ;;  %v14244_v56 = vsel %vm14180_vm10, %v15384_v12, %v14212_v32  ;;  %v14147_v50 = vpop.f32.mrb[4].mxu1  ;;  %v15386_v45 = vadd.f32 %v13855_v5, %v23419_v7  ;;  %v13857_v1 = vpop.f32.mrb[5].mxu0 }
 0xa44   : > { %v14246_v38 = vsel %vm14182_vm11, %v15400_v60, %v14214_v42  ;;  %14276 = vst [vmem:[%s23435_s29 + $0x20] sm:$0xff] %v14244_v56  ;;  %v14245_v19 = vsel %vm14181_vm12, %v15385_v53, %v14213_v13  ;;  %v15402_v47 = vadd.f32 %v14147_v50, %v23421_v11  ;;  %v14149_v23 = vpop.f32.mrb[5].mxu1  ;;  %v15387_v48 = vadd.f32 %v13857_v1, %v23424_v14  ;;  %v13859_v6 = vpop.f32.mrb[6].mxu0 }
 0xa45   : > { %14278 = vst [vmem:[%s23435_s29 + $0x30] sm:$0xff] %v14246_v38  ;;  %v14247_v54 = vsel %vm14183_vm13, %v15401_v57, %v14215_v51  ;;  %14277 = vst [vmem:[%s23435_s29 + $0x28] sm:$0xff] %v14245_v19  ;;  %v15403_v59 = vadd.f32 %v14149_v23, %v23426_v36  ;;  %v14151_v24 = vpop.f32.mrb[6].mxu1  ;;  %vm14184_vm14 = vcmp.gt.f32.partialorder %v15386_v45, 0.0  ;;  %v14216_v41 = vmul.f32 0.01, %v15386_v45 }
 0xa46   : > { %14279 = vst [vmem:[%s23435_s29 + $0x38] sm:$0xff] %v14247_v54  ;;  %vm14186_vm15 = vcmp.gt.f32.partialorder %v15402_v47, 0.0  ;;  %v14218_v55 = vmul.f32 0.01, %v15402_v47  ;;  %vm14185_vm1 = vcmp.gt.f32.partialorder %v15387_v48, 0.0  ;;  %v15388_v25 = vadd.f32 %v13859_v6, %v23419_v7  ;;  %v13861_v30 = vpop.f32.mrb[7].mxu0 }
 0xa47   : > { %v14217_v27 = vmul.f32 0.01, %v15387_v48  ;;  %vm14187_vm2 = vcmp.gt.f32.partialorder %v15403_v59, 0.0  ;;  %v14219_v29 = vmul.f32 0.01, %v15403_v59  ;;  %v14248_v16 = vsel %vm14184_vm14, %v15386_v45, %v14216_v41  ;;  %v14153_v8 = vpop.f32.mrb[7].mxu1 }
 0xa48   : > { %v14250_v62 = vsel %vm14186_vm15, %v15402_v47, %v14218_v55  ;;  %v15404_v4 = vadd.f32 %v14151_v24, %v23421_v11  ;;  %14280 = vst [vmem:[%s23435_s29 + $0x40] sm:$0xff] %v14248_v16  ;;  %v15389_v31 = vadd.f32 %v13861_v30, %v23424_v14  ;;  %v15405_v9 = vadd.f32 %v14153_v8, %v23426_v36 }
 0xa49   : > { %14282 = vst [vmem:[%s23435_s29 + $0x50] sm:$0xff] %v14250_v62  ;;  %v14249_v39 = vsel %vm14185_vm1, %v15387_v48, %v14217_v27  ;;  %v14251_v2 = vsel %vm14187_vm2, %v15403_v59, %v14219_v29  ;;  %vm14188_vm3 = vcmp.gt.f32.partialorder %v15388_v25, 0.0  ;;  %v14220_v35 = vmul.f32 0.01, %v15388_v25 }
 0xa4a   : > { %14281 = vst [vmem:[%s23435_s29 + $0x48] sm:$0xff] %v14249_v39  ;;  %14283 = vst [vmem:[%s23435_s29 + $0x58] sm:$0xff] %v14251_v2  ;;  %vm14190_vm4 = vcmp.gt.f32.partialorder %v15404_v4, 0.0  ;;  %v14222_v21 = vmul.f32 0.01, %v15404_v4  ;;  %vm14189_vm0 = vcmp.gt.f32.partialorder %v15389_v31, 0.0 }
 0xa4b   : > { %v14221_v28 = vmul.f32 0.01, %v15389_v31  ;;  %vm14191_vm5 = vcmp.gt.f32.partialorder %v15405_v9, 0.0  ;;  %v14223_v46 = vmul.f32 0.01, %v15405_v9  ;;  %v14252_v17 = vsel %vm14188_vm3, %v15388_v25, %v14220_v35  ;;  %v13865_v40 = vpop.f32.mrb[8].mxu0 }
 0xa4c   : > { %v14254_v15 = vsel %vm14190_vm4, %v15404_v4, %v14222_v21  ;;  %v14157_v20 = vpop.f32.mrb[8].mxu1  ;;  %14284 = vst [vmem:[%s23435_s29 + $0x60] sm:$0xff] %v14252_v17  ;;  %v15390_v49 = vadd.f32 %v13865_v40, %v23419_v7  ;;  %v13867_v33 = vpop.f32.mrb[9].mxu0 }
 0xa4d   : > { %14286 = vst [vmem:[%s23435_s29 + $0x70] sm:$0xff] %v14254_v15  ;;  %v14253_v52 = vsel %vm14189_vm0, %v15389_v31, %v14221_v28  ;;  %v14255_v3 = vsel %vm14191_vm5, %v15405_v9, %v14223_v46  ;;  %v15406_v34 = vadd.f32 %v14157_v20, %v23421_v11  ;;  %v14159_v43 = vpop.f32.mrb[9].mxu1  ;;  %v15391_v44 = vadd.f32 %v13867_v33, %v23424_v14  ;;  %v13869_v63 = vpop.f32.mrb[10].mxu0 }
 0xa4e   : > { %14285 = vst [vmem:[%s23435_s29 + $0x68] sm:$0xff] %v14253_v52  ;;  %14287 = vst [vmem:[%s23435_s29 + $0x78] sm:$0xff] %v14255_v3  ;;  %v15407_v26 = vadd.f32 %v14159_v43, %v23426_v36  ;;  %v14161_v18 = vpop.f32.mrb[10].mxu1  ;;  %vm14192_vm6 = vcmp.gt.f32.partialorder %v15390_v49, 0.0  ;;  %v14224_v61 = vmul.f32 0.01, %v15390_v49  ;;  %v15392_v22 = vadd.f32 %v13869_v63, %v23419_v7 }
 0xa4f   : > { %vm14194_vm7 = vcmp.gt.f32.partialorder %v15406_v34, 0.0  ;;  %v14226_v10 = vmul.f32 0.01, %v15406_v34  ;;  %vm14193_vm8 = vcmp.gt.f32.partialorder %v15391_v44, 0.0  ;;  %v14225_v12 = vmul.f32 0.01, %v15391_v44 }
 0xa50   : > { %vm14195_vm9 = vcmp.gt.f32.partialorder %v15407_v26, 0.0  ;;  %v14227_v60 = vmul.f32 0.01, %v15407_v26  ;;  %v14256_v0 = vsel %vm14192_vm6, %v15390_v49, %v14224_v61  ;;  %v15408_v37 = vadd.f32 %v14161_v18, %v23421_v11  ;;  %v13871_v53 = vpop.f32.mrb[11].mxu0  ;;  %v14163_v57 = vpop.f32.mrb[11].mxu1 }
 0xa51   : > { %v14258_v58 = vsel %vm14194_vm7, %v15406_v34, %v14226_v10  ;;  %14288 = vst [vmem:[%s23435_s29 + $0x80] sm:$0xff] %v14256_v0  ;;  %v14257_v32 = vsel %vm14193_vm8, %v15391_v44, %v14225_v12  ;;  %v15393_v13 = vadd.f32 %v13871_v53, %v23424_v14  ;;  %v15409_v51 = vadd.f32 %v14163_v57, %v23426_v36 }
 0xa52   : > { %14290 = vst [vmem:[%s23435_s29 + $0x90] sm:$0xff] %v14258_v58  ;;  %v14259_v42 = vsel %vm14195_vm9, %v15407_v26, %v14227_v60  ;;  %v13875_v56 = vpop.f32.mrb[12].mxu0  ;;  %v14167_v38 = vpop.f32.mrb[12].mxu1  ;;  %14289 = vst [vmem:[%s23435_s29 + $0x88] sm:$0xff] %v14257_v32  ;;  %vm14196_vm10 = vcmp.gt.f32.partialorder %v15392_v22, 0.0  ;;  %vm14198_vm11 = vcmp.gt.f32.partialorder %v15408_v37, 0.0 }
 0xa53   : > { %14291 = vst [vmem:[%s23435_s29 + $0x98] sm:$0xff] %v14259_v42  ;;  %v14228_v5 = vmul.f32 0.01, %v15392_v22  ;;  %v14230_v50 = vmul.f32 0.01, %v15408_v37  ;;  %vm14197_vm12 = vcmp.gt.f32.partialorder %v15393_v13, 0.0  ;;  %v15394_v1 = vadd.f32 %v13875_v56, %v23419_v7 }
 0xa54   : > { %v14229_v19 = vmul.f32 0.01, %v15393_v13  ;;  %vm14199_vm13 = vcmp.gt.f32.partialorder %v15409_v51, 0.0  ;;  %v14231_v54 = vmul.f32 0.01, %v15409_v51  ;;  %v15410_v23 = vadd.f32 %v14167_v38, %v23421_v11  ;;  %v13877_v48 = vpop.f32.mrb[13].mxu0 }
 0xa55   : > { %v14260_v45 = vsel %vm14196_vm10, %v15392_v22, %v14228_v5  ;;  %v14262_v47 = vsel %vm14198_vm11, %v15408_v37, %v14230_v50  ;;  %v14169_v59 = vpop.f32.mrb[13].mxu1  ;;  %v15395_v41 = vadd.f32 %v13877_v48, %v23424_v14  ;;  %v13879_v27 = vpop.f32.mrb[14].mxu0  ;;  %vm14200_vm14 = vcmp.gt.f32.partialorder %v15394_v1, 0.0 }
 0xa56   : > { %14292 = vst [vmem:[%s23435_s29 + $0xa0] sm:$0xff] %v14260_v45  ;;  %14294 = vst [vmem:[%s23435_s29 + $0xb0] sm:$0xff] %v14262_v47  ;;  %v14261_v6 = vsel %vm14197_vm12, %v15393_v13, %v14229_v19  ;;  %v14263_v24 = vsel %vm14199_vm13, %v15409_v51, %v14231_v54  ;;  %v15411_v55 = vadd.f32 %v14169_v59, %v23426_v36  ;;  %v14171_v29 = vpop.f32.mrb[14].mxu1  ;;  %v14232_v16 = vmul.f32 0.01, %v15394_v1  ;;  %v13881_v31 = vpop.f32.mrb[15].mxu0 }
 0xa57   : > { %14293 = vst [vmem:[%s23435_s29 + $0xa8] sm:$0xff] %v14261_v6  ;;  %14295 = vst [vmem:[%s23435_s29 + $0xb8] sm:$0xff] %v14263_v24  ;;  %vm14202_vm15 = vcmp.gt.f32.partialorder %v15410_v23, 0.0  ;;  %v14234_v62 = vmul.f32 0.01, %v15410_v23  ;;  %vm14201_vm1 = vcmp.gt.f32.partialorder %v15395_v41, 0.0  ;;  %v15396_v39 = vadd.f32 %v13879_v27, %v23419_v7 }
 0xa58   : > { %v14233_v25 = vmul.f32 0.01, %v15395_v41  ;;  %vm14203_vm2 = vcmp.gt.f32.partialorder %v15411_v55, 0.0  ;;  %v14235_v4 = vmul.f32 0.01, %v15411_v55  ;;  %v14264_v30 = vsel %vm14200_vm14, %v15394_v1, %v14232_v16  ;;  %v14173_v9 = vpop.f32.mrb[15].mxu1 }
 0xa59   : > { %v14266_v8 = vsel %vm14202_vm15, %v15410_v23, %v14234_v62  ;;  %v15412_v2 = vadd.f32 %v14171_v29, %v23421_v11  ;;  %14296 = vst [vmem:[%s23435_s29 + $0xc0] sm:$0xff] %v14264_v30  ;;  %v15397_v28 = vadd.f32 %v13881_v31, %v23424_v14  ;;  %v15413_v46 = vadd.f32 %v14173_v9, %v23426_v36 }
 0xa5a   : > { %14298 = vst [vmem:[%s23435_s29 + $0xd0] sm:$0xff] %v14266_v8  ;;  %v14265_v35 = vsel %vm14201_vm1, %v15395_v41, %v14233_v25  ;;  %v14267_v21 = vsel %vm14203_vm2, %v15411_v55, %v14235_v4  ;;  %vm14204_vm3 = vcmp.gt.f32.partialorder %v15396_v39, 0.0  ;;  %v14236_v7 = vmul.f32 0.01, %v15396_v39 }
 0xa5b   : > { %14297 = vst [vmem:[%s23435_s29 + $0xc8] sm:$0xff] %v14265_v35  ;;  %14299 = vst [vmem:[%s23435_s29 + $0xd8] sm:$0xff] %v14267_v21  ;;  %vm14206_vm4 = vcmp.gt.f32.partialorder %v15412_v2, 0.0  ;;  %v14238_v11 = vmul.f32 0.01, %v15412_v2  ;;  %vm14205_vm0 = vcmp.gt.f32.partialorder %v15397_v28, 0.0 }
 0xa5c   : > { %v14237_v17 = vmul.f32 0.01, %v15397_v28  ;;  %vm14207_vm5 = vcmp.gt.f32.partialorder %v15413_v46, 0.0  ;;  %v14239_v15 = vmul.f32 0.01, %v15413_v46  ;;  %v14268_v40 = vsel %vm14204_vm3, %v15396_v39, %v14236_v7 }
 0xa5d   : > { %v14270_v20 = vsel %vm14206_vm4, %v15412_v2, %v14238_v11  ;;  %14300 = vst [vmem:[%s23435_s29 + $0xe0] sm:$0xff] %v14268_v40 }
 0xa5e   : > { %14302 = vst [vmem:[%s23435_s29 + $0xf0] sm:$0xff] %v14270_v20  ;;  %v14269_v52 = vsel %vm14205_vm0, %v15397_v28, %v14237_v17  ;;  %v14271_v14 = vsel %vm14207_vm5, %v15413_v46, %v14239_v15 }
 0xa5f   : > { %14301 = vst [vmem:[%s23435_s29 + $0xe8] sm:$0xff] %v14269_v52  ;;  %14303 = vst [vmem:[%s23435_s29 + $0xf8] sm:$0xff] %v14271_v14 }
 0xa60 PF: > { %p14_p9 = scmp.ge.s32.totalorder %s17847_s28, 4   ;;  %s24423_s24 = smov %s17784_s25 }
 0xa61   : > { %s24424_s25 = smov %s17856_s8  ;;  %s24425_s26 = smov %s17847_s28 }
 0xa62   :  { %16 = sbr.rel (!%p14_p9) target bundleno = 2 (0x2), region = 121 }

</bundles_post_ra>
